<compile_context>
chip_gen: v7x
topology: tpu7x:2x2x1
jax: 0.10.0
libtpu: 0.0.40
codegen_flags: <defaults>
</compile_context>

<pallas_src>
import numpy as np

import jax
import jax.numpy as jnp
from jax.experimental import pallas as pl
from jax.experimental.pallas import tpu as pltpu

# ------------------------- module config (from __init__) --------------------
INPUT_H = 256
INPUT_W = 128
DIM = 32                       # dim
INPUT_RESOLUTION = (14, 14)    # input_resolution
NUM_HEADS = 4
WINDOW_SIZE = 4
SHIFT_SIZE = 2                 # SW-MSA path (mask exercised)
MLP_RATIO = 4.0
LN_EPS = 1e-5                  # torch.nn.LayerNorm default

HEAD_DIM = DIM // NUM_HEADS
QK_SCALE = HEAD_DIM ** -0.5
MLP_HIDDEN = int(DIM * MLP_RATIO)            # 128
N_WIN = WINDOW_SIZE * WINDOW_SIZE            # tokens per window (16)
X_DIM = NUM_HEADS * N_WIN                    # all-heads score width (64)

# actual spatial size implied by the forward()
H_1 = int(INPUT_H / (224 / INPUT_RESOLUTION[0]))   # 16
W_1 = int(INPUT_W / (224 / INPUT_RESOLUTION[1]))   # 8
PAD_B = (WINDOW_SIZE - H_1 % WINDOW_SIZE) % WINDOW_SIZE
PAD_R = (WINDOW_SIZE - W_1 % WINDOW_SIZE) % WINDOW_SIZE
H_PAD = H_1 + PAD_B
W_PAD = W_1 + PAD_R
N_WINDOWS = (H_PAD // WINDOW_SIZE) * (W_PAD // WINDOW_SIZE)   # windows / image (8)
R_TOK = H_PAD * W_PAD                                         # tokens / image (128)

VEC_W = 128                    # lane width of the packed vector-constant rows
(VROW_G1, VROW_B1, VROW_BPROJ, VROW_G2, VROW_B2,
 VROW_BFC2, VROW_BFC1, VROW_BQKV) = range(8)

assert MLP_HIDDEN <= VEC_W and 3 * DIM <= VEC_W

# drop, attn_drop, drop_path are all 0.0 -> Identity (nothing to emit).


# ------------------------ host-side constant setup --------------------------
def make_attn_mask(H, W, ws, shift):
    """Reproduces the in-forward mask generation of the PyTorch module."""
    nW = (H // ws) * (W // ws)
    if shift == 0:
        return np.zeros((nW, ws * ws, ws * ws), np.float32)
    img = np.zeros((H, W), np.float32)
    cnt = 0
    for hs in ((0, H - ws), (H - ws, H - shift), (H - shift, H)):
        for wsl in ((0, W - ws), (W - ws, W - shift), (W - shift, W)):
            img[hs[0]:hs[1], wsl[0]:wsl[1]] = cnt
            cnt += 1
    mw = img.reshape(H // ws, ws, W // ws, ws).transpose(0, 2, 1, 3)
    mw = mw.reshape(-1, ws * ws)
    diff = mw[:, None, :] - mw[:, :, None]
    return np.where(diff != 0, -100.0, 0.0).astype(np.float32)


def relative_position_index(ws):
    """Standard Swin relative position index (WindowAttention.__init__)."""
    coords = np.stack(np.meshgrid(np.arange(ws), np.arange(ws), indexing="ij"))
    coords_flat = coords.reshape(2, -1)
    rel = coords_flat[:, :, None] - coords_flat[:, None, :]      # (2, N, N)
    rel = rel.transpose(1, 2, 0).astype(np.int64)
    rel[:, :, 0] += ws - 1
    rel[:, :, 1] += ws - 1
    rel[:, :, 0] *= 2 * ws - 1
    return rel.sum(-1)                                           # (N, N)


ATTN_MASK_NP = make_attn_mask(H_PAD, W_PAD, WINDOW_SIZE, SHIFT_SIZE)   # (nW,N,N)
REL_POS_INDEX_NP = relative_position_index(WINDOW_SIZE)                # (N, N)


def precompute_attn_bias(params):
    """rel-pos bias + shift mask folded, in (nW, N, H*N) layout (eager, once)."""
    idx = REL_POS_INDEX_NP.reshape(-1)
    rel = params["rel_bias_table"][idx]                          # (N*N, H)
    rel = rel.reshape(N_WIN, N_WIN, NUM_HEADS)
    rel = jnp.transpose(rel, (2, 0, 1)).astype(jnp.float32)      # (H, N, N)
    mask = jnp.asarray(ATTN_MASK_NP)                             # (nW, N, N)
    bias = rel[None, :, :, :] + mask[:, None, :, :]              # (nW, H, N, N)
    bias = jnp.transpose(bias, (0, 2, 1, 3))                     # (nW, N, H, N)
    return bias.reshape(N_WINDOWS, N_WIN, X_DIM)                 # (nW, N, H*N)


def build_token_perm_np():
    """P[j, t] = 1 iff the (rolled, window-major) token slot j reads original
    padded-image token t.  x_win = P @ x_orig;  x_orig = P.T @ x_win."""
    ws = WINDOW_SIZE
    idx = np.arange(R_TOK).reshape(H_PAD, W_PAD)
    if SHIFT_SIZE > 0:
        idx = np.roll(idx, (-SHIFT_SIZE, -SHIFT_SIZE), axis=(0, 1))
    idx = idx.reshape(H_PAD // ws, ws, W_PAD // ws, ws)
    idx = idx.transpose(0, 2, 1, 3).reshape(-1)                  # (nW*N,)
    P = np.zeros((R_TOK, R_TOK), np.float32)
    P[np.arange(R_TOK), idx] = 1.0
    return P


def build_constants(params, TB):
    """All resident kernel constants (computed once, outside jit).
    NOTE: inference-only assumption - regenerate if params change."""
    C = DIM
    # fold qk scale into the q-columns of the qkv projection
    scale_vec = np.concatenate([np.full(C, QK_SCALE, np.float32),
                                np.ones(2 * C, np.float32)])
    w_qkv = params["w_qkv"] * jnp.asarray(scale_vec)[None, :]        # (C, 3C)
    b_qkv = params["b_qkv"].reshape(-1) * jnp.asarray(scale_vec)     # (3C,)

    # packed weight matrix: [w_qkv | w_proj | w_fc1]  -> (C, 3C + C + HID) = (32, 256)
    w_in = jnp.concatenate([w_qkv, params["w_proj"], params["w_fc1"]],
                           axis=1).astype(jnp.bfloat16)
    w_fc2 = params["w_fc2"].astype(jnp.bfloat16)                     # (HID, C)

    # packed small vectors, one lane-padded row each
    def row(v):
        v = jnp.asarray(v, jnp.float32).reshape(-1)
        return jnp.pad(v, (0, VEC_W - v.shape[0]))
    vecs = jnp.stack([row(params["g1"]), row(params["b1"]), row(params["b_proj"]),
                      row(params["g2"]), row(params["b2"]), row(params["b_fc2"]),
                      row(params["b_fc1"]), row(b_qkv)])             # (8, 128)

    # rel-pos bias + shift mask, tiled for the TB images of one grid step
    bias = precompute_attn_bias(params)                              # (nW, N, X)
    bias_tb = jnp.tile(bias, (TB, 1, 1))                             # (TB*nW, N, X)

    # per-image token permutation (roll + window partition), block-diag over TB
    P = build_token_perm_np()
    P_big = np.kron(np.eye(TB, dtype=np.float32), P)                 # (TB*R, TB*R)
    perm_fwd = jnp.asarray(P_big, jnp.bfloat16)    # exact 0/1 in bf16
    perm_inv = jnp.asarray(P_big.T, jnp.float32)

    # block-diagonal head mask for K/V expansion and per-head row-sum matrix
    col_h = np.arange(DIM)[None, :] // HEAD_DIM
    row_h = np.arange(X_DIM)[:, None] // N_WIN
    bd_mask = jnp.asarray((col_h == row_h).astype(np.float32), jnp.bfloat16)  # (X, C)
    seg_r = np.arange(X_DIM)[:, None] // N_WIN
    seg_c = np.arange(X_DIM)[None, :] // N_WIN
    sum_blk = jnp.asarray((seg_r == seg_c).astype(np.float32))                # (X, X)

    return dict(bias=bias_tb, perm_fwd=perm_fwd, perm_inv=perm_inv,
                bd_mask=bd_mask, sum_blk=sum_blk, vecs=vecs,
                w_in=w_in, w_fc2=w_fc2)


# ------------------------------ in-kernel math --------------------------------
def _erf(z):
    # Abramowitz & Stegun 7.1.26, |err| ~ 1.5e-7 (matches exact-erf nn.GELU at f32).
    a1, a2, a3, a4, a5 = 0.254829592, -0.284496736, 1.421413741, -1.453152027, 1.061405429
    p = 0.3275911
    sgn = jnp.where(z >= 0.0, 1.0, -1.0)
    az = jnp.abs(z)
    t = 1.0 / (1.0 + p * az)
    poly = ((((a5 * t + a4) * t + a3) * t + a2) * t + a1) * t
    return sgn * (1.0 - poly * jnp.exp(-az * az))


def _gelu_exact(x):
    return 0.5 * x * (1.0 + _erf(x * 0.7071067811865476))


def _layernorm(x, gamma, beta):
    mu = jnp.mean(x, axis=-1, keepdims=True)
    var = jnp.mean((x - mu) ** 2, axis=-1, keepdims=True)
    return (x - mu) * jax.lax.rsqrt(var + LN_EPS) * gamma + beta


# --------------------- fused Swin block kernel (TB images / step) -------------
def _swin_block_kernel(x_ref, bias_ref, pfw_ref, pinv_ref, bdm_ref, sblk_ref,
                       vec_ref, w_in_ref, w_fc2_ref, o_ref):
    TB, R, C = x_ref.shape
    M = TB * R                     # token rows this step (>= 256)
    W_TOT = M // N_WIN             # windows this step
    bf16 = jnp.bfloat16

    x = x_ref[...].reshape(M, C)                                 # f32, original order

    vec = vec_ref[...]                                           # (8, 128) f32
    g1 = vec[VROW_G1:VROW_G1 + 1, :C]
    b1 = vec[VROW_B1:VROW_B1 + 1, :C]
    b_proj = vec[VROW_BPROJ:VROW_BPROJ + 1, :C]
    g2 = vec[VROW_G2:VROW_G2 + 1, :C]
    b2 = vec[VROW_B2:VROW_B2 + 1, :C]
    b_fc2 = vec[VROW_BFC2:VROW_BFC2 + 1, :C]
    b_fc1 = vec[VROW_BFC1:VROW_BFC1 + 1, :MLP_HIDDEN]
    b_qkv = vec[VROW_BQKV:VROW_BQKV + 1, :3 * C]

    w_in = w_in_ref[...]                                         # (C, 256) bf16
    w_qkv = w_in[:, :3 * C]
    w_proj = w_in[:, 3 * C:4 * C]
    w_fc1 = w_in[:, 4 * C:4 * C + MLP_HIDDEN]

    # ---- LayerNorm 1 (f32) ----------------------------------------------------
    xn = _layernorm(x, g1, b1)

    # ---- roll + window-partition folded in as a one-hot matmul (MXU) -----------
    # (permuting bf16 values with exact 0/1 weights is lossless)
    xn_w = jnp.dot(pfw_ref[...], xn.astype(bf16),
                   preferred_element_type=jnp.float32)           # (M, C), window-major

    # ---- QKV projection (qk_scale pre-folded into the q columns) ---------------
    qkv = jnp.dot(xn_w.astype(bf16), w_qkv,
                  preferred_element_type=jnp.float32) + b_qkv    # (M, 3C) f32
    q = qkv[:, :C].reshape(W_TOT, N_WIN, C)
    k = qkv[:, C:2 * C].reshape(W_TOT, N_WIN, C)
    v = qkv[:, 2 * C:].reshape(W_TOT, N_WIN, C)

    # ---- all heads at once via block-diagonal K / V (mask is a host constant) --
    bdm = bdm_ref[...]                                           # (X, C) bf16
    k_bd = jnp.concatenate([k.astype(bf16)] * NUM_HEADS, axis=1) * bdm   # (W, X, C)
    v_bd = jnp.concatenate([v.astype(bf16)] * NUM_HEADS, axis=1) * bdm

    # scores s[w, n, h*N + m] = <q_h[w, n], k_h[w, m]>
    s = jnp.einsum('wnc,wxc->wnx', q.astype(bf16), k_bd,
                   preferred_element_type=jnp.float32)           # (W, N, X) f32
    s = s + bias_ref[...]                  # folded rel-pos bias + shift mask

    # per-head softmax; row-global max subtraction is an exact per-segment shift,
    # denominator via per-head row-sum matmul (f32) + clamp so approx-recip can't
    # produce inf/NaN even if a whole head underflows.
    s = s - jnp.max(s, axis=-1, keepdims=True)
    p = jnp.exp(s).reshape(M, X_DIM)
    denom = jnp.dot(p, sblk_ref[...], preferred_element_type=jnp.float32)
    denom = jnp.maximum(denom, 1e-30)
    p = (p * pl.reciprocal(denom, approx=True)).reshape(W_TOT, N_WIN, X_DIM)

    ctx = jnp.einsum('wnx,wxc->wnc', p.astype(bf16), v_bd,
                     preferred_element_type=jnp.float32).reshape(M, C)
    attn_w = jnp.dot(ctx.astype(bf16), w_proj,
                     preferred_element_type=jnp.float32) + b_proj

    # ---- window-reverse + roll-back folded in as the inverse permutation (f32) -
    attn = jnp.dot(pinv_ref[...], attn_w, preferred_element_type=jnp.float32)

    # ---- residual + LayerNorm 2 + MLP + residual (original token order) --------
    x1 = x + attn
    xn2 = _layernorm(x1, g2, b2)
    h = jnp.dot(xn2.astype(bf16), w_fc1,
                preferred_element_type=jnp.float32) + b_fc1
    h = _gelu_exact(h)
    y = jnp.dot(h.astype(bf16), w_fc2_ref[...],
                preferred_element_type=jnp.float32) + b_fc2
    o_ref[...] = (x1 + y).reshape(TB, R, C)


def _fused_block_call(x_tok, consts, TB):
    B, R, C = x_tok.shape
    assert B % TB == 0, (B, TB)

    names = ("bias", "perm_fwd", "perm_inv", "bd_mask", "sum_blk",
             "vecs", "w_in", "w_fc2")
    cargs = [consts[n] for n in names]

    def const_spec(a):
        nd = a.ndim
        return pl.BlockSpec(a.shape, lambda b, _nd=nd: (0,) * _nd)

    # NOTE(v7x): with 2 TensorCores per chip, switching this axis to
    # pltpu.CORE_PARALLEL (or an explicit core_map) guarantees the >=2 grid
    # steps shard across cores; "parallel" is kept here for v5e/v6e portability.
    return pl.pallas_call(
        _swin_block_kernel,
        out_shape=jax.ShapeDtypeStruct((B, R, C), jnp.float32),
        grid=(B // TB,),
        in_specs=[pl.BlockSpec((TB, R, C), lambda b: (b, 0, 0))]
                 + [const_spec(a) for a in cargs],
        out_specs=pl.BlockSpec((TB, R, C), lambda b: (b, 0, 0)),
        compiler_params=pltpu.CompilerParams(
            dimension_semantics=("parallel",)),
    )(x_tok, *cargs)


# ------------------------------- full forward ---------------------------------
def swin_block_forward(x, consts, TB):
    B, L, C = x.shape
    assert L == H_1 * W_1 and C == DIM

    x = x.reshape(B, H_1, W_1, C)
    if PAD_B or PAD_R:                       # no-op at this geometry
        x = jnp.pad(x, ((0, 0), (0, PAD_B), (0, PAD_R), (0, 0)))
    x_tok = x.reshape(B, R_TOK, C)           # free reshape; token permutation is in-kernel

    y = _fused_block_call(x_tok, consts, TB)         # (B, R_TOK, C), original order

    y = y.reshape(B, H_PAD, W_PAD, C)
    if PAD_B or PAD_R:
        y = y[:, :H_1, :W_1, :]
    return y.reshape(B, H_1 * W_1, C)


# ------------------------------ parameter init --------------------------------
def make_params(key):
    ks = jax.random.split(key, 9)

    def init(k, shape, scale=0.02):
        return scale * jax.random.normal(k, shape, dtype=jnp.float32)

    return {
        # norm1 / norm2 (torch default init: ones / zeros)
        "g1": jnp.ones((DIM,), jnp.float32),
        "b1": jnp.zeros((DIM,), jnp.float32),
        "g2": jnp.ones((DIM,), jnp.float32),
        "b2": jnp.zeros((DIM,), jnp.float32),
        # WindowAttention: qkv / proj (weights stored transposed: (in, out))
        "w_qkv": init(ks[0], (DIM, 3 * DIM)),
        "b_qkv": init(ks[1], (3 * DIM,)),
        "w_proj": init(ks[2], (DIM, DIM)),
        "b_proj": init(ks[3], (DIM,)),
        # relative position bias table ((2*ws-1)^2, num_heads)
        "rel_bias_table": init(ks[4], ((2 * WINDOW_SIZE - 1) ** 2, NUM_HEADS)),
        # Mlp: fc1 / fc2
        "w_fc1": init(ks[5], (DIM, MLP_HIDDEN)),
        "b_fc1": init(ks[6], (MLP_HIDDEN,)),
        "w_fc2": init(ks[7], (MLP_HIDDEN, DIM)),
        "b_fc2": init(ks[8], (DIM,)),
    }


# --------------------- pure-JAX reference of the PyTorch module ---------------
def reference_forward(x, params):
    ws, shift = WINDOW_SIZE, SHIFT_SIZE
    B, L, C = x.shape
    x = x.reshape(B, H_1, W_1, C)
    x = jnp.pad(x, ((0, 0), (0, PAD_B), (0, PAD_R), (0, 0)))
    H, W = H_PAD, W_PAD
    shortcut = x.reshape(B, H * W, C)

    def ln(t, g, b):
        mu = jnp.mean(t, -1, keepdims=True)
        var = jnp.mean((t - mu) ** 2, -1, keepdims=True)
        return (t - mu) / jnp.sqrt(var + LN_EPS) * g + b

    xn = ln(shortcut, params["g1"], params["b1"]).reshape(B, H, W, C)
    if shift > 0:
        xn = jnp.roll(xn, (-shift, -shift), axis=(1, 2))
    xw = xn.reshape(B, H // ws, ws, W // ws, ws, C).transpose(0, 1, 3, 2, 4, 5)
    xw = xw.reshape(B * N_WINDOWS, N_WIN, C)

    qkv = xw @ params["w_qkv"] + params["b_qkv"]
    qkv = qkv.reshape(B * N_WINDOWS, N_WIN, 3, NUM_HEADS, HEAD_DIM).transpose(2, 0, 3, 1, 4)
    q, k, v = qkv[0] * QK_SCALE, qkv[1], qkv[2]                  # (B*nW, H, N, hd)
    attn = q @ jnp.swapaxes(k, -1, -2)                           # (B*nW, H, N, N)
    rel = params["rel_bias_table"][REL_POS_INDEX_NP.reshape(-1)]
    rel = rel.reshape(N_WIN, N_WIN, NUM_HEADS).transpose(2, 0, 1)
    attn = attn + rel[None]
    mask = jnp.asarray(ATTN_MASK_NP)
    attn = attn.reshape(B, N_WINDOWS, NUM_HEADS, N_WIN, N_WIN) + mask[None, :, None]
    attn = jax.nn.softmax(attn.reshape(B * N_WINDOWS, NUM_HEADS, N_WIN, N_WIN), axis=-1)
    out = (attn @ v).transpose(0, 2, 1, 3).reshape(B * N_WINDOWS, N_WIN, C)
    out = out @ params["w_proj"] + params["b_proj"]

    out = out.reshape(B, H // ws, W // ws, ws, ws, C).transpose(0, 1, 3, 2, 4, 5)
    out = out.reshape(B, H, W, C)
    if shift > 0:
        out = jnp.roll(out, (shift, shift), axis=(1, 2))
    x1 = shortcut + out.reshape(B, H * W, C)
    h = jax.nn.gelu(ln(x1, params["g2"], params["b2"]) @ params["w_fc1"]
                    + params["b_fc1"], approximate=False)
    y = h @ params["w_fc2"] + params["b_fc2"]
    res = (x1 + y).reshape(B, H, W, C)[:, :H_1, :W_1, :]
    return res.reshape(B, H_1 * W_1, C)


# ------------------------------------ main ------------------------------------
if __name__ == "__main__":
    root = jax.random.PRNGKey(0)
    k_params, k_x = jax.random.split(root)
    params = make_params(k_params)

    B = 4
    TB = 2 if B % 2 == 0 else 1            # >=256 matmul rows/step, grid of B//TB steps
    consts = build_constants(params, TB)   # hoisted out of jit (config constants)

    x = jax.random.normal(k_x, (B, H_1 * W_1, DIM), dtype=jnp.float32)

    fwd = jax.jit(lambda xx: swin_block_forward(xx, consts, TB))
    out = fwd(x)
    jax.block_until_ready(out)

    assert out.shape == (B, H_1 * W_1, DIM), out.shape
    assert bool(jnp.all(jnp.isfinite(out)))

    # loose-tolerance parity check vs. the f32 reference (kernel matmuls are bf16)
    ref = reference_forward(x, params)
    max_err = float(jnp.max(jnp.abs(out - ref)))
    assert max_err < 2e-2, f"max abs err vs reference = {max_err}"

    print("KERNEL_OK")
</pallas_src>

<mosaic_0001>
module attributes {stable_mosaic.version = 11 : i64} {
  func.func @_swin_block_kernel(%arg0: i32, %arg1: memref<2x128x32xf32, #tpu.memory_space<vmem>>, %arg2: memref<16x16x64xf32, #tpu.memory_space<vmem>>, %arg3: memref<256x256xbf16, #tpu.memory_space<vmem>>, %arg4: memref<256x256xf32, #tpu.memory_space<vmem>>, %arg5: memref<64x32xbf16, #tpu.memory_space<vmem>>, %arg6: memref<64x64xf32, #tpu.memory_space<vmem>>, %arg7: memref<8x128xf32, #tpu.memory_space<vmem>>, %arg8: memref<32x256xbf16, #tpu.memory_space<vmem>>, %arg9: memref<128x32xbf16, #tpu.memory_space<vmem>>, %arg10: memref<2x128x32xf32, #tpu.memory_space<vmem>>) attributes {dimension_semantics = [#tpu.dimension_semantics<parallel>], iteration_bounds = array<i64: 2>, scalar_prefetch = 0 : i64, scratch_operands = 0 : i64, tpu.core_type = #tpu.core_type<tc>, window_params = [{transform_indices = @transform_0, window_bounds = array<i64: 2, 128, 32>}, {pipeline_mode = #tpu.pipeline_mode<synchronous>, transform_indices = @transform_1, window_bounds = array<i64: 16, 16, 64>}, {pipeline_mode = #tpu.pipeline_mode<synchronous>, transform_indices = @transform_2, window_bounds = array<i64: 256, 256>}, {pipeline_mode = #tpu.pipeline_mode<synchronous>, transform_indices = @transform_3, window_bounds = array<i64: 256, 256>}, {pipeline_mode = #tpu.pipeline_mode<synchronous>, transform_indices = @transform_4, window_bounds = array<i64: 64, 32>}, {pipeline_mode = #tpu.pipeline_mode<synchronous>, transform_indices = @transform_5, window_bounds = array<i64: 64, 64>}, {pipeline_mode = #tpu.pipeline_mode<synchronous>, transform_indices = @transform_6, window_bounds = array<i64: 8, 128>}, {pipeline_mode = #tpu.pipeline_mode<synchronous>, transform_indices = @transform_7, window_bounds = array<i64: 32, 256>}, {pipeline_mode = #tpu.pipeline_mode<synchronous>, transform_indices = @transform_8, window_bounds = array<i64: 128, 32>}, {transform_indices = @transform_9, window_bounds = array<i64: 2, 128, 32>}]} {
    %c0 = arith.constant 0 : index
    %c0_0 = arith.constant 0 : index
    %c0_1 = arith.constant 0 : index
    %0 = vector.load %arg1[%c0, %c0_0, %c0_1] : memref<2x128x32xf32, #tpu.memory_space<vmem>>, vector<2x128x32xf32>
    %1 = vector.shape_cast %0 : vector<2x128x32xf32> to vector<256x32xf32>
    %c0_2 = arith.constant 0 : index
    %c0_3 = arith.constant 0 : index
    %2 = vector.load %arg7[%c0_2, %c0_3] : memref<8x128xf32, #tpu.memory_space<vmem>>, vector<8x128xf32>
    %3 = vector.extract_strided_slice %2 {offsets = [0, 0], sizes = [1, 32], strides = [1, 1]} : vector<8x128xf32> to vector<1x32xf32>
    %4 = vector.extract_strided_slice %2 {offsets = [1, 0], sizes = [1, 32], strides = [1, 1]} : vector<8x128xf32> to vector<1x32xf32>
    %5 = vector.extract_strided_slice %2 {offsets = [2, 0], sizes = [1, 32], strides = [1, 1]} : vector<8x128xf32> to vector<1x32xf32>
    %6 = vector.extract_strided_slice %2 {offsets = [3, 0], sizes = [1, 32], strides = [1, 1]} : vector<8x128xf32> to vector<1x32xf32>
    %7 = vector.extract_strided_slice %2 {offsets = [4, 0], sizes = [1, 32], strides = [1, 1]} : vector<8x128xf32> to vector<1x32xf32>
    %8 = vector.extract_strided_slice %2 {offsets = [5, 0], sizes = [1, 32], strides = [1, 1]} : vector<8x128xf32> to vector<1x32xf32>
    %9 = vector.extract_strided_slice %2 {offsets = [6, 0], sizes = [1, 128], strides = [1, 1]} : vector<8x128xf32> to vector<1x128xf32>
    %10 = vector.extract_strided_slice %2 {offsets = [7, 0], sizes = [1, 96], strides = [1, 1]} : vector<8x128xf32> to vector<1x96xf32>
    %c0_4 = arith.constant 0 : index
    %c0_5 = arith.constant 0 : index
    %11 = vector.load %arg8[%c0_4, %c0_5] : memref<32x256xbf16, #tpu.memory_space<vmem>>, vector<32x256xbf16>
    %12 = vector.extract_strided_slice %11 {offsets = [0, 0], sizes = [32, 96], strides = [1, 1]} : vector<32x256xbf16> to vector<32x96xbf16>
    %13 = vector.extract_strided_slice %11 {offsets = [0, 96], sizes = [32, 32], strides = [1, 1]} : vector<32x256xbf16> to vector<32x32xbf16>
    %14 = vector.extract_strided_slice %11 {offsets = [0, 128], sizes = [32, 128], strides = [1, 1]} : vector<32x256xbf16> to vector<32x128xbf16>
    %cst = arith.constant dense<0.000000e+00> : vector<256xf32>
    %15 = vector.multi_reduction <add>, %1, %cst [1] : vector<256x32xf32> to vector<256xf32>
    %16 = vector.shape_cast %15 : vector<256xf32> to vector<256x1xf32>
    %cst_6 = arith.constant 3.200000e+01 : f32
    %17 = vector.broadcast %cst_6 : f32 to vector<256x1xf32>
    %18 = arith.divf %16, %17 : vector<256x1xf32>
    %19 = vector.broadcast %18 : vector<256x1xf32> to vector<256x32xf32>
    %20 = arith.subf %1, %19 : vector<256x32xf32>
    %21 = arith.mulf %20, %20 : vector<256x32xf32>
    %cst_7 = arith.constant dense<0.000000e+00> : vector<256xf32>
    %22 = vector.multi_reduction <add>, %21, %cst_7 [1] : vector<256x32xf32> to vector<256xf32>
    %23 = vector.shape_cast %22 : vector<256xf32> to vector<256x1xf32>
    %cst_8 = arith.constant 3.200000e+01 : f32
    %24 = vector.broadcast %cst_8 : f32 to vector<256x1xf32>
    %25 = arith.divf %23, %24 : vector<256x1xf32>
    %26 = vector.broadcast %18 : vector<256x1xf32> to vector<256x32xf32>
    %27 = arith.subf %1, %26 : vector<256x32xf32>
    %cst_9 = arith.constant 9.99999974E-6 : f32
    %28 = vector.broadcast %cst_9 : f32 to vector<256x1xf32>
    %29 = arith.addf %25, %28 : vector<256x1xf32>
    %30 = math.rsqrt %29 : vector<256x1xf32>
    %31 = vector.broadcast %30 : vector<256x1xf32> to vector<256x32xf32>
    %32 = arith.mulf %27, %31 : vector<256x32xf32>
    %33 = vector.broadcast %3 : vector<1x32xf32> to vector<256x32xf32>
    %34 = arith.mulf %32, %33 : vector<256x32xf32>
    %35 = vector.broadcast %4 : vector<1x32xf32> to vector<256x32xf32>
    %36 = arith.addf %34, %35 : vector<256x32xf32>
    %c0_10 = arith.constant 0 : index
    %c0_11 = arith.constant 0 : index
    %37 = vector.load %arg3[%c0_10, %c0_11] : memref<256x256xbf16, #tpu.memory_space<vmem>>, vector<256x256xbf16>
    %38 = arith.truncf %36 : vector<256x32xf32> to vector<256x32xbf16>
    %cst_12 = arith.constant dense<0.000000e+00> : vector<256x32xf32>
    %39 = tpu.matmul %37, %38, %cst_12 {dimension_numbers = #tpu.dot_dimension_numbers<[1], [0], [0], [1], [0, 0, 1, 1], [], []>} : vector<256x256xbf16>, vector<256x32xbf16>, vector<256x32xf32> -> vector<256x32xf32>
    %40 = arith.truncf %39 : vector<256x32xf32> to vector<256x32xbf16>
    %cst_13 = arith.constant dense<0.000000e+00> : vector<256x96xf32>
    %41 = tpu.matmul %40, %12, %cst_13 {dimension_numbers = #tpu.dot_dimension_numbers<[1], [0], [0], [1], [0, 0, 1, 1], [], []>} : vector<256x32xbf16>, vector<32x96xbf16>, vector<256x96xf32> -> vector<256x96xf32>
    %42 = vector.broadcast %10 : vector<1x96xf32> to vector<256x96xf32>
    %43 = arith.addf %41, %42 : vector<256x96xf32>
    %44 = vector.extract_strided_slice %43 {offsets = [0, 0], sizes = [256, 32], strides = [1, 1]} : vector<256x96xf32> to vector<256x32xf32>
    %45 = vector.shape_cast %44 : vector<256x32xf32> to vector<16x16x32xf32>
    %46 = vector.extract_strided_slice %43 {offsets = [0, 32], sizes = [256, 32], strides = [1, 1]} : vector<256x96xf32> to vector<256x32xf32>
    %47 = vector.shape_cast %46 : vector<256x32xf32> to vector<16x16x32xf32>
    %48 = vector.extract_strided_slice %43 {offsets = [0, 64], sizes = [256, 32], strides = [1, 1]} : vector<256x96xf32> to vector<256x32xf32>
    %49 = vector.shape_cast %48 : vector<256x32xf32> to vector<16x16x32xf32>
    %c0_14 = arith.constant 0 : index
    %c0_15 = arith.constant 0 : index
    %50 = vector.load %arg5[%c0_14, %c0_15] : memref<64x32xbf16, #tpu.memory_space<vmem>>, vector<64x32xbf16>
    %51 = arith.truncf %47 : vector<16x16x32xf32> to vector<16x16x32xbf16>
    %52 = tpu.concatenate %51, %51, %51, %51 in 1 : vector<16x16x32xbf16>, vector<16x16x32xbf16>, vector<16x16x32xbf16>, vector<16x16x32xbf16> -> vector<16x64x32xbf16>
    %53 = vector.shape_cast %50 : vector<64x32xbf16> to vector<1x64x32xbf16>
    %54 = vector.broadcast %53 : vector<1x64x32xbf16> to vector<16x64x32xbf16>
    %55 = arith.mulf %52, %54 : vector<16x64x32xbf16>
    %56 = arith.truncf %49 : vector<16x16x32xf32> to vector<16x16x32xbf16>
    %57 = tpu.concatenate %56, %56, %56, %56 in 1 : vector<16x16x32xbf16>, vector<16x16x32xbf16>, vector<16x16x32xbf16>, vector<16x16x32xbf16> -> vector<16x64x32xbf16>
    %58 = vector.shape_cast %50 : vector<64x32xbf16> to vector<1x64x32xbf16>
    %59 = vector.broadcast %58 : vector<1x64x32xbf16> to vector<16x64x32xbf16>
    %60 = arith.mulf %57, %59 : vector<16x64x32xbf16>
    %61 = arith.truncf %45 : vector<16x16x32xf32> to vector<16x16x32xbf16>
    "tpu.trace_start"() <{level = 10 : i32, message = "wnc,wxc->wnx"}> : () -> ()
    %cst_16 = arith.constant dense<0.000000e+00> : vector<16x16x64xf32>
    %62 = tpu.matmul %61, %55, %cst_16 {dimension_numbers = #tpu.dot_dimension_numbers<[2], [2], [1], [1], [0, 0, 0, 1, 1, 1], [0], [0]>} : vector<16x16x32xbf16>, vector<16x64x32xbf16>, vector<16x16x64xf32> -> vector<16x16x64xf32>
    "tpu.trace_stop"() : () -> ()
    %c0_17 = arith.constant 0 : index
    %c0_18 = arith.constant 0 : index
    %c0_19 = arith.constant 0 : index
    %63 = vector.load %arg2[%c0_17, %c0_18, %c0_19] : memref<16x16x64xf32, #tpu.memory_space<vmem>>, vector<16x16x64xf32>
    %64 = arith.addf %62, %63 : vector<16x16x64xf32>
    %cst_20 = arith.constant dense<0xFF800000> : vector<16x16xf32>
    %65 = vector.multi_reduction <maximumf>, %64, %cst_20 [2] : vector<16x16x64xf32> to vector<16x16xf32>
    %66 = vector.shape_cast %65 : vector<16x16xf32> to vector<16x16x1xf32>
    %67 = vector.broadcast %66 : vector<16x16x1xf32> to vector<16x16x64xf32>
    %68 = arith.subf %64, %67 : vector<16x16x64xf32>
    %69 = math.exp %68 : vector<16x16x64xf32>
    %70 = vector.shape_cast %69 : vector<16x16x64xf32> to vector<256x64xf32>
    %c0_21 = arith.constant 0 : index
    %c0_22 = arith.constant 0 : index
    %71 = vector.load %arg6[%c0_21, %c0_22] : memref<64x64xf32, #tpu.memory_space<vmem>>, vector<64x64xf32>
    %cst_23 = arith.constant dense<0.000000e+00> : vector<256x64xf32>
    %72 = tpu.matmul %70, %71, %cst_23 {dimension_numbers = #tpu.dot_dimension_numbers<[1], [0], [0], [1], [0, 0, 1, 1], [], []>} : vector<256x64xf32>, vector<64x64xf32>, vector<256x64xf32> -> vector<256x64xf32>
    %cst_24 = arith.constant 1.000000e-30 : f32
    %73 = vector.broadcast %cst_24 : f32 to vector<256x64xf32>
    %74 = arith.maximumf %72, %73 : vector<256x64xf32>
    %75 = tpu.reciprocal %74 {approx = true} : vector<256x64xf32> -> vector<256x64xf32>
    %76 = arith.mulf %70, %75 : vector<256x64xf32>
    %77 = vector.shape_cast %76 : vector<256x64xf32> to vector<16x16x64xf32>
    %78 = arith.truncf %77 : vector<16x16x64xf32> to vector<16x16x64xbf16>
    "tpu.trace_start"() <{level = 10 : i32, message = "wnx,wxc->wnc"}> : () -> ()
    %cst_25 = arith.constant dense<0.000000e+00> : vector<16x16x32xf32>
    %79 = tpu.matmul %78, %60, %cst_25 {dimension_numbers = #tpu.dot_dimension_numbers<[2], [1], [1], [2], [0, 0, 0, 1, 1, 2], [0], [0]>} : vector<16x16x64xbf16>, vector<16x64x32xbf16>, vector<16x16x32xf32> -> vector<16x16x32xf32>
    "tpu.trace_stop"() : () -> ()
    %80 = vector.shape_cast %79 : vector<16x16x32xf32> to vector<256x32xf32>
    %81 = arith.truncf %80 : vector<256x32xf32> to vector<256x32xbf16>
    %cst_26 = arith.constant dense<0.000000e+00> : vector<256x32xf32>
    %82 = tpu.matmul %81, %13, %cst_26 {dimension_numbers = #tpu.dot_dimension_numbers<[1], [0], [0], [1], [0, 0, 1, 1], [], []>} : vector<256x32xbf16>, vector<32x32xbf16>, vector<256x32xf32> -> vector<256x32xf32>
    %83 = vector.broadcast %5 : vector<1x32xf32> to vector<256x32xf32>
    %84 = arith.addf %82, %83 : vector<256x32xf32>
    %c0_27 = arith.constant 0 : index
    %c0_28 = arith.constant 0 : index
    %85 = vector.load %arg4[%c0_27, %c0_28] : memref<256x256xf32, #tpu.memory_space<vmem>>, vector<256x256xf32>
    %cst_29 = arith.constant dense<0.000000e+00> : vector<256x32xf32>
    %86 = tpu.matmul %85, %84, %cst_29 {dimension_numbers = #tpu.dot_dimension_numbers<[1], [0], [0], [1], [0, 0, 1, 1], [], []>} : vector<256x256xf32>, vector<256x32xf32>, vector<256x32xf32> -> vector<256x32xf32>
    %87 = arith.addf %1, %86 : vector<256x32xf32>
    %cst_30 = arith.constant dense<0.000000e+00> : vector<256xf32>
    %88 = vector.multi_reduction <add>, %87, %cst_30 [1] : vector<256x32xf32> to vector<256xf32>
    %89 = vector.shape_cast %88 : vector<256xf32> to vector<256x1xf32>
    %cst_31 = arith.constant 3.200000e+01 : f32
    %90 = vector.broadcast %cst_31 : f32 to vector<256x1xf32>
    %91 = arith.divf %89, %90 : vector<256x1xf32>
    %92 = vector.broadcast %91 : vector<256x1xf32> to vector<256x32xf32>
    %93 = arith.subf %87, %92 : vector<256x32xf32>
    %94 = arith.mulf %93, %93 : vector<256x32xf32>
    %cst_32 = arith.constant dense<0.000000e+00> : vector<256xf32>
    %95 = vector.multi_reduction <add>, %94, %cst_32 [1] : vector<256x32xf32> to vector<256xf32>
    %96 = vector.shape_cast %95 : vector<256xf32> to vector<256x1xf32>
    %cst_33 = arith.constant 3.200000e+01 : f32
    %97 = vector.broadcast %cst_33 : f32 to vector<256x1xf32>
    %98 = arith.divf %96, %97 : vector<256x1xf32>
    %99 = vector.broadcast %91 : vector<256x1xf32> to vector<256x32xf32>
    %100 = arith.subf %87, %99 : vector<256x32xf32>
    %cst_34 = arith.constant 9.99999974E-6 : f32
    %101 = vector.broadcast %cst_34 : f32 to vector<256x1xf32>
    %102 = arith.addf %98, %101 : vector<256x1xf32>
    %103 = math.rsqrt %102 : vector<256x1xf32>
    %104 = vector.broadcast %103 : vector<256x1xf32> to vector<256x32xf32>
    %105 = arith.mulf %100, %104 : vector<256x32xf32>
    %106 = vector.broadcast %6 : vector<1x32xf32> to vector<256x32xf32>
    %107 = arith.mulf %105, %106 : vector<256x32xf32>
    %108 = vector.broadcast %7 : vector<1x32xf32> to vector<256x32xf32>
    %109 = arith.addf %107, %108 : vector<256x32xf32>
    %110 = arith.truncf %109 : vector<256x32xf32> to vector<256x32xbf16>
    %cst_35 = arith.constant dense<0.000000e+00> : vector<256x128xf32>
    %111 = tpu.matmul %110, %14, %cst_35 {dimension_numbers = #tpu.dot_dimension_numbers<[1], [0], [0], [1], [0, 0, 1, 1], [], []>} : vector<256x32xbf16>, vector<32x128xbf16>, vector<256x128xf32> -> vector<256x128xf32>
    %112 = vector.broadcast %9 : vector<1x128xf32> to vector<256x128xf32>
    %113 = arith.addf %111, %112 : vector<256x128xf32>
    %cst_36 = arith.constant 5.000000e-01 : f32
    %114 = vector.broadcast %cst_36 : f32 to vector<256x128xf32>
    %115 = arith.mulf %114, %113 : vector<256x128xf32>
    %cst_37 = arith.constant 0.707106769 : f32
    %116 = vector.broadcast %cst_37 : f32 to vector<256x128xf32>
    %117 = arith.mulf %113, %116 : vector<256x128xf32>
    %cst_38 = arith.constant 0.000000e+00 : f32
    %118 = vector.broadcast %cst_38 : f32 to vector<256x128xf32>
    %119 = arith.cmpf oge, %117, %118 : vector<256x128xf32>
    %cst_39 = arith.constant 1.000000e+00 : f32
    %cst_40 = arith.constant -1.000000e+00 : f32
    %120 = vector.broadcast %cst_39 : f32 to vector<256x128xf32>
    %121 = vector.broadcast %cst_40 : f32 to vector<256x128xf32>
    %122 = arith.select %119, %120, %121 : vector<256x128xi1>, vector<256x128xf32>
    %123 = math.absf %117 : vector<256x128xf32>
    %cst_41 = arith.constant 0.327591091 : f32
    %124 = vector.broadcast %cst_41 : f32 to vector<256x128xf32>
    %125 = arith.mulf %124, %123 : vector<256x128xf32>
    %cst_42 = arith.constant 1.000000e+00 : f32
    %126 = vector.broadcast %cst_42 : f32 to vector<256x128xf32>
    %127 = arith.addf %126, %125 : vector<256x128xf32>
    %cst_43 = arith.constant 1.000000e+00 : f32
    %128 = vector.broadcast %cst_43 : f32 to vector<256x128xf32>
    %129 = arith.divf %128, %127 : vector<256x128xf32>
    %cst_44 = arith.constant 1.06140542 : f32
    %130 = vector.broadcast %cst_44 : f32 to vector<256x128xf32>
    %131 = arith.mulf %130, %129 : vector<256x128xf32>
    %cst_45 = arith.constant -1.45315206 : f32
    %132 = vector.broadcast %cst_45 : f32 to vector<256x128xf32>
    %133 = arith.addf %131, %132 : vector<256x128xf32>
    %134 = arith.mulf %133, %129 : vector<256x128xf32>
    %cst_46 = arith.constant 1.42141378 : f32
    %135 = vector.broadcast %cst_46 : f32 to vector<256x128xf32>
    %136 = arith.addf %134, %135 : vector<256x128xf32>
    %137 = arith.mulf %136, %129 : vector<256x128xf32>
    %cst_47 = arith.constant -0.284496725 : f32
    %138 = vector.broadcast %cst_47 : f32 to vector<256x128xf32>
    %139 = arith.addf %137, %138 : vector<256x128xf32>
    %140 = arith.mulf %139, %129 : vector<256x128xf32>
    %cst_48 = arith.constant 0.254829586 : f32
    %141 = vector.broadcast %cst_48 : f32 to vector<256x128xf32>
    %142 = arith.addf %140, %141 : vector<256x128xf32>
    %143 = arith.mulf %142, %129 : vector<256x128xf32>
    %cst_49 = arith.constant 0.000000e+00 : f32
    %144 = vector.broadcast %cst_49 : f32 to vector<256x128xf32>
    %145 = arith.subf %144, %123 : vector<256x128xf32>
    %146 = arith.mulf %145, %123 : vector<256x128xf32>
    %147 = math.exp %146 : vector<256x128xf32>
    %148 = arith.mulf %143, %147 : vector<256x128xf32>
    %cst_50 = arith.constant 1.000000e+00 : f32
    %149 = vector.broadcast %cst_50 : f32 to vector<256x128xf32>
    %150 = arith.subf %149, %148 : vector<256x128xf32>
    %151 = arith.mulf %122, %150 : vector<256x128xf32>
    %cst_51 = arith.constant 1.000000e+00 : f32
    %152 = vector.broadcast %cst_51 : f32 to vector<256x128xf32>
    %153 = arith.addf %152, %151 : vector<256x128xf32>
    %154 = arith.mulf %115, %153 : vector<256x128xf32>
    %155 = arith.truncf %154 : vector<256x128xf32> to vector<256x128xbf16>
    %c0_52 = arith.constant 0 : index
    %c0_53 = arith.constant 0 : index
    %156 = vector.load %arg9[%c0_52, %c0_53] : memref<128x32xbf16, #tpu.memory_space<vmem>>, vector<128x32xbf16>
    %cst_54 = arith.constant dense<0.000000e+00> : vector<256x32xf32>
    %157 = tpu.matmul %155, %156, %cst_54 {dimension_numbers = #tpu.dot_dimension_numbers<[1], [0], [0], [1], [0, 0, 1, 1], [], []>} : vector<256x128xbf16>, vector<128x32xbf16>, vector<256x32xf32> -> vector<256x32xf32>
    %158 = vector.broadcast %8 : vector<1x32xf32> to vector<256x32xf32>
    %159 = arith.addf %157, %158 : vector<256x32xf32>
    %160 = arith.addf %87, %159 : vector<256x32xf32>
    %161 = vector.shape_cast %160 : vector<256x32xf32> to vector<2x128x32xf32>
    %c0_55 = arith.constant 0 : index
    %c0_56 = arith.constant 0 : index
    %c0_57 = arith.constant 0 : index
    %162 = vector.load %arg10[%c0_55, %c0_56, %c0_57] : memref<2x128x32xf32, #tpu.memory_space<vmem>>, vector<2x128x32xf32>
    tpu.vector_store %arg10[%c0_55, %c0_56, %c0_57], %161 {strides = array<i32>} : memref<2x128x32xf32, #tpu.memory_space<vmem>>, vector<2x128x32xf32>,
    return
  }
  func.func @transform_0(%arg0: i32) -> (i32, i32, i32) {
    %c0_i32 = arith.constant 0 : i32
    %c0_i32_0 = arith.constant 0 : i32
    %c0_i32_1 = arith.constant 0 : i32
    return %arg0, %c0_i32, %c0_i32_0 : i32, i32, i32
  }
  func.func @transform_1(%arg0: i32) -> (i32, i32, i32) {
    %c0_i32 = arith.constant 0 : i32
    %c0_i32_0 = arith.constant 0 : i32
    %c0_i32_1 = arith.constant 0 : i32
    %c0_i32_2 = arith.constant 0 : i32
    return %c0_i32, %c0_i32_0, %c0_i32_1 : i32, i32, i32
  }
  func.func @transform_2(%arg0: i32) -> (i32, i32) {
    %c0_i32 = arith.constant 0 : i32
    %c0_i32_0 = arith.constant 0 : i32
    %c0_i32_1 = arith.constant 0 : i32
    return %c0_i32, %c0_i32_0 : i32, i32
  }
  func.func @transform_3(%arg0: i32) -> (i32, i32) {
    %c0_i32 = arith.constant 0 : i32
    %c0_i32_0 = arith.constant 0 : i32
    %c0_i32_1 = arith.constant 0 : i32
    return %c0_i32, %c0_i32_0 : i32, i32
  }
  func.func @transform_4(%arg0: i32) -> (i32, i32) {
    %c0_i32 = arith.constant 0 : i32
    %c0_i32_0 = arith.constant 0 : i32
    %c0_i32_1 = arith.constant 0 : i32
    return %c0_i32, %c0_i32_0 : i32, i32
  }
  func.func @transform_5(%arg0: i32) -> (i32, i32) {
    %c0_i32 = arith.constant 0 : i32
    %c0_i32_0 = arith.constant 0 : i32
    %c0_i32_1 = arith.constant 0 : i32
    return %c0_i32, %c0_i32_0 : i32, i32
  }
  func.func @transform_6(%arg0: i32) -> (i32, i32) {
    %c0_i32 = arith.constant 0 : i32
    %c0_i32_0 = arith.constant 0 : i32
    %c0_i32_1 = arith.constant 0 : i32
    return %c0_i32, %c0_i32_0 : i32, i32
  }
  func.func @transform_7(%arg0: i32) -> (i32, i32) {
    %c0_i32 = arith.constant 0 : i32
    %c0_i32_0 = arith.constant 0 : i32
    %c0_i32_1 = arith.constant 0 : i32
    return %c0_i32, %c0_i32_0 : i32, i32
  }
  func.func @transform_8(%arg0: i32) -> (i32, i32) {
    %c0_i32 = arith.constant 0 : i32
    %c0_i32_0 = arith.constant 0 : i32
    %c0_i32_1 = arith.constant 0 : i32
    return %c0_i32, %c0_i32_0 : i32, i32
  }
  func.func @transform_9(%arg0: i32) -> (i32, i32, i32) {
    %c0_i32 = arith.constant 0 : i32
    %c0_i32_0 = arith.constant 0 : i32
    %c0_i32_1 = arith.constant 0 : i32
    return %arg0, %c0_i32, %c0_i32_0 : i32, i32, i32
  }
}

</mosaic_0001>

<bundles_post_ra>
// kernel: _lambda_.1
= control target key start
LH: loop header
LB: loop body
LE: loop exit
PB: predicated region body
PF: predicated region fallthrough
CT: control target
= control target key end

     0   :  { %s8705_s30 = smov 0   ;;  %s12622_s0 = inlined_call_operand.vmem [shape: f32[4,128,32], index: 0, kind: input, shape index: {}]   ;;  %s12623_s1 = inlined_call_operand.vmem [shape: f32[16,16,64], index: 1, kind: input, shape index: {}]   ;;  %s12624_s2 = inlined_call_operand.vmem [shape: bf16[256,256], index: 2, kind: input, shape index: {}]   ;;  %s12625_s3 = inlined_call_operand.vmem [shape: f32[256,256], index: 3, kind: input, shape index: {}]   ;;  %s12626_s4 = inlined_call_operand.vmem [shape: bf16[64,32], index: 4, kind: input, shape index: {}]   ;;  %s12627_s5 = inlined_call_operand.vmem [shape: f32[64,64], index: 5, kind: input, shape index: {}]   ;;  %s12628_s6 = inlined_call_operand.vmem [shape: f32[8,128], index: 6, kind: input, shape index: {}]   ;;  %s12629_s7 = inlined_call_operand.vmem [shape: bf16[32,256], index: 7, kind: input, shape index: {}]   ;;  %s12630_s8 = inlined_call_operand.vmem [shape: bf16[128,32], index: 8, kind: input, shape index: {}]   ;;  %s12631_s9 = inlined_call_operand.vmem [shape: f32[4,128,32], index: 9, kind: output, shape index: {}]  }
   0x1 LB: > { %s6901_s10 = sadd.s32 4294967295, %s8646_s30   ;;  %p6905_p0 = scmp.ge.s32.totalorder %s8646_s30, 1  ;;  %s8646_s30 = sphi %s8705_s30, %s19_s30  }
   0x2   : > { %p289_p1 = scmp.lt.s32.totalorder %s8646_s30, 3 }
   0x4   : > { %p290_p2 = pnand %p6905_p0, %p289_p1 }
   0x6   : > { %293 = sbr.rel (%p290_p2) target bundleno = 3574 (0xdf6), region = 56 }
   0xd   : > { %s6906_s11 = sshll.u32 %s6901_s10, 1  ;;  %vm379_vm0 = vcmask 261120   ;;  %s8648_s20 = smov 32   ;;  %vm8651_vm1 = vmmov 0   ;;  %vm2795_vm2 = vcmask 523264  }
   0xe   : > { %p328_p3 = scmp.lt.s32.totalorder %s6906_s11, 3  ;;  %s8650_s27 = smov 96  }
   0xf   : > { %s8652_s10 = smov 64  }
  0x10   : > { %s12745_s11 = smov (!%p328_p3, %s6906_s11), 3 }
  0x11   : > { %s7074_s12 = sshll.u32 %s12745_s11, 7 }
  0x12   : > { %s8721_s15 = scalar_lea.vmem %s12622_s0, %s7074_s12  ;;  %s12490_s25 = scalar_lea.vmem %s12631_s9, %s7074_s12 }
  0x13   : > { %v8724_v0 = vld [vmem:[%s8721_s15 + $0x80] sm:$0xff]  ;;  %v8727_v1 = vld [vmem:[%s8721_s15 + $0x88] sm:$0xff]  ;;  %v8744_v8 = vld [vmem:[%s8721_s15 + $0x90] sm:$0xff] }
  0x14   : > { %v8730_v2 = vld [vmem:[%s8721_s15] sm:$0xff]  ;;  %v428_v3 = vsel %vm379_vm0, %v8724_v0, 0.0  ;;  %v8737_v5 = vld [vmem:[%s8721_s15 + $0x8] sm:$0xff]  ;;  %v431_v6 = vsel %vm379_vm0, %v8727_v1, 0.0  ;;  %v8747_v9 = vld [vmem:[%s8721_s15 + $0x98] sm:$0xff]  ;;  %v434_v10 = vsel %vm379_vm0, %v8744_v8, 0.0 }
  0x15   : > { %v380_v4 = vsel %vm379_vm0, %v8730_v2, 0.0  ;;  %429 = vadd.xlane.f32.xlu0 %v428_v3  ;;  %v383_v7 = vsel %vm379_vm0, %v8737_v5, 0.0  ;;  %v437_v11 = vsel %vm379_vm0, %v8747_v9, 0.0  ;;  %v8754_v12 = vld [vmem:[%s8721_s15 + $0x10] sm:$0xff]  ;;  %v8757_v13 = vld [vmem:[%s8721_s15 + $0x18] sm:$0xff]  ;;  %v8760_v14 = vld [vmem:[%s8721_s15 + $0xa0] sm:$0xff] }
  0x16   : > { %381 = vadd.xlane.f32.xlu1 %v380_v4  ;;  %v8763_v15 = vld [vmem:[%s8721_s15 + $0x20] sm:$0xff]  ;;  %v8766_v16 = vld [vmem:[%s8721_s15 + $0xa8] sm:$0xff]  ;;  %v386_v18 = vsel %vm379_vm0, %v8754_v12, 0.0  ;;  %v389_v19 = vsel %vm379_vm0, %v8757_v13, 0.0  ;;  %v440_v20 = vsel %vm379_vm0, %v8760_v14, 0.0  ;;  %v8784_v24 = vld [vmem:[%s8721_s15 + $0xb0] sm:$0xff] }
  0x17   : > { %v8769_v17 = vld [vmem:[%s8721_s15 + $0x28] sm:$0xff]  ;;  %v392_v21 = vsel %vm379_vm0, %v8763_v15, 0.0  ;;  %v443_v22 = vsel %vm379_vm0, %v8766_v16, 0.0  ;;  %v8787_v25 = vld [vmem:[%s8721_s15 + $0xb8] sm:$0xff]  ;;  %v446_v26 = vsel %vm379_vm0, %v8784_v24, 0.0  ;;  %v8794_v28 = vld [vmem:[%s8721_s15 + $0x30] sm:$0xff] }
  0x18   : > { %v395_v23 = vsel %vm379_vm0, %v8769_v17, 0.0  ;;  %v449_v27 = vsel %vm379_vm0, %v8787_v25, 0.0  ;;  %v8797_v29 = vld [vmem:[%s8721_s15 + $0x38] sm:$0xff]  ;;  %v398_v30 = vsel %vm379_vm0, %v8794_v28, 0.0  ;;  %v8804_v32 = vld [vmem:[%s8721_s15 + $0xc0] sm:$0xff]  ;;  %v8807_v33 = vld [vmem:[%s8721_s15 + $0xc8] sm:$0xff] }
  0x19   : > { %432 = vadd.xlane.f32.xlu0 %v431_v6  ;;  %v401_v31 = vsel %vm379_vm0, %v8797_v29, 0.0  ;;  %v452_v34 = vsel %vm379_vm0, %v8804_v32, 0.0  ;;  %v455_v35 = vsel %vm379_vm0, %v8807_v33, 0.0  ;;  %v8814_v36 = vld [vmem:[%s8721_s15 + $0x40] sm:$0xff]  ;;  %v8817_v37 = vld [vmem:[%s8721_s15 + $0x48] sm:$0xff]  ;;  %v8824_v40 = vld [vmem:[%s8721_s15 + $0xd0] sm:$0xff] }
  0x1a   : > { %384 = vadd.xlane.f32.xlu1 %v383_v7  ;;  %v404_v38 = vsel %vm379_vm0, %v8814_v36, 0.0  ;;  %v407_v39 = vsel %vm379_vm0, %v8817_v37, 0.0  ;;  %v8827_v41 = vld [vmem:[%s8721_s15 + $0xd8] sm:$0xff]  ;;  %v458_v42 = vsel %vm379_vm0, %v8824_v40, 0.0  ;;  %v8834_v44 = vld [vmem:[%s8721_s15 + $0x50] sm:$0xff]  ;;  %v8844_v48 = vld [vmem:[%s8721_s15 + $0xe0] sm:$0xff] }
  0x1b   : > { %v461_v43 = vsel %vm379_vm0, %v8827_v41, 0.0  ;;  %v8837_v45 = vld [vmem:[%s8721_s15 + $0x58] sm:$0xff]  ;;  %v410_v46 = vsel %vm379_vm0, %v8834_v44, 0.0  ;;  %v8847_v49 = vld [vmem:[%s8721_s15 + $0xe8] sm:$0xff]  ;;  %v464_v50 = vsel %vm379_vm0, %v8844_v48, 0.0  ;;  %v8854_v52 = vld [vmem:[%s8721_s15 + $0x60] sm:$0xff] }
  0x1c   : > { %v413_v47 = vsel %vm379_vm0, %v8837_v45, 0.0  ;;  %v467_v51 = vsel %vm379_vm0, %v8847_v49, 0.0  ;;  %v8857_v53 = vld [vmem:[%s8721_s15 + $0x68] sm:$0xff]  ;;  %v416_v54 = vsel %vm379_vm0, %v8854_v52, 0.0  ;;  %v8864_v56 = vld [vmem:[%s8721_s15 + $0xf0] sm:$0xff]  ;;  %v8867_v57 = vld [vmem:[%s8721_s15 + $0xf8] sm:$0xff] }
  0x1d   : > { %435 = vadd.xlane.f32.xlu0 %v434_v10  ;;  %v419_v55 = vsel %vm379_vm0, %v8857_v53, 0.0  ;;  %v470_v58 = vsel %vm379_vm0, %v8864_v56, 0.0  ;;  %v473_v59 = vsel %vm379_vm0, %v8867_v57, 0.0  ;;  %v8874_v60 = vld [vmem:[%s8721_s15 + $0x70] sm:$0xff]  ;;  %v8877_v61 = vld [vmem:[%s8721_s15 + $0x78] sm:$0xff] }
  0x1e   : > { %438 = vadd.xlane.f32.xlu1 %v437_v11  ;;  %v422_v62 = vsel %vm379_vm0, %v8874_v60, 0.0  ;;  %v425_v63 = vsel %vm379_vm0, %v8877_v61, 0.0 }
  0x21   : > { %387 = vadd.xlane.f32.xlu0 %v386_v18 }
  0x22   : > { %390 = vadd.xlane.f32.xlu1 %v389_v19 }
  0x25   : > { %441 = vadd.xlane.f32.xlu0 %v440_v20 }
  0x26   : > { %444 = vadd.xlane.f32.xlu1 %v443_v22 }
  0x29   : > { %393 = vadd.xlane.f32.xlu0 %v392_v21 }
  0x2a   : > { %396 = vadd.xlane.f32.xlu1 %v395_v23 }
  0x2d   : > { %447 = vadd.xlane.f32.xlu0 %v446_v26 }
  0x2e   : > { %450 = vadd.xlane.f32.xlu1 %v449_v27 }
  0x31   : > { %399 = vadd.xlane.f32.xlu0 %v398_v30 }
  0x32   : > { %402 = vadd.xlane.f32.xlu1 %v401_v31 }
  0x35   : > { %453 = vadd.xlane.f32.xlu0 %v452_v34 }
  0x36   : > { %456 = vadd.xlane.f32.xlu1 %v455_v35 }
  0x39   : > { %405 = vadd.xlane.f32.xlu0 %v404_v38 }
  0x3a   : > { %408 = vadd.xlane.f32.xlu1 %v407_v39 }
  0x3d   : > { %459 = vadd.xlane.f32.xlu0 %v458_v42 }
  0x3e   : > { %462 = vadd.xlane.f32.xlu1 %v461_v43 }
  0x41   : > { %411 = vadd.xlane.f32.xlu0 %v410_v46 }
  0x42   : > { %414 = vadd.xlane.f32.xlu1 %v413_v47 }
  0x45   : > { %465 = vadd.xlane.f32.xlu0 %v464_v50 }
  0x46   : > { %468 = vadd.xlane.f32.xlu1 %v467_v51 }
  0x49   : > { %417 = vadd.xlane.f32.xlu0 %v416_v54 }
  0x4a   : > { %420 = vadd.xlane.f32.xlu1 %v419_v55 }
  0x4d   : > { %471 = vadd.xlane.f32.xlu0 %v470_v58 }
  0x4e   : > { %474 = vadd.xlane.f32.xlu1 %v473_v59 }
  0x51   : > { %423 = vadd.xlane.f32.xlu0 %v422_v62 }
  0x52   : > { %426 = vadd.xlane.f32.xlu1 %v425_v63 }
  0xa2   : > { %v430_v3 = vpop.xlane.xlu0 %429 }
  0xa3   : > { %v382_v4 = vpop.xlane.xlu1 %381  ;;  %v493_v6 = vmul.f32 0.03125, %v430_v3 }
  0xa4   : > { %v477_v7 = vmul.f32 0.03125, %v382_v4 }
  0xa5   : > { %v8884_v10 = vsub.f32 %v8724_v0, %v493_v6 }
  0xa6   : > { %v8887_v11 = vsub.f32 %v8730_v2, %v477_v7  ;;  %v433_v18 = vpop.xlane.xlu0 %432 }
  0xa7   : > { %v385_v19 = vpop.xlane.xlu1 %384  ;;  %v494_v20 = vmul.f32 0.03125, %v433_v18  ;;  %v557_v21 = vmul.f32 %v8884_v10, %v8884_v10 }
  0xa8   : > { %v478_v22 = vmul.f32 0.03125, %v385_v19  ;;  %v541_v23 = vmul.f32 %v8887_v11, %v8887_v11 }
  0xa9   : > { %v8894_v26 = vsub.f32 %v8727_v1, %v494_v20  ;;  %v621_v27 = vsel %vm379_vm0, %v557_v21, 0.0 }
  0xaa   : > { %v8898_v0 = vsub.f32 %v8737_v5, %v478_v22  ;;  %v436_v2 = vpop.xlane.xlu0 %435  ;;  %622 = vadd.xlane.f32.xlu0 %v621_v27  ;;  %v573_v30 = vsel %vm379_vm0, %v541_v23, 0.0 }
  0xab   : > { %v439_v31 = vpop.xlane.xlu1 %438  ;;  %v495_v34 = vmul.f32 0.03125, %v436_v2  ;;  %v558_v35 = vmul.f32 %v8894_v26, %v8894_v26 }
  0xac   : > { %v496_v38 = vmul.f32 0.03125, %v439_v31  ;;  %v542_v39 = vmul.f32 %v8898_v0, %v8898_v0 }
  0xad   : > { %v8906_v1 = vsub.f32 %v8744_v8, %v495_v34  ;;  %v624_v42 = vsel %vm379_vm0, %v558_v35, 0.0 }
  0xae   : > { %v8910_v5 = vsub.f32 %v8747_v9, %v496_v38  ;;  %v388_v43 = vpop.xlane.xlu0 %387  ;;  %625 = vadd.xlane.f32.xlu1 %v624_v42  ;;  %574 = vadd.xlane.f32.xlu0 %v573_v30  ;;  %v576_v46 = vsel %vm379_vm0, %v542_v39, 0.0 }
  0xaf   : > { %v391_v47 = vpop.xlane.xlu1 %390  ;;  %v479_v50 = vmul.f32 0.03125, %v388_v43  ;;  %v559_v51 = vmul.f32 %v8906_v1, %v8906_v1 }
  0xb0   : > { %v480_v54 = vmul.f32 0.03125, %v391_v47  ;;  %v560_v8 = vmul.f32 %v8910_v5, %v8910_v5 }
  0xb1   : > { %v8918_v55 = vsub.f32 %v8754_v12, %v479_v50  ;;  %v627_v9 = vsel %vm379_vm0, %v559_v51, 0.0 }
  0xb2   : > { %v8922_v58 = vsub.f32 %v8757_v13, %v480_v54  ;;  %v442_v59 = vpop.xlane.xlu0 %441  ;;  %628 = vadd.xlane.f32.xlu0 %v627_v9  ;;  %577 = vadd.xlane.f32.xlu1 %v576_v46  ;;  %v630_v62 = vsel %vm379_vm0, %v560_v8, 0.0 }
  0xb3   : > { %v445_v63 = vpop.xlane.xlu1 %444  ;;  %v497_v3 = vmul.f32 0.03125, %v442_v59  ;;  %v543_v4 = vmul.f32 %v8918_v55, %v8918_v55 }
  0xb4   : > { %v498_v6 = vmul.f32 0.03125, %v445_v63  ;;  %v544_v12 = vmul.f32 %v8922_v58, %v8922_v58 }
  0xb5   : > { %v8930_v7 = vsub.f32 %v8760_v14, %v497_v3  ;;  %v579_v13 = vsel %vm379_vm0, %v543_v4, 0.0 }
  0xb6   : > { %v8934_v18 = vsub.f32 %v8766_v16, %v498_v6  ;;  %v394_v19 = vpop.xlane.xlu0 %393  ;;  %580 = vadd.xlane.f32.xlu0 %v579_v13  ;;  %631 = vadd.xlane.f32.xlu1 %v630_v62  ;;  %v582_v20 = vsel %vm379_vm0, %v544_v12, 0.0 }
  0xb7   : > { %v397_v21 = vpop.xlane.xlu1 %396  ;;  %v481_v22 = vmul.f32 0.03125, %v394_v19  ;;  %v561_v23 = vmul.f32 %v8930_v7, %v8930_v7 }
  0xb8   : > { %v482_v27 = vmul.f32 0.03125, %v397_v21  ;;  %v562_v14 = vmul.f32 %v8934_v18, %v8934_v18 }
  0xb9   : > { %v8942_v2 = vsub.f32 %v8763_v15, %v481_v22  ;;  %v633_v16 = vsel %vm379_vm0, %v561_v23, 0.0 }
  0xba   : > { %v8946_v30 = vsub.f32 %v8769_v17, %v482_v27  ;;  %v448_v31 = vpop.xlane.xlu0 %447  ;;  %634 = vadd.xlane.f32.xlu0 %v633_v16  ;;  %583 = vadd.xlane.f32.xlu1 %v582_v20  ;;  %v636_v34 = vsel %vm379_vm0, %v562_v14, 0.0 }
  0xbb   : > { %v451_v35 = vpop.xlane.xlu1 %450  ;;  %v499_v38 = vmul.f32 0.03125, %v448_v31  ;;  %v545_v39 = vmul.f32 %v8942_v2, %v8942_v2 }
  0xbc   : > { %v500_v42 = vmul.f32 0.03125, %v451_v35  ;;  %v546_v15 = vmul.f32 %v8946_v30, %v8946_v30 }
  0xbd   : > { %v8954_v43 = vsub.f32 %v8784_v24, %v499_v38  ;;  %v585_v17 = vsel %vm379_vm0, %v545_v39, 0.0 }
  0xbe   : > { %v8958_v46 = vsub.f32 %v8787_v25, %v500_v42  ;;  %v400_v47 = vpop.xlane.xlu0 %399  ;;  %586 = vadd.xlane.f32.xlu0 %v585_v17  ;;  %637 = vadd.xlane.f32.xlu1 %v636_v34  ;;  %v588_v50 = vsel %vm379_vm0, %v546_v15, 0.0 }
  0xbf   : > { %v403_v51 = vpop.xlane.xlu1 %402  ;;  %v483_v54 = vmul.f32 0.03125, %v400_v47  ;;  %v563_v8 = vmul.f32 %v8954_v43, %v8954_v43 }
  0xc0   : > { %v484_v9 = vmul.f32 0.03125, %v403_v51  ;;  %v564_v24 = vmul.f32 %v8958_v46, %v8958_v46 }
  0xc1   : > { %v8966_v59 = vsub.f32 %v8794_v28, %v483_v54  ;;  %v639_v25 = vsel %vm379_vm0, %v563_v8, 0.0 }
  0xc2   : > { %v8970_v62 = vsub.f32 %v8797_v29, %v484_v9  ;;  %v454_v63 = vpop.xlane.xlu0 %453  ;;  %640 = vadd.xlane.f32.xlu0 %v639_v25  ;;  %589 = vadd.xlane.f32.xlu1 %v588_v50  ;;  %v642_v3 = vsel %vm379_vm0, %v564_v24, 0.0 }
  0xc3   : > { %v457_v4 = vpop.xlane.xlu1 %456  ;;  %v501_v6 = vmul.f32 0.03125, %v454_v63  ;;  %v547_v12 = vmul.f32 %v8966_v59, %v8966_v59 }
  0xc4   : > { %v502_v13 = vmul.f32 0.03125, %v457_v4  ;;  %v548_v28 = vmul.f32 %v8970_v62, %v8970_v62 }
  0xc5   : > { %v8978_v19 = vsub.f32 %v8804_v32, %v501_v6  ;;  %v591_v29 = vsel %vm379_vm0, %v547_v12, 0.0 }
  0xc6   : > { %v8982_v20 = vsub.f32 %v8807_v33, %v502_v13  ;;  %v406_v21 = vpop.xlane.xlu0 %405  ;;  %592 = vadd.xlane.f32.xlu0 %v591_v29  ;;  %643 = vadd.xlane.f32.xlu1 %v642_v3  ;;  %v594_v22 = vsel %vm379_vm0, %v548_v28, 0.0 }
  0xc7   : > { %v409_v23 = vpop.xlane.xlu1 %408  ;;  %v485_v27 = vmul.f32 0.03125, %v406_v21  ;;  %v565_v14 = vmul.f32 %v8978_v19, %v8978_v19 }
  0xc8   : > { %v486_v16 = vmul.f32 0.03125, %v409_v23  ;;  %v566_v32 = vmul.f32 %v8982_v20, %v8982_v20 }
  0xc9   : > { %v8990_v31 = vsub.f32 %v8814_v36, %v485_v27  ;;  %v645_v33 = vsel %vm379_vm0, %v565_v14, 0.0 }
  0xca   : > { %v8994_v34 = vsub.f32 %v8817_v37, %v486_v16  ;;  %v460_v35 = vpop.xlane.xlu0 %459  ;;  %646 = vadd.xlane.f32.xlu0 %v645_v33  ;;  %595 = vadd.xlane.f32.xlu1 %v594_v22  ;;  %v648_v38 = vsel %vm379_vm0, %v566_v32, 0.0 }
  0xcb   : > { %v463_v39 = vpop.xlane.xlu1 %462  ;;  %v503_v42 = vmul.f32 0.03125, %v460_v35  ;;  %v549_v15 = vmul.f32 %v8990_v31, %v8990_v31 }
  0xcc   : > { %v504_v17 = vmul.f32 0.03125, %v463_v39  ;;  %v550_v36 = vmul.f32 %v8994_v34, %v8994_v34 }
  0xcd   : > { %v9002_v47 = vsub.f32 %v8824_v40, %v503_v42  ;;  %v597_v37 = vsel %vm379_vm0, %v549_v15, 0.0 }
  0xce   : > { %v9006_v50 = vsub.f32 %v8827_v41, %v504_v17  ;;  %v412_v51 = vpop.xlane.xlu0 %411  ;;  %598 = vadd.xlane.f32.xlu0 %v597_v37  ;;  %649 = vadd.xlane.f32.xlu1 %v648_v38  ;;  %v600_v54 = vsel %vm379_vm0, %v550_v36, 0.0 }
  0xcf   : > { %v415_v8 = vpop.xlane.xlu1 %414  ;;  %v487_v9 = vmul.f32 0.03125, %v412_v51  ;;  %v567_v24 = vmul.f32 %v9002_v47, %v9002_v47 }
  0xd0   : > { %v488_v25 = vmul.f32 0.03125, %v415_v8  ;;  %v568_v40 = vmul.f32 %v9006_v50, %v9006_v50 }
  0xd1   : > { %v9014_v63 = vsub.f32 %v8834_v44, %v487_v9  ;;  %v651_v41 = vsel %vm379_vm0, %v567_v24, 0.0 }
  0xd2   : > { %v9018_v3 = vsub.f32 %v8837_v45, %v488_v25  ;;  %v466_v4 = vpop.xlane.xlu0 %465  ;;  %652 = vadd.xlane.f32.xlu0 %v651_v41  ;;  %601 = vadd.xlane.f32.xlu1 %v600_v54  ;;  %v654_v6 = vsel %vm379_vm0, %v568_v40, 0.0 }
  0xd3   : > { %v469_v12 = vpop.xlane.xlu1 %468  ;;  %v505_v13 = vmul.f32 0.03125, %v466_v4  ;;  %v551_v28 = vmul.f32 %v9014_v63, %v9014_v63 }
  0xd4   : > { %v506_v29 = vmul.f32 0.03125, %v469_v12  ;;  %v552_v44 = vmul.f32 %v9018_v3, %v9018_v3 }
  0xd5   : > { %v9026_v21 = vsub.f32 %v8844_v48, %v505_v13  ;;  %v603_v45 = vsel %vm379_vm0, %v551_v28, 0.0 }
  0xd6   : > { %v9030_v22 = vsub.f32 %v8847_v49, %v506_v29  ;;  %v418_v23 = vpop.xlane.xlu0 %417  ;;  %604 = vadd.xlane.f32.xlu0 %v603_v45  ;;  %655 = vadd.xlane.f32.xlu1 %v654_v6  ;;  %v606_v27 = vsel %vm379_vm0, %v552_v44, 0.0 }
  0xd7   : > { %v421_v14 = vpop.xlane.xlu1 %420  ;;  %v489_v16 = vmul.f32 0.03125, %v418_v23  ;;  %v569_v32 = vmul.f32 %v9026_v21, %v9026_v21 }
  0xd8   : > { %v490_v33 = vmul.f32 0.03125, %v421_v14  ;;  %v570_v48 = vmul.f32 %v9030_v22, %v9030_v22 }
  0xd9   : > { %v9038_v35 = vsub.f32 %v8854_v52, %v489_v16  ;;  %v657_v49 = vsel %vm379_vm0, %v569_v32, 0.0  ;;  %v797_v16 = vlaneseq }
  0xda   : > { %v9042_v38 = vsub.f32 %v8857_v53, %v490_v33  ;;  %v472_v39 = vpop.xlane.xlu0 %471  ;;  %658 = vadd.xlane.f32.xlu0 %v657_v49  ;;  %607 = vadd.xlane.f32.xlu1 %v606_v27  ;;  %v660_v42 = vsel %vm379_vm0, %v570_v48, 0.0 }
  0xdb   : > { %v475_v15 = vpop.xlane.xlu1 %474  ;;  %v507_v17 = vmul.f32 0.03125, %v472_v39  ;;  %v553_v36 = vmul.f32 %v9038_v35, %v9038_v35 }
  0xdc   : > { %v508_v37 = vmul.f32 0.03125, %v475_v15  ;;  %v554_v52 = vmul.f32 %v9042_v38, %v9042_v38  ;;  %v9078_v15 = vshrl.u32 %v797_v16, 7 }
  0xdd   : > { %v9050_v51 = vsub.f32 %v8864_v56, %v507_v17  ;;  %v609_v53 = vsel %vm379_vm0, %v553_v36, 0.0 }
  0xde   : > { %v9054_v54 = vsub.f32 %v8867_v57, %v508_v37  ;;  %v424_v8 = vpop.xlane.xlu0 %423  ;;  %610 = vadd.xlane.f32.xlu0 %v609_v53  ;;  %661 = vadd.xlane.f32.xlu1 %v660_v42  ;;  %v612_v9 = vsel %vm379_vm0, %v554_v52, 0.0  ;;  %12669 = vst [vmem:[#allocation2_spill] sm:$0xff] %v9078_v15 }
  0xdf   : > { %v427_v24 = vpop.xlane.xlu1 %426  ;;  %v491_v25 = vmul.f32 0.03125, %v424_v8  ;;  %v571_v40 = vmul.f32 %v9050_v51, %v9050_v51 }
  0xe0   : > { %v492_v41 = vmul.f32 0.03125, %v427_v24  ;;  %v572_v56 = vmul.f32 %v9054_v54, %v9054_v54 }
  0xe1   : > { %v9062_v4 = vsub.f32 %v8874_v60, %v491_v25  ;;  %v663_v57 = vsel %vm379_vm0, %v571_v40, 0.0  ;;  %v9084_v40 = vld [vmem:[%s12628_s6] sm:$0xff] }
  0xe2   : > { %v9066_v6 = vsub.f32 %v8877_v61, %v492_v41  ;;  %664 = vadd.xlane.f32.xlu0 %v663_v57  ;;  %613 = vadd.xlane.f32.xlu1 %v612_v9  ;;  %v666_v13 = vsel %vm379_vm0, %v572_v56, 0.0  ;;  %v8151_v61 = vld [vmem:[%s12624_s2 + $0x4] ss:$8 sps:$4 sm:$0xff]   ;;  %v799_v9 = vsub.s32 0, %v9078_v15 }
  0xe3   : > { %v555_v12 = vmul.f32 %v9062_v4, %v9062_v4  ;;  %1109 = vmatprep.mubr.bf16.mxu0 %v8151_v61 }
  0xe4   : > { %v556_v28 = vmul.f32 %v9066_v6, %v9066_v6 }
  0xe5   : > { %v615_v29 = vsel %vm379_vm0, %v555_v12, 0.0 }
  0xe6   : > { %616 = vadd.xlane.f32.xlu0 %v615_v29  ;;  %667 = vadd.xlane.f32.xlu1 %v666_v13  ;;  %v618_v60 = vsel %vm379_vm0, %v556_v28, 0.0  ;;  %v9088_v29 = vrot.slane %v9084_v40, %v799_v9 }
  0xea   : > { %619 = vadd.xlane.f32.xlu1 %v618_v60  ;;  %v835_v60 = vsub.s32 1, %v9078_v15 }
 0x137   : > { %v623_v44 = vpop.xlane.xlu0 %622 }
 0x138   : > { %v685_v45 = vmul.f32 0.03125, %v623_v44 }
 0x13a   : > { %v717_v23 = vadd.f32 1e-05, %v685_v45 }
 0x13b   : > { %v575_v27 = vpop.xlane.xlu0 %574  ;;  %v626_v14 = vpop.xlane.xlu1 %625 }
 0x13c   : > { %8215 = vrsqrt.f32 %v717_v23  ;;  %v669_v32 = vmul.f32 0.03125, %v575_v27  ;;  %v686_v33 = vmul.f32 0.03125, %v626_v14 }
 0x13e   : > { %v701_v48 = vadd.f32 1e-05, %v669_v32  ;;  %v718_v49 = vadd.f32 1e-05, %v686_v33 }
 0x13f   : > { %v629_v39 = vpop.xlane.xlu0 %628  ;;  %v578_v42 = vpop.xlane.xlu1 %577 }
 0x140   : > { %8217 = vrsqrt.f32 %v701_v48  ;;  %v687_v17 = vmul.f32 0.03125, %v629_v39  ;;  %v670_v36 = vmul.f32 0.03125, %v578_v42  ;;  %v9093_v48 = vrot.slane %v9084_v40, %v835_v60 }
 0x141   : > { %8219 = vrsqrt.f32 %v718_v49 }
 0x142   : > { %v719_v37 = vadd.f32 1e-05, %v687_v17  ;;  %v702_v52 = vadd.f32 1e-05, %v670_v36 }
 0x143   : > { %v581_v53 = vpop.xlane.xlu0 %580  ;;  %v632_v8 = vpop.xlane.xlu1 %631 }
 0x144   : > { %8221 = vrsqrt.f32 %v719_v37  ;;  %v671_v24 = vmul.f32 0.03125, %v581_v53  ;;  %v688_v25 = vmul.f32 0.03125, %v632_v8 }
 0x145   : > { %8223 = vrsqrt.f32 %v702_v52 }
 0x146   : > { %v8216_v41 = vpop.eup %8215  ;;  %v703_v56 = vadd.f32 1e-05, %v671_v24  ;;  %v720_v57 = vadd.f32 1e-05, %v688_v25 }
 0x147   : > { %v635_v12 = vpop.xlane.xlu0 %634  ;;  %v584_v13 = vpop.xlane.xlu1 %583  ;;  %v781_v28 = vmul.f32 %v8216_v41, %v8884_v10 }
 0x148   : > { %8225 = vrsqrt.f32 %v703_v56  ;;  %v689_v61 = vmul.f32 0.03125, %v635_v12  ;;  %v672_v44 = vmul.f32 0.03125, %v584_v13 }
 0x149   : > { %8227 = vrsqrt.f32 %v720_v57  ;;  %v817_v33 = vmul.f32 %v9088_v29, %v781_v28 }
 0x14a   : > { %v8218_v45 = vpop.eup %8217  ;;  %v721_v23 = vadd.f32 1e-05, %v689_v61  ;;  %v704_v27 = vadd.f32 1e-05, %v672_v44 }
 0x14b   : > { %v8220_v14 = vpop.eup %8219  ;;  %v587_v16 = vpop.xlane.xlu0 %586  ;;  %v765_v42 = vmul.f32 %v8218_v45, %v8887_v11  ;;  %v853_v24 = vadd.f32 %v9093_v48, %v817_v33 }
 0x14c   : > { %v638_v32 = vpop.xlane.xlu1 %637  ;;  %8229 = vrsqrt.f32 %v721_v23  ;;  %v673_v10 = vmul.f32 0.03125, %v587_v16  ;;  %v782_v39 = vmul.f32 %v8220_v14, %v8894_v26 }
 0x14d   : > { %v690_v49 = vmul.f32 0.03125, %v638_v32  ;;  %8231 = vrsqrt.f32 %v704_v27  ;;  %v801_v57 = vmul.f32 %v9088_v29, %v765_v42 }
 0x14e   : > { %v8222_v17 = vpop.eup %8221  ;;  %v705_v36 = vadd.f32 1e-05, %v673_v10  ;;  %v818_v52 = vmul.f32 %v9088_v29, %v782_v39 }
 0x14f   : > { %v722_v37 = vadd.f32 1e-05, %v690_v49  ;;  %v8224_v53 = vpop.eup %8223  ;;  %v641_v8 = vpop.xlane.xlu0 %640  ;;  %v783_v25 = vmul.f32 %v8222_v17, %v8906_v1 }
 0x150   : > { %v590_v9 = vpop.xlane.xlu1 %589  ;;  %8233 = vrsqrt.f32 %v705_v36  ;;  %v691_v41 = vmul.f32 0.03125, %v641_v8  ;;  %v854_v26 = vadd.f32 %v9093_v48, %v818_v52  ;;  %v766_v11 = vmul.f32 %v8224_v53, %v8898_v0 }
 0x151   : > { %v674_v56 = vmul.f32 0.03125, %v590_v9  ;;  %8235 = vrsqrt.f32 %v722_v37  ;;  %v819_v1 = vmul.f32 %v9088_v29, %v783_v25  ;;  %v837_v0 = vadd.f32 %v9093_v48, %v801_v57 }
 0x152   : > { %v8226_v12 = vpop.eup %8225  ;;  %v723_v13 = vadd.f32 1e-05, %v691_v41  ;;  %v909_v60 = vpack.c.bf16 %v854_v26, %v853_v24  ;;  %v802_v23 = vmul.f32 %v9088_v29, %v766_v11 }
 0x153   : > { %v706_v28 = vadd.f32 1e-05, %v674_v56  ;;  %v8228_v61 = vpop.eup %8227  ;;  %v593_v44 = vpop.xlane.xlu0 %592  ;;  %v767_v33 = vmul.f32 %v8226_v12, %v8918_v55  ;;  %v855_v53 = vadd.f32 %v9093_v48, %v819_v1 }
 0x154   : > { %v644_v45 = vpop.xlane.xlu1 %643  ;;  %8237 = vrsqrt.f32 %v723_v13  ;;  %v675_v27 = vmul.f32 0.03125, %v593_v44  ;;  %7076 = vmatprep.subr.bf16.mxu0 %v909_v60  ;;  %v784_v16 = vmul.f32 %v8228_v61, %v8910_v5  ;;  %v838_v32 = vadd.f32 %v9093_v48, %v802_v23 }
 0x155   : > { %v692_v14 = vmul.f32 0.03125, %v644_v45  ;;  %8239 = vrsqrt.f32 %v706_v28  ;;  %v803_v25 = vmul.f32 %v9088_v29, %v767_v33 }
 0x156   : > { %v8230_v10 = vpop.eup %8229  ;;  %v707_v49 = vadd.f32 1e-05, %v675_v27  ;;  %v820_v42 = vmul.f32 %v9088_v29, %v784_v16  ;;  %v901_v37 = vpack.c.bf16 %v838_v32, %v837_v0 }
 0x157   : > { %v724_v39 = vadd.f32 1e-05, %v692_v14  ;;  %v8232_v17 = vpop.eup %8231  ;;  %v647_v36 = vpop.xlane.xlu0 %646  ;;  %v785_v5 = vmul.f32 %v8230_v10, %v8930_v7 }
 0x158   : > { %v596_v52 = vpop.xlane.xlu1 %595  ;;  %8241 = vrsqrt.f32 %v707_v49  ;;  %v693_v8 = vmul.f32 0.03125, %v647_v36  ;;  %v856_v24 = vadd.f32 %v9093_v48, %v820_v42  ;;  %7077 = vmatpush3.bf16.msra.mxu0 %v901_v37  ;;  %v768_v55 = vmul.f32 %v8232_v17, %v8922_v58 }
 0x159   : > { %v676_v9 = vmul.f32 0.03125, %v596_v52  ;;  %8243 = vrsqrt.f32 %v724_v39  ;;  %v821_v28 = vmul.f32 %v9088_v29, %v785_v5  ;;  %v839_v58 = vadd.f32 %v9093_v48, %v803_v25 }
 0x15a   : > { %v8234_v41 = vpop.eup %8233  ;;  %v725_v56 = vadd.f32 1e-05, %v693_v8  ;;  %v910_v11 = vpack.c.bf16 %v856_v24, %v855_v53  ;;  %v804_v7 = vmul.f32 %v9088_v29, %v768_v55 }
 0x15b   : > { %v708_v26 = vadd.f32 1e-05, %v676_v9  ;;  %v8236_v57 = vpop.eup %8235  ;;  %v599_v12 = vpop.xlane.xlu0 %598  ;;  %v769_v23 = vmul.f32 %v8234_v41, %v8942_v2  ;;  %v857_v49 = vadd.f32 %v9093_v48, %v821_v28 }
 0x15c   : > { %v650_v13 = vpop.xlane.xlu1 %649  ;;  %8245 = vrsqrt.f32 %v725_v56  ;;  %v677_v60 = vmul.f32 0.03125, %v599_v12  ;;  %7078 = vmatprep.subr.bf16.mxu0 %v910_v11  ;;  %v786_v44 = vmul.f32 %v8236_v57, %v8934_v18  ;;  %v840_v45 = vadd.f32 %v9093_v48, %v804_v7 }
 0x15d   : > { %v694_v61 = vmul.f32 0.03125, %v650_v13  ;;  %8247 = vrsqrt.f32 %v708_v26  ;;  %v805_v36 = vmul.f32 %v9088_v29, %v769_v23 }
 0x15e   : > { %v8238_v1 = vpop.eup %8237  ;;  %v709_v27 = vadd.f32 1e-05, %v677_v60  ;;  %v822_v16 = vmul.f32 %v9088_v29, %v786_v44  ;;  %v902_v33 = vpack.c.bf16 %v840_v45, %v839_v58 }
 0x15f   : > { %v726_v14 = vadd.f32 1e-05, %v694_v61  ;;  %v8240_v0 = vpop.eup %8239  ;;  %v653_v32 = vpop.xlane.xlu0 %652  ;;  %v787_v18 = vmul.f32 %v8238_v1, %v8954_v43 }
 0x160   : > { %v602_v10 = vpop.xlane.xlu1 %601  ;;  %8249 = vrsqrt.f32 %v709_v27  ;;  %v695_v39 = vmul.f32 0.03125, %v653_v32  ;;  %v858_v17 = vadd.f32 %v9093_v48, %v822_v16  ;;  %7079 = vmatpush3.bf16.msra.mxu0 %v902_v33  ;;  %v770_v2 = vmul.f32 %v8240_v0, %v8946_v30 }
 0x161   : > { %v678_v42 = vmul.f32 0.03125, %v602_v10  ;;  %8251 = vrsqrt.f32 %v726_v14  ;;  %v823_v55 = vmul.f32 %v9088_v29, %v787_v18  ;;  %v841_v30 = vadd.f32 %v9093_v48, %v805_v36 }
 0x162   : > { %v8242_v37 = vpop.eup %8241  ;;  %v727_v52 = vadd.f32 1e-05, %v695_v39  ;;  %v911_v5 = vpack.c.bf16 %v858_v17, %v857_v49  ;;  %v806_v43 = vmul.f32 %v9088_v29, %v770_v2 }
 0x163   : > { %v710_v53 = vadd.f32 1e-05, %v678_v42  ;;  %v8244_v8 = vpop.eup %8243  ;;  %v605_v9 = vpop.xlane.xlu0 %604  ;;  %v771_v11 = vmul.f32 %v8242_v37, %v8966_v59  ;;  %v859_v58 = vadd.f32 %v9093_v48, %v823_v55 }
 0x164   : > { %v656_v24 = vpop.xlane.xlu1 %655  ;;  %8253 = vrsqrt.f32 %v727_v52  ;;  %v679_v25 = vmul.f32 0.03125, %v605_v9  ;;  %7080 = vmatprep.subr.bf16.mxu0 %v911_v5  ;;  %v788_v56 = vmul.f32 %v8244_v8, %v8958_v46  ;;  %v842_v26 = vadd.f32 %v9093_v48, %v806_v43 }
 0x165   : > { %v696_v41 = vmul.f32 0.03125, %v656_v24  ;;  %8255 = vrsqrt.f32 %v710_v53  ;;  %v807_v27 = vmul.f32 %v9088_v29, %v771_v11 }
 0x166   : > { %v8246_v57 = vpop.eup %8245  ;;  %v711_v12 = vadd.f32 1e-05, %v679_v25  ;;  %v824_v7 = vmul.f32 %v9088_v29, %v788_v56  ;;  %v903_v61 = vpack.c.bf16 %v842_v26, %v841_v30 }
 0x167   : > { %v728_v13 = vadd.f32 1e-05, %v696_v41  ;;  %v8248_v28 = vpop.eup %8247  ;;  %v659_v60 = vpop.xlane.xlu0 %658  ;;  %v789_v46 = vmul.f32 %v8246_v57, %v8978_v19 }
 0x168   : > { %v608_v44 = vpop.xlane.xlu1 %607  ;;  %8257 = vrsqrt.f32 %v711_v12  ;;  %v697_v45 = vmul.f32 0.03125, %v659_v60  ;;  %v860_v1 = vadd.f32 %v9093_v48, %v824_v7  ;;  %7081 = vmatpush3.bf16.msra.mxu0 %v903_v61  ;;  %v772_v59 = vmul.f32 %v8248_v28, %v8970_v62 }
 0x169   : > { %v680_v23 = vmul.f32 0.03125, %v608_v44  ;;  %8259 = vrsqrt.f32 %v728_v13  ;;  %v825_v18 = vmul.f32 %v9088_v29, %v789_v46  ;;  %v843_v62 = vadd.f32 %v9093_v48, %v807_v27 }
 0x16a   : > { %v8250_v14 = vpop.eup %8249  ;;  %v729_v16 = vadd.f32 1e-05, %v697_v45  ;;  %v912_v32 = vpack.c.bf16 %v860_v1, %v859_v58  ;;  %v808_v19 = vmul.f32 %v9088_v29, %v772_v59 }
 0x16b   : > { %v712_v0 = vadd.f32 1e-05, %v680_v23  ;;  %v8252_v33 = vpop.eup %8251  ;;  %v611_v10 = vpop.xlane.xlu0 %610  ;;  %v773_v36 = vmul.f32 %v8250_v14, %v8990_v31  ;;  %v861_v55 = vadd.f32 %v9093_v48, %v825_v18 }
 0x16c   : > { %v662_v49 = vpop.xlane.xlu1 %661  ;;  %8261 = vrsqrt.f32 %v729_v16  ;;  %v681_v39 = vmul.f32 0.03125, %v611_v10  ;;  %7082 = vmatprep.subr.bf16.mxu0 %v912_v32  ;;  %v790_v17 = vmul.f32 %v8252_v33, %v8982_v20  ;;  %v844_v2 = vadd.f32 %v9093_v48, %v808_v19 }
 0x16d   : > { %v698_v42 = vmul.f32 0.03125, %v662_v49  ;;  %8263 = vrsqrt.f32 %v712_v0  ;;  %v809_v30 = vmul.f32 %v9088_v29, %v773_v36 }
 0x16e   : > { %v8254_v37 = vpop.eup %8253  ;;  %v713_v52 = vadd.f32 1e-05, %v681_v39  ;;  %v826_v5 = vmul.f32 %v9088_v29, %v790_v17  ;;  %v904_v24 = vpack.c.bf16 %v844_v2, %v843_v62 }
 0x16f   : > { %v730_v53 = vadd.f32 1e-05, %v698_v42  ;;  %v8256_v8 = vpop.eup %8255  ;;  %v665_v9 = vpop.xlane.xlu0 %664  ;;  %v791_v20 = vmul.f32 %v8254_v37, %v9002_v47  ;;  %v845_v46 = vadd.f32 %v9093_v48, %v809_v30 }
 0x170   : > { %v614_v43 = vpop.xlane.xlu1 %613  ;;  %8265 = vrsqrt.f32 %v713_v52  ;;  %v699_v25 = vmul.f32 0.03125, %v665_v9  ;;  %v862_v56 = vadd.f32 %v9093_v48, %v826_v5  ;;  %7083 = vmatpush3.bf16.msra.mxu0 %v904_v24  ;;  %v774_v31 = vmul.f32 %v8256_v8, %v8994_v34 }
 0x171   : > { %v682_v41 = vmul.f32 0.03125, %v614_v43  ;;  %8267 = vrsqrt.f32 %v730_v53  ;;  %v827_v60 = vmul.f32 %v9088_v29, %v791_v20 }
 0x172   : > { %v8258_v26 = vpop.eup %8257  ;;  %v731_v11 = vadd.f32 1e-05, %v699_v25  ;;  %v913_v12 = vpack.c.bf16 %v862_v56, %v861_v55  ;;  %v810_v47 = vmul.f32 %v9088_v29, %v774_v31 }
 0x173   : > { %v714_v57 = vadd.f32 1e-05, %v682_v41  ;;  %v8260_v13 = vpop.eup %8259  ;;  %v617_v7 = vpop.xlane.xlu0 %616  ;;  %v775_v61 = vmul.f32 %v8258_v26, %v9014_v63  ;;  %v863_v63 = vadd.f32 %v9093_v48, %v827_v60 }
 0x174   : > { %v668_v28 = vpop.xlane.xlu1 %667  ;;  %8269 = vrsqrt.f32 %v731_v11  ;;  %v683_v44 = vmul.f32 0.03125, %v617_v7  ;;  %7084 = vmatprep.subr.bf16.mxu0 %v913_v12  ;;  %v792_v34 = vmul.f32 %v8260_v13, %v9006_v50  ;;  %v846_v45 = vadd.f32 %v9093_v48, %v810_v47 }
 0x175   : > { %v700_v58 = vmul.f32 0.03125, %v668_v28  ;;  %8271 = vrsqrt.f32 %v714_v57  ;;  %v811_v32 = vmul.f32 %v9088_v29, %v775_v61  ;;  %v8152_v61 = vld [vmem:[%s12624_s2 + $0x14] ss:$8 sps:$4 sm:$0xff]  }
 0x176   : > { %v8262_v23 = vpop.eup %8261  ;;  %v715_v1 = vadd.f32 1e-05, %v683_v44  ;;  %v828_v27 = vmul.f32 %v9088_v29, %v792_v34  ;;  %v905_v16 = vpack.c.bf16 %v846_v45, %v845_v46  ;;  %v8157_v44 = vld [vmem:[%s12624_s2 + $0x20] ss:$8 sps:$4 sm:$0xff]   ;;  %v8160_v34 = vld [vmem:[%s12624_s2 + $0x30] ss:$8 sps:$4 sm:$0xff]  }
 0x177   : > { %v732_v59 = vadd.f32 1e-05, %v700_v58  ;;  %v8264_v14 = vpop.eup %8263  ;;  %v793_v33 = vmul.f32 %v8262_v23, %v9026_v21  ;;  %v847_v62 = vadd.f32 %v9093_v48, %v811_v32  ;;  %v8158_v58 = vld [vmem:[%s12624_s2 + $0x34] ss:$8 sps:$4 sm:$0xff]   ;;  %v8161_v46 = vld [vmem:[%s12624_s2 + $0x44] ss:$8 sps:$4 sm:$0xff]  }
 0x178   : > { %v620_v0 = vpop.xlane.xlu1 %619  ;;  %8273 = vrsqrt.f32 %v715_v1  ;;  %v864_v10 = vadd.f32 %v9093_v48, %v828_v27  ;;  %v776_v49 = vmul.f32 %v8264_v14, %v9018_v3  ;;  %7085 = vmatpush3.bf16.msra.mxu0 %v905_v16  ;;  %v8163_v45 = vld [vmem:[%s12624_s2 + $0x40] ss:$8 sps:$4 sm:$0xff]   ;;  %v8164_v23 = vld [vmem:[%s12624_s2 + $0x54] ss:$8 sps:$4 sm:$0xff]   ;;  %v8166_v1 = vld [vmem:[%s12624_s2 + $0x50] ss:$8 sps:$4 sm:$0xff]  }
 0x179   : > { %v684_v50 = vmul.f32 0.03125, %v620_v0  ;;  %8275 = vrsqrt.f32 %v732_v59  ;;  %v829_v2 = vmul.f32 %v9088_v29, %v793_v33  ;;  %v8167_v59 = vld [vmem:[%s12624_s2 + $0x64] ss:$8 sps:$4 sm:$0xff]   ;;  %v8169_v27 = vld [vmem:[%s12624_s2 + $0x60] ss:$8 sps:$4 sm:$0xff]  }
 0x17a   : > { %v8266_v19 = vpop.eup %8265  ;;  %v914_v39 = vpack.c.bf16 %v864_v10, %v863_v63  ;;  %v812_v42 = vmul.f32 %v9088_v29, %v776_v49  ;;  %v8170_v14 = vld [vmem:[%s12624_s2 + $0x74] ss:$8 sps:$4 sm:$0xff]   ;;  %v8172_v16 = vld [vmem:[%s12624_s2 + $0x70] ss:$8 sps:$4 sm:$0xff]   ;;  %v8173_v0 = vld [vmem:[%s12624_s2 + $0x84] ss:$8 sps:$4 sm:$0xff]  }
 0x17b   : > { %v716_v18 = vadd.f32 1e-05, %v684_v50  ;;  %v8268_v17 = vpop.eup %8267  ;;  %v777_v3 = vmul.f32 %v8266_v19, %v9038_v35  ;;  %v865_v8 = vadd.f32 %v9093_v48, %v829_v2  ;;  %v8175_v63 = vld [vmem:[%s12624_s2 + $0x80] ss:$8 sps:$4 sm:$0xff]   ;;  %v8176_v32 = vld [vmem:[%s12624_s2 + $0x94] ss:$8 sps:$4 sm:$0xff]  }
 0x17c   : > { %7086 = vmatprep.subr.bf16.mxu0 %v914_v39  ;;  %v848_v21 = vadd.f32 %v9093_v48, %v812_v42  ;;  %v794_v36 = vmul.f32 %v8268_v17, %v9030_v22  ;;  %v8178_v33 = vld [vmem:[%s12624_s2 + $0x90] ss:$8 sps:$4 sm:$0xff]   ;;  %v8179_v50 = vld [vmem:[%s12624_s2 + $0xa4] ss:$8 sps:$4 sm:$0xff]   ;;  %v8181_v10 = vld [vmem:[%s12624_s2 + $0xa0] ss:$8 sps:$4 sm:$0xff]  }
 0x17d   : > { %8277 = vrsqrt.f32 %v716_v18  ;;  %v813_v43 = vmul.f32 %v9088_v29, %v777_v3  ;;  %v8182_v49 = vld [vmem:[%s12624_s2 + $0xb4] ss:$8 sps:$4 sm:$0xff]   ;;  %v8184_v19 = vld [vmem:[%s12624_s2 + $0xb0] ss:$8 sps:$4 sm:$0xff]   ;;  %v8185_v18 = vld [vmem:[%s12624_s2 + $0xc4] ss:$8 sps:$4 sm:$0xff]  }
 0x17e   : > { %v8270_v37 = vpop.eup %8269  ;;  %v906_v52 = vpack.c.bf16 %v848_v21, %v847_v62  ;;  %v830_v53 = vmul.f32 %v9088_v29, %v794_v36  ;;  %v8197_v39 = vld [vmem:[%s12629_s7] ss:$8 sps:$4 sm:$0xff]   ;;  %v8188_v17 = vld [vmem:[%s12624_s2 + $0xd4] ss:$8 sps:$4 sm:$0xff]   ;;  %v8199_v62 = vld [vmem:[%s12629_s7 + $0x10] ss:$8 sps:$4 sm:$0xff]  }
 0x17f   : > { %v8272_v5 = vpop.eup %8271  ;;  %v795_v55 = vmul.f32 %v8270_v37, %v9050_v51  ;;  %v849_v56 = vadd.f32 %v9093_v48, %v813_v43  ;;  %v8187_v42 = vld [vmem:[%s12624_s2 + $0xc0] ss:$8 sps:$4 sm:$0xff]   ;;  %7466 = vmatprep.subr.bf16.mxu1 %v8197_v39  ;;  %v8190_v2 = vld [vmem:[%s12624_s2 + $0xd0] ss:$8 sps:$4 sm:$0xff]   ;;  %v8191_v21 = vld [vmem:[%s12624_s2 + $0xe4] ss:$8 sps:$4 sm:$0xff]  }
 0x180   : > { %7087 = vmatpush3.bf16.msra.mxu0 %v906_v52  ;;  %v866_v9 = vadd.f32 %v9093_v48, %v830_v53  ;;  %v778_v24 = vmul.f32 %v8272_v5, %v9042_v38  ;;  %7467 = vmatpush3.bf16.msra.mxu1 %v8197_v39  ;;  %v8193_v36 = vld [vmem:[%s12624_s2 + $0xe0] ss:$8 sps:$4 sm:$0xff]   ;;  %v8194_v3 = vld [vmem:[%s12624_s2 + $0xf4] ss:$8 sps:$4 sm:$0xff]   ;;  %v8196_v37 = vld [vmem:[%s12624_s2 + $0xf0] ss:$8 sps:$4 sm:$0xff]  }
 0x181   : > { %v831_v38 = vmul.f32 %v9088_v29, %v795_v55  ;;  %7468 = vmatprep.subr.bf16.mxu1 %v8199_v62  ;;  %v8201_v52 = vld [vmem:[%s12626_s4 + $0x8] sm:$0xff]   ;;  %v8202_v53 = vld [vmem:[%s12626_s4 + $0x10] sm:$0xff]   ;;  %v8203_v5 = vld [vmem:[%s12626_s4] sm:$0xff]  }
 0x182   : > { %v8274_v20 = vpop.eup %8273  ;;  %v915_v22 = vpack.c.bf16 %v866_v9, %v865_v8  ;;  %v814_v35 = vmul.f32 %v9088_v29, %v778_v24  ;;  %1525 = vrot.lane.b32.xlu1 %v8201_v52, %s8648_s20  ;;  %1523 = vrot.lane.b32.xlu0 %v8203_v5, %s8648_s20  ;;  %v8204_v8 = vld [vmem:[%s12626_s4 + $0x18] sm:$0xff]  }
 0x183   : > { %v8276_v25 = vpop.eup %8275  ;;  %v779_v41 = vmul.f32 %v8274_v20, %v9062_v4  ;;  %v867_v4 = vadd.f32 %v9093_v48, %v831_v38 }
 0x184   : > { %7088 = vmatprep.subr.bf16.mxu0 %v915_v22  ;;  %v850_v31 = vadd.f32 %v9093_v48, %v814_v35  ;;  %v796_v30 = vmul.f32 %v8276_v25, %v9054_v54  ;;  %7469 = vmatpush3.bf16.msra.mxu1 %v8199_v62 }
 0x185   : > { %v815_v12 = vmul.f32 %v9088_v29, %v779_v41 }
 0x186   : > { %v907_v11 = vpack.c.bf16 %v850_v31, %v849_v56  ;;  %v832_v51 = vmul.f32 %v9088_v29, %v796_v30  ;;  %1527 = vrot.lane.b32.xlu1 %v8202_v53, %s8648_s20 }
 0x187   : > { %v8278_v26 = vpop.eup %8277  ;;  %v851_v54 = vadd.f32 %v9093_v48, %v815_v12 }
 0x188   : > { %v780_v57 = vmul.f32 %v8278_v26, %v9066_v6  ;;  %7089 = vmatpush3.bf16.msra.mxu0 %v907_v11  ;;  %v868_v13 = vadd.f32 %v9093_v48, %v832_v51  ;;  %v8149_v6 = vld [vmem:[%s12624_s2] ss:$8 sps:$4 sm:$0xff]  }
 0x18a   : > { %v816_v7 = vmul.f32 %v9088_v29, %v780_v57  ;;  %v916_v28 = vpack.c.bf16 %v868_v13, %v867_v4  ;;  %v8154_v29 = vld [vmem:[%s12624_s2 + $0x10] ss:$8 sps:$4 sm:$0xff]   ;;  %1529 = vrot.lane.b32.xlu1 %v8204_v8, %s8648_s20 }
 0x18c   : > { %v852_v47 = vadd.f32 %v9093_v48, %v816_v7  ;;  %7090 = vmatprep.subr.bf16.mxu0 %v916_v28  ;;  %v8155_v48 = vld [vmem:[%s12624_s2 + $0x24] ss:$8 sps:$4 sm:$0xff]  }
 0x18e   : > { %v908_v60 = vpack.c.bf16 %v852_v47, %v851_v54 }
 0x190   : > { %7091 = vmatpush3.bf16.msra.mxu0 %v908_v60 }
 0x193   : > { %1110 = vmatmul.mubr.bf16.vlgmr.msra.gmra.mrb[0].mxu0 %v8149_v6 }
 0x194   : > { %1117 = vmatprep.mubr.bf16.mxu0 %v8152_v61 }
 0x19b   : > { %1118 = vmatmul.mubr.bf16.gmra.mrb[4].mxu0 %v8154_v29 }
 0x19c   : > { %1125 = vmatprep.mubr.bf16.mxu0 %v8155_v48 }
 0x1a3   : > { %1126 = vmatmul.mubr.bf16.gmra.mrb[8].mxu0 %v8157_v44 }
 0x1a4   : > { %1133 = vmatprep.mubr.bf16.mxu0 %v8158_v58 }
 0x1ab   : > { %1134 = vmatmul.mubr.bf16.gmra.mrb[12].mxu0 %v8160_v34 }
 0x1ac   : > { %1141 = vmatprep.mubr.bf16.mxu0 %v8161_v46 }
 0x1b3   : > { %1142 = vmatmul.mubr.bf16.gmra.mrb[16].mxu0 %v8163_v45 }
 0x1b4   : > { %1149 = vmatprep.mubr.bf16.mxu0 %v8164_v23 }
 0x1bb   : > { %1150 = vmatmul.mubr.bf16.gmra.mrb[20].mxu0 %v8166_v1 }
 0x1bc   : > { %1157 = vmatprep.mubr.bf16.mxu0 %v8167_v59 }
 0x1c3   : > { %1158 = vmatmul.mubr.bf16.gmra.mrb[24].mxu0 %v8169_v27 }
 0x1c4   : > { %1165 = vmatprep.mubr.bf16.mxu0 %v8170_v14 }
 0x1cb   : > { %1166 = vmatmul.mubr.bf16.gmra.mrb[28].mxu0 %v8172_v16 }
 0x1cc   : > { %1173 = vmatprep.mubr.bf16.mxu0 %v8173_v0 }
 0x1d3   : > { %1174 = vmatmul.mubr.bf16.gmra.mrb[32].mxu0 %v8175_v63 }
 0x1d4   : > { %1181 = vmatprep.mubr.bf16.mxu0 %v8176_v32 }
 0x1db   : > { %1182 = vmatmul.mubr.bf16.gmra.mrb[36].mxu0 %v8178_v33 }
 0x1dc   : > { %1189 = vmatprep.mubr.bf16.mxu0 %v8179_v50 }
 0x1e3   : > { %1190 = vmatmul.mubr.bf16.gmra.mrb[40].mxu0 %v8181_v10 }
 0x1e4   : > { %1197 = vmatprep.mubr.bf16.mxu0 %v8182_v49 }
 0x1eb   : > { %1198 = vmatmul.mubr.bf16.gmra.mrb[44].mxu0 %v8184_v19 }
 0x1ec   : > { %1205 = vmatprep.mubr.bf16.mxu0 %v8185_v18 }
 0x1f3   : > { %1206 = vmatmul.mubr.bf16.gmra.mrb[48].mxu0 %v8187_v42 }
 0x1f4   : > { %1213 = vmatprep.mubr.bf16.mxu0 %v8188_v17 }
 0x1fb   : > { %1214 = vmatmul.mubr.bf16.gmra.mrb[52].mxu0 %v8190_v2 }
 0x1fc   : > { %1221 = vmatprep.mubr.bf16.mxu0 %v8191_v21 }
 0x203   : > { %1222 = vmatmul.mubr.bf16.gmra.mrb[56].mxu0 %v8193_v36 }
 0x204   : > { %1229 = vmatprep.mubr.bf16.mxu0 %v8194_v3 }
 0x20b   : > { %1230 = vmatmul.mubr.bf16.gmra.mrb[60].mxu0 %v8196_v37 }
 0x266   : > { %v7092_v9 = vpop.f32.mrb[0].mxu0 }
 0x267   : > { %v7093_v24 = vpop.f32.mrb[1].mxu0 }
 0x268   : > { %v7094_v43 = vadd.f32 %v7093_v24, %v7092_v9  ;;  %v7095_v55 = vpop.f32.mrb[2].mxu0 }
 0x269   : > { %v7096_v20 = vpop.f32.mrb[3].mxu0 }
 0x26a   : > { %v7097_v22 = vadd.f32 %v7096_v20, %v7095_v55 }
 0x26c   : > { %v1238_v35 = vpack.c.bf16 %v7097_v22, %v7094_v43 }
 0x26e   : > { %v7098_v25 = vpop.f32.mrb[4].mxu0  ;;  %7470 = vmatprep.mubr.msk.bf16.mxu1 %vm379_vm0, %v1238_v35 }
 0x26f   : > { %v7099_v41 = vpop.f32.mrb[5].mxu0 }
 0x270   : > { %v7100_v56 = vadd.f32 %v7099_v41, %v7098_v25  ;;  %v7101_v31 = vpop.f32.mrb[6].mxu0 }
 0x271   : > { %v7102_v30 = vpop.f32.mrb[7].mxu0 }
 0x272   : > { %v7103_v38 = vadd.f32 %v7102_v30, %v7101_v31 }
 0x274   : > { %v1239_v26 = vpack.c.bf16 %v7103_v38, %v7100_v56 }
 0x276   : > { %7471 = vmatmul.mubr.msk.bf16.vlgmr.msra.gmra.mrb[0].mxu1 %vm379_vm0, %v1239_v26  ;;  %v7104_v11 = vpop.f32.mrb[8].mxu0 }
 0x277   : > { %v7105_v51 = vpop.f32.mrb[9].mxu0 }
 0x278   : > { %v7106_v57 = vadd.f32 %v7105_v51, %v7104_v11  ;;  %v7107_v12 = vpop.f32.mrb[10].mxu0 }
 0x279   : > { %v7108_v4 = vpop.f32.mrb[11].mxu0 }
 0x27a   : > { %v7109_v13 = vadd.f32 %v7108_v4, %v7107_v12 }
 0x27c   : > { %v1240_v7 = vpack.c.bf16 %v7109_v13, %v7106_v57 }
 0x27e   : > { %v7110_v28 = vpop.f32.mrb[12].mxu0  ;;  %7474 = vmatprep.mubr.msk.bf16.mxu1 %vm379_vm0, %v1240_v7 }
 0x27f   : > { %v7111_v54 = vpop.f32.mrb[13].mxu0 }
 0x280   : > { %v7112_v47 = vadd.f32 %v7111_v54, %v7110_v28  ;;  %v7113_v60 = vpop.f32.mrb[14].mxu0 }
 0x281   : > { %v7114_v6 = vpop.f32.mrb[15].mxu0 }
 0x282   : > { %v7115_v61 = vadd.f32 %v7114_v6, %v7113_v60 }
 0x284   : > { %v1241_v29 = vpack.c.bf16 %v7115_v61, %v7112_v47 }
 0x286   : > { %7475 = vmatmul.mubr.msk.bf16.gmra.mrb[4].mxu1 %vm379_vm0, %v1241_v29  ;;  %v7116_v48 = vpop.f32.mrb[16].mxu0 }
 0x287   : > { %v7117_v44 = vpop.f32.mrb[17].mxu0 }
 0x288   : > { %v7118_v58 = vadd.f32 %v7117_v44, %v7116_v48  ;;  %v7119_v34 = vpop.f32.mrb[18].mxu0 }
 0x289   : > { %v7120_v46 = vpop.f32.mrb[19].mxu0 }
 0x28a   : > { %v7121_v45 = vadd.f32 %v7120_v46, %v7119_v34 }
 0x28c   : > { %v1242_v23 = vpack.c.bf16 %v7121_v45, %v7118_v58 }
 0x28e   : > { %v7122_v1 = vpop.f32.mrb[20].mxu0  ;;  %7478 = vmatprep.mubr.msk.bf16.mxu1 %vm379_vm0, %v1242_v23 }
 0x28f   : > { %v7123_v59 = vpop.f32.mrb[21].mxu0 }
 0x290   : > { %v7124_v27 = vadd.f32 %v7123_v59, %v7122_v1  ;;  %v7125_v14 = vpop.f32.mrb[22].mxu0 }
 0x291   : > { %v7126_v16 = vpop.f32.mrb[23].mxu0 }
 0x292   : > { %v7127_v0 = vadd.f32 %v7126_v16, %v7125_v14 }
 0x294   : > { %v1243_v63 = vpack.c.bf16 %v7127_v0, %v7124_v27 }
 0x296   : > { %7479 = vmatmul.mubr.msk.bf16.gmra.mrb[8].mxu1 %vm379_vm0, %v1243_v63  ;;  %v7128_v32 = vpop.f32.mrb[24].mxu0 }
 0x297   : > { %v7129_v33 = vpop.f32.mrb[25].mxu0 }
 0x298   : > { %v7130_v50 = vadd.f32 %v7129_v33, %v7128_v32  ;;  %v7131_v10 = vpop.f32.mrb[26].mxu0 }
 0x299   : > { %v7132_v49 = vpop.f32.mrb[27].mxu0 }
 0x29a   : > { %v7133_v19 = vadd.f32 %v7132_v49, %v7131_v10 }
 0x29c   : > { %v1244_v18 = vpack.c.bf16 %v7133_v19, %v7130_v50 }
 0x29e   : > { %v7134_v39 = vpop.f32.mrb[28].mxu0  ;;  %7482 = vmatprep.mubr.msk.bf16.mxu1 %vm379_vm0, %v1244_v18 }
 0x29f   : > { %v7135_v42 = vpop.f32.mrb[29].mxu0 }
 0x2a0   : > { %v7136_v17 = vadd.f32 %v7135_v42, %v7134_v39  ;;  %v7137_v62 = vpop.f32.mrb[30].mxu0  ;;  %v1256_v42 = vsub.s32 7, %v9078_v15 }
 0x2a1   : > { %v7138_v2 = vpop.f32.mrb[31].mxu0 }
 0x2a2   : > { %v7139_v21 = vadd.f32 %v7138_v2, %v7137_v62  ;;  %v12632_v62 = vmov 0.0   ;;  %v9326_v2 = vrot.slane %v9084_v40, %v1256_v42 }
 0x2a3   : > { %7502 = vmatprep.subr.bf16.mxu1 %v12632_v62  ;;  %7562 = vmatprep.subr.bf16.mxu0 %v12632_v62 }
 0x2a4   : > { %v1245_v36 = vpack.c.bf16 %v7139_v21, %v7136_v17  ;;  %v9321_v17 = vpop.permute.xlu1 %1525  ;;  %7570 = vmatprep.mubr.msk.bf16.mxu0 %vm8651_vm1, %v12632_v62 }
 0x2a6   : > { %7483 = vmatmul.mubr.msk.bf16.gmra.mrb[12].mxu1 %vm379_vm0, %v1245_v36  ;;  %v7140_v3 = vpop.f32.mrb[32].mxu0 }
 0x2a7   : > { %v7141_v37 = vpop.f32.mrb[33].mxu0 }
 0x2a8   : > { %v7142_v52 = vadd.f32 %v7141_v37, %v7140_v3  ;;  %v7143_v53 = vpop.f32.mrb[34].mxu0 }
 0x2a9   : > { %v7144_v5 = vpop.f32.mrb[35].mxu0 }
 0x2aa   : > { %v7145_v8 = vadd.f32 %v7144_v5, %v7143_v53  ;;  %v9330_v53 = vpop.permute.xlu1 %1527 }
 0x2ac   : > { %v1246_v9 = vpack.c.bf16 %v7145_v8, %v7142_v52 }
 0x2ae   : > { %v7146_v24 = vpop.f32.mrb[36].mxu0  ;;  %7486 = vmatprep.mubr.msk.bf16.mxu1 %vm379_vm0, %v1246_v9 }
 0x2af   : > { %v7147_v43 = vpop.f32.mrb[37].mxu0 }
 0x2b0   : > { %v7148_v55 = vadd.f32 %v7147_v43, %v7146_v24  ;;  %v7149_v20 = vpop.f32.mrb[38].mxu0  ;;  %v9336_v43 = vpop.permute.xlu0 %1523 }
 0x2b1   : > { %v7150_v22 = vpop.f32.mrb[39].mxu0 }
 0x2b2   : > { %v7151_v35 = vadd.f32 %v7150_v22, %v7149_v20  ;;  %v9344_v22 = vpop.permute.xlu1 %1529 }
 0x2b4   : > { %v1247_v25 = vpack.c.bf16 %v7151_v35, %v7148_v55 }
 0x2b6   : > { %7487 = vmatmul.mubr.msk.bf16.gmra.mrb[16].mxu1 %vm379_vm0, %v1247_v25  ;;  %v7152_v41 = vpop.f32.mrb[40].mxu0 }
 0x2b7   : > { %v7153_v56 = vpop.f32.mrb[41].mxu0 }
 0x2b8   : > { %v7154_v31 = vadd.f32 %v7153_v56, %v7152_v41  ;;  %v7155_v30 = vpop.f32.mrb[42].mxu0 }
 0x2b9   : > { %v7156_v38 = vpop.f32.mrb[43].mxu0 }
 0x2ba   : > { %v7157_v26 = vadd.f32 %v7156_v38, %v7155_v30 }
 0x2bc   : > { %v1248_v11 = vpack.c.bf16 %v7157_v26, %v7154_v31 }
 0x2be   : > { %v7158_v51 = vpop.f32.mrb[44].mxu0  ;;  %7490 = vmatprep.mubr.msk.bf16.mxu1 %vm379_vm0, %v1248_v11 }
 0x2bf   : > { %v7159_v57 = vpop.f32.mrb[45].mxu0 }
 0x2c0   : > { %v7160_v12 = vadd.f32 %v7159_v57, %v7158_v51  ;;  %v7161_v4 = vpop.f32.mrb[46].mxu0 }
 0x2c1   : > { %v7162_v13 = vpop.f32.mrb[47].mxu0 }
 0x2c2   : > { %v7163_v7 = vadd.f32 %v7162_v13, %v7161_v4 }
 0x2c4   : > { %v1249_v28 = vpack.c.bf16 %v7163_v7, %v7160_v12 }
 0x2c6   : > { %7491 = vmatmul.mubr.msk.bf16.gmra.mrb[20].mxu1 %vm379_vm0, %v1249_v28  ;;  %v7164_v54 = vpop.f32.mrb[48].mxu0 }
 0x2c7   : > { %v7165_v47 = vpop.f32.mrb[49].mxu0 }
 0x2c8   : > { %v7166_v60 = vadd.f32 %v7165_v47, %v7164_v54  ;;  %v7167_v6 = vpop.f32.mrb[50].mxu0 }
 0x2c9   : > { %v7168_v61 = vpop.f32.mrb[51].mxu0 }
 0x2ca   : > { %v7169_v29 = vadd.f32 %v7168_v61, %v7167_v6 }
 0x2cc   : > { %v1250_v48 = vpack.c.bf16 %v7169_v29, %v7166_v60 }
 0x2ce   : > { %v7170_v44 = vpop.f32.mrb[52].mxu0  ;;  %7494 = vmatprep.mubr.msk.bf16.mxu1 %vm379_vm0, %v1250_v48 }
 0x2cf   : > { %v7171_v58 = vpop.f32.mrb[53].mxu0 }
 0x2d0   : > { %v7172_v34 = vadd.f32 %v7171_v58, %v7170_v44  ;;  %v7173_v46 = vpop.f32.mrb[54].mxu0 }
 0x2d1   : > { %v7174_v45 = vpop.f32.mrb[55].mxu0 }
 0x2d2   : > { %v7175_v23 = vadd.f32 %v7174_v45, %v7173_v46 }
 0x2d4   : > { %v1251_v1 = vpack.c.bf16 %v7175_v23, %v7172_v34 }
 0x2d6   : > { %7495 = vmatmul.mubr.msk.bf16.gmra.mrb[24].mxu1 %vm379_vm0, %v1251_v1  ;;  %v7176_v59 = vpop.f32.mrb[56].mxu0 }
 0x2d7   : > { %v7177_v27 = vpop.f32.mrb[57].mxu0 }
 0x2d8   : > { %v7178_v14 = vadd.f32 %v7177_v27, %v7176_v59  ;;  %v7179_v16 = vpop.f32.mrb[58].mxu0 }
 0x2d9   : > { %v7180_v0 = vpop.f32.mrb[59].mxu0 }
 0x2da   : > { %v7181_v63 = vadd.f32 %v7180_v0, %v7179_v16 }
 0x2dc   : > { %v1252_v32 = vpack.c.bf16 %v7181_v63, %v7178_v14 }
 0x2de   : > { %v7182_v33 = vpop.f32.mrb[60].mxu0  ;;  %7498 = vmatprep.mubr.msk.bf16.mxu1 %vm379_vm0, %v1252_v32 }
 0x2df   : > { %v7183_v50 = vpop.f32.mrb[61].mxu0 }
 0x2e0   : > { %v7184_v10 = vadd.f32 %v7183_v50, %v7182_v33  ;;  %v7185_v49 = vpop.f32.mrb[62].mxu0 }
 0x2e1   : > { %v7186_v19 = vpop.f32.mrb[63].mxu0 }
 0x2e2   : > { %v7187_v18 = vadd.f32 %v7186_v19, %v7185_v49 }
 0x2e4   : > { %v1253_v39 = vpack.c.bf16 %v7187_v18, %v7184_v10 }
 0x2e6   : > { %7499 = vmatmul.mubr.msk.bf16.gmra.mrb[28].mxu1 %vm379_vm0, %v1253_v39 }
 0x2e7   : > { %7510 = vmatprep.mubr.msk.bf16.mxu1 %vm8651_vm1, %v12632_v62 }
 0x349   : > { %v7472_v21 = vpop.f32.mrb[0].mxu1 }
 0x34a   : > { %v1352_v36 = vpop.f32.mrb[1].mxu1  ;;  %v1361_v37 = vadd.f32 %v7472_v21, %v9326_v2 }
 0x34b   : > { %v7473_v3 = vpop.f32.mrb[2].mxu1  ;;  %v1353_v8 = vadd.f32 %v1352_v36, %v9326_v2 }
 0x34c   : > { %v1364_v52 = vadd.f32 %v7473_v3, %v9326_v2  ;;  %v1355_v5 = vpop.f32.mrb[3].mxu1 }
 0x34d   : > { %v1356_v9 = vadd.f32 %v1355_v5, %v9326_v2 }
 0x34e   : > { %v9334_v24 = vpack.c.bf16 %v1364_v52, %v1361_v37 }
 0x34f   : > { %v9338_v40 = vpack.c.bf16 %v1356_v9, %v1353_v8 }
 0x350   : > { %v1539_v56 = vmul.bf16 %v9336_v43, %v9334_v24  ;;  %v1540_v31 = vmul.bf16 %v9321_v17, %v9334_v24  ;;  %v1541_v4 = vmul.bf16 %v9330_v53, %v9334_v24  ;;  %v1542_v13 = vmul.bf16 %v9344_v22, %v9334_v24 }
 0x351   : > { %v1535_v55 = vmul.bf16 %v9336_v43, %v9338_v40  ;;  %v1536_v20 = vmul.bf16 %v9321_v17, %v9338_v40  ;;  %v1537_v35 = vmul.bf16 %v9330_v53, %v9338_v40  ;;  %v1538_v25 = vmul.bf16 %v9344_v22, %v9338_v40 }
 0x353   : > { %1711 = vrot.lane.b32.xlu0 %v1535_v55, %s8650_s27  ;;  %1713 = vrot.lane.b32.xlu1 %v1536_v20, %s8650_s27 }
 0x357   : > { %1715 = vrot.lane.b32.xlu0 %v1537_v35, %s8650_s27  ;;  %1717 = vrot.lane.b32.xlu1 %v1538_v25, %s8650_s27 }
 0x359   : > { %v7476_v41 = vpop.f32.mrb[4].mxu1 }
 0x35a   : > { %v1377_v30 = vadd.f32 %v7476_v41, %v9326_v2  ;;  %v1368_v38 = vpop.f32.mrb[5].mxu1 }
 0x35b   : > { %v1369_v26 = vadd.f32 %v1368_v38, %v9326_v2  ;;  %v7477_v11 = vpop.f32.mrb[6].mxu1  ;;  %1779 = vrot.lane.b32.xlu0 %v1539_v56, %s8650_s27  ;;  %1781 = vrot.lane.b32.xlu1 %v1540_v31, %s8650_s27 }
 0x35c   : > { %v1380_v51 = vadd.f32 %v7477_v11, %v9326_v2  ;;  %v1371_v57 = vpop.f32.mrb[7].mxu1 }
 0x35d   : > { %v1372_v12 = vadd.f32 %v1371_v57, %v9326_v2 }
 0x35e   : > { %v9368_v7 = vpack.c.bf16 %v1380_v51, %v1377_v30 }
 0x35f   : > { %v9370_v28 = vpack.c.bf16 %v1372_v12, %v1369_v26  ;;  %1783 = vrot.lane.b32.xlu0 %v1541_v4, %s8650_s27  ;;  %1785 = vrot.lane.b32.xlu1 %v1542_v13, %s8650_s27 }
 0x360   : > { %v1547_v29 = vmul.bf16 %v9336_v43, %v9368_v7  ;;  %v1548_v48 = vmul.bf16 %v9321_v17, %v9368_v7  ;;  %v1549_v59 = vmul.bf16 %v9330_v53, %v9368_v7  ;;  %v1550_v27 = vmul.bf16 %v9344_v22, %v9368_v7 }
 0x361   : > { %v1543_v54 = vmul.bf16 %v9336_v43, %v9370_v28  ;;  %v1544_v47 = vmul.bf16 %v9321_v17, %v9370_v28  ;;  %v1546_v60 = vmul.bf16 %v9344_v22, %v9370_v28  ;;  %v1545_v6 = vmul.bf16 %v9330_v53, %v9370_v28 }
 0x363   : > { %1847 = vrot.lane.b32.xlu0 %v1543_v54, %s8650_s27  ;;  %1849 = vrot.lane.b32.xlu1 %v1544_v47, %s8650_s27 }
 0x367   : > { %1851 = vrot.lane.b32.xlu0 %v1545_v6, %s8650_s27  ;;  %1853 = vrot.lane.b32.xlu1 %v1546_v60, %s8650_s27 }
 0x369   : > { %v7480_v61 = vpop.f32.mrb[8].mxu1 }
 0x36a   : > { %v1393_v44 = vadd.f32 %v7480_v61, %v9326_v2  ;;  %v1384_v58 = vpop.f32.mrb[9].mxu1 }
 0x36b   : > { %v1385_v34 = vadd.f32 %v1384_v58, %v9326_v2  ;;  %v7481_v46 = vpop.f32.mrb[10].mxu1  ;;  %1915 = vrot.lane.b32.xlu0 %v1547_v29, %s8650_s27  ;;  %1917 = vrot.lane.b32.xlu1 %v1548_v48, %s8650_s27 }
 0x36c   : > { %v1396_v45 = vadd.f32 %v7481_v46, %v9326_v2  ;;  %v1387_v23 = vpop.f32.mrb[11].mxu1 }
 0x36d   : > { %v1388_v1 = vadd.f32 %v1387_v23, %v9326_v2 }
 0x36e   : > { %v9404_v14 = vpack.c.bf16 %v1396_v45, %v1393_v44 }
 0x36f   : > { %v9406_v16 = vpack.c.bf16 %v1388_v1, %v1385_v34  ;;  %1919 = vrot.lane.b32.xlu0 %v1549_v59, %s8650_s27  ;;  %1921 = vrot.lane.b32.xlu1 %v1550_v27, %s8650_s27 }
 0x370   : > { %v1555_v0 = vmul.bf16 %v9336_v43, %v9404_v14  ;;  %v1556_v33 = vmul.bf16 %v9321_v17, %v9404_v14  ;;  %v1557_v49 = vmul.bf16 %v9330_v53, %v9404_v14  ;;  %v1558_v52 = vmul.bf16 %v9344_v22, %v9404_v14 }
 0x371   : > { %v1551_v63 = vmul.bf16 %v9336_v43, %v9406_v16  ;;  %v1552_v32 = vmul.bf16 %v9321_v17, %v9406_v16  ;;  %v1553_v10 = vmul.bf16 %v9330_v53, %v9406_v16  ;;  %v1554_v37 = vmul.bf16 %v9344_v22, %v9406_v16 }
 0x373   : > { %1983 = vrot.lane.b32.xlu0 %v1551_v63, %s8650_s27  ;;  %2051 = vrot.lane.b32.xlu1 %v1555_v0, %s8650_s27 }
 0x377   : > { %1985 = vrot.lane.b32.xlu0 %v1552_v32, %s8650_s27  ;;  %2053 = vrot.lane.b32.xlu1 %v1556_v33, %s8650_s27 }
 0x379   : > { %v7484_v50 = vpop.f32.mrb[12].mxu1 }
 0x37a   : > { %v1409_v19 = vadd.f32 %v7484_v50, %v9326_v2  ;;  %v1400_v18 = vpop.f32.mrb[13].mxu1 }
 0x37b   : > { %v1401_v39 = vadd.f32 %v1400_v18, %v9326_v2  ;;  %v7485_v42 = vpop.f32.mrb[14].mxu1  ;;  %1987 = vrot.lane.b32.xlu0 %v1553_v10, %s8650_s27  ;;  %2055 = vrot.lane.b32.xlu1 %v1557_v49, %s8650_s27 }
 0x37c   : > { %v1412_v21 = vadd.f32 %v7485_v42, %v9326_v2  ;;  %v1403_v36 = vpop.f32.mrb[15].mxu1 }
 0x37d   : > { %v1404_v3 = vadd.f32 %v1403_v36, %v9326_v2 }
 0x37e   : > { %v9436_v5 = vpack.c.bf16 %v1412_v21, %v1409_v19 }
 0x37f   : > { %v9438_v8 = vpack.c.bf16 %v1404_v3, %v1401_v39  ;;  %1989 = vrot.lane.b32.xlu0 %v1554_v37, %s8650_s27  ;;  %2057 = vrot.lane.b32.xlu1 %v1558_v52, %s8650_s27 }
 0x380   : > { %v1563_v9 = vmul.bf16 %v9336_v43, %v9436_v5  ;;  %v1564_v35 = vmul.bf16 %v9321_v17, %v9436_v5  ;;  %v1565_v56 = vmul.bf16 %v9330_v53, %v9436_v5  ;;  %v1566_v4 = vmul.bf16 %v9344_v22, %v9436_v5 }
 0x381   : > { %v1559_v55 = vmul.bf16 %v9336_v43, %v9438_v8  ;;  %v1560_v20 = vmul.bf16 %v9321_v17, %v9438_v8  ;;  %v1561_v41 = vmul.bf16 %v9330_v53, %v9438_v8  ;;  %v1562_v12 = vmul.bf16 %v9344_v22, %v9438_v8 }
 0x383   : > { %2119 = vrot.lane.b32.xlu0 %v1559_v55, %s8650_s27  ;;  %2187 = vrot.lane.b32.xlu1 %v1563_v9, %s8650_s27 }
 0x387   : > { %2121 = vrot.lane.b32.xlu0 %v1560_v20, %s8650_s27  ;;  %2189 = vrot.lane.b32.xlu1 %v1564_v35, %s8650_s27 }
 0x389   : > { %v7488_v25 = vpop.f32.mrb[16].mxu1 }
 0x38a   : > { %v1425_v31 = vadd.f32 %v7488_v25, %v9326_v2  ;;  %v1416_v30 = vpop.f32.mrb[17].mxu1 }
 0x38b   : > { %v1417_v38 = vadd.f32 %v1416_v30, %v9326_v2  ;;  %v7489_v26 = vpop.f32.mrb[18].mxu1  ;;  %2123 = vrot.lane.b32.xlu0 %v1561_v41, %s8650_s27  ;;  %2191 = vrot.lane.b32.xlu1 %v1565_v56, %s8650_s27 }
 0x38c   : > { %v1428_v11 = vadd.f32 %v7489_v26, %v9326_v2  ;;  %v1419_v51 = vpop.f32.mrb[19].mxu1 }
 0x38d   : > { %v1420_v57 = vadd.f32 %v1419_v51, %v9326_v2 }
 0x38e   : > { %v9468_v13 = vpack.c.bf16 %v1428_v11, %v1425_v31 }
 0x38f   : > { %v9470_v54 = vpack.c.bf16 %v1420_v57, %v1417_v38  ;;  %2125 = vrot.lane.b32.xlu0 %v1562_v12, %s8650_s27  ;;  %2193 = vrot.lane.b32.xlu1 %v1566_v4, %s8650_s27 }
 0x390   : > { %v1571_v47 = vmul.bf16 %v9336_v43, %v9468_v13  ;;  %v1572_v61 = vmul.bf16 %v9321_v17, %v9468_v13  ;;  %v1573_v44 = vmul.bf16 %v9330_v53, %v9468_v13  ;;  %v1574_v0 = vmul.bf16 %v9344_v22, %v9468_v13 }
 0x391   : > { %v1567_v60 = vmul.bf16 %v9336_v43, %v9470_v54  ;;  %v1568_v6 = vmul.bf16 %v9321_v17, %v9470_v54  ;;  %v1569_v48 = vmul.bf16 %v9330_v53, %v9470_v54  ;;  %v1570_v27 = vmul.bf16 %v9344_v22, %v9470_v54 }
 0x393   : > { %2255 = vrot.lane.b32.xlu0 %v1567_v60, %s8650_s27  ;;  %2323 = vrot.lane.b32.xlu1 %v1571_v47, %s8650_s27 }
 0x397   : > { %2257 = vrot.lane.b32.xlu0 %v1568_v6, %s8650_s27  ;;  %2325 = vrot.lane.b32.xlu1 %v1572_v61, %s8650_s27 }
 0x399   : > { %v7492_v29 = vpop.f32.mrb[20].mxu1 }
 0x39a   : > { %v1441_v58 = vadd.f32 %v7492_v29, %v9326_v2  ;;  %v1432_v34 = vpop.f32.mrb[21].mxu1 }
 0x39b   : > { %v1433_v46 = vadd.f32 %v1432_v34, %v9326_v2  ;;  %v7493_v45 = vpop.f32.mrb[22].mxu1  ;;  %2259 = vrot.lane.b32.xlu0 %v1569_v48, %s8650_s27  ;;  %2327 = vrot.lane.b32.xlu1 %v1573_v44, %s8650_s27 }
 0x39c   : > { %v1444_v23 = vadd.f32 %v7493_v45, %v9326_v2  ;;  %v1435_v1 = vpop.f32.mrb[23].mxu1 }
 0x39d   : > { %v1436_v59 = vadd.f32 %v1435_v1, %v9326_v2 }
 0x39e   : > { %v9500_v63 = vpack.c.bf16 %v1444_v23, %v1441_v58 }
 0x39f   : > { %v9502_v32 = vpack.c.bf16 %v1436_v59, %v1433_v46  ;;  %2261 = vrot.lane.b32.xlu0 %v1570_v27, %s8650_s27  ;;  %2329 = vrot.lane.b32.xlu1 %v1574_v0, %s8650_s27 }
 0x3a0   : > { %v1579_v33 = vmul.bf16 %v9336_v43, %v9500_v63  ;;  %v1580_v49 = vmul.bf16 %v9321_v17, %v9500_v63  ;;  %v1581_v39 = vmul.bf16 %v9330_v53, %v9500_v63  ;;  %v1582_v20 = vmul.bf16 %v9344_v22, %v9500_v63 }
 0x3a1   : > { %v1575_v50 = vmul.bf16 %v9336_v43, %v9502_v32  ;;  %v1576_v10 = vmul.bf16 %v9321_v17, %v9502_v32  ;;  %v1577_v18 = vmul.bf16 %v9330_v53, %v9502_v32  ;;  %v1578_v55 = vmul.bf16 %v9344_v22, %v9502_v32 }
 0x3a3   : > { %2391 = vrot.lane.b32.xlu0 %v1575_v50, %s8650_s27  ;;  %2459 = vrot.lane.b32.xlu1 %v1579_v33, %s8650_s27 }
 0x3a7   : > { %2393 = vrot.lane.b32.xlu0 %v1576_v10, %s8650_s27  ;;  %2461 = vrot.lane.b32.xlu1 %v1580_v49, %s8650_s27 }
 0x3a9   : > { %v7496_v19 = vpop.f32.mrb[24].mxu1 }
 0x3aa   : > { %v1457_v42 = vadd.f32 %v7496_v19, %v9326_v2  ;;  %v1448_v21 = vpop.f32.mrb[25].mxu1 }
 0x3ab   : > { %v1449_v36 = vadd.f32 %v1448_v21, %v9326_v2  ;;  %v7497_v3 = vpop.f32.mrb[26].mxu1  ;;  %2395 = vrot.lane.b32.xlu0 %v1577_v18, %s8650_s27  ;;  %2463 = vrot.lane.b32.xlu1 %v1581_v39, %s8650_s27 }
 0x3ac   : > { %v1460_v37 = vadd.f32 %v7497_v3, %v9326_v2  ;;  %v1451_v52 = vpop.f32.mrb[27].mxu1 }
 0x3ad   : > { %v1452_v9 = vadd.f32 %v1451_v52, %v9326_v2 }
 0x3ae   : > { %v9532_v35 = vpack.c.bf16 %v1460_v37, %v1457_v42 }
 0x3af   : > { %v9534_v25 = vpack.c.bf16 %v1452_v9, %v1449_v36  ;;  %2397 = vrot.lane.b32.xlu0 %v1578_v55, %s8650_s27  ;;  %2465 = vrot.lane.b32.xlu1 %v1582_v20, %s8650_s27 }
 0x3b0   : > { %v1587_v41 = vmul.bf16 %v9336_v43, %v9532_v35  ;;  %v1588_v30 = vmul.bf16 %v9321_v17, %v9532_v35  ;;  %v1589_v11 = vmul.bf16 %v9330_v53, %v9532_v35  ;;  %v1590_v29 = vmul.bf16 %v9344_v22, %v9532_v35 }
 0x3b1   : > { %v1583_v56 = vmul.bf16 %v9336_v43, %v9534_v25  ;;  %v1584_v31 = vmul.bf16 %v9321_v17, %v9534_v25  ;;  %v1585_v26 = vmul.bf16 %v9330_v53, %v9534_v25  ;;  %v1586_v61 = vmul.bf16 %v9344_v22, %v9534_v25 }
 0x3b3   : > { %2527 = vrot.lane.b32.xlu0 %v1583_v56, %s8650_s27  ;;  %2595 = vrot.lane.b32.xlu1 %v1587_v41, %s8650_s27 }
 0x3b7   : > { %2529 = vrot.lane.b32.xlu0 %v1584_v31, %s8650_s27  ;;  %2597 = vrot.lane.b32.xlu1 %v1588_v30, %s8650_s27 }
 0x3b9   : > { %v7500_v38 = vpop.f32.mrb[28].mxu1 }
 0x3ba   : > { %v1473_v51 = vadd.f32 %v7500_v38, %v9326_v2  ;;  %v1464_v57 = vpop.f32.mrb[29].mxu1 }
 0x3bb   : > { %v1465_v12 = vadd.f32 %v1464_v57, %v9326_v2  ;;  %v7501_v4 = vpop.f32.mrb[30].mxu1  ;;  %2531 = vrot.lane.b32.xlu0 %v1585_v26, %s8650_s27  ;;  %2599 = vrot.lane.b32.xlu1 %v1589_v11, %s8650_s27 }
 0x3bc   : > { %v1476_v47 = vadd.f32 %v7501_v4, %v9326_v2  ;;  %v1467_v60 = vpop.f32.mrb[31].mxu1 }
 0x3bd   : > { %v1468_v6 = vadd.f32 %v1467_v60, %v9326_v2 }
 0x3be   : > { %v9564_v48 = vpack.c.bf16 %v1476_v47, %v1473_v51 }
 0x3bf   : > { %v9566_v44 = vpack.c.bf16 %v1468_v6, %v1465_v12  ;;  %2533 = vrot.lane.b32.xlu0 %v1586_v61, %s8650_s27  ;;  %2601 = vrot.lane.b32.xlu1 %v1590_v29, %s8650_s27 }
 0x3c0   : > { %v1595_v58 = vmul.bf16 %v9336_v43, %v9564_v48  ;;  %v1596_v1 = vmul.bf16 %v9321_v17, %v9564_v48  ;;  %v1597_v27 = vmul.bf16 %v9330_v53, %v9564_v48  ;;  %v1598_v50 = vmul.bf16 %v9344_v22, %v9564_v48 }
 0x3c1   : > { %v1591_v2 = vmul.bf16 %v9336_v43, %v9566_v44  ;;  %v1592_v45 = vmul.bf16 %v9321_v17, %v9566_v44  ;;  %v1593_v59 = vmul.bf16 %v9330_v53, %v9566_v44  ;;  %v1594_v17 = vmul.bf16 %v9344_v22, %v9566_v44 }
 0x3c3   : > { %2663 = vrot.lane.b32.xlu0 %v1591_v2, %s8650_s27  ;;  %2731 = vrot.lane.b32.xlu1 %v1595_v58, %s8650_s27 }
 0x3c5   : > { %v1712_v34 = vpop.permute.xlu0 %1711  ;;  %v1714_v46 = vpop.permute.xlu1 %1713 }
 0x3c6   : > { %v1723_v23 = vsel %vm379_vm0, %v1712_v34, 0  ;;  %v1726_v33 = vsel %vm379_vm0, %v1714_v46, 0 }
 0x3c7   : > { %7503 = vmatpush3.bf16.xpose.msra.mxu1 %v1723_v23  ;;  %2665 = vrot.lane.b32.xlu0 %v1592_v45, %s8650_s27 }
 0x3c8   : > { %2733 = vrot.lane.b32.xlu1 %v1596_v1, %s8650_s27  ;;  %7504 = vmatprep.subr.bf16.mxu1 %v12632_v62 }
 0x3c9   : > { %v1718_v43 = vpop.permute.xlu1 %1717  ;;  %v1716_v10 = vpop.permute.xlu0 %1715 }
 0x3ca   : > { %v1729_v19 = vsel %vm379_vm0, %v1716_v10, 0  ;;  %v1732_v22 = vsel %vm379_vm0, %v1718_v43, 0 }
 0x3cb   : > { %2667 = vrot.lane.b32.xlu0 %v1593_v59, %s8650_s27 }
 0x3cc   : > { %2735 = vrot.lane.b32.xlu1 %v1597_v27, %s8650_s27 }
 0x3cd   : > { %v1782_v0 = vpop.permute.xlu1 %1781  ;;  %v1780_v21 = vpop.permute.xlu0 %1779 }
 0x3ce   : > { %v1791_v3 = vsel %vm379_vm0, %v1780_v21, 0  ;;  %v1794_v9 = vsel %vm379_vm0, %v1782_v0, 0 }
 0x3cf   : > { %2669 = vrot.lane.b32.xlu0 %v1594_v17, %s8650_s27  ;;  %7505 = vmatpush3.bf16.xpose.msra.mxu1 %v1726_v33 }
 0x3d0   : > { %2737 = vrot.lane.b32.xlu1 %v1598_v50, %s8650_s27  ;;  %7506 = vmatprep.subr.bf16.mxu1 %v12632_v62 }
 0x3d1   : > { %v1786_v53 = vpop.permute.xlu1 %1785  ;;  %v1784_v20 = vpop.permute.xlu0 %1783 }
 0x3d2   : > { %v1797_v56 = vsel %vm379_vm0, %v1784_v20, 0  ;;  %v1800_v38 = vsel %vm379_vm0, %v1786_v53, 0 }
 0x3d5   : > { %v1850_v49 = vpop.permute.xlu1 %1849  ;;  %v1848_v11 = vpop.permute.xlu0 %1847 }
 0x3d6   : > { %v1859_v57 = vsel %vm379_vm0, %v1848_v11, 0  ;;  %v1862_v47 = vsel %vm379_vm0, %v1850_v49, 0 }
 0x3d7   : > { %7507 = vmatpush3.bf16.xpose.msra.mxu1 %v1729_v19 }
 0x3d8   : > { %7508 = vmatprep.subr.bf16.mxu1 %v12632_v62 }
 0x3d9   : > { %v9600_v18 = vpop.permute.xlu1 %1853  ;;  %v1852_v6 = vpop.permute.xlu0 %1851 }
 0x3da   : > { %v1865_v29 = vsel %vm379_vm0, %v1852_v6, 0  ;;  %v1868_v34 = vsel %vm379_vm0, %v9600_v18, 0 }
 0x3dd   : > { %v9602_v39 = vpop.permute.xlu1 %1917  ;;  %v1916_v45 = vpop.permute.xlu0 %1915 }
 0x3de   : > { %v1927_v1 = vsel %vm379_vm0, %v1916_v45, 0  ;;  %v1930_v27 = vsel %vm379_vm0, %v9602_v39, 0 }
 0x3df   : > { %7509 = vmatpush3.bf16.xpose.msra.mxu1 %v1732_v22 }
 0x3e0   : > { %7514 = vmatprep.subr.bf16.mxu1 %v12632_v62 }
 0x3e1   : > { %v9606_v42 = vpop.permute.xlu1 %1921  ;;  %v1920_v17 = vpop.permute.xlu0 %1919 }
 0x3e2   : > { %v1933_v50 = vsel %vm379_vm0, %v1920_v17, 0  ;;  %v1936_v49 = vsel %vm379_vm0, %v9606_v42, 0 }
 0x3e5   : > { %v2052_v36 = vpop.permute.xlu1 %2051  ;;  %v1984_v18 = vpop.permute.xlu0 %1983 }
 0x3e6   : > { %v2063_v37 = vsel %vm379_vm0, %v2052_v36, 0  ;;  %7511 = vmatmul.mubr.msk.bf16.vlgmr.msra.gmra.mrb[32].mxu1 %vm379_vm0, %v9338_v40  ;;  %v1995_v22 = vsel %vm379_vm0, %v1984_v18, 0 }
 0x3e7   : > { %7515 = vmatpush3.bf16.xpose.msra.mxu1 %v1791_v3  ;;  %7563 = vmatpush3.bf16.xpose.msra.mxu0 %v2063_v37 }
 0x3e8   : > { %7516 = vmatprep.subr.bf16.mxu1 %v12632_v62  ;;  %7564 = vmatprep.subr.bf16.mxu0 %v12632_v62 }
 0x3e9   : > { %7522 = vmatprep.mubr.msk.bf16.mxu1 %vm8651_vm1, %v12632_v62  ;;  %v2054_v52 = vpop.permute.xlu1 %2053  ;;  %v1986_v42 = vpop.permute.xlu0 %1985 }
 0x3ea   : > { %v2066_v55 = vsel %vm379_vm0, %v2054_v52, 0  ;;  %v1998_v3 = vsel %vm379_vm0, %v1986_v42, 0 }
 0x3ed   : > { %v2056_v41 = vpop.permute.xlu1 %2055  ;;  %v1988_v52 = vpop.permute.xlu0 %1987 }
 0x3ee   : > { %v2069_v31 = vsel %vm379_vm0, %v2056_v41, 0 }
 0x3ef   : > { %7517 = vmatpush3.bf16.xpose.msra.mxu1 %v1794_v9  ;;  %7565 = vmatpush3.bf16.xpose.msra.mxu0 %v2066_v55  ;;  %v2001_v55 = vsel %vm379_vm0, %v1988_v52, 0  ;;  %v1675_v52 = vld [vmem:[%s12623_s1] sm:$0xff] }
 0x3f0   : > { %7518 = vmatprep.subr.bf16.mxu1 %v12632_v62  ;;  %7566 = vmatprep.subr.bf16.mxu0 %v12632_v62 }
 0x3f1   : > { %v2058_v30 = vpop.permute.xlu1 %2057  ;;  %v1990_v41 = vpop.permute.xlu0 %1989 }
 0x3f2   : > { %v2072_v26 = vsel %vm379_vm0, %v2058_v30, 0 }
 0x3f5   : > { %v2188_v51 = vpop.permute.xlu1 %2187 }
 0x3f6   : > { %v2199_v12 = vsel %vm379_vm0, %v2188_v51, 0 }
 0x3f7   : > { %7519 = vmatpush3.bf16.xpose.msra.mxu1 %v1797_v56  ;;  %7567 = vmatpush3.bf16.xpose.msra.mxu0 %v2069_v31  ;;  %v2004_v31 = vsel %vm379_vm0, %v1990_v41, 0 }
 0x3f8   : > { %7520 = vmatprep.subr.bf16.mxu1 %v12632_v62  ;;  %7568 = vmatprep.subr.bf16.mxu0 %v12632_v62 }
 0x3f9   : > { %v2190_v4 = vpop.permute.xlu1 %2189 }
 0x3fa   : > { %v2202_v60 = vsel %vm379_vm0, %v2190_v4, 0 }
 0x3fd   : > { %v2192_v61 = vpop.permute.xlu1 %2191 }
 0x3fe   : > { %v2205_v58 = vsel %vm379_vm0, %v2192_v61, 0 }
 0x3ff   : > { %7521 = vmatpush3.bf16.xpose.msra.mxu1 %v1800_v38  ;;  %7569 = vmatpush3.bf16.xpose.msra.mxu0 %v2072_v26  ;;  %v2120_v38 = vpop.permute.xlu0 %2119 }
 0x400   : > { %7526 = vmatprep.subr.bf16.mxu1 %v12632_v62  ;;  %7586 = vmatprep.subr.bf16.mxu0 %v12632_v62  ;;  %v2131_v11 = vsel %vm379_vm0, %v2120_v38, 0 }
 0x401   : > { %v2194_v2 = vpop.permute.xlu1 %2193 }
 0x402   : > { %v2208_v46 = vsel %vm379_vm0, %v2194_v2, 0 }
 0x405   : > { %v2324_v23 = vpop.permute.xlu1 %2323 }
 0x406   : > { %7523 = vmatmul.mubr.msk.bf16.vlgmr.msra.gmra.mrb[36].mxu1 %vm379_vm0, %v9334_v24  ;;  %7571 = vmatmul.mubr.msk.bf16.vlgmr.msra.gmra.mrb[64].mxu0 %vm379_vm0, %v9404_v14  ;;  %v2335_v43 = vsel %vm379_vm0, %v2324_v23, 0 }
 0x407   : > { %7527 = vmatpush3.bf16.xpose.msra.mxu1 %v1859_v57  ;;  %7587 = vmatpush3.bf16.xpose.msra.mxu0 %v2199_v12  ;;  %v2122_v57 = vpop.permute.xlu0 %2121 }
 0x408   : > { %7528 = vmatprep.subr.bf16.mxu1 %v12632_v62  ;;  %7588 = vmatprep.subr.bf16.mxu0 %v12632_v62  ;;  %v2134_v4 = vsel %vm379_vm0, %v2122_v57, 0 }
 0x409   : > { %7534 = vmatprep.mubr.msk.bf16.mxu1 %vm8651_vm1, %v12632_v62  ;;  %7594 = vmatprep.mubr.msk.bf16.mxu0 %vm8651_vm1, %v12632_v62  ;;  %v2326_v59 = vpop.permute.xlu1 %2325 }
 0x40a   : > { %v2338_v0 = vsel %vm379_vm0, %v2326_v59, 0 }
 0x40d   : > { %v2328_v33 = vpop.permute.xlu1 %2327 }
 0x40e   : > { %v2341_v53 = vsel %vm379_vm0, %v2328_v33, 0 }
 0x40f   : > { %7529 = vmatpush3.bf16.xpose.msra.mxu1 %v1862_v47  ;;  %7589 = vmatpush3.bf16.xpose.msra.mxu0 %v2202_v60  ;;  %v2124_v60 = vpop.permute.xlu0 %2123 }
 0x410   : > { %7530 = vmatprep.subr.bf16.mxu1 %v12632_v62  ;;  %7590 = vmatprep.subr.bf16.mxu0 %v12632_v62  ;;  %v2137_v61 = vsel %vm379_vm0, %v2124_v60, 0 }
 0x411   : > { %v2330_v10 = vpop.permute.xlu1 %2329 }
 0x412   : > { %v2344_v19 = vsel %vm379_vm0, %v2330_v10, 0 }
 0x415   : > { %v2460_v39 = vpop.permute.xlu1 %2459 }
 0x416   : > { %v2471_v21 = vsel %vm379_vm0, %v2460_v39, 0 }
 0x417   : > { %7531 = vmatpush3.bf16.xpose.msra.mxu1 %v1865_v29  ;;  %7591 = vmatpush3.bf16.xpose.msra.mxu0 %v2205_v58  ;;  %v2126_v58 = vpop.permute.xlu0 %2125 }
 0x418   : > { %7532 = vmatprep.subr.bf16.mxu1 %v12632_v62  ;;  %7592 = vmatprep.subr.bf16.mxu0 %v12632_v62 }
 0x419   : > { %v2462_v36 = vpop.permute.xlu1 %2461 }
 0x41a   : > { %v2474_v37 = vsel %vm379_vm0, %v2462_v36, 0 }
 0x41b   : > { %v2256_v45 = vpop.permute.xlu0 %2255 }
 0x41d   : > { %v2464_v9 = vpop.permute.xlu1 %2463 }
 0x41e   : > { %v2477_v20 = vsel %vm379_vm0, %v2464_v9, 0 }
 0x41f   : > { %7533 = vmatpush3.bf16.xpose.msra.mxu1 %v1868_v34  ;;  %7593 = vmatpush3.bf16.xpose.msra.mxu0 %v2208_v46  ;;  %v2140_v34 = vsel %vm379_vm0, %v2126_v58, 0  ;;  %v2258_v59 = vpop.permute.xlu0 %2257 }
 0x420   : > { %7538 = vmatprep.subr.bf16.mxu1 %v12632_v62  ;;  %7610 = vmatprep.subr.bf16.mxu0 %v12632_v62 }
 0x421   : > { %v2466_v56 = vpop.permute.xlu1 %2465 }
 0x422   : > { %v2480_v30 = vsel %vm379_vm0, %v2466_v56, 0 }
 0x423   : > { %v2260_v33 = vpop.permute.xlu0 %2259 }
 0x425   : > { %v2596_v26 = vpop.permute.xlu1 %2595 }
 0x426   : > { %7535 = vmatmul.mubr.msk.bf16.vlgmr.msra.gmra.mrb[40].mxu1 %vm379_vm0, %v9370_v28  ;;  %7595 = vmatmul.mubr.msk.bf16.vlgmr.msra.gmra.mrb[68].mxu0 %vm379_vm0, %v9436_v5  ;;  %v2607_v51 = vsel %vm379_vm0, %v2596_v26, 0 }
 0x427   : > { %7539 = vmatpush3.bf16.xpose.msra.mxu1 %v1927_v1  ;;  %7611 = vmatpush3.bf16.xpose.msra.mxu0 %v2335_v43  ;;  %v2267_v1 = vsel %vm379_vm0, %v2256_v45, 0 }
 0x428   : > { %7540 = vmatprep.subr.bf16.mxu1 %v12632_v62  ;;  %7612 = vmatprep.subr.bf16.mxu0 %v12632_v62 }
 0x429   : > { %7546 = vmatprep.mubr.msk.bf16.mxu1 %vm8651_vm1, %v12632_v62  ;;  %7618 = vmatprep.mubr.msk.bf16.mxu0 %vm8651_vm1, %v12632_v62  ;;  %v2598_v12 = vpop.permute.xlu1 %2597 }
 0x42a   : > { %v2610_v47 = vsel %vm379_vm0, %v2598_v12, 0 }
 0x42d   : > { %v2600_v6 = vpop.permute.xlu1 %2599 }
 0x42e   : > { %v2613_v29 = vsel %vm379_vm0, %v2600_v6, 0 }
 0x42f   : > { %7541 = vmatpush3.bf16.xpose.msra.mxu1 %v1930_v27  ;;  %7613 = vmatpush3.bf16.xpose.msra.mxu0 %v2338_v0  ;;  %v2270_v0 = vsel %vm379_vm0, %v2258_v59, 0 }
 0x430   : > { %7542 = vmatprep.subr.bf16.mxu1 %v12632_v62  ;;  %7614 = vmatprep.subr.bf16.mxu0 %v12632_v62 }
 0x431   : > { %v2602_v2 = vpop.permute.xlu1 %2601 }
 0x432   : > { %v2616_v46 = vsel %vm379_vm0, %v2602_v2, 0 }
 0x435   : > { %v2732_v23 = vpop.permute.xlu1 %2731 }
 0x436   : > { %v2743_v43 = vsel %vm379_vm0, %v2732_v23, 0 }
 0x437   : > { %7543 = vmatpush3.bf16.xpose.msra.mxu1 %v1933_v50  ;;  %7615 = vmatpush3.bf16.xpose.msra.mxu0 %v2341_v53  ;;  %v2273_v53 = vsel %vm379_vm0, %v2260_v33, 0 }
 0x438   : > { %7544 = vmatprep.subr.bf16.mxu1 %v12632_v62  ;;  %7616 = vmatprep.subr.bf16.mxu0 %v12632_v62 }
 0x43a   : > { %v2734_v27 = vpop.permute.xlu1 %2733 }
 0x43b   : > { %v2746_v17 = vsel %vm379_vm0, %v2734_v27, 0 }
 0x43e   : > { %v2736_v50 = vpop.permute.xlu1 %2735 }
 0x43f   : > { %7545 = vmatpush3.bf16.xpose.msra.mxu1 %v1936_v49  ;;  %7617 = vmatpush3.bf16.xpose.msra.mxu0 %v2344_v19  ;;  %v2749_v10 = vsel %vm379_vm0, %v2736_v50, 0  ;;  %v2262_v49 = vpop.permute.xlu0 %2261 }
 0x440   : > { %7550 = vmatprep.subr.bf16.mxu1 %v12632_v62  ;;  %7634 = vmatprep.subr.bf16.mxu0 %v12632_v62  ;;  %v2276_v18 = vsel %vm379_vm0, %v2262_v49, 0 }
 0x442   : > { %v2738_v19 = vpop.permute.xlu1 %2737 }
 0x443   : > { %v2752_v39 = vsel %vm379_vm0, %v2738_v19, 0 }
 0x446   : > { %7547 = vmatmul.mubr.msk.bf16.vlgmr.msra.gmra.mrb[44].mxu1 %vm379_vm0, %v9368_v7  ;;  %7619 = vmatmul.mubr.msk.bf16.vlgmr.msra.gmra.mrb[72].mxu0 %vm379_vm0, %v9468_v13 }
 0x447   : > { %7551 = vmatpush3.bf16.xpose.msra.mxu1 %v1995_v22  ;;  %7635 = vmatpush3.bf16.xpose.msra.mxu0 %v2471_v21  ;;  %v2392_v22 = vpop.permute.xlu0 %2391 }
 0x448   : > { %7552 = vmatprep.subr.bf16.mxu1 %v12632_v62  ;;  %7636 = vmatprep.subr.bf16.mxu0 %v12632_v62  ;;  %v2403_v21 = vsel %vm379_vm0, %v2392_v22, 0  ;;  %v1679_v22 = vld [vmem:[%s12623_s1 + $0x20] sm:$0xff] }
 0x449   : > { %7558 = vmatprep.mubr.msk.bf16.mxu1 %vm8651_vm1, %v12632_v62  ;;  %7642 = vmatprep.mubr.msk.bf16.mxu0 %vm8651_vm1, %v12632_v62 }
 0x44b   : > { %v2394_v42 = vpop.permute.xlu0 %2393 }
 0x44c   : > { %v2406_v36 = vsel %vm379_vm0, %v2394_v42, 0 }
 0x44f   : > { %7553 = vmatpush3.bf16.xpose.msra.mxu1 %v1998_v3  ;;  %7637 = vmatpush3.bf16.xpose.msra.mxu0 %v2474_v37  ;;  %v2396_v3 = vpop.permute.xlu0 %2395 }
 0x450   : > { %7554 = vmatprep.subr.bf16.mxu1 %v12632_v62  ;;  %7638 = vmatprep.subr.bf16.mxu0 %v12632_v62  ;;  %v2409_v37 = vsel %vm379_vm0, %v2396_v3, 0  ;;  %v1680_v3 = vld [vmem:[%s12623_s1 + $0x28] sm:$0xff] }
 0x453   : > { %v2398_v56 = vpop.permute.xlu0 %2397 }
 0x457   : > { %7555 = vmatpush3.bf16.xpose.msra.mxu1 %v2001_v55  ;;  %7639 = vmatpush3.bf16.xpose.msra.mxu0 %v2477_v20  ;;  %v1676_v55 = vld [vmem:[%s12623_s1 + $0x8] sm:$0xff]  ;;  %v2528_v57 = vpop.permute.xlu0 %2527 }
 0x458   : > { %7556 = vmatprep.subr.bf16.mxu1 %v12632_v62  ;;  %7640 = vmatprep.subr.bf16.mxu0 %v12632_v62  ;;  %v2539_v12 = vsel %vm379_vm0, %v2528_v57, 0 }
 0x45f   : > { %7557 = vmatpush3.bf16.xpose.msra.mxu1 %v2004_v31  ;;  %7641 = vmatpush3.bf16.xpose.msra.mxu0 %v2480_v30 }
 0x460   : > { %7574 = vmatprep.subr.bf16.mxu1 %v12632_v62  ;;  %7658 = vmatprep.subr.bf16.mxu0 %v12632_v62 }
 0x466   : > { %7559 = vmatmul.mubr.msk.bf16.vlgmr.msra.gmra.mrb[48].mxu1 %vm379_vm0, %v9406_v16  ;;  %7643 = vmatmul.mubr.msk.bf16.vlgmr.msra.gmra.mrb[76].mxu0 %vm379_vm0, %v9500_v63 }
 0x467   : > { %7575 = vmatpush3.bf16.xpose.msra.mxu1 %v2131_v11  ;;  %7659 = vmatpush3.bf16.xpose.msra.mxu0 %v2607_v51  ;;  %v2412_v11 = vsel %vm379_vm0, %v2398_v56, 0 }
 0x468   : > { %7576 = vmatprep.subr.bf16.mxu1 %v12632_v62  ;;  %7660 = vmatprep.subr.bf16.mxu0 %v12632_v62 }
 0x469   : > { %7582 = vmatprep.mubr.msk.bf16.mxu1 %vm8651_vm1, %v12632_v62  ;;  %7666 = vmatprep.mubr.msk.bf16.mxu0 %vm8651_vm1, %v12632_v62 }
 0x46f   : > { %7577 = vmatpush3.bf16.xpose.msra.mxu1 %v2134_v4  ;;  %7661 = vmatpush3.bf16.xpose.msra.mxu0 %v2610_v47  ;;  %v2530_v4 = vpop.permute.xlu0 %2529 }
 0x470   : > { %7578 = vmatprep.subr.bf16.mxu1 %v12632_v62  ;;  %7662 = vmatprep.subr.bf16.mxu0 %v12632_v62  ;;  %v2542_v47 = vsel %vm379_vm0, %v2530_v4, 0 }
 0x473   : > { %v2532_v60 = vpop.permute.xlu0 %2531 }
 0x474   : > { %v2545_v6 = vsel %vm379_vm0, %v2532_v60, 0  ;;  %v2991_v60 = vld [vmem:[%s12627_s5 + $0x18] sm:$0xff] }
 0x477   : > { %7579 = vmatpush3.bf16.xpose.msra.mxu1 %v2137_v61  ;;  %7663 = vmatpush3.bf16.xpose.msra.mxu0 %v2613_v29  ;;  %v1677_v61 = vld [vmem:[%s12623_s1 + $0x10] sm:$0xff]  ;;  %v2534_v29 = vpop.permute.xlu0 %2533 }
 0x478   : > { %7580 = vmatprep.subr.bf16.mxu1 %v12632_v62  ;;  %7664 = vmatprep.subr.bf16.mxu0 %v12632_v62  ;;  %v2548_v33 = vsel %vm379_vm0, %v2534_v29, 0  ;;  %v2993_v29 = vld [vmem:[%s12627_s5 + $0x28] sm:$0xff] }
 0x47f   : > { %7581 = vmatpush3.bf16.xpose.msra.mxu1 %v2140_v34  ;;  %7665 = vmatpush3.bf16.xpose.msra.mxu0 %v2616_v46  ;;  %v1678_v34 = vld [vmem:[%s12623_s1 + $0x18] sm:$0xff] }
 0x480   : > { %7598 = vmatprep.subr.bf16.mxu1 %v12632_v62  ;;  %7682 = vmatprep.subr.bf16.mxu0 %v12632_v62 }
 0x486   : > { %7583 = vmatmul.mubr.msk.bf16.vlgmr.msra.gmra.mrb[52].mxu1 %vm379_vm0, %v9438_v8  ;;  %7667 = vmatmul.mubr.msk.bf16.vlgmr.msra.gmra.mrb[80].mxu0 %vm379_vm0, %v9532_v35 }
 0x487   : > { %7599 = vmatpush3.bf16.xpose.msra.mxu1 %v2267_v1  ;;  %7683 = vmatpush3.bf16.xpose.msra.mxu0 %v2743_v43 }
 0x488   : > { %7600 = vmatprep.subr.bf16.mxu1 %v12632_v62  ;;  %7684 = vmatprep.subr.bf16.mxu0 %v12632_v62 }
 0x489   : > { %7606 = vmatprep.mubr.msk.bf16.mxu1 %vm8651_vm1, %v12632_v62  ;;  %7690 = vmatprep.mubr.msk.bf16.mxu0 %vm8651_vm1, %v12632_v62 }
 0x48f   : > { %7601 = vmatpush3.bf16.xpose.msra.mxu1 %v2270_v0  ;;  %7685 = vmatpush3.bf16.xpose.msra.mxu0 %v2746_v17 }
 0x490   : > { %7602 = vmatprep.subr.bf16.mxu1 %v12632_v62  ;;  %7686 = vmatprep.subr.bf16.mxu0 %v12632_v62 }
 0x497   : > { %7603 = vmatpush3.bf16.xpose.msra.mxu1 %v2273_v53  ;;  %7687 = vmatpush3.bf16.xpose.msra.mxu0 %v2749_v10  ;;  %v2664_v53 = vpop.permute.xlu0 %2663 }
 0x498   : > { %7604 = vmatprep.subr.bf16.mxu1 %v12632_v62  ;;  %7688 = vmatprep.subr.bf16.mxu0 %v12632_v62  ;;  %v2675_v10 = vsel %vm379_vm0, %v2664_v53, 0 }
 0x49b   : > { %v2666_v49 = vpop.permute.xlu0 %2665 }
 0x49c   : > { %v2678_v19 = vsel %vm379_vm0, %v2666_v49, 0 }
 0x49f   : > { %7605 = vmatpush3.bf16.xpose.msra.mxu1 %v2276_v18  ;;  %7689 = vmatpush3.bf16.xpose.msra.mxu0 %v2752_v39  ;;  %v2668_v18 = vpop.permute.xlu0 %2667 }
 0x4a0   : > { %7622 = vmatprep.subr.bf16.mxu1 %v12632_v62  ;;  %7758 = vmatprep.subr.bf16.mxu0 %v12632_v62  ;;  %v2681_v39 = vsel %vm379_vm0, %v2668_v18, 0 }
 0x4a6   : > { %7607 = vmatmul.mubr.msk.bf16.vlgmr.msra.gmra.mrb[56].mxu1 %vm379_vm0, %v9470_v54  ;;  %7691 = vmatmul.mubr.msk.bf16.vlgmr.msra.gmra.mrb[84].mxu0 %vm379_vm0, %v9564_v48 }
 0x4a7   : > { %7623 = vmatpush3.bf16.xpose.msra.mxu1 %v2403_v21  ;;  %7630 = vmatprep.mubr.msk.bf16.mxu1 %vm8651_vm1, %v12632_v62  ;;  %v2670_v21 = vpop.permute.xlu0 %2669 }
 0x4a8   : > { %7624 = vmatprep.subr.bf16.mxu1 %v12632_v62  ;;  %7766 = vmatprep.mubr.msk.bf16.mxu0 %vm8651_vm1, %v12632_v62 }
 0x4af   : > { %7625 = vmatpush3.bf16.xpose.msra.mxu1 %v2406_v36 }
 0x4b0   : > { %7626 = vmatprep.subr.bf16.mxu1 %v12632_v62 }
 0x4b7   : > { %7627 = vmatpush3.bf16.xpose.msra.mxu1 %v2409_v37  ;;  %v2988_v37 = vld [vmem:[%s12627_s5] sm:$0xff] }
 0x4b8   : > { %7628 = vmatprep.subr.bf16.mxu1 %v12632_v62 }
 0x4b9   : > { %v1768_v9 = vpop.f32.mrb[32].mxu1 }
 0x4ba   : > { %v9771_v20 = vadd.f32 %v1768_v9, %v1675_v52  ;;  %v7512_v41 = vpop.f32.mrb[33].mxu1  ;;  %v2989_v52 = vld [vmem:[%s12627_s5 + $0x8] sm:$0xff] }
 0x4bb   : > { %v1771_v31 = vpop.f32.mrb[34].mxu1  ;;  %v8070_v57 = vpack.c.bf16 %v2989_v52, %v2988_v37 }
 0x4bc   : > { %v9773_v30 = vadd.f32 %v1771_v31, %v1676_v55  ;;  %v7513_v38 = vpop.f32.mrb[35].mxu1  ;;  %v2796_v26 = vsel %vm2795_vm2, %v9771_v20, -inf }
 0x4bd   : > { %2797 = vmax.xlane.f32.xlu0 %v2796_v26 }
 0x4be   : > { %v2799_v51 = vsel %vm2795_vm2, %v9773_v30, -inf }
 0x4bf   : > { %2800 = vmax.xlane.f32.xlu1 %v2799_v51  ;;  %7629 = vmatpush3.bf16.xpose.msra.mxu1 %v2412_v11 }
 0x4c0   : > { %7646 = vmatprep.subr.bf16.mxu1 %v12632_v62 }
 0x4c6   : > { %7631 = vmatmul.mubr.msk.bf16.vlgmr.msra.gmra.mrb[60].mxu1 %vm379_vm0, %v9502_v32 }
 0x4c7   : > { %7647 = vmatpush3.bf16.xpose.msra.mxu1 %v2539_v12  ;;  %7654 = vmatprep.mubr.msk.bf16.mxu1 %vm8651_vm1, %v12632_v62  ;;  %v2684_v12 = vsel %vm379_vm0, %v2670_v21, 0 }
 0x4c8   : > { %7648 = vmatprep.subr.bf16.mxu1 %v12632_v62 }
 0x4cf   : > { %7649 = vmatpush3.bf16.xpose.msra.mxu1 %v2542_v47  ;;  %v2990_v47 = vld [vmem:[%s12627_s5 + $0x10] sm:$0xff] }
 0x4d0   : > { %7650 = vmatprep.subr.bf16.mxu1 %v12632_v62 }
 0x4d7   : > { %7651 = vmatpush3.bf16.xpose.msra.mxu1 %v2545_v6  ;;  %v8074_v6 = vpack.c.bf16 %v2991_v60, %v2990_v47 }
 0x4d8   : > { %7652 = vmatprep.subr.bf16.mxu1 %v12632_v62 }
 0x4d9   : > { %v1836_v58 = vpop.f32.mrb[36].mxu1  ;;  %v9794_v2 = vpop.f32.mrb[64].mxu0 }
 0x4da   : > { %v9799_v46 = vadd.f32 %v1836_v58, %v1677_v61  ;;  %v7524_v45 = vpop.f32.mrb[37].mxu1  ;;  %v7572_v23 = vpop.f32.mrb[65].mxu0  ;;  %v2992_v61 = vld [vmem:[%s12627_s5 + $0x20] sm:$0xff] }
 0x4db   : > { %v1839_v1 = vpop.f32.mrb[38].mxu1  ;;  %v9801_v43 = vpop.f32.mrb[66].mxu0  ;;  %v8078_v58 = vpack.c.bf16 %v2993_v29, %v2992_v61  ;;  %v2995_v45 = vld [vmem:[%s12627_s5 + $0x38] sm:$0xff] }
 0x4dc   : > { %v9803_v59 = vadd.f32 %v1839_v1, %v1678_v34  ;;  %v7525_v27 = vpop.f32.mrb[39].mxu1  ;;  %v7573_v0 = vpop.f32.mrb[67].mxu0  ;;  %v2802_v17 = vsel %vm2795_vm2, %v9799_v46, -inf  ;;  %v2994_v34 = vld [vmem:[%s12627_s5 + $0x30] sm:$0xff] }
 0x4dd   : > { %2803 = vmax.xlane.f32.xlu0 %v2802_v17  ;;  %v8082_v23 = vpack.c.bf16 %v2995_v45, %v2994_v34  ;;  %v1681_v1 = vld [vmem:[%s12623_s1 + $0x30] sm:$0xff]  ;;  %v1682_v17 = vld [vmem:[%s12623_s1 + $0x38] sm:$0xff] }
 0x4de   : > { %v2805_v50 = vsel %vm2795_vm2, %v9803_v59, -inf }
 0x4df   : > { %7653 = vmatpush3.bf16.xpose.msra.mxu1 %v2548_v33 }
 0x4e0   : > { %7670 = vmatprep.subr.bf16.mxu1 %v12632_v62 }
 0x4e1   : > { %2806 = vmax.xlane.f32.xlu0 %v2805_v50 }
 0x4e6   : > { %7655 = vmatmul.mubr.msk.bf16.vlgmr.msra.gmra.mrb[64].mxu1 %vm379_vm0, %v9534_v25 }
 0x4e7   : > { %7671 = vmatpush3.bf16.xpose.msra.mxu1 %v2675_v10  ;;  %7678 = vmatprep.mubr.msk.bf16.mxu1 %vm8651_vm1, %v12632_v62 }
 0x4e8   : > { %7672 = vmatprep.subr.bf16.mxu1 %v12632_v62 }
 0x4ef   : > { %7673 = vmatpush3.bf16.xpose.msra.mxu1 %v2678_v19 }
 0x4f0   : > { %7674 = vmatprep.subr.bf16.mxu1 %v12632_v62 }
 0x4f7   : > { %7675 = vmatpush3.bf16.xpose.msra.mxu1 %v2681_v39 }
 0x4f8   : > { %7676 = vmatprep.subr.bf16.mxu1 %v12632_v62 }
 0x4f9   : > { %v1904_v42 = vpop.f32.mrb[40].mxu1  ;;  %v9824_v36 = vpop.f32.mrb[68].mxu0 }
 0x4fa   : > { %v9835_v9 = vadd.f32 %v1904_v42, %v1679_v22  ;;  %v7536_v55 = vpop.f32.mrb[41].mxu1  ;;  %v7596_v41 = vpop.f32.mrb[69].mxu0  ;;  %v1683_v42 = vld [vmem:[%s12623_s1 + $0x40] sm:$0xff] }
 0x4fb   : > { %v1907_v56 = vpop.f32.mrb[42].mxu1  ;;  %v9837_v31 = vpop.f32.mrb[70].mxu0  ;;  %v1684_v55 = vld [vmem:[%s12623_s1 + $0x48] sm:$0xff] }
 0x4fc   : > { %v9839_v38 = vadd.f32 %v1907_v56, %v1680_v3  ;;  %v7537_v26 = vpop.f32.mrb[43].mxu1  ;;  %v7597_v11 = vpop.f32.mrb[71].mxu0  ;;  %v2808_v51 = vsel %vm2795_vm2, %v9835_v9, -inf  ;;  %v1685_v3 = vld [vmem:[%s12623_s1 + $0x50] sm:$0xff] }
 0x4fd   : > { %2809 = vmax.xlane.f32.xlu0 %v2808_v51  ;;  %v1686_v11 = vld [vmem:[%s12623_s1 + $0x58] sm:$0xff] }
 0x4fe   : > { %v2811_v4 = vsel %vm2795_vm2, %v9839_v38, -inf  ;;  %v9911_v61 = vadd.f32 %v9801_v43, %v1686_v11 }
 0x4ff   : > { %2812 = vmax.xlane.f32.xlu1 %v2811_v4  ;;  %7677 = vmatpush3.bf16.xpose.msra.mxu1 %v2684_v12  ;;  %v9904_v12 = vadd.f32 %v9794_v2, %v1685_v3 }
 0x500   : > { %8071 = vmatprep.subr.bf16.mxu1 %v8070_v57  ;;  %v2829_v2 = vsel %vm2795_vm2, %v9911_v61, -inf }
 0x506   : > { %7679 = vmatmul.mubr.msk.bf16.vlgmr.msra.gmra.mrb[68].mxu1 %vm379_vm0, %v9566_v44 }
 0x507   : > { %8073 = vmatpush3.bf16.msra.mxu1 %v8070_v57 }
 0x508   : > { %8075 = vmatprep.subr.bf16.mxu1 %v8074_v6 }
 0x50b   : > { %8077 = vmatpush3.bf16.msra.mxu1 %v8074_v6 }
 0x50c   : > { %8079 = vmatprep.subr.bf16.mxu1 %v8078_v58 }
 0x50f   : > { %8081 = vmatpush3.bf16.msra.mxu1 %v8078_v58  ;;  %v2826_v58 = vsel %vm2795_vm2, %v9904_v12, -inf }
 0x510   : > { %8083 = vmatprep.subr.bf16.mxu1 %v8082_v23 }
 0x513   : > { %8085 = vmatpush3.bf16.msra.mxu1 %v8082_v23 }
 0x514   : > { %7794 = vmatprep.subr.bf16.mxu1 %v12632_v62 }
 0x519   : > { %v1972_v27 = vpop.f32.mrb[44].mxu1  ;;  %v9870_v0 = vpop.f32.mrb[72].mxu0 }
 0x51a   : > { %v9875_v33 = vadd.f32 %v1972_v27, %v1681_v1  ;;  %v7548_v50 = vpop.f32.mrb[45].mxu1  ;;  %v7620_v53 = vpop.f32.mrb[73].mxu0 }
 0x51b   : > { %v1975_v10 = vpop.f32.mrb[46].mxu1  ;;  %v9877_v49 = vpop.f32.mrb[74].mxu0  ;;  %v1689_v53 = vld [vmem:[%s12623_s1 + $0x70] sm:$0xff] }
 0x51c   : > { %v9879_v19 = vadd.f32 %v1975_v10, %v1682_v17  ;;  %v7549_v18 = vpop.f32.mrb[47].mxu1  ;;  %v7621_v39 = vpop.f32.mrb[75].mxu0  ;;  %v2814_v22 = vsel %vm2795_vm2, %v9875_v33, -inf  ;;  %v1687_v17 = vld [vmem:[%s12623_s1 + $0x60] sm:$0xff] }
 0x51d   : > { %2815 = vmax.xlane.f32.xlu0 %v2814_v22 }
 0x51e   : > { %v2817_v21 = vsel %vm2795_vm2, %v9879_v19, -inf }
 0x51f   : > { %2818 = vmax.xlane.f32.xlu1 %v2817_v21 }
 0x539   : > { %v2040_v37 = vpop.f32.mrb[48].mxu1  ;;  %v9891_v52 = vpop.f32.mrb[76].mxu0 }
 0x53a   : > { %v9896_v41 = vadd.f32 %v2040_v37, %v1683_v42  ;;  %v7560_v56 = vpop.f32.mrb[49].mxu1  ;;  %v7644_v26 = vpop.f32.mrb[77].mxu0  ;;  %v1690_v42 = vld [vmem:[%s12623_s1 + $0x78] sm:$0xff] }
 0x53b   : > { %v2043_v51 = vpop.f32.mrb[50].mxu1  ;;  %v9901_v57 = vpop.f32.mrb[78].mxu0 }
 0x53c   : > { %v9906_v4 = vadd.f32 %v2043_v51, %v1684_v55  ;;  %v7561_v47 = vpop.f32.mrb[51].mxu1  ;;  %v7645_v60 = vpop.f32.mrb[79].mxu0  ;;  %v2820_v6 = vsel %vm2795_vm2, %v9896_v41, -inf  ;;  %v9946_v55 = vadd.f32 %v9824_v36, %v1689_v53 }
 0x53d   : > { %2821 = vmax.xlane.f32.xlu0 %v2820_v6  ;;  %v9955_v47 = vadd.f32 %v9837_v31, %v1690_v42 }
 0x53e   : > { %v2823_v29 = vsel %vm2795_vm2, %v9906_v4, -inf  ;;  %v2838_v36 = vsel %vm2795_vm2, %v9946_v55, -inf }
 0x53f   : > { %2824 = vmax.xlane.f32.xlu1 %v2823_v29  ;;  %v2841_v6 = vsel %vm2795_vm2, %v9955_v47, -inf }
 0x541   : > { %2827 = vmax.xlane.f32.xlu0 %v2826_v58 }
 0x543   : > { %2830 = vmax.xlane.f32.xlu1 %v2829_v2 }
 0x54a   : > { %v2798_v34 = vpop.xlane.xlu0 %2797 }
 0x54b   : > { %v2892_v45 = vsub.f32 %v9771_v20, %v2798_v34  ;;  %v1688_v20 = vld [vmem:[%s12623_s1 + $0x68] sm:$0xff] }
 0x54c   : > { %v2801_v23 = vpop.xlane.xlu1 %2800 }
 0x54d   : > { %v2924_v1 = vmul.f32 1.442695, %v2892_v45  ;;  %v2893_v43 = vsub.f32 %v9773_v30, %v2801_v23  ;;  %v1691_v23 = vld [vmem:[%s12623_s1 + $0x80] sm:$0xff] }
 0x54f   : > { %8279 = vpow2.f32 %v2924_v1  ;;  %v2926_v27 = vmul.f32 1.442695, %v2893_v43  ;;  %v1693_v43 = vld [vmem:[%s12623_s1 + $0x90] sm:$0xff] }
 0x550   : > { %v9988_v42 = vadd.f32 %v9870_v0, %v1693_v43 }
 0x551   : > { %8281 = vpow2.f32 %v2926_v27 }
 0x559   : > { %v9924_v50 = vpop.eup %8279  ;;  %v2176_v10 = vpop.f32.mrb[52].mxu1 }
 0x55a   : > { %v9929_v18 = vpop.f32.mrb[80].mxu0  ;;  %v9934_v30 = vadd.f32 %v2176_v10, %v1687_v17  ;;  %v7584_v39 = vpop.f32.mrb[53].mxu1  ;;  %7710 = vmatprep.mubr.msk.f32.mxu1 %vm2795_vm2, %v9924_v50 }
 0x55b   : > { %v7668_v22 = vpop.f32.mrb[81].mxu0  ;;  %v9938_v21 = vpop.eup %8281 }
 0x55c   : > { %v2179_v3 = vpop.f32.mrb[54].mxu1  ;;  %v9943_v37 = vpop.f32.mrb[82].mxu0  ;;  %7711 = vmatmul.mubr.msk.f32.vlgmr.msra.gmra.mrb[72].mxu1 %vm2795_vm2, %v9938_v21  ;;  %v2832_v51 = vsel %vm2795_vm2, %v9934_v30, -inf }
 0x55d   : > { %v9948_v56 = vadd.f32 %v2179_v3, %v1688_v20  ;;  %v7585_v26 = vpop.f32.mrb[55].mxu1  ;;  %v7669_v11 = vpop.f32.mrb[83].mxu0  ;;  %2833 = vmax.xlane.f32.xlu0 %v2832_v51  ;;  %v1694_v20 = vld [vmem:[%s12623_s1 + $0x98] sm:$0xff] }
 0x55f   : > { %v2835_v60 = vsel %vm2795_vm2, %v9948_v56, -inf }
 0x560   : > { %2836 = vmax.xlane.f32.xlu1 %v2835_v60 }
 0x561   : > { %2839 = vmax.xlane.f32.xlu0 %v2838_v36  ;;  %v9997_v36 = vadd.f32 %v9877_v49, %v1694_v20  ;;  %v1698_v20 = vld [vmem:[%s12623_s1 + $0xb8] sm:$0xff] }
 0x564   : > { %2842 = vmax.xlane.f32.xlu1 %v2841_v6  ;;  %v2850_v6 = vsel %vm2795_vm2, %v9988_v42, -inf }
 0x56a   : > { %v2804_v29 = vpop.xlane.xlu0 %2803 }
 0x56b   : > { %v2894_v58 = vsub.f32 %v9799_v46, %v2804_v29  ;;  %v1692_v46 = vld [vmem:[%s12623_s1 + $0x88] sm:$0xff]  ;;  %v2853_v29 = vsel %vm2795_vm2, %v9997_v36, -inf }
 0x56d   : > { %v2928_v2 = vmul.f32 1.442695, %v2894_v58 }
 0x56e   : > { %v2807_v34 = vpop.xlane.xlu0 %2806 }
 0x56f   : > { %8283 = vpow2.f32 %v2928_v2  ;;  %v2895_v31 = vsub.f32 %v9803_v59, %v2807_v34 }
 0x571   : > { %v2930_v45 = vmul.f32 1.442695, %v2895_v31 }
 0x573   : > { %8285 = vpow2.f32 %v2930_v45 }
 0x579   : > { %v9968_v1 = vpop.eup %8283  ;;  %v2312_v27 = vpop.f32.mrb[56].mxu1 }
 0x57a   : > { %v9973_v17 = vpop.f32.mrb[84].mxu0  ;;  %v9978_v59 = vadd.f32 %v2312_v27, %v1691_v23  ;;  %v7608_v53 = vpop.f32.mrb[57].mxu1  ;;  %7713 = vmatprep.mubr.msk.f32.mxu1 %vm2795_vm2, %v9968_v1  ;;  %v1695_v23 = vld [vmem:[%s12623_s1 + $0xa0] sm:$0xff]  ;;  %v1697_v27 = vld [vmem:[%s12623_s1 + $0xb0] sm:$0xff] }
 0x57b   : > { %v7692_v10 = vpop.f32.mrb[85].mxu0  ;;  %v2315_v39 = vpop.f32.mrb[58].mxu1 }
 0x57c   : > { %v9985_v22 = vpop.f32.mrb[86].mxu0  ;;  %v9990_v3 = vadd.f32 %v2315_v39, %v1692_v46  ;;  %v7609_v26 = vpop.f32.mrb[59].mxu1  ;;  %v2844_v51 = vsel %vm2795_vm2, %v9978_v59, -inf }
 0x57d   : > { %v7693_v11 = vpop.f32.mrb[87].mxu0  ;;  %v9994_v60 = vpop.eup %8285  ;;  %2845 = vmax.xlane.f32.xlu0 %v2844_v51  ;;  %v10030_v26 = vadd.f32 %v9891_v52, %v1697_v27 }
 0x57e   : > { %7714 = vmatmul.mubr.msk.f32.gmra.mrb[74].mxu1 %vm2795_vm2, %v9994_v60  ;;  %v2847_v0 = vsel %vm2795_vm2, %v9990_v3, -inf }
 0x57f   : > { %2848 = vmax.xlane.f32.xlu1 %v2847_v0  ;;  %v2862_v52 = vsel %vm2795_vm2, %v10030_v26, -inf }
 0x581   : > { %2851 = vmax.xlane.f32.xlu0 %v2850_v6  ;;  %v10039_v6 = vadd.f32 %v9901_v57, %v1698_v20 }
 0x583   : > { %2854 = vmax.xlane.f32.xlu1 %v2853_v29 }
 0x58a   : > { %v2810_v58 = vpop.xlane.xlu0 %2809 }
 0x58b   : > { %v2896_v2 = vsub.f32 %v9835_v9, %v2810_v58  ;;  %v1696_v9 = vld [vmem:[%s12623_s1 + $0xa8] sm:$0xff]  ;;  %v2865_v58 = vsel %vm2795_vm2, %v10039_v6, -inf }
 0x58c   : > { %v2813_v49 = vpop.xlane.xlu1 %2812 }
 0x58d   : > { %v2932_v34 = vmul.f32 1.442695, %v2896_v2  ;;  %v2897_v31 = vsub.f32 %v9839_v38, %v2813_v49 }
 0x58f   : > { %8287 = vpow2.f32 %v2932_v34  ;;  %v2934_v45 = vmul.f32 1.442695, %v2897_v31 }
 0x591   : > { %8289 = vpow2.f32 %v2934_v45 }
 0x599   : > { %v10012_v43 = vpop.eup %8287  ;;  %v2448_v46 = vpop.f32.mrb[60].mxu1 }
 0x59a   : > { %v10020_v53 = vadd.f32 %v2448_v46, %v1695_v23  ;;  %v7632_v38 = vpop.f32.mrb[61].mxu1  ;;  %7716 = vmatprep.mubr.msk.f32.mxu1 %vm2795_vm2, %v10012_v43  ;;  %v1699_v23 = vld [vmem:[%s12623_s1 + $0xc0] sm:$0xff]  ;;  %v1701_v46 = vld [vmem:[%s12623_s1 + $0xd0] sm:$0xff] }
 0x59b   : > { %v10024_v10 = vpop.eup %8289  ;;  %v2451_v39 = vpop.f32.mrb[62].mxu1 }
 0x59c   : > { %v10032_v11 = vadd.f32 %v2451_v39, %v1696_v9  ;;  %v7633_v51 = vpop.f32.mrb[63].mxu1  ;;  %7717 = vmatmul.mubr.msk.f32.gmra.mrb[76].mxu1 %vm2795_vm2, %v10024_v10  ;;  %v2856_v0 = vsel %vm2795_vm2, %v10020_v53, -inf  ;;  %v1702_v39 = vld [vmem:[%s12623_s1 + $0xd8] sm:$0xff] }
 0x59d   : > { %2857 = vmax.xlane.f32.xlu0 %v2856_v0  ;;  %v10070_v0 = vadd.f32 %v9929_v18, %v1701_v46 }
 0x59e   : > { %v2859_v29 = vsel %vm2795_vm2, %v10032_v11, -inf }
 0x59f   : > { %2860 = vmax.xlane.f32.xlu1 %v2859_v29  ;;  %v2874_v18 = vsel %vm2795_vm2, %v10070_v0, -inf }
 0x5a1   : > { %2863 = vmax.xlane.f32.xlu0 %v2862_v52 }
 0x5a3   : > { %2866 = vmax.xlane.f32.xlu1 %v2865_v58 }
 0x5aa   : > { %v2816_v2 = vpop.xlane.xlu0 %2815 }
 0x5ab   : > { %v2898_v49 = vsub.f32 %v9875_v33, %v2816_v2  ;;  %v1700_v33 = vld [vmem:[%s12623_s1 + $0xc8] sm:$0xff]  ;;  %v10079_v2 = vadd.f32 %v9943_v37, %v1702_v39 }
 0x5ac   : > { %v2819_v34 = vpop.xlane.xlu1 %2818 }
 0x5ad   : > { %v2936_v31 = vmul.f32 1.442695, %v2898_v49  ;;  %v2899_v57 = vsub.f32 %v9879_v19, %v2819_v34  ;;  %v2877_v34 = vsel %vm2795_vm2, %v10079_v2, -inf }
 0x5af   : > { %8291 = vpow2.f32 %v2936_v31  ;;  %v2938_v45 = vmul.f32 1.442695, %v2899_v57 }
 0x5b1   : > { %8293 = vpow2.f32 %v2938_v45 }
 0x5b9   : > { %v10052_v27 = vpop.eup %8291  ;;  %v2584_v9 = vpop.f32.mrb[64].mxu1 }
 0x5ba   : > { %v10060_v38 = vadd.f32 %v2584_v9, %v1699_v23  ;;  %v7656_v19 = vpop.f32.mrb[65].mxu1  ;;  %7719 = vmatprep.mubr.msk.f32.mxu1 %vm2795_vm2, %v10052_v27 }
 0x5bb   : > { %v10064_v20 = vpop.eup %8293  ;;  %v2587_v51 = vpop.f32.mrb[66].mxu1 }
 0x5bc   : > { %v10072_v29 = vadd.f32 %v2587_v51, %v1700_v33  ;;  %v7657_v52 = vpop.f32.mrb[67].mxu1  ;;  %7720 = vmatmul.mubr.msk.f32.gmra.mrb[78].mxu1 %vm2795_vm2, %v10064_v20  ;;  %v2868_v58 = vsel %vm2795_vm2, %v10060_v38, -inf }
 0x5bd   : > { %2869 = vmax.xlane.f32.xlu0 %v2868_v58 }
 0x5be   : > { %v2871_v49 = vsel %vm2795_vm2, %v10072_v29, -inf }
 0x5bf   : > { %2872 = vmax.xlane.f32.xlu1 %v2871_v49 }
 0x5c1   : > { %2875 = vmax.xlane.f32.xlu0 %v2874_v18 }
 0x5c3   : > { %2878 = vmax.xlane.f32.xlu1 %v2877_v34 }
 0x5ca   : > { %v2822_v31 = vpop.xlane.xlu0 %2821 }
 0x5cb   : > { %v2900_v57 = vsub.f32 %v9896_v41, %v2822_v31  ;;  %v1703_v41 = vld [vmem:[%s12623_s1 + $0xe0] sm:$0xff]  ;;  %v1706_v31 = vld [vmem:[%s12623_s1 + $0xf8] sm:$0xff] }
 0x5cc   : > { %v2825_v45 = vpop.xlane.xlu1 %2824 }
 0x5cd   : > { %v2940_v23 = vmul.f32 1.442695, %v2900_v57  ;;  %v2901_v37 = vsub.f32 %v9906_v4, %v2825_v45  ;;  %v1705_v4 = vld [vmem:[%s12623_s1 + $0xf0] sm:$0xff] }
 0x5ce   : > { %v2828_v46 = vpop.xlane.xlu0 %2827  ;;  %v10112_v45 = vadd.f32 %v9973_v17, %v1705_v4 }
 0x5cf   : > { %8295 = vpow2.f32 %v2940_v23  ;;  %v2942_v9 = vmul.f32 1.442695, %v2901_v37  ;;  %v2902_v33 = vsub.f32 %v9904_v12, %v2828_v46  ;;  %v1704_v12 = vld [vmem:[%s12623_s1 + $0xe8] sm:$0xff] }
 0x5d0   : > { %v2831_v19 = vpop.xlane.xlu1 %2830 }
 0x5d1   : > { %8297 = vpow2.f32 %v2942_v9  ;;  %v2944_v39 = vmul.f32 1.442695, %v2902_v33  ;;  %v2903_v51 = vsub.f32 %v9911_v61, %v2831_v19  ;;  %v10123_v33 = vadd.f32 %v9985_v22, %v1706_v31 }
 0x5d3   : > { %8299 = vpow2.f32 %v2944_v39  ;;  %v2946_v52 = vmul.f32 1.442695, %v2903_v51  ;;  %v2886_v39 = vsel %vm2795_vm2, %v10112_v45, -inf  ;;  %v2889_v22 = vsel %vm2795_vm2, %v10123_v33, -inf }
 0x5d5   : > { %8301 = vpow2.f32 %v2946_v52 }
 0x5d9   : > { %v10094_v58 = vpop.eup %8295  ;;  %v2720_v49 = vpop.f32.mrb[68].mxu1 }
 0x5da   : > { %v10102_v18 = vadd.f32 %v2720_v49, %v1703_v41  ;;  %v7680_v61 = vpop.f32.mrb[69].mxu1  ;;  %7722 = vmatprep.mubr.msk.f32.mxu1 %vm2795_vm2, %v10094_v58 }
 0x5db   : > { %v10106_v34 = vpop.eup %8297  ;;  %v2723_v57 = vpop.f32.mrb[70].mxu1 }
 0x5dc   : > { %v10114_v23 = vadd.f32 %v2723_v57, %v1704_v12  ;;  %v7681_v37 = vpop.f32.mrb[71].mxu1  ;;  %7723 = vmatmul.mubr.msk.f32.gmra.mrb[80].mxu1 %vm2795_vm2, %v10106_v34  ;;  %v2880_v46 = vsel %vm2795_vm2, %v10102_v18, -inf }
 0x5dd   : > { %v10120_v9 = vpop.eup %8299  ;;  %2881 = vmax.xlane.f32.xlu0 %v2880_v46 }
 0x5de   : > { %7725 = vmatprep.mubr.msk.f32.mxu1 %vm2795_vm2, %v10120_v9  ;;  %v2883_v17 = vsel %vm2795_vm2, %v10114_v23, -inf }
 0x5df   : > { %v10129_v19 = vpop.eup %8301  ;;  %2884 = vmax.xlane.f32.xlu1 %v2883_v17 }
 0x5e0   : > { %7726 = vmatmul.mubr.msk.f32.gmra.mrb[82].mxu1 %vm2795_vm2, %v10129_v19 }
 0x5e1   : > { %2887 = vmax.xlane.f32.xlu0 %v2886_v39 }
 0x5e3   : > { %2890 = vmax.xlane.f32.xlu1 %v2889_v22  ;;  %v8602_v22 = vld [vmem:[%s12626_s4 + $0x18] sm:$0xff]  }
 0x5ea   : > { %v2834_v51 = vpop.xlane.xlu0 %2833 }
 0x5eb   : > { %v2904_v52 = vsub.f32 %v9934_v30, %v2834_v51  ;;  %v8599_v30 = vld [vmem:[%s12626_s4 + $0x8] sm:$0xff]  }
 0x5ed   : > { %v2837_v41 = vpop.xlane.xlu1 %2836  ;;  %v2948_v4 = vmul.f32 1.442695, %v2904_v52 }
 0x5ee   : > { %v2905_v49 = vsub.f32 %v9948_v56, %v2837_v41  ;;  %v2840_v12 = vpop.xlane.xlu0 %2839  ;;  %v8600_v56 = vld [vmem:[%s12626_s4] sm:$0xff]  }
 0x5ef   : > { %8303 = vpow2.f32 %v2948_v4  ;;  %v2906_v31 = vsub.f32 %v9946_v55, %v2840_v12  ;;  %v8601_v55 = vld [vmem:[%s12626_s4 + $0x10] sm:$0xff]  }
 0x5f0   : > { %v2950_v61 = vmul.f32 1.442695, %v2905_v49 }
 0x5f1   : > { %v2843_v57 = vpop.xlane.xlu1 %2842  ;;  %v2952_v37 = vmul.f32 1.442695, %v2906_v31 }
 0x5f2   : > { %8305 = vpow2.f32 %v2950_v61  ;;  %v2907_v46 = vsub.f32 %v9955_v47, %v2843_v57 }
 0x5f3   : > { %8307 = vpow2.f32 %v2952_v37 }
 0x5f4   : > { %v2954_v17 = vmul.f32 1.442695, %v2907_v46  ;;  %1601 = vrot.lane.b32.xlu1 %v8599_v30, %s8652_s10 }
 0x5f6   : > { %8309 = vpow2.f32 %v2954_v17 }
 0x5f7   : > { %1599 = vrot.lane.b32.xlu0 %v8600_v56, %s8652_s10 }
 0x5f8   : > { %1603 = vrot.lane.b32.xlu1 %v8601_v55, %s8652_s10 }
 0x5f9   : > { %v10153_v47 = vpop.eup %8303 }
 0x5fa   : > { %7728 = vmatprep.mubr.msk.f32.mxu1 %vm2795_vm2, %v10153_v47 }
 0x5fc   : > { %v10157_v39 = vpop.eup %8305  ;;  %1605 = vrot.lane.b32.xlu1 %v8602_v22, %s8652_s10 }
 0x5fd   : > { %7729 = vmatmul.mubr.msk.f32.gmra.mrb[84].mxu1 %vm2795_vm2, %v10157_v39  ;;  %v10165_v51 = vpop.eup %8307 }
 0x5fe   : > { %7731 = vmatprep.mubr.msk.f32.mxu1 %vm2795_vm2, %v10165_v51 }
 0x600   : > { %v10169_v52 = vpop.eup %8309 }
 0x601   : > { %7732 = vmatmul.mubr.msk.f32.gmra.mrb[86].mxu1 %vm2795_vm2, %v10169_v52 }
 0x60a   : > { %v2846_v41 = vpop.xlane.xlu0 %2845 }
 0x60b   : > { %v2908_v4 = vsub.f32 %v9978_v59, %v2846_v41 }
 0x60c   : > { %v2849_v49 = vpop.xlane.xlu1 %2848 }
 0x60d   : > { %v2956_v12 = vmul.f32 1.442695, %v2908_v4  ;;  %v2909_v61 = vsub.f32 %v9990_v3, %v2849_v49 }
 0x60e   : > { %v2852_v31 = vpop.xlane.xlu0 %2851 }
 0x60f   : > { %8311 = vpow2.f32 %v2956_v12  ;;  %v2958_v57 = vmul.f32 1.442695, %v2909_v61  ;;  %v2910_v37 = vsub.f32 %v9988_v42, %v2852_v31 }
 0x610   : > { %v2855_v46 = vpop.xlane.xlu1 %2854 }
 0x611   : > { %8313 = vpow2.f32 %v2958_v57  ;;  %v2960_v17 = vmul.f32 1.442695, %v2910_v37  ;;  %v2911_v30 = vsub.f32 %v9997_v36, %v2855_v46 }
 0x613   : > { %8315 = vpow2.f32 %v2960_v17  ;;  %v2962_v56 = vmul.f32 1.442695, %v2911_v30 }
 0x615   : > { %8317 = vpow2.f32 %v2962_v56 }
 0x619   : > { %v10177_v55 = vpop.eup %8311 }
 0x61a   : > { %7734 = vmatprep.mubr.msk.f32.mxu1 %vm2795_vm2, %v10177_v55 }
 0x61b   : > { %v10181_v59 = vpop.eup %8313 }
 0x61c   : > { %7735 = vmatmul.mubr.msk.f32.gmra.mrb[88].mxu1 %vm2795_vm2, %v10181_v59 }
 0x61d   : > { %v10185_v3 = vpop.eup %8315 }
 0x61e   : > { %7737 = vmatprep.mubr.msk.f32.mxu1 %vm2795_vm2, %v10185_v3 }
 0x61f   : > { %v10189_v42 = vpop.eup %8317 }
 0x620   : > { %7738 = vmatmul.mubr.msk.f32.gmra.mrb[90].mxu1 %vm2795_vm2, %v10189_v42 }
 0x62a   : > { %v2858_v36 = vpop.xlane.xlu0 %2857 }
 0x62b   : > { %v2912_v22 = vsub.f32 %v10020_v53, %v2858_v36 }
 0x62c   : > { %v2861_v41 = vpop.xlane.xlu1 %2860 }
 0x62d   : > { %v2964_v4 = vmul.f32 1.442695, %v2912_v22  ;;  %v2913_v49 = vsub.f32 %v10032_v11, %v2861_v41 }
 0x62e   : > { %v2864_v12 = vpop.xlane.xlu0 %2863 }
 0x62f   : > { %8319 = vpow2.f32 %v2964_v4  ;;  %v2966_v61 = vmul.f32 1.442695, %v2913_v49  ;;  %v2914_v31 = vsub.f32 %v10030_v26, %v2864_v12  ;;  %v7712_v57 = vpop.f32.mrb[72].mxu1 }
 0x630   : > { %v3318_v37 = vmax.f32 %v7712_v57, 1e-30  ;;  %v3158_v46 = vpop.f32.mrb[73].mxu1  ;;  %v2867_v17 = vpop.xlane.xlu1 %2866 }
 0x631   : > { %8321 = vpow2.f32 %v2966_v61  ;;  %v2968_v30 = vmul.f32 1.442695, %v2914_v31  ;;  %v3317_v56 = vmax.f32 %v3158_v46, 1e-30  ;;  %v2915_v62 = vsub.f32 %v10039_v6, %v2867_v17 }
 0x632   : > { %8323 = vrcp.f32 %v3318_v37 }
 0x633   : > { %8325 = vpow2.f32 %v2968_v30  ;;  %v2970_v53 = vmul.f32 1.442695, %v2915_v62 }
 0x634   : > { %8327 = vrcp.f32 %v3317_v56 }
 0x635   : > { %8329 = vpow2.f32 %v2970_v53 }
 0x639   : > { %v10197_v11 = vpop.eup %8319 }
 0x63a   : > { %7740 = vmatprep.mubr.msk.f32.mxu1 %vm2795_vm2, %v10197_v11 }
 0x63b   : > { %v10201_v26 = vpop.eup %8321 }
 0x63c   : > { %v8324_v36 = vpop.eup %8323  ;;  %7741 = vmatmul.mubr.msk.f32.gmra.mrb[92].mxu1 %vm2795_vm2, %v10201_v26 }
 0x63d   : > { %v10205_v22 = vpop.eup %8325  ;;  %v10208_v6 = vmul.f32 %v8324_v36, %v9938_v21 }
 0x63e   : > { %v8328_v41 = vpop.eup %8327  ;;  %7743 = vmatprep.mubr.msk.f32.mxu1 %vm2795_vm2, %v10205_v22 }
 0x63f   : > { %v10212_v62 = vpop.eup %8329  ;;  %v10215_v4 = vmul.f32 %v8328_v41, %v9924_v50 }
 0x640   : > { %7744 = vmatmul.mubr.msk.f32.gmra.mrb[94].mxu1 %vm2795_vm2, %v10212_v62 }
 0x64a   : > { %v2870_v12 = vpop.xlane.xlu0 %2869 }
 0x64b   : > { %v2916_v61 = vsub.f32 %v10060_v38, %v2870_v12 }
 0x64c   : > { %v2873_v21 = vpop.xlane.xlu1 %2872 }
 0x64d   : > { %v2972_v31 = vmul.f32 1.442695, %v2916_v61  ;;  %v2917_v57 = vsub.f32 %v10072_v29, %v2873_v21 }
 0x64e   : > { %v2876_v37 = vpop.xlane.xlu0 %2875 }
 0x64f   : > { %8331 = vpow2.f32 %v2972_v31  ;;  %v2974_v46 = vmul.f32 1.442695, %v2917_v57  ;;  %v2918_v17 = vsub.f32 %v10070_v0, %v2876_v37 }
 0x650   : > { %v2879_v50 = vpop.xlane.xlu1 %2878 }
 0x651   : > { %8333 = vpow2.f32 %v2974_v46  ;;  %v2976_v30 = vmul.f32 1.442695, %v2918_v17  ;;  %v2919_v56 = vsub.f32 %v10079_v2, %v2879_v50  ;;  %v7715_v53 = vpop.f32.mrb[74].mxu1 }
 0x652   : > { %v3320_v36 = vmax.f32 %v7715_v53, 1e-30  ;;  %v3168_v41 = vpop.f32.mrb[75].mxu1 }
 0x653   : > { %8335 = vpow2.f32 %v2976_v30  ;;  %v2978_v49 = vmul.f32 1.442695, %v2919_v56  ;;  %v3319_v38 = vmax.f32 %v3168_v41, 1e-30 }
 0x654   : > { %8337 = vrcp.f32 %v3320_v36 }
 0x655   : > { %8339 = vpow2.f32 %v2978_v49 }
 0x656   : > { %8341 = vrcp.f32 %v3319_v38 }
 0x659   : > { %v10225_v29 = vpop.eup %8331 }
 0x65a   : > { %7746 = vmatprep.mubr.msk.f32.mxu1 %vm2795_vm2, %v10225_v29 }
 0x65b   : > { %v10229_v0 = vpop.eup %8333 }
 0x65c   : > { %7747 = vmatmul.mubr.msk.f32.gmra.mrb[96].mxu1 %vm2795_vm2, %v10229_v0 }
 0x65d   : > { %v10233_v2 = vpop.eup %8335 }
 0x65e   : > { %v8338_v12 = vpop.eup %8337  ;;  %7749 = vmatprep.mubr.msk.f32.mxu1 %vm2795_vm2, %v10233_v2 }
 0x65f   : > { %v10237_v61 = vpop.eup %8339  ;;  %v10240_v49 = vmul.f32 %v8338_v12, %v9994_v60 }
 0x660   : > { %v8342_v21 = vpop.eup %8341  ;;  %7750 = vmatmul.mubr.msk.f32.gmra.mrb[98].mxu1 %vm2795_vm2, %v10237_v61 }
 0x661   : > { %v10245_v31 = vmul.f32 %v8342_v21, %v9968_v1 }
 0x66a   : > { %v2882_v37 = vpop.xlane.xlu0 %2881 }
 0x66b   : > { %v2920_v46 = vsub.f32 %v10102_v18, %v2882_v37 }
 0x66c   : > { %v2885_v17 = vpop.xlane.xlu1 %2884 }
 0x66d   : > { %v2980_v50 = vmul.f32 1.442695, %v2920_v46  ;;  %v2921_v30 = vsub.f32 %v10114_v23, %v2885_v17 }
 0x66e   : > { %v2888_v56 = vpop.xlane.xlu0 %2887 }
 0x66f   : > { %8343 = vpow2.f32 %v2980_v50  ;;  %v2982_v60 = vmul.f32 1.442695, %v2921_v30  ;;  %v2922_v53 = vsub.f32 %v10112_v45, %v2888_v56  ;;  %v7718_v36 = vpop.f32.mrb[76].mxu1 }
 0x670   : > { %v3322_v41 = vmax.f32 %v7718_v36, 1e-30  ;;  %v3178_v38 = vpop.f32.mrb[77].mxu1  ;;  %v2891_v1 = vpop.xlane.xlu1 %2890 }
 0x671   : > { %8345 = vpow2.f32 %v2982_v60  ;;  %v2984_v12 = vmul.f32 1.442695, %v2922_v53  ;;  %v3321_v21 = vmax.f32 %v3178_v38, 1e-30  ;;  %v2923_v57 = vsub.f32 %v10123_v33, %v2891_v1 }
 0x672   : > { %8347 = vrcp.f32 %v3322_v41  ;;  %v10253_v18 = vpop.permute.xlu0 %1599 }
 0x673   : > { %8349 = vpow2.f32 %v2984_v12  ;;  %v2986_v37 = vmul.f32 1.442695, %v2923_v57  ;;  %v1611_v23 = vmul.bf16 %v10253_v18, %v9338_v40  ;;  %v1615_v53 = vmul.bf16 %v10253_v18, %v9334_v24 }
 0x674   : > { %8351 = vrcp.f32 %v3321_v21  ;;  %v10257_v46 = vpop.permute.xlu1 %1601 }
 0x675   : > { %8353 = vpow2.f32 %v2986_v37  ;;  %3433 = vrot.lane.b32.xlu0 %v1611_v23, %s8652_s10  ;;  %v1612_v45 = vmul.bf16 %v10257_v46, %v9338_v40  ;;  %v1616_v21 = vmul.bf16 %v10257_v46, %v9334_v24  ;;  %v12670_v37 = vmov 0.0  }
 0x677   : > { %3435 = vrot.lane.b32.xlu1 %v1612_v45, %s8652_s10  ;;  %v1620_v45 = vmul.bf16 %v10257_v46, %v9370_v28 }
 0x678   : > { %v10263_v33 = vpop.permute.xlu1 %1603 }
 0x679   : > { %v10265_v17 = vpop.eup %8343  ;;  %v1613_v57 = vmul.bf16 %v10263_v33, %v9338_v40 }
 0x67a   : > { %7752 = vmatprep.mubr.msk.f32.mxu1 %vm2795_vm2, %v10265_v17 }
 0x67b   : > { %v10271_v50 = vpop.eup %8345  ;;  %3437 = vrot.lane.b32.xlu0 %v1613_v57, %s8652_s10  ;;  %v1623_v57 = vmul.bf16 %v10253_v18, %v9368_v7 }
 0x67c   : > { %v8348_v30 = vpop.eup %8347  ;;  %7753 = vmatmul.mubr.msk.f32.gmra.mrb[100].mxu1 %vm2795_vm2, %v10271_v50  ;;  %v10276_v56 = vpop.permute.xlu1 %1605 }
 0x67d   : > { %v10278_v60 = vpop.eup %8349  ;;  %v1614_v36 = vmul.bf16 %v10276_v56, %v9338_v40  ;;  %v10293_v1 = vmul.f32 %v8348_v30, %v10024_v10  ;;  %v1617_v40 = vmul.bf16 %v10263_v33, %v9334_v24  ;;  %v1619_v10 = vmul.bf16 %v10253_v18, %v9370_v28 }
 0x67e   : > { %v8352_v41 = vpop.eup %8351  ;;  %7755 = vmatprep.mubr.msk.f32.mxu1 %vm2795_vm2, %v10278_v60  ;;  %v1624_v30 = vmul.bf16 %v10257_v46, %v9368_v7 }
 0x67f   : > { %v10286_v38 = vpop.eup %8353  ;;  %3493 = vrot.lane.b32.xlu0 %v1615_v53, %s8652_s10  ;;  %3439 = vrot.lane.b32.xlu1 %v1614_v36, %s8652_s10  ;;  %v10296_v12 = vmul.f32 %v8352_v41, %v10012_v43  ;;  %v1618_v43 = vmul.bf16 %v10276_v56, %v9334_v24  ;;  %v1621_v24 = vmul.bf16 %v10263_v33, %v9370_v28 }
 0x680   : > { %7756 = vmatmul.mubr.msk.f32.gmra.mrb[102].mxu1 %vm2795_vm2, %v10286_v38 }
 0x681   : > { %7802 = vmatprep.mubr.msk.bf16.mxu1 %vm8651_vm1, %v12670_v37  ;;  %v3415_v23 = vpack.c.bf16 %v10293_v1, %v10296_v12 }
 0x683   : > { %3497 = vrot.lane.b32.xlu0 %v1617_v40, %s8652_s10  ;;  %3495 = vrot.lane.b32.xlu1 %v1616_v21, %s8652_s10  ;;  %v1622_v21 = vmul.bf16 %v10276_v56, %v9370_v28  ;;  %v1628_v28 = vmul.bf16 %v10257_v46, %v9406_v16 }
 0x687   : > { %3553 = vrot.lane.b32.xlu0 %v1619_v10, %s8652_s10  ;;  %3499 = vrot.lane.b32.xlu1 %v1618_v43, %s8652_s10  ;;  %v1625_v10 = vmul.bf16 %v10263_v33, %v9368_v7  ;;  %v1627_v43 = vmul.bf16 %v10253_v18, %v9406_v16 }
 0x68b   : > { %3555 = vrot.lane.b32.xlu0 %v1620_v45, %s8652_s10  ;;  %3613 = vrot.lane.b32.xlu1 %v1623_v57, %s8652_s10  ;;  %v1626_v45 = vmul.bf16 %v10276_v56, %v9368_v7  ;;  %v1631_v57 = vmul.bf16 %v10253_v18, %v9404_v14  ;;  %v1629_v7 = vmul.bf16 %v10263_v33, %v9406_v16 }
 0x68f   : > { %v7721_v53 = vpop.f32.mrb[78].mxu1  ;;  %3557 = vrot.lane.b32.xlu0 %v1621_v24, %s8652_s10  ;;  %3615 = vrot.lane.b32.xlu1 %v1624_v30, %s8652_s10 }
 0x690   : > { %v3324_v36 = vmax.f32 %v7721_v53, 1e-30  ;;  %v3188_v41 = vpop.f32.mrb[79].mxu1 }
 0x691   : > { %v3323_v40 = vmax.f32 %v3188_v41, 1e-30 }
 0x692   : > { %8355 = vrcp.f32 %v3324_v36  ;;  %v1632_v36 = vmul.bf16 %v10257_v46, %v9404_v14 }
 0x693   : > { %8357 = vrcp.f32 %v3323_v40  ;;  %3559 = vrot.lane.b32.xlu0 %v1622_v21, %s8652_s10  ;;  %3617 = vrot.lane.b32.xlu1 %v1625_v10, %s8652_s10  ;;  %v1633_v21 = vmul.bf16 %v10263_v33, %v9404_v14  ;;  %v1634_v10 = vmul.bf16 %v10276_v56, %v9404_v14  ;;  %v1640_v14 = vmul.bf16 %v10257_v46, %v9436_v5 }
 0x697   : > { %3673 = vrot.lane.b32.xlu0 %v1627_v43, %s8652_s10  ;;  %3619 = vrot.lane.b32.xlu1 %v1626_v45, %s8652_s10  ;;  %v1639_v43 = vmul.bf16 %v10253_v18, %v9436_v5  ;;  %v1637_v45 = vmul.bf16 %v10263_v33, %v9438_v8 }
 0x69b   : > { %3675 = vrot.lane.b32.xlu0 %v1628_v28, %s8652_s10  ;;  %3733 = vrot.lane.b32.xlu1 %v1631_v57, %s8652_s10 }
 0x69c   : > { %v8356_v24 = vpop.eup %8355 }
 0x69d   : > { %v8358_v30 = vpop.eup %8357  ;;  %v10345_v53 = vmul.f32 %v8356_v24, %v10064_v20  ;;  %v1630_v20 = vmul.bf16 %v10276_v56, %v9406_v16  ;;  %v1636_v16 = vmul.bf16 %v10257_v46, %v9438_v8 }
 0x69e   : > { %v10352_v41 = vmul.f32 %v8358_v30, %v10052_v27  ;;  %v1635_v27 = vmul.bf16 %v10253_v18, %v9438_v8 }
 0x69f   : > { %3677 = vrot.lane.b32.xlu0 %v1629_v7, %s8652_s10  ;;  %3735 = vrot.lane.b32.xlu1 %v1632_v36, %s8652_s10  ;;  %v1638_v7 = vmul.bf16 %v10276_v56, %v9438_v8  ;;  %v1641_v36 = vmul.bf16 %v10263_v33, %v9436_v5  ;;  %v1644_v8 = vmul.bf16 %v10257_v46, %v9470_v54 }
 0x6a0   : > { %v3416_v40 = vpack.c.bf16 %v10345_v53, %v10352_v41 }
 0x6a3   : > { %3679 = vrot.lane.b32.xlu0 %v1630_v20, %s8652_s10  ;;  %3737 = vrot.lane.b32.xlu1 %v1633_v21, %s8652_s10 }
 0x6a7   : > { %3793 = vrot.lane.b32.xlu0 %v1635_v27, %s8652_s10  ;;  %3739 = vrot.lane.b32.xlu1 %v1634_v10, %s8652_s10 }
 0x6ab   : > { %3795 = vrot.lane.b32.xlu0 %v1636_v16, %s8652_s10  ;;  %3853 = vrot.lane.b32.xlu1 %v1639_v43, %s8652_s10  ;;  %v1643_v16 = vmul.bf16 %v10253_v18, %v9470_v54  ;;  %v1642_v43 = vmul.bf16 %v10276_v56, %v9436_v5 }
 0x6af   : > { %v7724_v28 = vpop.f32.mrb[80].mxu1  ;;  %3797 = vrot.lane.b32.xlu0 %v1637_v45, %s8652_s10  ;;  %3855 = vrot.lane.b32.xlu1 %v1640_v14, %s8652_s10  ;;  %v1647_v45 = vmul.bf16 %v10253_v18, %v9468_v13 }
 0x6b0   : > { %v3326_v57 = vmax.f32 %v7724_v28, 1e-30  ;;  %v3198_v24 = vpop.f32.mrb[81].mxu1 }
 0x6b1   : > { %v3325_v30 = vmax.f32 %v3198_v24, 1e-30  ;;  %v1648_v24 = vmul.bf16 %v10257_v46, %v9468_v13 }
 0x6b2   : > { %8359 = vrcp.f32 %v3326_v57  ;;  %v1645_v57 = vmul.bf16 %v10263_v33, %v9470_v54 }
 0x6b3   : > { %8361 = vrcp.f32 %v3325_v30  ;;  %v7727_v20 = vpop.f32.mrb[82].mxu1  ;;  %3799 = vrot.lane.b32.xlu0 %v1638_v7, %s8652_s10  ;;  %3857 = vrot.lane.b32.xlu1 %v1641_v36, %s8652_s10 }
 0x6b4   : > { %v3328_v21 = vmax.f32 %v7727_v20, 1e-30  ;;  %v3208_v27 = vpop.f32.mrb[83].mxu1 }
 0x6b5   : > { %v3327_v10 = vmax.f32 %v3208_v27, 1e-30  ;;  %v1649_v27 = vmul.bf16 %v10263_v33, %v9468_v13 }
 0x6b6   : > { %8363 = vrcp.f32 %v3328_v21  ;;  %v1646_v21 = vmul.bf16 %v10276_v56, %v9470_v54  ;;  %v1652_v54 = vmul.bf16 %v10257_v46, %v9502_v32 }
 0x6b7   : > { %8365 = vrcp.f32 %v3327_v10  ;;  %3913 = vrot.lane.b32.xlu0 %v1643_v16, %s8652_s10  ;;  %3859 = vrot.lane.b32.xlu1 %v1642_v43, %s8652_s10  ;;  %v1650_v16 = vmul.bf16 %v10276_v56, %v9468_v13  ;;  %v1653_v43 = vmul.bf16 %v10263_v33, %v9502_v32  ;;  %v1656_v13 = vmul.bf16 %v10257_v46, %v9500_v63 }
 0x6bb   : > { %3915 = vrot.lane.b32.xlu0 %v1644_v8, %s8652_s10  ;;  %3973 = vrot.lane.b32.xlu1 %v1647_v45, %s8652_s10 }
 0x6bc   : > { %v8360_v14 = vpop.eup %8359 }
 0x6bd   : > { %v8362_v28 = vpop.eup %8361  ;;  %v10401_v5 = vmul.f32 %v8360_v14, %v10106_v34 }
 0x6be   : > { %v10408_v30 = vmul.f32 %v8362_v28, %v10094_v58 }
 0x6bf   : > { %3917 = vrot.lane.b32.xlu0 %v1645_v57, %s8652_s10  ;;  %3975 = vrot.lane.b32.xlu1 %v1648_v24, %s8652_s10  ;;  %v1654_v57 = vmul.bf16 %v10276_v56, %v9502_v32  ;;  %v1657_v24 = vmul.bf16 %v10263_v33, %v9500_v63 }
 0x6c0   : > { %v8364_v7 = vpop.eup %8363  ;;  %v3417_v36 = vpack.c.bf16 %v10401_v5, %v10408_v30 }
 0x6c1   : > { %v8366_v20 = vpop.eup %8365  ;;  %v10415_v34 = vmul.f32 %v8364_v7, %v10129_v19  ;;  %v1651_v19 = vmul.bf16 %v10253_v18, %v9502_v32  ;;  %v1660_v32 = vmul.bf16 %v10257_v46, %v9534_v25 }
 0x6c2   : > { %v10422_v58 = vmul.f32 %v8366_v20, %v10120_v9  ;;  %v1655_v9 = vmul.bf16 %v10253_v18, %v9500_v63 }
 0x6c3   : > { %3919 = vrot.lane.b32.xlu0 %v1646_v21, %s8652_s10  ;;  %3977 = vrot.lane.b32.xlu1 %v1649_v27, %s8652_s10 }
 0x6c4   : > { %v3418_v10 = vpack.c.bf16 %v10415_v34, %v10422_v58 }
 0x6c7   : > { %4033 = vrot.lane.b32.xlu0 %v1651_v19, %s8652_s10  ;;  %3979 = vrot.lane.b32.xlu1 %v1650_v16, %s8652_s10  ;;  %v1659_v19 = vmul.bf16 %v10253_v18, %v9534_v25  ;;  %v1658_v16 = vmul.bf16 %v10276_v56, %v9500_v63 }
 0x6cb   : > { %4035 = vrot.lane.b32.xlu0 %v1652_v54, %s8652_s10  ;;  %4093 = vrot.lane.b32.xlu1 %v1655_v9, %s8652_s10  ;;  %v1663_v54 = vmul.bf16 %v10253_v18, %v9532_v35 }
 0x6cf   : > { %4037 = vrot.lane.b32.xlu0 %v1653_v43, %s8652_s10  ;;  %4095 = vrot.lane.b32.xlu1 %v1656_v13, %s8652_s10  ;;  %v1661_v13 = vmul.bf16 %v10263_v33, %v9534_v25 }
 0x6d0   : > { %v7730_v8 = vpop.f32.mrb[84].mxu1 }
 0x6d1   : > { %v3330_v45 = vmax.f32 %v7730_v8, 1e-30  ;;  %v3218_v14 = vpop.f32.mrb[85].mxu1  ;;  %v1664_v8 = vmul.bf16 %v10257_v46, %v9532_v35 }
 0x6d2   : > { %v3329_v28 = vmax.f32 %v3218_v14, 1e-30 }
 0x6d3   : > { %8367 = vrcp.f32 %v3330_v45  ;;  %4039 = vrot.lane.b32.xlu0 %v1654_v57, %s8652_s10  ;;  %4097 = vrot.lane.b32.xlu1 %v1657_v24, %s8652_s10  ;;  %v1662_v24 = vmul.bf16 %v10276_v56, %v9534_v25 }
 0x6d4   : > { %8369 = vrcp.f32 %v3329_v28  ;;  %v7733_v7 = vpop.f32.mrb[86].mxu1 }
 0x6d5   : > { %v3332_v20 = vmax.f32 %v7733_v7, 1e-30  ;;  %v3228_v21 = vpop.f32.mrb[87].mxu1  ;;  %v1665_v7 = vmul.bf16 %v10263_v33, %v9532_v35 }
 0x6d6   : > { %v3331_v27 = vmax.f32 %v3228_v21, 1e-30  ;;  %v1666_v21 = vmul.bf16 %v10276_v56, %v9532_v35 }
 0x6d7   : > { %8371 = vrcp.f32 %v3332_v20  ;;  %4153 = vrot.lane.b32.xlu0 %v1659_v19, %s8652_s10  ;;  %4099 = vrot.lane.b32.xlu1 %v1658_v16, %s8652_s10  ;;  %v1669_v16 = vmul.bf16 %v10263_v33, %v9566_v44 }
 0x6d8   : > { %8373 = vrcp.f32 %v3331_v27  ;;  %v1671_v27 = vmul.bf16 %v10253_v18, %v9564_v48 }
 0x6db   : > { %4155 = vrot.lane.b32.xlu0 %v1660_v32, %s8652_s10  ;;  %4213 = vrot.lane.b32.xlu1 %v1663_v54, %s8652_s10  ;;  %v1672_v32 = vmul.bf16 %v10257_v46, %v9564_v48 }
 0x6dd   : > { %v8368_v9 = vpop.eup %8367 }
 0x6de   : > { %v8370_v43 = vpop.eup %8369  ;;  %v10465_v63 = vmul.f32 %v8368_v9, %v10157_v39 }
 0x6df   : > { %v10472_v45 = vmul.f32 %v8370_v43, %v10153_v47  ;;  %4157 = vrot.lane.b32.xlu0 %v1661_v13, %s8652_s10  ;;  %4215 = vrot.lane.b32.xlu1 %v1664_v8, %s8652_s10 }
 0x6e1   : > { %v8372_v14 = vpop.eup %8371  ;;  %v3419_v28 = vpack.c.bf16 %v10465_v63, %v10472_v45 }
 0x6e2   : > { %v8374_v57 = vpop.eup %8373  ;;  %v10479_v39 = vmul.f32 %v8372_v14, %v10169_v52  ;;  %v1667_v52 = vmul.bf16 %v10253_v18, %v9566_v44  ;;  %v1670_v14 = vmul.bf16 %v10276_v56, %v9566_v44 }
 0x6e3   : > { %v10486_v47 = vmul.f32 %v8374_v57, %v10165_v51  ;;  %4159 = vrot.lane.b32.xlu0 %v1662_v24, %s8652_s10  ;;  %4217 = vrot.lane.b32.xlu1 %v1665_v7, %s8652_s10  ;;  %v1668_v51 = vmul.bf16 %v10257_v46, %v9566_v44  ;;  %v1673_v57 = vmul.bf16 %v10263_v33, %v9564_v48 }
 0x6e4   : > { %v1674_v44 = vmul.bf16 %v10276_v56, %v9564_v48  ;;  %v12671_v33 = vpack.c.bf16 %v10208_v6, %v10215_v4  ;;  %v8603_v48 = vld [vmem:[%s12629_s7] ss:$8 sps:$4 sm:$0xff]   ;;  %v8604_v6 = vld [vmem:[%s12629_s7 + $0x10] ss:$8 sps:$4 sm:$0xff]  }
 0x6e5   : > { %v3420_v20 = vpack.c.bf16 %v10479_v39, %v10486_v47 }
 0x6e7   : > { %v3434_v25 = vpop.permute.xlu0 %3433  ;;  %4273 = vrot.lane.b32.xlu0 %v1667_v52, %s8652_s10  ;;  %4219 = vrot.lane.b32.xlu1 %v1666_v21, %s8652_s10 }
 0x6e8   : > { %7759 = vmatpush3.bf16.msra.mxu0 %v3434_v25 }
 0x6e9   : > { %7760 = vmatprep.subr.bf16.mxu0 %v12670_v37  ;;  %v3436_v19 = vpop.permute.xlu1 %3435 }
 0x6eb   : > { %4275 = vrot.lane.b32.xlu0 %v1668_v51, %s8652_s10  ;;  %4333 = vrot.lane.b32.xlu1 %v1671_v27, %s8652_s10 }
 0x6ec   : > { %7761 = vmatpush3.bf16.msra.mxu0 %v3436_v19 }
 0x6ed   : > { %v3438_v35 = vpop.permute.xlu0 %3437  ;;  %7762 = vmatprep.subr.bf16.mxu0 %v12670_v37 }
 0x6ef   : > { %v7736_v54 = vpop.f32.mrb[88].mxu1  ;;  %4277 = vrot.lane.b32.xlu0 %v1669_v16, %s8652_s10  ;;  %4335 = vrot.lane.b32.xlu1 %v1672_v32, %s8652_s10 }
 0x6f0   : > { %v3334_v18 = vmax.f32 %v7736_v54, 1e-30  ;;  %v3238_v9 = vpop.f32.mrb[89].mxu1  ;;  %7763 = vmatpush3.bf16.msra.mxu0 %v3438_v35 }
 0x6f1   : > { %v3333_v43 = vmax.f32 %v3238_v9, 1e-30  ;;  %v3494_v13 = vpop.permute.xlu0 %3493  ;;  %v3440_v8 = vpop.permute.xlu1 %3439  ;;  %7764 = vmatprep.subr.bf16.mxu0 %v12670_v37 }
 0x6f2   : > { %8375 = vrcp.f32 %v3334_v18 }
 0x6f3   : > { %8377 = vrcp.f32 %v3333_v43  ;;  %v7739_v46 = vpop.f32.mrb[90].mxu1  ;;  %4279 = vrot.lane.b32.xlu0 %v1670_v14, %s8652_s10  ;;  %4337 = vrot.lane.b32.xlu1 %v1673_v57, %s8652_s10 }
 0x6f4   : > { %v3336_v24 = vmax.f32 %v7739_v46, 1e-30  ;;  %v3248_v7 = vpop.f32.mrb[91].mxu1  ;;  %7765 = vmatpush3.bf16.msra.mxu0 %v3440_v8 }
 0x6f5   : > { %v3335_v52 = vmax.f32 %v3248_v7, 1e-30  ;;  %v3498_v21 = vpop.permute.xlu0 %3497  ;;  %v3496_v25 = vpop.permute.xlu1 %3495  ;;  %7770 = vmatprep.subr.bf16.mxu0 %v12670_v37 }
 0x6f6   : > { %8379 = vrcp.f32 %v3336_v24 }
 0x6f7   : > { %8381 = vrcp.f32 %v3335_v52  ;;  %4339 = vrot.lane.b32.xlu1 %v1674_v44, %s8652_s10  ;;  %7767 = vmatmul.mubr.msk.bf16.vlgmr.msra.gmra.mrb[88].mxu0 %vm2795_vm2, %v12671_v33 }
 0x6f8   : > { %7771 = vmatpush3.bf16.msra.mxu0 %v3494_v13  ;;  %7778 = vmatprep.mubr.msk.bf16.mxu0 %vm8651_vm1, %v12670_v37 }
 0x6f9   : > { %v3554_v51 = vpop.permute.xlu0 %3553  ;;  %v3500_v27 = vpop.permute.xlu1 %3499  ;;  %7772 = vmatprep.subr.bf16.mxu0 %v12670_v37  ;;  %4409 = vrot.lane.b32.xlu0 %v8603_v48, %s8648_s20 }
 0x6fb   : > { %4411 = vrot.lane.b32.xlu1 %v8604_v6, %s8648_s20 }
 0x6fc   : > { %v8376_v4 = vpop.eup %8375  ;;  %7773 = vmatpush3.bf16.msra.mxu0 %v3496_v25 }
 0x6fd   : > { %v8378_v56 = vpop.eup %8377  ;;  %v10539_v19 = vmul.f32 %v8376_v4, %v10181_v59  ;;  %v3556_v35 = vpop.permute.xlu0 %3555  ;;  %7774 = vmatprep.subr.bf16.mxu0 %v12670_v37 }
 0x6fe   : > { %v3614_v16 = vpop.permute.xlu1 %3613  ;;  %v10543_v32 = vmul.f32 %v8378_v56, %v10177_v55 }
 0x6ff   : > { %7795 = vmatpush3.bf16.msra.mxu1 %v3614_v16 }
 0x700   : > { %7796 = vmatprep.subr.bf16.mxu1 %v12670_v37  ;;  %v8380_v54 = vpop.eup %8379  ;;  %7775 = vmatpush3.bf16.msra.mxu0 %v3498_v21  ;;  %v3421_v18 = vpack.c.bf16 %v10539_v19, %v10543_v32 }
 0x701   : > { %v8382_v9 = vpop.eup %8381  ;;  %v10549_v43 = vmul.f32 %v8380_v54, %v10189_v42  ;;  %v3558_v59 = vpop.permute.xlu0 %3557  ;;  %7776 = vmatprep.subr.bf16.mxu0 %v12670_v37  ;;  %v12672_v42 = vpack.c.bf16 %v10240_v49, %v10245_v31 }
 0x702   : > { %v3616_v13 = vpop.permute.xlu1 %3615  ;;  %v10553_v8 = vmul.f32 %v8382_v9, %v10185_v3 }
 0x703   : > { %7797 = vmatpush3.bf16.msra.mxu1 %v3616_v13 }
 0x704   : > { %7798 = vmatprep.subr.bf16.mxu1 %v12670_v37  ;;  %7777 = vmatpush3.bf16.msra.mxu0 %v3500_v27  ;;  %v3422_v55 = vpack.c.bf16 %v10549_v43, %v10553_v8 }
 0x705   : > { %v3560_v14 = vpop.permute.xlu0 %3559  ;;  %7782 = vmatprep.subr.bf16.mxu0 %v12670_v37 }
 0x706   : > { %v3618_v57 = vpop.permute.xlu1 %3617 }
 0x707   : > { %7799 = vmatpush3.bf16.msra.mxu1 %v3618_v57  ;;  %7779 = vmatmul.mubr.msk.bf16.vlgmr.msra.gmra.mrb[92].mxu0 %vm2795_vm2, %v12672_v42 }
 0x708   : > { %7800 = vmatprep.subr.bf16.mxu1 %v12670_v37  ;;  %7783 = vmatpush3.bf16.msra.mxu0 %v3554_v51 }
 0x709   : > { %7790 = vmatprep.mubr.msk.bf16.mxu0 %vm8651_vm1, %v12670_v37  ;;  %v3674_v3 = vpop.permute.xlu0 %3673  ;;  %7784 = vmatprep.subr.bf16.mxu0 %v12670_v37 }
 0x70a   : > { %v3620_v46 = vpop.permute.xlu1 %3619 }
 0x70b   : > { %7801 = vmatpush3.bf16.msra.mxu1 %v3620_v46 }
 0x70c   : > { %7818 = vmatprep.subr.bf16.mxu1 %v12670_v37  ;;  %7785 = vmatpush3.bf16.msra.mxu0 %v3556_v35 }
 0x70d   : > { %v3676_v24 = vpop.permute.xlu0 %3675  ;;  %7786 = vmatprep.subr.bf16.mxu0 %v12670_v37 }
 0x70e   : > { %7803 = vmatmul.mubr.msk.bf16.vlgmr.msra.gmra.mrb[104].mxu1 %vm2795_vm2, %v3416_v40  ;;  %v3734_v49 = vpop.permute.xlu1 %3733 }
 0x70f   : > { %7819 = vmatpush3.bf16.msra.mxu1 %v3734_v49  ;;  %7826 = vmatprep.mubr.msk.bf16.mxu1 %vm8651_vm1, %v12670_v37  ;;  %v7742_v31 = vpop.f32.mrb[92].mxu1 }
 0x710   : > { %7820 = vmatprep.subr.bf16.mxu1 %v12670_v37  ;;  %v3338_v7 = vmax.f32 %v7742_v31, 1e-30  ;;  %v3258_v52 = vpop.f32.mrb[93].mxu1  ;;  %7787 = vmatpush3.bf16.msra.mxu0 %v3558_v59 }
 0x711   : > { %v3337_v21 = vmax.f32 %v3258_v52, 1e-30  ;;  %v3678_v25 = vpop.permute.xlu0 %3677  ;;  %7788 = vmatprep.subr.bf16.mxu0 %v12670_v37 }
 0x712   : > { %v3736_v44 = vpop.permute.xlu1 %3735  ;;  %8383 = vrcp.f32 %v3338_v7 }
 0x713   : > { %7821 = vmatpush3.bf16.msra.mxu1 %v3736_v44  ;;  %8385 = vrcp.f32 %v3337_v21  ;;  %v7745_v53 = vpop.f32.mrb[94].mxu1 }
 0x714   : > { %7822 = vmatprep.subr.bf16.mxu1 %v12670_v37  ;;  %v3340_v41 = vmax.f32 %v7745_v53, 1e-30  ;;  %v3268_v40 = vpop.f32.mrb[95].mxu1  ;;  %7789 = vmatpush3.bf16.msra.mxu0 %v3560_v14 }
 0x715   : > { %v3339_v33 = vmax.f32 %v3268_v40, 1e-30  ;;  %v3680_v51 = vpop.permute.xlu0 %3679  ;;  %7806 = vmatprep.subr.bf16.mxu0 %v12670_v37 }
 0x716   : > { %v3738_v27 = vpop.permute.xlu1 %3737  ;;  %8387 = vrcp.f32 %v3340_v41 }
 0x717   : > { %7823 = vmatpush3.bf16.msra.mxu1 %v3738_v27  ;;  %8389 = vrcp.f32 %v3339_v33  ;;  %7791 = vmatmul.mubr.msk.bf16.vlgmr.msra.gmra.mrb[96].mxu0 %vm2795_vm2, %v3415_v23 }
 0x718   : > { %7824 = vmatprep.subr.bf16.mxu1 %v12670_v37  ;;  %7807 = vmatpush3.bf16.msra.mxu0 %v3674_v3 }
 0x719   : > { %7814 = vmatprep.mubr.msk.bf16.mxu0 %vm8651_vm1, %v12670_v37  ;;  %v3794_v48 = vpop.permute.xlu0 %3793  ;;  %7808 = vmatprep.subr.bf16.mxu0 %v12670_v37 }
 0x71a   : > { %v3740_v6 = vpop.permute.xlu1 %3739 }
 0x71b   : > { %7825 = vmatpush3.bf16.msra.mxu1 %v3740_v6 }
 0x71c   : > { %7842 = vmatprep.subr.bf16.mxu1 %v12670_v37  ;;  %v8384_v4 = vpop.eup %8383  ;;  %7809 = vmatpush3.bf16.msra.mxu0 %v3676_v24 }
 0x71d   : > { %v8386_v56 = vpop.eup %8385  ;;  %v10589_v1 = vmul.f32 %v8384_v4, %v10201_v26  ;;  %v3796_v12 = vpop.permute.xlu0 %3795  ;;  %7810 = vmatprep.subr.bf16.mxu0 %v12670_v37 }
 0x71e   : > { %7827 = vmatmul.mubr.msk.bf16.vlgmr.msra.gmra.mrb[108].mxu1 %vm2795_vm2, %v3418_v10  ;;  %v3854_v23 = vpop.permute.xlu1 %3853  ;;  %v10597_v35 = vmul.f32 %v8386_v56, %v10197_v11 }
 0x71f   : > { %7843 = vmatpush3.bf16.msra.mxu1 %v3854_v23  ;;  %7850 = vmatprep.mubr.msk.bf16.mxu1 %vm8651_vm1, %v12670_v37 }
 0x720   : > { %7844 = vmatprep.subr.bf16.mxu1 %v12670_v37  ;;  %v8388_v26 = vpop.eup %8387  ;;  %7811 = vmatpush3.bf16.msra.mxu0 %v3678_v25  ;;  %v3423_v16 = vpack.c.bf16 %v10589_v1, %v10597_v35 }
 0x721   : > { %v8390_v34 = vpop.eup %8389  ;;  %v10605_v58 = vmul.f32 %v8388_v26, %v10212_v62  ;;  %v3798_v10 = vpop.permute.xlu0 %3797  ;;  %7812 = vmatprep.subr.bf16.mxu0 %v12670_v37 }
 0x722   : > { %v3856_v54 = vpop.permute.xlu1 %3855  ;;  %v10609_v11 = vmul.f32 %v8390_v34, %v10205_v22 }
 0x723   : > { %7845 = vmatpush3.bf16.msra.mxu1 %v3856_v54 }
 0x724   : > { %7846 = vmatprep.subr.bf16.mxu1 %v12670_v37  ;;  %7813 = vmatpush3.bf16.msra.mxu0 %v3680_v51  ;;  %v3424_v9 = vpack.c.bf16 %v10605_v58, %v10609_v11 }
 0x725   : > { %v3800_v59 = vpop.permute.xlu0 %3799  ;;  %7830 = vmatprep.subr.bf16.mxu0 %v12670_v37 }
 0x726   : > { %v3858_v13 = vpop.permute.xlu1 %3857 }
 0x727   : > { %7847 = vmatpush3.bf16.msra.mxu1 %v3858_v13  ;;  %7815 = vmatmul.mubr.msk.bf16.vlgmr.msra.gmra.mrb[100].mxu0 %vm2795_vm2, %v3417_v36 }
 0x728   : > { %7848 = vmatprep.subr.bf16.mxu1 %v12670_v37  ;;  %7831 = vmatpush3.bf16.msra.mxu0 %v3794_v48 }
 0x729   : > { %7838 = vmatprep.mubr.msk.bf16.mxu0 %vm8651_vm1, %v12670_v37  ;;  %v3914_v22 = vpop.permute.xlu0 %3913  ;;  %7832 = vmatprep.subr.bf16.mxu0 %v12670_v37 }
 0x72a   : > { %v3860_v62 = vpop.permute.xlu1 %3859 }
 0x72b   : > { %7849 = vmatpush3.bf16.msra.mxu1 %v3860_v62 }
 0x72c   : > { %7866 = vmatprep.subr.bf16.mxu1 %v12670_v37  ;;  %7833 = vmatpush3.bf16.msra.mxu0 %v3796_v12 }
 0x72d   : > { %v3916_v14 = vpop.permute.xlu0 %3915  ;;  %7834 = vmatprep.subr.bf16.mxu0 %v12670_v37 }
 0x72e   : > { %7851 = vmatmul.mubr.msk.bf16.vlgmr.msra.gmra.mrb[112].mxu1 %vm2795_vm2, %v3420_v20  ;;  %v3974_v5 = vpop.permute.xlu1 %3973 }
 0x72f   : > { %7867 = vmatpush3.bf16.msra.mxu1 %v3974_v5  ;;  %7874 = vmatprep.mubr.msk.bf16.mxu1 %vm8651_vm1, %v12670_v37  ;;  %v7748_v30 = vpop.f32.mrb[96].mxu1 }
 0x730   : > { %7868 = vmatprep.subr.bf16.mxu1 %v12670_v37  ;;  %v3342_v36 = vmax.f32 %v7748_v30, 1e-30  ;;  %v3278_v57 = vpop.f32.mrb[97].mxu1  ;;  %7835 = vmatpush3.bf16.msra.mxu0 %v3798_v10 }
 0x731   : > { %v3341_v42 = vmax.f32 %v3278_v57, 1e-30  ;;  %v3918_v3 = vpop.permute.xlu0 %3917  ;;  %7836 = vmatprep.subr.bf16.mxu0 %v12670_v37 }
 0x732   : > { %v3976_v46 = vpop.permute.xlu1 %3975  ;;  %8391 = vrcp.f32 %v3342_v36 }
 0x733   : > { %7869 = vmatpush3.bf16.msra.mxu1 %v3976_v46  ;;  %8393 = vrcp.f32 %v3341_v42  ;;  %v7751_v39 = vpop.f32.mrb[98].mxu1 }
 0x734   : > { %7870 = vmatprep.subr.bf16.mxu1 %v12670_v37  ;;  %v3344_v47 = vmax.f32 %v7751_v39, 1e-30  ;;  %v3288_v20 = vpop.f32.mrb[99].mxu1  ;;  %7837 = vmatpush3.bf16.msra.mxu0 %v3800_v59 }
 0x735   : > { %v3343_v24 = vmax.f32 %v3288_v20, 1e-30  ;;  %v3920_v49 = vpop.permute.xlu0 %3919  ;;  %7854 = vmatprep.subr.bf16.mxu0 %v12670_v37 }
 0x736   : > { %v3978_v31 = vpop.permute.xlu1 %3977  ;;  %8395 = vrcp.f32 %v3344_v47 }
 0x737   : > { %7871 = vmatpush3.bf16.msra.mxu1 %v3978_v31  ;;  %8397 = vrcp.f32 %v3343_v24  ;;  %7839 = vmatmul.mubr.msk.bf16.vlgmr.msra.gmra.mrb[104].mxu0 %vm2795_vm2, %v3419_v28 }
 0x738   : > { %7872 = vmatprep.subr.bf16.mxu1 %v12670_v37  ;;  %7855 = vmatpush3.bf16.msra.mxu0 %v3914_v22 }
 0x739   : > { %7862 = vmatprep.mubr.msk.bf16.mxu0 %vm8651_vm1, %v12670_v37  ;;  %v4034_v7 = vpop.permute.xlu0 %4033  ;;  %7856 = vmatprep.subr.bf16.mxu0 %v12670_v37 }
 0x73a   : > { %v3980_v52 = vpop.permute.xlu1 %3979 }
 0x73b   : > { %7873 = vmatpush3.bf16.msra.mxu1 %v3980_v52 }
 0x73c   : > { %7890 = vmatprep.subr.bf16.mxu1 %v12670_v37  ;;  %v8392_v21 = vpop.eup %8391  ;;  %7857 = vmatpush3.bf16.msra.mxu0 %v3916_v14 }
 0x73d   : > { %v8394_v25 = vpop.eup %8393  ;;  %v10645_v63 = vmul.f32 %v8392_v21, %v10229_v0  ;;  %v4036_v45 = vpop.permute.xlu0 %4035  ;;  %7858 = vmatprep.subr.bf16.mxu0 %v12670_v37 }
 0x73e   : > { %7875 = vmatmul.mubr.msk.bf16.vlgmr.msra.gmra.mrb[116].mxu1 %vm2795_vm2, %v3422_v55  ;;  %v4094_v28 = vpop.permute.xlu1 %4093  ;;  %v10653_v44 = vmul.f32 %v8394_v25, %v10225_v29 }
 0x73f   : > { %7891 = vmatpush3.bf16.msra.mxu1 %v4094_v28  ;;  %7898 = vmatprep.mubr.msk.bf16.mxu1 %vm8651_vm1, %v12670_v37 }
 0x740   : > { %7892 = vmatprep.subr.bf16.mxu1 %v12670_v37  ;;  %v8396_v0 = vpop.eup %8395  ;;  %7859 = vmatpush3.bf16.msra.mxu0 %v3918_v3  ;;  %v3425_v53 = vpack.c.bf16 %v10645_v63, %v10653_v44 }
 0x741   : > { %v8398_v43 = vpop.eup %8397  ;;  %v10661_v8 = vmul.f32 %v8396_v0, %v10237_v61  ;;  %v4038_v55 = vpop.permute.xlu0 %4037  ;;  %7860 = vmatprep.subr.bf16.mxu0 %v12670_v37 }
 0x742   : > { %v4096_v41 = vpop.permute.xlu1 %4095  ;;  %v10665_v29 = vmul.f32 %v8398_v43, %v10233_v2 }
 0x743   : > { %7893 = vmatpush3.bf16.msra.mxu1 %v4096_v41 }
 0x744   : > { %7894 = vmatprep.subr.bf16.mxu1 %v12670_v37  ;;  %7861 = vmatpush3.bf16.msra.mxu0 %v3920_v49  ;;  %v3426_v40 = vpack.c.bf16 %v10661_v8, %v10665_v29 }
 0x745   : > { %v4040_v33 = vpop.permute.xlu0 %4039  ;;  %7878 = vmatprep.subr.bf16.mxu0 %v12670_v37 }
 0x746   : > { %v4098_v51 = vpop.permute.xlu1 %4097 }
 0x747   : > { %7895 = vmatpush3.bf16.msra.mxu1 %v4098_v51  ;;  %7863 = vmatmul.mubr.msk.bf16.vlgmr.msra.gmra.mrb[108].mxu0 %vm2795_vm2, %v3421_v18 }
 0x748   : > { %7896 = vmatprep.subr.bf16.mxu1 %v12670_v37  ;;  %7879 = vmatpush3.bf16.msra.mxu0 %v4034_v7 }
 0x749   : > { %7886 = vmatprep.mubr.msk.bf16.mxu0 %vm8651_vm1, %v12670_v37  ;;  %v4154_v2 = vpop.permute.xlu0 %4153  ;;  %7880 = vmatprep.subr.bf16.mxu0 %v12670_v37 }
 0x74a   : > { %v4100_v61 = vpop.permute.xlu1 %4099 }
 0x74b   : > { %7897 = vmatpush3.bf16.msra.mxu1 %v4100_v61 }
 0x74c   : > { %7914 = vmatprep.subr.bf16.mxu1 %v12670_v37  ;;  %7881 = vmatpush3.bf16.msra.mxu0 %v4036_v45 }
 0x74d   : > { %v4156_v27 = vpop.permute.xlu0 %4155  ;;  %7882 = vmatprep.subr.bf16.mxu0 %v12670_v37 }
 0x74e   : > { %7899 = vmatmul.mubr.msk.bf16.vlgmr.msra.gmra.mrb[120].mxu1 %vm2795_vm2, %v3424_v9  ;;  %v4214_v19 = vpop.permute.xlu1 %4213 }
 0x74f   : > { %7915 = vmatpush3.bf16.msra.mxu1 %v4214_v19  ;;  %7922 = vmatprep.mubr.msk.bf16.mxu1 %vm8651_vm1, %v12670_v37  ;;  %v7754_v32 = vpop.f32.mrb[100].mxu1 }
 0x750   : > { %7916 = vmatprep.subr.bf16.mxu1 %v12670_v37  ;;  %v3346_v18 = vmax.f32 %v7754_v32, 1e-30  ;;  %v3298_v48 = vpop.f32.mrb[101].mxu1  ;;  %7883 = vmatpush3.bf16.msra.mxu0 %v4038_v55 }
 0x751   : > { %v3345_v6 = vmax.f32 %v3298_v48, 1e-30  ;;  %v4158_v4 = vpop.permute.xlu0 %4157  ;;  %7884 = vmatprep.subr.bf16.mxu0 %v12670_v37 }
 0x752   : > { %v4216_v56 = vpop.permute.xlu1 %4215  ;;  %8399 = vrcp.f32 %v3346_v18 }
 0x753   : > { %7917 = vmatpush3.bf16.msra.mxu1 %v4216_v56  ;;  %8401 = vrcp.f32 %v3345_v6  ;;  %v7757_v12 = vpop.f32.mrb[102].mxu1 }
 0x754   : > { %7918 = vmatprep.subr.bf16.mxu1 %v12670_v37  ;;  %v3348_v23 = vmax.f32 %v7757_v12, 1e-30  ;;  %v3308_v26 = vpop.f32.mrb[103].mxu1  ;;  %7885 = vmatpush3.bf16.msra.mxu0 %v4040_v33 }
 0x755   : > { %v3347_v34 = vmax.f32 %v3308_v26, 1e-30  ;;  %7902 = vmatprep.subr.bf16.mxu0 %v12670_v37  ;;  %v4160_v10 = vpop.permute.xlu0 %4159 }
 0x756   : > { %v4218_v58 = vpop.permute.xlu1 %4217  ;;  %8403 = vrcp.f32 %v3348_v23 }
 0x757   : > { %7919 = vmatpush3.bf16.msra.mxu1 %v4218_v58  ;;  %8405 = vrcp.f32 %v3347_v34  ;;  %7887 = vmatmul.mubr.msk.bf16.vlgmr.msra.gmra.mrb[112].mxu0 %vm2795_vm2, %v3423_v16 }
 0x758   : > { %7920 = vmatprep.subr.bf16.mxu1 %v12670_v37  ;;  %7903 = vmatpush3.bf16.msra.mxu0 %v4154_v2 }
 0x759   : > { %7910 = vmatprep.mubr.msk.bf16.mxu0 %vm8651_vm1, %v12670_v37  ;;  %7904 = vmatprep.subr.bf16.mxu0 %v12670_v37  ;;  %v4274_v9 = vpop.permute.xlu0 %4273 }
 0x75a   : > { %v4220_v54 = vpop.permute.xlu1 %4219 }
 0x75b   : > { %7921 = vmatpush3.bf16.msra.mxu1 %v4220_v54 }
 0x75c   : > { %7938 = vmatprep.subr.bf16.mxu1 %v12670_v37  ;;  %v8400_v11 = vpop.eup %8399  ;;  %7905 = vmatpush3.bf16.msra.mxu0 %v4156_v27 }
 0x75d   : > { %v8402_v59 = vpop.eup %8401  ;;  %v3410_v1 = vmul.f32 %v8400_v11, %v10271_v50  ;;  %7906 = vmatprep.subr.bf16.mxu0 %v12670_v37  ;;  %v4276_v30 = vpop.permute.xlu0 %4275 }
 0x75e   : > { %7923 = vmatmul.mubr.msk.bf16.vlgmr.msra.gmra.mrb[124].mxu1 %vm2795_vm2, %v3426_v40  ;;  %v4334_v35 = vpop.permute.xlu1 %4333  ;;  %v3409_v16 = vmul.f32 %v8402_v59, %v10265_v17 }
 0x75f   : > { %7939 = vmatpush3.bf16.msra.mxu1 %v4334_v35  ;;  %7946 = vmatprep.mubr.msk.bf16.mxu1 %vm8651_vm1, %v12670_v37 }
 0x760   : > { %7940 = vmatprep.subr.bf16.mxu1 %v12670_v37  ;;  %v8404_v13 = vpop.eup %8403  ;;  %7907 = vmatpush3.bf16.msra.mxu0 %v4158_v4  ;;  %v3427_v22 = vpack.c.bf16 %v3410_v1, %v3409_v16 }
 0x761   : > { %v8406_v62 = vpop.eup %8405  ;;  %v3412_v14 = vmul.f32 %v8404_v13, %v10286_v38  ;;  %7908 = vmatprep.subr.bf16.mxu0 %v12670_v37  ;;  %v4278_v38 = vpop.permute.xlu0 %4277 }
 0x762   : > { %v4336_v50 = vpop.permute.xlu1 %4335  ;;  %v3411_v5 = vmul.f32 %v8406_v62, %v10278_v60 }
 0x763   : > { %7941 = vmatpush3.bf16.msra.mxu1 %v4336_v50 }
 0x764   : > { %7942 = vmatprep.subr.bf16.mxu1 %v12670_v37  ;;  %7909 = vmatpush3.bf16.msra.mxu0 %v4160_v10  ;;  %v3428_v17 = vpack.c.bf16 %v3412_v14, %v3411_v5 }
 0x765   : > { %7926 = vmatprep.subr.bf16.mxu0 %v12670_v37  ;;  %v4280_v57 = vpop.permute.xlu0 %4279 }
 0x766   : > { %v4338_v36 = vpop.permute.xlu1 %4337 }
 0x767   : > { %7943 = vmatpush3.bf16.msra.mxu1 %v4338_v36  ;;  %7911 = vmatmul.mubr.msk.bf16.vlgmr.msra.gmra.mrb[116].mxu0 %vm2795_vm2, %v3425_v53 }
 0x768   : > { %7944 = vmatprep.subr.bf16.mxu1 %v12670_v37  ;;  %7927 = vmatpush3.bf16.msra.mxu0 %v4274_v9 }
 0x769   : > { %7934 = vmatprep.mubr.msk.bf16.mxu0 %vm8651_vm1, %v12670_v37  ;;  %7928 = vmatprep.subr.bf16.mxu0 %v12670_v37 }
 0x76a   : > { %v4340_v60 = vpop.permute.xlu1 %4339 }
 0x76b   : > { %7945 = vmatpush3.bf16.msra.mxu1 %v4340_v60  ;;  %v4410_v42 = vpop.permute.xlu0 %4409 }
 0x76c   : > { %7929 = vmatpush3.bf16.msra.mxu0 %v4276_v30 }
 0x76d   : > { %7930 = vmatprep.subr.bf16.mxu0 %v12670_v37 }
 0x76e   : > { %7947 = vmatmul.mubr.msk.bf16.vlgmr.msra.gmra.mrb[128].mxu1 %vm2795_vm2, %v3428_v17  ;;  %v4412_v3 = vpop.permute.xlu1 %4411 }
 0x770   : > { %7931 = vmatpush3.bf16.msra.mxu0 %v4278_v38 }
 0x771   : > { %7932 = vmatprep.subr.bf16.mxu0 %v12670_v37 }
 0x774   : > { %7933 = vmatpush3.bf16.msra.mxu0 %v4280_v57 }
 0x775   : > { %7950 = vmatprep.subr.bf16.mxu0 %v4410_v42 }
 0x777   : > { %7935 = vmatmul.mubr.msk.bf16.vlgmr.msra.gmra.mrb[120].mxu0 %vm2795_vm2, %v3427_v22 }
 0x778   : > { %7951 = vmatpush3.bf16.msra.mxu0 %v4410_v42 }
 0x779   : > { %7952 = vmatprep.subr.bf16.mxu0 %v4412_v3 }
 0x77c   : > { %7953 = vmatpush3.bf16.msra.mxu0 %v4412_v3 }
 0x7ca   : > { %v3482_v46 = vpop.f32.mrb[88].mxu0 }
 0x7cb   : > { %v7768_v39 = vpop.f32.mrb[89].mxu0 }
 0x7cc   : > { %v3485_v47 = vpop.f32.mrb[90].mxu0 }
 0x7cd   : > { %v4389_v20 = vpack.c.bf16 %v3485_v47, %v3482_v46  ;;  %v7769_v24 = vpop.f32.mrb[91].mxu0  ;;  %v8653_v47 = vmov 0.0|0.0  }
 0x7ce   : > { %8086 = vmatprep.subr.bf16.mxu0 %v8653_v47 }
 0x7cf   : > { %7954 = vmatprep.mubr.msk.bf16.mxu0 %vm379_vm0, %v4389_v20 }
 0x7da   : > { %v3542_v49 = vpop.f32.mrb[92].mxu0 }
 0x7db   : > { %v7780_v31 = vpop.f32.mrb[93].mxu0 }
 0x7dc   : > { %v3545_v7 = vpop.f32.mrb[94].mxu0 }
 0x7dd   : > { %v4390_v37 = vpack.c.bf16 %v3545_v7, %v3542_v49  ;;  %v7781_v52 = vpop.f32.mrb[95].mxu0 }
 0x7df   : > { %7955 = vmatmul.mubr.msk.bf16.vlgmr.msra.gmra.mrb[124].mxu0 %vm379_vm0, %v4390_v37 }
 0x7e1   : > { %v3662_v21 = vpop.f32.mrb[104].mxu1 }
 0x7e2   : > { %v7804_v25 = vpop.f32.mrb[105].mxu1 }
 0x7e3   : > { %v3665_v63 = vpop.f32.mrb[106].mxu1 }
 0x7e4   : > { %v4392_v45 = vpack.c.bf16 %v3665_v63, %v3662_v21  ;;  %v7805_v28 = vpop.f32.mrb[107].mxu1 }
 0x7ea   : > { %v3602_v44 = vpop.f32.mrb[96].mxu0 }
 0x7eb   : > { %v7792_v0 = vpop.f32.mrb[97].mxu0 }
 0x7ec   : > { %v3605_v53 = vpop.f32.mrb[98].mxu0 }
 0x7ed   : > { %v4391_v43 = vpack.c.bf16 %v3605_v53, %v3602_v44  ;;  %v7793_v8 = vpop.f32.mrb[99].mxu0 }
 0x7ee   : > { %v4625_v8 = vld [vmem:[%s12625_s3 + $0x8] sm:$0xff] }
 0x7ef   : > { %7958 = vmatprep.mubr.msk.bf16.mxu0 %vm379_vm0, %v4391_v43  ;;  %v4407_v43 = vsub.s32 2, %v9078_v15 }
 0x7f0   : > { %7959 = vmatmul.mubr.msk.bf16.gmra.mrb[128].mxu0 %vm379_vm0, %v4392_v45 }
 0x7f1   : > { %v3782_v55 = vpop.f32.mrb[108].mxu1 }
 0x7f2   : > { %v7828_v41 = vpop.f32.mrb[109].mxu1 }
 0x7f3   : > { %v3785_v29 = vpop.f32.mrb[110].mxu1 }
 0x7f4   : > { %v4394_v40 = vpack.c.bf16 %v3785_v29, %v3782_v55  ;;  %v7829_v33 = vpop.f32.mrb[111].mxu1  ;;  %v8605_v55 = vld [vmem:[%s12628_s6] sm:$0xff] }
 0x7f5   : > { %v10748_v41 = vrot.slane %v8605_v55, %v4407_v43 }
 0x7fa   : > { %v3722_v51 = vpop.f32.mrb[100].mxu0 }
 0x7fb   : > { %v7816_v2 = vpop.f32.mrb[101].mxu0 }
 0x7fc   : > { %v3725_v61 = vpop.f32.mrb[102].mxu0 }
 0x7fd   : > { %v4393_v27 = vpack.c.bf16 %v3725_v61, %v3722_v51  ;;  %v7817_v19 = vpop.f32.mrb[103].mxu0 }
 0x7ff   : > { %7962 = vmatprep.mubr.msk.bf16.mxu0 %vm379_vm0, %v4393_v27 }
 0x800   : > { %7963 = vmatmul.mubr.msk.bf16.gmra.mrb[132].mxu0 %vm379_vm0, %v4394_v40 }
 0x801   : > { %v3902_v32 = vpop.f32.mrb[112].mxu1 }
 0x802   : > { %v7852_v18 = vpop.f32.mrb[113].mxu1 }
 0x803   : > { %v3905_v48 = vpop.f32.mrb[114].mxu1 }
 0x804   : > { %v4396_v6 = vpack.c.bf16 %v3905_v48, %v3902_v32  ;;  %v7853_v4 = vpop.f32.mrb[115].mxu1 }
 0x80a   : > { %v3842_v56 = vpop.f32.mrb[104].mxu0 }
 0x80b   : > { %v7840_v12 = vpop.f32.mrb[105].mxu0 }
 0x80c   : > { %v3845_v23 = vpop.f32.mrb[106].mxu0 }
 0x80d   : > { %v4395_v26 = vpack.c.bf16 %v3845_v23, %v3842_v56  ;;  %v7841_v34 = vpop.f32.mrb[107].mxu0 }
 0x80f   : > { %7966 = vmatprep.mubr.msk.bf16.mxu0 %vm379_vm0, %v4395_v26 }
 0x810   : > { %7967 = vmatmul.mubr.msk.bf16.gmra.mrb[136].mxu0 %vm379_vm0, %v4396_v6 }
 0x811   : > { %v4022_v58 = vpop.f32.mrb[116].mxu1 }
 0x812   : > { %v7876_v10 = vpop.f32.mrb[117].mxu1 }
 0x813   : > { %v4025_v54 = vpop.f32.mrb[118].mxu1 }
 0x814   : > { %v4398_v11 = vpack.c.bf16 %v4025_v54, %v4022_v58  ;;  %v7877_v9 = vpop.f32.mrb[119].mxu1 }
 0x81a   : > { %v3962_v59 = vpop.f32.mrb[108].mxu0 }
 0x81b   : > { %v7864_v1 = vpop.f32.mrb[109].mxu0 }
 0x81c   : > { %v3965_v35 = vpop.f32.mrb[110].mxu0 }
 0x81d   : > { %v4397_v16 = vpack.c.bf16 %v3965_v35, %v3962_v59  ;;  %v7865_v13 = vpop.f32.mrb[111].mxu0 }
 0x81f   : > { %7970 = vmatprep.mubr.msk.bf16.mxu0 %vm379_vm0, %v4397_v16 }
 0x820   : > { %7971 = vmatmul.mubr.msk.bf16.gmra.mrb[140].mxu0 %vm379_vm0, %v4398_v11 }
 0x821   : > { %v4142_v22 = vpop.f32.mrb[120].mxu1 }
 0x822   : > { %v7900_v62 = vpop.f32.mrb[121].mxu1 }
 0x823   : > { %v4145_v14 = vpop.f32.mrb[122].mxu1 }
 0x824   : > { %v4400_v50 = vpack.c.bf16 %v4145_v14, %v4142_v22  ;;  %v7901_v5 = vpop.f32.mrb[123].mxu1 }
 0x82a   : > { %v4082_v30 = vpop.f32.mrb[112].mxu0 }
 0x82b   : > { %v7888_v17 = vpop.f32.mrb[113].mxu0 }
 0x82c   : > { %v4085_v36 = vpop.f32.mrb[114].mxu0 }
 0x82d   : > { %v4399_v38 = vpack.c.bf16 %v4085_v36, %v4082_v30  ;;  %v7889_v60 = vpop.f32.mrb[115].mxu0 }
 0x82f   : > { %7974 = vmatprep.mubr.msk.bf16.mxu0 %vm379_vm0, %v4399_v38 }
 0x830   : > { %7975 = vmatmul.mubr.msk.bf16.gmra.mrb[144].mxu0 %vm379_vm0, %v4400_v50 }
 0x831   : > { %v4262_v57 = vpop.f32.mrb[124].mxu1 }
 0x832   : > { %v7924_v42 = vpop.f32.mrb[125].mxu1 }
 0x833   : > { %v4265_v3 = vpop.f32.mrb[126].mxu1 }
 0x834   : > { %v4402_v46 = vpack.c.bf16 %v4265_v3, %v4262_v57  ;;  %v7925_v39 = vpop.f32.mrb[127].mxu1 }
 0x83a   : > { %v4202_v20 = vpop.f32.mrb[116].mxu0 }
 0x83b   : > { %v7912_v24 = vpop.f32.mrb[117].mxu0 }
 0x83c   : > { %v4205_v49 = vpop.f32.mrb[118].mxu0 }
 0x83d   : > { %v4401_v31 = vpack.c.bf16 %v4205_v49, %v4202_v20  ;;  %v7913_v7 = vpop.f32.mrb[119].mxu0 }
 0x83f   : > { %7978 = vmatprep.mubr.msk.bf16.mxu0 %vm379_vm0, %v4401_v31 }
 0x840   : > { %7979 = vmatmul.mubr.msk.bf16.gmra.mrb[148].mxu0 %vm379_vm0, %v4402_v46 }
 0x841   : > { %v4382_v37 = vpop.f32.mrb[128].mxu1 }
 0x842   : > { %v7948_v52 = vpop.f32.mrb[129].mxu1 }
 0x843   : > { %v4385_v21 = vpop.f32.mrb[130].mxu1 }
 0x844   : > { %v4404_v25 = vpack.c.bf16 %v4385_v21, %v4382_v37  ;;  %v7949_v63 = vpop.f32.mrb[131].mxu1 }
 0x84a   : > { %v4322_v45 = vpop.f32.mrb[120].mxu0 }
 0x84b   : > { %v7936_v28 = vpop.f32.mrb[121].mxu0 }
 0x84c   : > { %v4325_v44 = vpop.f32.mrb[122].mxu0 }
 0x84d   : > { %v4403_v0 = vpack.c.bf16 %v4325_v44, %v4322_v45  ;;  %v7937_v53 = vpop.f32.mrb[123].mxu0 }
 0x84f   : > { %7982 = vmatprep.mubr.msk.bf16.mxu0 %vm379_vm0, %v4403_v0 }
 0x850   : > { %7983 = vmatmul.mubr.msk.bf16.gmra.mrb[152].mxu0 %vm379_vm0, %v4404_v25 }
 0x851   : > { %4752 = vmatprep.mubr.f32.mxu0 %v4625_v8 }
 0x8b2   : > { %v7956_v29 = vpop.f32.mrb[124].mxu0 }
 0x8b3   : > { %v4497_v40 = vpop.f32.mrb[125].mxu0  ;;  %v4506_v51 = vadd.f32 %v7956_v29, %v10748_v41 }
 0x8b4   : > { %v7957_v33 = vpop.f32.mrb[126].mxu0  ;;  %v4498_v27 = vadd.f32 %v4497_v40, %v10748_v41 }
 0x8b5   : > { %v4509_v2 = vadd.f32 %v7957_v33, %v10748_v41  ;;  %v4500_v61 = vpop.f32.mrb[127].mxu0 }
 0x8b6   : > { %v4501_v19 = vadd.f32 %v4500_v61, %v10748_v41 }
 0x8b7   : > { %v8090_v32 = vpack.c.bf16 %v4509_v2, %v4506_v51 }
 0x8b8   : > { %v8087_v18 = vpack.c.bf16 %v4501_v19, %v4498_v27 }
 0x8ba   : > { %8088 = vmatpush1.bf16.msra.mxu0 %v8087_v18 }
 0x8bb   : > { %8089 = vmatprep.subr.bf16.mxu0 %v8653_v47 }
 0x8be   : > { %8091 = vmatpush1.bf16.msra.mxu0 %v8090_v32 }
 0x8bf   : > { %8092 = vmatprep.subr.bf16.mxu0 %v8653_v47 }
 0x8c3   : > { %v7960_v48 = vpop.f32.mrb[128].mxu0 }
 0x8c4   : > { %v4513_v6 = vpop.f32.mrb[129].mxu0  ;;  %v4522_v56 = vadd.f32 %v7960_v48, %v10748_v41 }
 0x8c5   : > { %v7961_v4 = vpop.f32.mrb[130].mxu0  ;;  %v4514_v26 = vadd.f32 %v4513_v6, %v10748_v41 }
 0x8c6   : > { %v4525_v12 = vadd.f32 %v7961_v4, %v10748_v41  ;;  %v4516_v23 = vpop.f32.mrb[131].mxu0 }
 0x8c7   : > { %v4517_v34 = vadd.f32 %v4516_v23, %v10748_v41 }
 0x8c8   : > { %v8096_v58 = vpack.c.bf16 %v4525_v12, %v4522_v56 }
 0x8c9   : > { %v8093_v10 = vpack.c.bf16 %v4517_v34, %v4514_v26 }
 0x8cb   : > { %8094 = vmatpush1.bf16.msra.mxu0 %v8093_v10  ;;  %v4624_v10 = vld [vmem:[%s12625_s3] sm:$0xff] }
 0x8cc   : > { %8095 = vmatprep.subr.bf16.mxu0 %v8653_v47 }
 0x8cf   : > { %8097 = vmatpush1.bf16.msra.mxu0 %v8096_v58 }
 0x8d0   : > { %8098 = vmatprep.subr.bf16.mxu0 %v8653_v47 }
 0x8d3   : > { %v7964_v54 = vpop.f32.mrb[132].mxu0 }
 0x8d4   : > { %v4529_v11 = vpop.f32.mrb[133].mxu0  ;;  %v4538_v59 = vadd.f32 %v7964_v54, %v10748_v41  ;;  %v4627_v54 = vld [vmem:[%s12625_s3 + $0x18] sm:$0xff] }
 0x8d5   : > { %v7965_v9 = vpop.f32.mrb[134].mxu0  ;;  %v4530_v16 = vadd.f32 %v4529_v11, %v10748_v41  ;;  %v4629_v11 = vld [vmem:[%s12625_s3 + $0x28] sm:$0xff] }
 0x8d6   : > { %v4541_v1 = vadd.f32 %v7965_v9, %v10748_v41  ;;  %v4532_v35 = vpop.f32.mrb[135].mxu0  ;;  %v4631_v9 = vld [vmem:[%s12625_s3 + $0x38] sm:$0xff] }
 0x8d7   : > { %v4533_v13 = vadd.f32 %v4532_v35, %v10748_v41  ;;  %v4632_v35 = vld [vmem:[%s12625_s3 + $0x40] sm:$0xff] }
 0x8d8   : > { %v8102_v22 = vpack.c.bf16 %v4541_v1, %v4538_v59  ;;  %v4630_v59 = vld [vmem:[%s12625_s3 + $0x30] sm:$0xff]  ;;  %v4633_v1 = vld [vmem:[%s12625_s3 + $0x48] sm:$0xff] }
 0x8d9   : > { %v8099_v62 = vpack.c.bf16 %v4533_v13, %v4530_v16  ;;  %v4635_v16 = vld [vmem:[%s12625_s3 + $0x58] sm:$0xff]  ;;  %v4634_v13 = vld [vmem:[%s12625_s3 + $0x50] sm:$0xff] }
 0x8db   : > { %8100 = vmatpush1.bf16.msra.mxu0 %v8099_v62  ;;  %v4636_v62 = vld [vmem:[%s12625_s3 + $0x60] sm:$0xff] }
 0x8dc   : > { %8101 = vmatprep.subr.bf16.mxu0 %v8653_v47 }
 0x8df   : > { %8103 = vmatpush1.bf16.msra.mxu0 %v8102_v22  ;;  %v4637_v22 = vld [vmem:[%s12625_s3 + $0x68] sm:$0xff] }
 0x8e0   : > { %8104 = vmatprep.subr.bf16.mxu0 %v8653_v47 }
 0x8e3   : > { %v7968_v14 = vpop.f32.mrb[136].mxu0 }
 0x8e4   : > { %v4545_v50 = vpop.f32.mrb[137].mxu0  ;;  %v4554_v30 = vadd.f32 %v7968_v14, %v10748_v41  ;;  %v4639_v14 = vld [vmem:[%s12625_s3 + $0x78] sm:$0xff] }
 0x8e5   : > { %v7969_v5 = vpop.f32.mrb[138].mxu0  ;;  %v4546_v38 = vadd.f32 %v4545_v50, %v10748_v41  ;;  %v4638_v50 = vld [vmem:[%s12625_s3 + $0x70] sm:$0xff] }
 0x8e6   : > { %v4557_v17 = vadd.f32 %v7969_v5, %v10748_v41  ;;  %v4548_v36 = vpop.f32.mrb[139].mxu0  ;;  %v4641_v5 = vld [vmem:[%s12625_s3 + $0x88] sm:$0xff] }
 0x8e7   : > { %v4549_v60 = vadd.f32 %v4548_v36, %v10748_v41  ;;  %v4642_v36 = vld [vmem:[%s12625_s3 + $0x90] sm:$0xff] }
 0x8e8   : > { %v8108_v57 = vpack.c.bf16 %v4557_v17, %v4554_v30  ;;  %v4640_v30 = vld [vmem:[%s12625_s3 + $0x80] sm:$0xff]  ;;  %v4643_v17 = vld [vmem:[%s12625_s3 + $0x98] sm:$0xff] }
 0x8e9   : > { %v8105_v42 = vpack.c.bf16 %v4549_v60, %v4546_v38  ;;  %v4645_v38 = vld [vmem:[%s12625_s3 + $0xa8] sm:$0xff]  ;;  %v4644_v60 = vld [vmem:[%s12625_s3 + $0xa0] sm:$0xff] }
 0x8eb   : > { %8106 = vmatpush1.bf16.msra.mxu0 %v8105_v42  ;;  %v4646_v42 = vld [vmem:[%s12625_s3 + $0xb0] sm:$0xff] }
 0x8ec   : > { %8107 = vmatprep.subr.bf16.mxu0 %v8653_v47 }
 0x8ef   : > { %8109 = vmatpush1.bf16.msra.mxu0 %v8108_v57  ;;  %v4647_v57 = vld [vmem:[%s12625_s3 + $0xb8] sm:$0xff] }
 0x8f0   : > { %8110 = vmatprep.subr.bf16.mxu0 %v8653_v47 }
 0x8f3   : > { %v7972_v3 = vpop.f32.mrb[140].mxu0 }
 0x8f4   : > { %v4561_v46 = vpop.f32.mrb[141].mxu0  ;;  %v4570_v20 = vadd.f32 %v7972_v3, %v10748_v41  ;;  %v4649_v3 = vld [vmem:[%s12625_s3 + $0xc8] sm:$0xff] }
 0x8f5   : > { %v7973_v39 = vpop.f32.mrb[142].mxu0  ;;  %v4562_v31 = vadd.f32 %v4561_v46, %v10748_v41  ;;  %v4648_v46 = vld [vmem:[%s12625_s3 + $0xc0] sm:$0xff] }
 0x8f6   : > { %v4573_v24 = vadd.f32 %v7973_v39, %v10748_v41  ;;  %v4564_v49 = vpop.f32.mrb[143].mxu0  ;;  %v4651_v39 = vld [vmem:[%s12625_s3 + $0xd8] sm:$0xff] }
 0x8f7   : > { %v4565_v7 = vadd.f32 %v4564_v49, %v10748_v41  ;;  %v4652_v49 = vld [vmem:[%s12625_s3 + $0xe0] sm:$0xff] }
 0x8f8   : > { %v8114_v37 = vpack.c.bf16 %v4573_v24, %v4570_v20  ;;  %v4650_v20 = vld [vmem:[%s12625_s3 + $0xd0] sm:$0xff]  ;;  %v4653_v24 = vld [vmem:[%s12625_s3 + $0xe8] sm:$0xff] }
 0x8f9   : > { %v8111_v52 = vpack.c.bf16 %v4565_v7, %v4562_v31  ;;  %v4655_v31 = vld [vmem:[%s12625_s3 + $0xf8] sm:$0xff]  ;;  %v4654_v7 = vld [vmem:[%s12625_s3 + $0xf0] sm:$0xff] }
 0x8fb   : > { %8112 = vmatpush1.bf16.msra.mxu0 %v8111_v52  ;;  %v4656_v52 = vld [vmem:[%s12625_s3 + $0x100] sm:$0xff] }
 0x8fc   : > { %8113 = vmatprep.subr.bf16.mxu0 %v8653_v47 }
 0x8ff   : > { %8115 = vmatpush1.bf16.msra.mxu0 %v8114_v37  ;;  %v4657_v37 = vld [vmem:[%s12625_s3 + $0x108] sm:$0xff] }
 0x900   : > { %8116 = vmatprep.subr.bf16.mxu0 %v8653_v47 }
 0x903   : > { %v7976_v21 = vpop.f32.mrb[144].mxu0 }
 0x904   : > { %v4577_v25 = vpop.f32.mrb[145].mxu0  ;;  %v4586_v45 = vadd.f32 %v7976_v21, %v10748_v41  ;;  %v4659_v21 = vld [vmem:[%s12625_s3 + $0x118] sm:$0xff] }
 0x905   : > { %v7977_v63 = vpop.f32.mrb[146].mxu0  ;;  %v4578_v0 = vadd.f32 %v4577_v25, %v10748_v41  ;;  %v4658_v25 = vld [vmem:[%s12625_s3 + $0x110] sm:$0xff] }
 0x906   : > { %v4589_v28 = vadd.f32 %v7977_v63, %v10748_v41  ;;  %v4580_v44 = vpop.f32.mrb[147].mxu0  ;;  %v4661_v63 = vld [vmem:[%s12625_s3 + $0x128] sm:$0xff] }
 0x907   : > { %v4581_v53 = vadd.f32 %v4580_v44, %v10748_v41  ;;  %v4662_v44 = vld [vmem:[%s12625_s3 + $0x130] sm:$0xff] }
 0x908   : > { %v8120_v43 = vpack.c.bf16 %v4589_v28, %v4586_v45  ;;  %v4660_v45 = vld [vmem:[%s12625_s3 + $0x120] sm:$0xff]  ;;  %v4663_v28 = vld [vmem:[%s12625_s3 + $0x138] sm:$0xff] }
 0x909   : > { %v8117_v8 = vpack.c.bf16 %v4581_v53, %v4578_v0  ;;  %v4665_v0 = vld [vmem:[%s12625_s3 + $0x148] sm:$0xff]  ;;  %v4664_v53 = vld [vmem:[%s12625_s3 + $0x140] sm:$0xff] }
 0x90b   : > { %8118 = vmatpush1.bf16.msra.mxu0 %v8117_v8  ;;  %v4666_v8 = vld [vmem:[%s12625_s3 + $0x150] sm:$0xff] }
 0x90c   : > { %8119 = vmatprep.subr.bf16.mxu0 %v8653_v47 }
 0x90f   : > { %8121 = vmatpush1.bf16.msra.mxu0 %v8120_v43  ;;  %v4667_v43 = vld [vmem:[%s12625_s3 + $0x158] sm:$0xff] }
 0x910   : > { %8122 = vmatprep.subr.bf16.mxu0 %v8653_v47 }
 0x913   : > { %v7980_v55 = vpop.f32.mrb[148].mxu0 }
 0x914   : > { %v4593_v29 = vpop.f32.mrb[149].mxu0  ;;  %v4602_v33 = vadd.f32 %v7980_v55, %v10748_v41  ;;  %v4669_v55 = vld [vmem:[%s12625_s3 + $0x168] sm:$0xff] }
 0x915   : > { %v7981_v40 = vpop.f32.mrb[150].mxu0  ;;  %v4594_v61 = vadd.f32 %v4593_v29, %v10748_v41  ;;  %v4668_v29 = vld [vmem:[%s12625_s3 + $0x160] sm:$0xff] }
 0x916   : > { %v4605_v51 = vadd.f32 %v7981_v40, %v10748_v41  ;;  %v4596_v2 = vpop.f32.mrb[151].mxu0  ;;  %v4671_v40 = vld [vmem:[%s12625_s3 + $0x178] sm:$0xff] }
 0x917   : > { %v4597_v27 = vadd.f32 %v4596_v2, %v10748_v41  ;;  %v4672_v2 = vld [vmem:[%s12625_s3 + $0x180] sm:$0xff] }
 0x918   : > { %v8126_v19 = vpack.c.bf16 %v4605_v51, %v4602_v33  ;;  %v4670_v33 = vld [vmem:[%s12625_s3 + $0x170] sm:$0xff]  ;;  %v4673_v51 = vld [vmem:[%s12625_s3 + $0x188] sm:$0xff] }
 0x919   : > { %v8123_v32 = vpack.c.bf16 %v4597_v27, %v4594_v61  ;;  %v4675_v61 = vld [vmem:[%s12625_s3 + $0x198] sm:$0xff]  ;;  %v4674_v27 = vld [vmem:[%s12625_s3 + $0x190] sm:$0xff] }
 0x91b   : > { %8124 = vmatpush1.bf16.msra.mxu0 %v8123_v32  ;;  %v4676_v32 = vld [vmem:[%s12625_s3 + $0x1a0] sm:$0xff] }
 0x91c   : > { %8125 = vmatprep.subr.bf16.mxu0 %v8653_v47 }
 0x91f   : > { %8127 = vmatpush1.bf16.msra.mxu0 %v8126_v19  ;;  %v4677_v19 = vld [vmem:[%s12625_s3 + $0x1a8] sm:$0xff] }
 0x920   : > { %8128 = vmatprep.subr.bf16.mxu0 %v8653_v47 }
 0x923   : > { %v7984_v18 = vpop.f32.mrb[152].mxu0 }
 0x924   : > { %v4609_v48 = vpop.f32.mrb[153].mxu0  ;;  %v4618_v4 = vadd.f32 %v7984_v18, %v10748_v41  ;;  %v4679_v18 = vld [vmem:[%s12625_s3 + $0x1b8] sm:$0xff] }
 0x925   : > { %v7985_v6 = vpop.f32.mrb[154].mxu0  ;;  %v4610_v23 = vadd.f32 %v4609_v48, %v10748_v41  ;;  %v4678_v48 = vld [vmem:[%s12625_s3 + $0x1b0] sm:$0xff] }
 0x926   : > { %v4621_v56 = vadd.f32 %v7985_v6, %v10748_v41  ;;  %v4612_v12 = vpop.f32.mrb[155].mxu0  ;;  %v4681_v6 = vld [vmem:[%s12625_s3 + $0x1c8] sm:$0xff] }
 0x927   : > { %v4613_v26 = vadd.f32 %v4612_v12, %v10748_v41  ;;  %v4626_v41 = vld [vmem:[%s12625_s3 + $0x10] sm:$0xff] }
 0x928   : > { %v8132_v34 = vpack.c.bf16 %v4621_v56, %v4618_v4  ;;  %v4680_v4 = vld [vmem:[%s12625_s3 + $0x1c0] sm:$0xff]  ;;  %v4683_v56 = vld [vmem:[%s12625_s3 + $0x1d8] sm:$0xff]  ;;  %v4682_v12 = vld [vmem:[%s12625_s3 + $0x1d0] sm:$0xff] }
 0x929   : > { %v8129_v58 = vpack.c.bf16 %v4613_v26, %v4610_v23  ;;  %v4685_v23 = vld [vmem:[%s12625_s3 + $0x1e8] sm:$0xff]  ;;  %v4684_v26 = vld [vmem:[%s12625_s3 + $0x1e0] sm:$0xff] }
 0x92b   : > { %8130 = vmatpush1.bf16.msra.mxu0 %v8129_v58  ;;  %v4686_v58 = vld [vmem:[%s12625_s3 + $0x1f0] sm:$0xff] }
 0x92c   : > { %8131 = vmatprep.subr.bf16.mxu0 %v8653_v47  ;;  %v4628_v47 = vld [vmem:[%s12625_s3 + $0x20] sm:$0xff] }
 0x92f   : > { %8133 = vmatpush1.bf16.msra.mxu0 %v8132_v34  ;;  %v4687_v34 = vld [vmem:[%s12625_s3 + $0x1f8] sm:$0xff] }
 0x932   : > { %4753 = vmatmul.mubr.f32.vlgmr.msra.gmra.mrb[156].mxu0 %v4624_v10 }
 0x933   : > { %4757 = vmatprep.mubr.f32.mxu0 %v4627_v54  ;;  %v8606_v54 = vld [vmem:[%s8721_s15] sm:$0xff] }
 0x936   : > { %4758 = vmatmul.mubr.f32.gmra.mrb[158].mxu0 %v4626_v41 }
 0x937   : > { %4762 = vmatprep.mubr.f32.mxu0 %v4629_v11 }
 0x93a   : > { %4763 = vmatmul.mubr.f32.gmra.mrb[160].mxu0 %v4628_v47 }
 0x93b   : > { %4767 = vmatprep.mubr.f32.mxu0 %v4631_v9 }
 0x93e   : > { %4768 = vmatmul.mubr.f32.gmra.mrb[162].mxu0 %v4630_v59  ;;  %v8607_v59 = vld [vmem:[%s8721_s15 + $0x8] sm:$0xff] }
 0x93f   : > { %4772 = vmatprep.mubr.f32.mxu0 %v4633_v1 }
 0x942   : > { %4773 = vmatmul.mubr.f32.gmra.mrb[164].mxu0 %v4632_v35 }
 0x943   : > { %4777 = vmatprep.mubr.f32.mxu0 %v4635_v16 }
 0x946   : > { %4778 = vmatmul.mubr.f32.gmra.mrb[166].mxu0 %v4634_v13 }
 0x947   : > { %4782 = vmatprep.mubr.f32.mxu0 %v4637_v22  ;;  %v8608_v22 = vld [vmem:[%s8721_s15 + $0x10] sm:$0xff] }
 0x94a   : > { %4783 = vmatmul.mubr.f32.gmra.mrb[168].mxu0 %v4636_v62 }
 0x94b   : > { %4787 = vmatprep.mubr.f32.mxu0 %v4639_v14 }
 0x94e   : > { %4788 = vmatmul.mubr.f32.gmra.mrb[170].mxu0 %v4638_v50 }
 0x94f   : > { %4792 = vmatprep.mubr.f32.mxu0 %v4641_v5 }
 0x952   : > { %4793 = vmatmul.mubr.f32.gmra.mrb[172].mxu0 %v4640_v30  ;;  %v8609_v30 = vld [vmem:[%s8721_s15 + $0x18] sm:$0xff] }
 0x953   : > { %4797 = vmatprep.mubr.f32.mxu0 %v4643_v17 }
 0x956   : > { %4798 = vmatmul.mubr.f32.gmra.mrb[174].mxu0 %v4642_v36 }
 0x957   : > { %4802 = vmatprep.mubr.f32.mxu0 %v4645_v38 }
 0x95a   : > { %4803 = vmatmul.mubr.f32.gmra.mrb[176].mxu0 %v4644_v60 }
 0x95b   : > { %4807 = vmatprep.mubr.f32.mxu0 %v4647_v57  ;;  %v8610_v57 = vld [vmem:[%s8721_s15 + $0x20] sm:$0xff] }
 0x95e   : > { %4808 = vmatmul.mubr.f32.gmra.mrb[178].mxu0 %v4646_v42 }
 0x95f   : > { %4812 = vmatprep.mubr.f32.mxu0 %v4649_v3 }
 0x962   : > { %4813 = vmatmul.mubr.f32.gmra.mrb[180].mxu0 %v4648_v46 }
 0x963   : > { %4817 = vmatprep.mubr.f32.mxu0 %v4651_v39 }
 0x966   : > { %4818 = vmatmul.mubr.f32.gmra.mrb[182].mxu0 %v4650_v20  ;;  %v8611_v20 = vld [vmem:[%s8721_s15 + $0x28] sm:$0xff] }
 0x967   : > { %4822 = vmatprep.mubr.f32.mxu0 %v4653_v24 }
 0x96a   : > { %4823 = vmatmul.mubr.f32.gmra.mrb[184].mxu0 %v4652_v49 }
 0x96b   : > { %4827 = vmatprep.mubr.f32.mxu0 %v4655_v31 }
 0x96e   : > { %4828 = vmatmul.mubr.f32.gmra.mrb[186].mxu0 %v4654_v7 }
 0x96f   : > { %4832 = vmatprep.mubr.f32.mxu0 %v4657_v37  ;;  %v8612_v37 = vld [vmem:[%s8721_s15 + $0x30] sm:$0xff] }
 0x972   : > { %4833 = vmatmul.mubr.f32.gmra.mrb[188].mxu0 %v4656_v52 }
 0x973   : > { %4837 = vmatprep.mubr.f32.mxu0 %v4659_v21 }
 0x976   : > { %4838 = vmatmul.mubr.f32.gmra.mrb[190].mxu0 %v4658_v25 }
 0x977   : > { %4842 = vmatprep.mubr.f32.mxu0 %v4661_v63 }
 0x97a   : > { %4843 = vmatmul.mubr.f32.gmra.mrb[192].mxu0 %v4660_v45  ;;  %v8613_v45 = vld [vmem:[%s8721_s15 + $0x38] sm:$0xff] }
 0x97b   : > { %4847 = vmatprep.mubr.f32.mxu0 %v4663_v28 }
 0x97e   : > { %4848 = vmatmul.mubr.f32.gmra.mrb[194].mxu0 %v4662_v44 }
 0x97f   : > { %4852 = vmatprep.mubr.f32.mxu0 %v4665_v0 }
 0x982   : > { %4853 = vmatmul.mubr.f32.gmra.mrb[196].mxu0 %v4664_v53 }
 0x983   : > { %4857 = vmatprep.mubr.f32.mxu0 %v4667_v43  ;;  %v8614_v43 = vld [vmem:[%s8721_s15 + $0x40] sm:$0xff] }
 0x986   : > { %4858 = vmatmul.mubr.f32.gmra.mrb[198].mxu0 %v4666_v8 }
 0x987   : > { %4862 = vmatprep.mubr.f32.mxu0 %v4669_v55 }
 0x98a   : > { %4863 = vmatmul.mubr.f32.gmra.mrb[200].mxu0 %v4668_v29 }
 0x98b   : > { %4867 = vmatprep.mubr.f32.mxu0 %v4671_v40 }
 0x98e   : > { %4868 = vmatmul.mubr.f32.gmra.mrb[202].mxu0 %v4670_v33  ;;  %v8615_v33 = vld [vmem:[%s8721_s15 + $0x48] sm:$0xff] }
 0x98f   : > { %4872 = vmatprep.mubr.f32.mxu0 %v4673_v51 }
 0x992   : > { %4873 = vmatmul.mubr.f32.gmra.mrb[204].mxu0 %v4672_v2 }
 0x993   : > { %4877 = vmatprep.mubr.f32.mxu0 %v4675_v61 }
 0x996   : > { %4878 = vmatmul.mubr.f32.gmra.mrb[206].mxu0 %v4674_v27 }
 0x997   : > { %4882 = vmatprep.mubr.f32.mxu0 %v4677_v19  ;;  %v8616_v19 = vld [vmem:[%s8721_s15 + $0x50] sm:$0xff] }
 0x99a   : > { %4883 = vmatmul.mubr.f32.gmra.mrb[208].mxu0 %v4676_v32 }
 0x99b   : > { %4887 = vmatprep.mubr.f32.mxu0 %v4679_v18 }
 0x99e   : > { %4888 = vmatmul.mubr.f32.gmra.mrb[210].mxu0 %v4678_v48 }
 0x99f   : > { %4892 = vmatprep.mubr.f32.mxu0 %v4681_v6 }
 0x9a2   : > { %4893 = vmatmul.mubr.f32.gmra.mrb[212].mxu0 %v4680_v4  ;;  %v8617_v4 = vld [vmem:[%s8721_s15 + $0x58] sm:$0xff] }
 0x9a3   : > { %4897 = vmatprep.mubr.f32.mxu0 %v4683_v56 }
 0x9a6   : > { %4898 = vmatmul.mubr.f32.gmra.mrb[214].mxu0 %v4682_v12 }
 0x9a7   : > { %4902 = vmatprep.mubr.f32.mxu0 %v4685_v23 }
 0x9aa   : > { %4903 = vmatmul.mubr.f32.gmra.mrb[216].mxu0 %v4684_v26 }
 0x9ab   : > { %4907 = vmatprep.mubr.f32.mxu0 %v4687_v34  ;;  %v8618_v34 = vld [vmem:[%s8721_s15 + $0x60] sm:$0xff] }
 0x9ae   : > { %4908 = vmatmul.mubr.f32.gmra.mrb[218].mxu0 %v4686_v58 }
 0xa05   : > { %v4754_v10 = vpop.f32.mrb[156].mxu0 }
 0xa06   : > { %v10987_v41 = vadd.f32 %v8606_v54, %v4754_v10  ;;  %v4756_v11 = vpop.f32.mrb[157].mxu0 }
 0xa08   : > { %12673 = vst [vmem:[#allocation3_spill] sm:$0xff] %v10987_v41  ;;  %v4945_v47 = vsel %vm379_vm0, %v10987_v41, 0.0 }
 0xa09   : > { %4946 = vadd.xlane.f32.xlu0 %v4945_v47  ;;  %v4759_v9 = vpop.f32.mrb[158].mxu0  ;;  %v8619_v47 = vld [vmem:[%s8721_s15 + $0x68] sm:$0xff] }
 0xa0a   : > { %v10992_v1 = vadd.f32 %v8607_v59, %v4759_v9  ;;  %v4761_v35 = vpop.f32.mrb[159].mxu0 }
 0xa0c   : > { %12674 = vst [vmem:[#allocation4_spill] sm:$0xff] %v10992_v1  ;;  %v4948_v16 = vsel %vm379_vm0, %v10992_v1, 0.0 }
 0xa0d   : > { %4949 = vadd.xlane.f32.xlu1 %v4948_v16  ;;  %v4764_v13 = vpop.f32.mrb[160].mxu0 }
 0xa0e   : > { %v10997_v62 = vadd.f32 %v8608_v22, %v4764_v13  ;;  %v4766_v14 = vpop.f32.mrb[161].mxu0  ;;  %v8620_v13 = vld [vmem:[%s8721_s15 + $0x70] sm:$0xff] }
 0xa10   : > { %12675 = vst [vmem:[#allocation5_spill] sm:$0xff] %v10997_v62  ;;  %v4951_v50 = vsel %vm379_vm0, %v10997_v62, 0.0 }
 0xa11   : > { %4952 = vadd.xlane.f32.xlu0 %v4951_v50  ;;  %v4769_v5 = vpop.f32.mrb[162].mxu0 }
 0xa12   : > { %v11002_v17 = vadd.f32 %v8609_v30, %v4769_v5  ;;  %v4771_v36 = vpop.f32.mrb[163].mxu0  ;;  %v8621_v30 = vld [vmem:[%s8721_s15 + $0x78] sm:$0xff] }
 0xa14   : > { %12676 = vst [vmem:[#allocation6_spill] sm:$0xff] %v11002_v17  ;;  %v4954_v38 = vsel %vm379_vm0, %v11002_v17, 0.0 }
 0xa15   : > { %4955 = vadd.xlane.f32.xlu0 %v4954_v38  ;;  %v4774_v60 = vpop.f32.mrb[164].mxu0 }
 0xa16   : > { %v11007_v42 = vadd.f32 %v8610_v57, %v4774_v60  ;;  %v4776_v3 = vpop.f32.mrb[165].mxu0 }
 0xa17   : > { %v8622_v3 = vld [vmem:[%s8721_s15 + $0x80] sm:$0xff] }
 0xa18   : > { %12677 = vst [vmem:[#allocation7_spill] sm:$0xff] %v11007_v42  ;;  %v4957_v46 = vsel %vm379_vm0, %v11007_v42, 0.0 }
 0xa19   : > { %4958 = vadd.xlane.f32.xlu0 %v4957_v46  ;;  %v4779_v39 = vpop.f32.mrb[166].mxu0 }
 0xa1a   : > { %v11012_v24 = vadd.f32 %v8611_v20, %v4779_v39  ;;  %v4781_v49 = vpop.f32.mrb[167].mxu0 }
 0xa1c   : > { %12678 = vst [vmem:[#allocation8_spill] sm:$0xff] %v11012_v24  ;;  %v4960_v31 = vsel %vm379_vm0, %v11012_v24, 0.0 }
 0xa1d   : > { %4961 = vadd.xlane.f32.xlu1 %v4960_v31  ;;  %v4784_v7 = vpop.f32.mrb[168].mxu0  ;;  %v8623_v31 = vld [vmem:[%s8721_s15 + $0x88] sm:$0xff] }
 0xa1e   : > { %v11017_v52 = vadd.f32 %v8612_v37, %v4784_v7  ;;  %v4786_v21 = vpop.f32.mrb[169].mxu0 }
 0xa20   : > { %12679 = vst [vmem:[#allocation9_spill] sm:$0xff] %v11017_v52  ;;  %v4963_v25 = vsel %vm379_vm0, %v11017_v52, 0.0 }
 0xa21   : > { %4964 = vadd.xlane.f32.xlu0 %v4963_v25  ;;  %v4789_v63 = vpop.f32.mrb[170].mxu0 }
 0xa22   : > { %v11022_v28 = vadd.f32 %v8613_v45, %v4789_v63  ;;  %v4791_v44 = vpop.f32.mrb[171].mxu0  ;;  %v8624_v63 = vld [vmem:[%s8721_s15 + $0x90] sm:$0xff] }
 0xa24   : > { %12680 = vst [vmem:[#allocation10_spill] sm:$0xff] %v11022_v28  ;;  %v4966_v0 = vsel %vm379_vm0, %v11022_v28, 0.0 }
 0xa25   : > { %4967 = vadd.xlane.f32.xlu1 %v4966_v0  ;;  %v4794_v53 = vpop.f32.mrb[172].mxu0 }
 0xa26   : > { %v11027_v8 = vadd.f32 %v8614_v43, %v4794_v53  ;;  %v4796_v55 = vpop.f32.mrb[173].mxu0  ;;  %v8625_v43 = vld [vmem:[%s8721_s15 + $0x98] sm:$0xff] }
 0xa28   : > { %12681 = vst [vmem:[#allocation11_spill] sm:$0xff] %v11027_v8  ;;  %v4969_v29 = vsel %vm379_vm0, %v11027_v8, 0.0 }
 0xa29   : > { %4970 = vadd.xlane.f32.xlu0 %v4969_v29  ;;  %v4799_v40 = vpop.f32.mrb[174].mxu0 }
 0xa2a   : > { %v11032_v51 = vadd.f32 %v8615_v33, %v4799_v40  ;;  %v4801_v2 = vpop.f32.mrb[175].mxu0 }
 0xa2b   : > { %v8626_v2 = vld [vmem:[%s8721_s15 + $0xa0] sm:$0xff] }
 0xa2c   : > { %12682 = vst [vmem:[#allocation12_spill] sm:$0xff] %v11032_v51  ;;  %v4972_v61 = vsel %vm379_vm0, %v11032_v51, 0.0 }
 0xa2d   : > { %4973 = vadd.xlane.f32.xlu1 %v4972_v61  ;;  %v4804_v27 = vpop.f32.mrb[176].mxu0 }
 0xa2e   : > { %v11037_v32 = vadd.f32 %v8616_v19, %v4804_v27  ;;  %v4806_v18 = vpop.f32.mrb[177].mxu0 }
 0xa30   : > { %12683 = vst [vmem:[#allocation13_spill] sm:$0xff] %v11037_v32  ;;  %v4975_v48 = vsel %vm379_vm0, %v11037_v32, 0.0 }
 0xa31   : > { %4976 = vadd.xlane.f32.xlu0 %v4975_v48  ;;  %v4809_v6 = vpop.f32.mrb[178].mxu0  ;;  %v8627_v48 = vld [vmem:[%s8721_s15 + $0xa8] sm:$0xff] }
 0xa32   : > { %v11042_v56 = vadd.f32 %v8617_v4, %v4809_v6  ;;  %v4811_v12 = vpop.f32.mrb[179].mxu0 }
 0xa34   : > { %12684 = vst [vmem:[#allocation14_spill] sm:$0xff] %v11042_v56  ;;  %v4978_v23 = vsel %vm379_vm0, %v11042_v56, 0.0 }
 0xa35   : > { %4979 = vadd.xlane.f32.xlu1 %v4978_v23  ;;  %v4814_v26 = vpop.f32.mrb[180].mxu0 }
 0xa36   : > { %v11047_v58 = vadd.f32 %v8618_v34, %v4814_v26  ;;  %v4816_v10 = vpop.f32.mrb[181].mxu0  ;;  %v8628_v26 = vld [vmem:[%s8721_s15 + $0xb0] sm:$0xff] }
 0xa38   : > { %12685 = vst [vmem:[#allocation15_spill] sm:$0xff] %v11047_v58  ;;  %v4981_v54 = vsel %vm379_vm0, %v11047_v58, 0.0 }
 0xa39   : > { %4982 = vadd.xlane.f32.xlu0 %v4981_v54  ;;  %v4819_v11 = vpop.f32.mrb[182].mxu0 }
 0xa3a   : > { %v11052_v9 = vadd.f32 %v8619_v47, %v4819_v11  ;;  %v4821_v59 = vpop.f32.mrb[183].mxu0  ;;  %v8629_v47 = vld [vmem:[%s8721_s15 + $0xb8] sm:$0xff] }
 0xa3c   : > { %12686 = vst [vmem:[#allocation16_spill] sm:$0xff] %v11052_v9  ;;  %v4984_v35 = vsel %vm379_vm0, %v11052_v9, 0.0 }
 0xa3d   : > { %4985 = vadd.xlane.f32.xlu1 %v4984_v35  ;;  %v4824_v16 = vpop.f32.mrb[184].mxu0 }
 0xa3e   : > { %v11057_v22 = vadd.f32 %v8620_v13, %v4824_v16  ;;  %v4826_v14 = vpop.f32.mrb[185].mxu0 }
 0xa3f   : > { %v8630_v14 = vld [vmem:[%s8721_s15 + $0xc0] sm:$0xff] }
 0xa40   : > { %12687 = vst [vmem:[#allocation17_spill] sm:$0xff] %v11057_v22  ;;  %v4987_v50 = vsel %vm379_vm0, %v11057_v22, 0.0 }
 0xa41   : > { %4988 = vadd.xlane.f32.xlu0 %v4987_v50  ;;  %v4829_v5 = vpop.f32.mrb[186].mxu0 }
 0xa42   : > { %v11062_v36 = vadd.f32 %v8621_v30, %v4829_v5  ;;  %v4831_v38 = vpop.f32.mrb[187].mxu0 }
 0xa44   : > { %12688 = vst [vmem:[#allocation18_spill] sm:$0xff] %v11062_v36  ;;  %v4990_v60 = vsel %vm379_vm0, %v11062_v36, 0.0 }
 0xa45   : > { %4991 = vadd.xlane.f32.xlu1 %v4990_v60  ;;  %v4834_v57 = vpop.f32.mrb[188].mxu0  ;;  %v8631_v60 = vld [vmem:[%s8721_s15 + $0xc8] sm:$0xff] }
 0xa46   : > { %v11067_v46 = vadd.f32 %v8622_v3, %v4834_v57  ;;  %v4836_v39 = vpop.f32.mrb[189].mxu0 }
 0xa48   : > { %12689 = vst [vmem:[#allocation19_spill] sm:$0xff] %v11067_v46  ;;  %v4993_v20 = vsel %vm379_vm0, %v11067_v46, 0.0 }
 0xa49   : > { %4994 = vadd.xlane.f32.xlu0 %v4993_v20  ;;  %v4839_v49 = vpop.f32.mrb[190].mxu0 }
 0xa4a   : > { %v11072_v7 = vadd.f32 %v8623_v31, %v4839_v49  ;;  %v4841_v37 = vpop.f32.mrb[191].mxu0  ;;  %v8632_v49 = vld [vmem:[%s8721_s15 + $0xd0] sm:$0xff] }
 0xa4c   : > { %12690 = vst [vmem:[#allocation20_spill] sm:$0xff] %v11072_v7  ;;  %v4996_v21 = vsel %vm379_vm0, %v11072_v7, 0.0 }
 0xa4d   : > { %4997 = vadd.xlane.f32.xlu1 %v4996_v21  ;;  %v4844_v25 = vpop.f32.mrb[192].mxu0 }
 0xa4e   : > { %v11077_v45 = vadd.f32 %v8624_v63, %v4844_v25  ;;  %v4846_v44 = vpop.f32.mrb[193].mxu0  ;;  %v8633_v63 = vld [vmem:[%s8721_s15 + $0xd8] sm:$0xff] }
 0xa50   : > { %12691 = vst [vmem:[#allocation21_spill] sm:$0xff] %v11077_v45  ;;  %v4999_v0 = vsel %vm379_vm0, %v11077_v45, 0.0 }
 0xa51   : > { %5000 = vadd.xlane.f32.xlu0 %v4999_v0  ;;  %v4849_v53 = vpop.f32.mrb[194].mxu0 }
 0xa52   : > { %v11082_v55 = vadd.f32 %v8625_v43, %v4849_v53  ;;  %v4851_v29 = vpop.f32.mrb[195].mxu0 }
 0xa53   : > { %v8634_v29 = vld [vmem:[%s8721_s15 + $0xe0] sm:$0xff] }
 0xa54   : > { %12692 = vst [vmem:[#allocation22_spill] sm:$0xff] %v11082_v55  ;;  %v5002_v40 = vsel %vm379_vm0, %v11082_v55, 0.0 }
 0xa55   : > { %5003 = vadd.xlane.f32.xlu1 %v5002_v40  ;;  %v4854_v33 = vpop.f32.mrb[196].mxu0 }
 0xa56   : > { %v11087_v61 = vadd.f32 %v8626_v2, %v4854_v33  ;;  %v4856_v27 = vpop.f32.mrb[197].mxu0 }
 0xa58   : > { %12693 = vst [vmem:[#allocation23_spill] sm:$0xff] %v11087_v61  ;;  %v5005_v19 = vsel %vm379_vm0, %v11087_v61, 0.0 }
 0xa59   : > { %5006 = vadd.xlane.f32.xlu0 %v5005_v19  ;;  %v4859_v18 = vpop.f32.mrb[198].mxu0  ;;  %v8635_v19 = vld [vmem:[%s8721_s15 + $0xe8] sm:$0xff] }
 0xa5a   : > { %v11092_v6 = vadd.f32 %v8627_v48, %v4859_v18  ;;  %v4861_v4 = vpop.f32.mrb[199].mxu0 }
 0xa5c   : > { %12694 = vst [vmem:[#allocation24_spill] sm:$0xff] %v11092_v6  ;;  %v5008_v12 = vsel %vm379_vm0, %v11092_v6, 0.0 }
 0xa5d   : > { %5009 = vadd.xlane.f32.xlu1 %v5008_v12  ;;  %v4864_v23 = vpop.f32.mrb[200].mxu0 }
 0xa5e   : > { %v11097_v34 = vadd.f32 %v8628_v26, %v4864_v23  ;;  %v4866_v10 = vpop.f32.mrb[201].mxu0  ;;  %v8636_v23 = vld [vmem:[%s8721_s15 + $0xf0] sm:$0xff] }
 0xa60   : > { %12695 = vst [vmem:[#allocation25_spill] sm:$0xff] %v11097_v34  ;;  %v5011_v54 = vsel %vm379_vm0, %v11097_v34, 0.0 }
 0xa61   : > { %5012 = vadd.xlane.f32.xlu0 %v5011_v54  ;;  %v4869_v11 = vpop.f32.mrb[202].mxu0 }
 0xa62   : > { %v11102_v59 = vadd.f32 %v8629_v47, %v4869_v11  ;;  %v4871_v35 = vpop.f32.mrb[203].mxu0  ;;  %v8637_v47 = vld [vmem:[%s8721_s15 + $0xf8] sm:$0xff] }
 0xa64   : > { %12696 = vst [vmem:[#allocation26_spill] sm:$0xff] %v11102_v59  ;;  %v5014_v16 = vsel %vm379_vm0, %v11102_v59, 0.0 }
 0xa65   : > { %5015 = vadd.xlane.f32.xlu1 %v5014_v16  ;;  %v4874_v13 = vpop.f32.mrb[204].mxu0 }
 0xa66   : > { %v11107_v50 = vadd.f32 %v8630_v14, %v4874_v13  ;;  %v4876_v5 = vpop.f32.mrb[205].mxu0 }
 0xa68   : > { %12697 = vst [vmem:[#allocation27_spill] sm:$0xff] %v11107_v50  ;;  %v5017_v30 = vsel %vm379_vm0, %v11107_v50, 0.0 }
 0xa69   : > { %5018 = vadd.xlane.f32.xlu0 %v5017_v30  ;;  %v4879_v38 = vpop.f32.mrb[206].mxu0 }
 0xa6a   : > { %v11112_v57 = vadd.f32 %v8631_v60, %v4879_v38  ;;  %v4881_v3 = vpop.f32.mrb[207].mxu0 }
 0xa6c   : > { %12698 = vst [vmem:[#allocation28_spill] sm:$0xff] %v11112_v57  ;;  %v5020_v39 = vsel %vm379_vm0, %v11112_v57, 0.0 }
 0xa6d   : > { %5021 = vadd.xlane.f32.xlu1 %v5020_v39  ;;  %v4884_v20 = vpop.f32.mrb[208].mxu0 }
 0xa6e   : > { %v11117_v31 = vadd.f32 %v8632_v49, %v4884_v20  ;;  %v4886_v37 = vpop.f32.mrb[209].mxu0 }
 0xa70   : > { %12699 = vst [vmem:[#allocation29_spill] sm:$0xff] %v11117_v31  ;;  %v5023_v21 = vsel %vm379_vm0, %v11117_v31, 0.0 }
 0xa71   : > { %5024 = vadd.xlane.f32.xlu0 %v5023_v21  ;;  %v4889_v25 = vpop.f32.mrb[210].mxu0 }
 0xa72   : > { %v11122_v44 = vadd.f32 %v8633_v63, %v4889_v25  ;;  %v4891_v0 = vpop.f32.mrb[211].mxu0 }
 0xa74   : > { %12700 = vst [vmem:[#allocation30_spill] sm:$0xff] %v11122_v44  ;;  %v5026_v53 = vsel %vm379_vm0, %v11122_v44, 0.0 }
 0xa75   : > { %5027 = vadd.xlane.f32.xlu1 %v5026_v53  ;;  %v4894_v43 = vpop.f32.mrb[212].mxu0 }
 0xa76   : > { %v11127_v40 = vadd.f32 %v8634_v29, %v4894_v43  ;;  %v4896_v33 = vpop.f32.mrb[213].mxu0 }
 0xa78   : > { %12701 = vst [vmem:[#allocation31_spill] sm:$0xff] %v11127_v40  ;;  %v5029_v2 = vsel %vm379_vm0, %v11127_v40, 0.0 }
 0xa79   : > { %5030 = vadd.xlane.f32.xlu0 %v5029_v2  ;;  %v4899_v27 = vpop.f32.mrb[214].mxu0 }
 0xa7a   : > { %v11132_v18 = vadd.f32 %v8635_v19, %v4899_v27  ;;  %v4901_v48 = vpop.f32.mrb[215].mxu0 }
 0xa7c   : > { %12702 = vst [vmem:[#allocation32_spill] sm:$0xff] %v11132_v18  ;;  %v5032_v4 = vsel %vm379_vm0, %v11132_v18, 0.0 }
 0xa7d   : > { %5033 = vadd.xlane.f32.xlu1 %v5032_v4  ;;  %v4904_v12 = vpop.f32.mrb[216].mxu0 }
 0xa7e   : > { %v11137_v26 = vadd.f32 %v8636_v23, %v4904_v12  ;;  %v4906_v10 = vpop.f32.mrb[217].mxu0 }
 0xa80   : > { %12703 = vst [vmem:[#allocation33_spill] sm:$0xff] %v11137_v26  ;;  %v5035_v54 = vsel %vm379_vm0, %v11137_v26, 0.0 }
 0xa81   : > { %5036 = vadd.xlane.f32.xlu0 %v5035_v54  ;;  %v4909_v11 = vpop.f32.mrb[218].mxu0 }
 0xa82   : > { %v11142_v35 = vadd.f32 %v8637_v47, %v4909_v11  ;;  %v4911_v16 = vpop.f32.mrb[219].mxu0 }
 0xa84   : > { %12704 = vst [vmem:[#allocation34_spill] sm:$0xff] %v11142_v35  ;;  %v5038_v13 = vsel %vm379_vm0, %v11142_v35, 0.0 }
 0xa85   : > { %5039 = vadd.xlane.f32.xlu1 %v5038_v13 }
 0xa96   : > { %v4947_v14 = vpop.xlane.xlu0 %4946 }
 0xa97   : > { %v5041_v5 = vmul.f32 0.03125, %v4947_v14 }
 0xa99   : > { %v11147_v30 = vsub.f32 %v10987_v41, %v5041_v5 }
 0xa9a   : > { %v4950_v38 = vpop.xlane.xlu1 %4949 }
 0xa9b   : > { %v5042_v60 = vmul.f32 0.03125, %v4950_v38  ;;  %v5105_v3 = vmul.f32 %v11147_v30, %v11147_v30 }
 0xa9d   : > { %v11152_v39 = vsub.f32 %v10992_v1, %v5042_v60  ;;  %v5137_v20 = vsel %vm379_vm0, %v5105_v3, 0.0 }
 0xa9e   : > { %v4953_v49 = vpop.xlane.xlu0 %4952  ;;  %5138 = vadd.xlane.f32.xlu0 %v5137_v20 }
 0xa9f   : > { %v5043_v37 = vmul.f32 0.03125, %v4953_v49  ;;  %v5106_v21 = vmul.f32 %v11152_v39, %v11152_v39 }
 0xaa1   : > { %v11158_v25 = vsub.f32 %v10997_v62, %v5043_v37  ;;  %v5140_v63 = vsel %vm379_vm0, %v5106_v21, 0.0 }
 0xaa2   : > { %v4956_v0 = vpop.xlane.xlu0 %4955  ;;  %5141 = vadd.xlane.f32.xlu1 %v5140_v63 }
 0xaa3   : > { %v5044_v53 = vmul.f32 0.03125, %v4956_v0  ;;  %v5107_v43 = vmul.f32 %v11158_v25, %v11158_v25 }
 0xaa5   : > { %v11164_v29 = vsub.f32 %v11002_v17, %v5044_v53  ;;  %v5143_v33 = vsel %vm379_vm0, %v5107_v43, 0.0 }
 0xaa6   : > { %v4959_v2 = vpop.xlane.xlu0 %4958  ;;  %5144 = vadd.xlane.f32.xlu0 %v5143_v33 }
 0xaa7   : > { %v5045_v27 = vmul.f32 0.03125, %v4959_v2  ;;  %v5108_v19 = vmul.f32 %v11164_v29, %v11164_v29 }
 0xaa9   : > { %v11170_v48 = vsub.f32 %v11007_v42, %v5045_v27  ;;  %v5146_v4 = vsel %vm379_vm0, %v5108_v19, 0.0 }
 0xaaa   : > { %v4962_v12 = vpop.xlane.xlu1 %4961  ;;  %5147 = vadd.xlane.f32.xlu1 %v5146_v4 }
 0xaab   : > { %v5046_v23 = vmul.f32 0.03125, %v4962_v12  ;;  %v5109_v10 = vmul.f32 %v11170_v48, %v11170_v48 }
 0xaad   : > { %v11176_v54 = vsub.f32 %v11012_v24, %v5046_v23  ;;  %v5149_v11 = vsel %vm379_vm0, %v5109_v10, 0.0 }
 0xaae   : > { %v4965_v47 = vpop.xlane.xlu0 %4964  ;;  %5150 = vadd.xlane.f32.xlu0 %v5149_v11 }
 0xaaf   : > { %v5047_v16 = vmul.f32 0.03125, %v4965_v47  ;;  %v5110_v13 = vmul.f32 %v11176_v54, %v11176_v54 }
 0xab1   : > { %v11182_v14 = vsub.f32 %v11017_v52, %v5047_v16  ;;  %v5152_v5 = vsel %vm379_vm0, %v5110_v13, 0.0 }
 0xab2   : > { %v4968_v38 = vpop.xlane.xlu1 %4967  ;;  %5153 = vadd.xlane.f32.xlu1 %v5152_v5 }
 0xab3   : > { %v5048_v60 = vmul.f32 0.03125, %v4968_v38  ;;  %v5111_v3 = vmul.f32 %v11182_v14, %v11182_v14 }
 0xab5   : > { %v11188_v20 = vsub.f32 %v11022_v28, %v5048_v60  ;;  %v5155_v49 = vsel %vm379_vm0, %v5111_v3, 0.0 }
 0xab6   : > { %v4971_v37 = vpop.xlane.xlu0 %4970  ;;  %5156 = vadd.xlane.f32.xlu0 %v5155_v49 }
 0xab7   : > { %v5049_v21 = vmul.f32 0.03125, %v4971_v37  ;;  %v5112_v63 = vmul.f32 %v11188_v20, %v11188_v20 }
 0xab9   : > { %v11194_v0 = vsub.f32 %v11027_v8, %v5049_v21  ;;  %v5158_v53 = vsel %vm379_vm0, %v5112_v63, 0.0 }
 0xaba   : > { %v4974_v43 = vpop.xlane.xlu1 %4973  ;;  %5159 = vadd.xlane.f32.xlu1 %v5158_v53 }
 0xabb   : > { %v5050_v33 = vmul.f32 0.03125, %v4974_v43  ;;  %v5113_v2 = vmul.f32 %v11194_v0, %v11194_v0 }
 0xabd   : > { %v11200_v27 = vsub.f32 %v11032_v51, %v5050_v33  ;;  %v5161_v19 = vsel %vm379_vm0, %v5113_v2, 0.0 }
 0xabe   : > { %v4977_v4 = vpop.xlane.xlu0 %4976  ;;  %5162 = vadd.xlane.f32.xlu0 %v5161_v19 }
 0xabf   : > { %v5051_v12 = vmul.f32 0.03125, %v4977_v4  ;;  %v5114_v23 = vmul.f32 %v11200_v27, %v11200_v27 }
 0xac1   : > { %v11206_v10 = vsub.f32 %v11037_v32, %v5051_v12  ;;  %v5164_v11 = vsel %vm379_vm0, %v5114_v23, 0.0 }
 0xac2   : > { %v4980_v47 = vpop.xlane.xlu1 %4979  ;;  %5165 = vadd.xlane.f32.xlu1 %v5164_v11 }
 0xac3   : > { %v5052_v16 = vmul.f32 0.03125, %v4980_v47  ;;  %v5115_v13 = vmul.f32 %v11206_v10, %v11206_v10 }
 0xac5   : > { %v11212_v5 = vsub.f32 %v11042_v56, %v5052_v16  ;;  %v5167_v38 = vsel %vm379_vm0, %v5115_v13, 0.0 }
 0xac6   : > { %v4983_v60 = vpop.xlane.xlu0 %4982  ;;  %5168 = vadd.xlane.f32.xlu0 %v5167_v38  ;;  %v8205_v38 = vld [vmem:[%s12629_s7 + $0x4] ss:$8 sps:$4 sm:$0xff]  }
 0xac7   : > { %v5053_v3 = vmul.f32 0.03125, %v4983_v60  ;;  %v5116_v49 = vmul.f32 %v11212_v5, %v11212_v5  ;;  %7986 = vmatprep.subr.bf16.mxu1 %v8205_v38 }
 0xac8   : > { %7987 = vmatpush3.bf16.msra.mxu1 %v8205_v38 }
 0xac9   : > { %v11218_v37 = vsub.f32 %v11047_v58, %v5053_v3  ;;  %v5170_v21 = vsel %vm379_vm0, %v5116_v49, 0.0 }
 0xaca   : > { %v4986_v63 = vpop.xlane.xlu1 %4985  ;;  %5171 = vadd.xlane.f32.xlu1 %v5170_v21 }
 0xacb   : > { %v5054_v53 = vmul.f32 0.03125, %v4986_v63  ;;  %v5117_v43 = vmul.f32 %v11218_v37, %v11218_v37 }
 0xacd   : > { %v11224_v33 = vsub.f32 %v11052_v9, %v5054_v53  ;;  %v5173_v2 = vsel %vm379_vm0, %v5117_v43, 0.0  ;;  %v8206_v53 = vld [vmem:[%s12629_s7 + $0x14] ss:$8 sps:$4 sm:$0xff]  }
 0xace   : > { %v4989_v19 = vpop.xlane.xlu0 %4988  ;;  %5174 = vadd.xlane.f32.xlu0 %v5173_v2  ;;  %7988 = vmatprep.subr.bf16.mxu1 %v8206_v53 }
 0xacf   : > { %v5055_v4 = vmul.f32 0.03125, %v4989_v19  ;;  %v5118_v12 = vmul.f32 %v11224_v33, %v11224_v33  ;;  %7989 = vmatpush3.bf16.msra.mxu1 %v8206_v53 }
 0xad1   : > { %v11230_v23 = vsub.f32 %v11057_v22, %v5055_v4  ;;  %v5176_v11 = vsel %vm379_vm0, %v5118_v12, 0.0 }
 0xad2   : > { %v4992_v47 = vpop.xlane.xlu1 %4991  ;;  %5177 = vadd.xlane.f32.xlu1 %v5176_v11 }
 0xad3   : > { %v5056_v16 = vmul.f32 0.03125, %v4992_v47  ;;  %v5119_v13 = vmul.f32 %v11230_v23, %v11230_v23 }
 0xad5   : > { %v11239_v60 = vsub.f32 %v11062_v36, %v5056_v16  ;;  %v5179_v3 = vsel %vm379_vm0, %v5119_v13, 0.0 }
 0xad6   : > { %v4995_v49 = vpop.xlane.xlu0 %4994  ;;  %5180 = vadd.xlane.f32.xlu0 %v5179_v3 }
 0xad7   : > { %v5057_v21 = vmul.f32 0.03125, %v4995_v49  ;;  %v5120_v63 = vmul.f32 %v11239_v60, %v11239_v60 }
 0xad9   : > { %v11248_v43 = vsub.f32 %v11067_v46, %v5057_v21  ;;  %v5182_v2 = vsel %vm379_vm0, %v5120_v63, 0.0 }
 0xada   : > { %v4998_v19 = vpop.xlane.xlu1 %4997  ;;  %5183 = vadd.xlane.f32.xlu1 %v5182_v2 }
 0xadb   : > { %v5058_v4 = vmul.f32 0.03125, %v4998_v19  ;;  %v5121_v12 = vmul.f32 %v11248_v43, %v11248_v43 }
 0xadd   : > { %v11254_v11 = vsub.f32 %v11072_v7, %v5058_v4  ;;  %v5185_v47 = vsel %vm379_vm0, %v5121_v12, 0.0 }
 0xade   : > { %v5001_v16 = vpop.xlane.xlu0 %5000  ;;  %5186 = vadd.xlane.f32.xlu0 %v5185_v47 }
 0xadf   : > { %v5059_v13 = vmul.f32 0.03125, %v5001_v16  ;;  %v5122_v38 = vmul.f32 %v11254_v11, %v11254_v11 }
 0xae1   : > { %v11260_v3 = vsub.f32 %v11077_v45, %v5059_v13  ;;  %v5188_v49 = vsel %vm379_vm0, %v5122_v38, 0.0 }
 0xae2   : > { %v5004_v21 = vpop.xlane.xlu1 %5003  ;;  %5189 = vadd.xlane.f32.xlu1 %v5188_v49 }
 0xae3   : > { %v5060_v63 = vmul.f32 0.03125, %v5004_v21  ;;  %v5123_v53 = vmul.f32 %v11260_v3, %v11260_v3 }
 0xae5   : > { %v11266_v2 = vsub.f32 %v11082_v55, %v5060_v63  ;;  %v5191_v19 = vsel %vm379_vm0, %v5123_v53, 0.0 }
 0xae6   : > { %v5007_v4 = vpop.xlane.xlu0 %5006  ;;  %5192 = vadd.xlane.f32.xlu0 %v5191_v19 }
 0xae7   : > { %v5061_v12 = vmul.f32 0.03125, %v5007_v4  ;;  %v5124_v47 = vmul.f32 %v11266_v2, %v11266_v2 }
 0xae9   : > { %v11272_v16 = vsub.f32 %v11087_v61, %v5061_v12  ;;  %v5194_v13 = vsel %vm379_vm0, %v5124_v47, 0.0 }
 0xaea   : > { %v5010_v38 = vpop.xlane.xlu1 %5009  ;;  %5195 = vadd.xlane.f32.xlu1 %v5194_v13 }
 0xaeb   : > { %v5062_v49 = vmul.f32 0.03125, %v5010_v38  ;;  %v5125_v21 = vmul.f32 %v11272_v16, %v11272_v16 }
 0xaed   : > { %v11278_v63 = vsub.f32 %v11092_v6, %v5062_v49  ;;  %v5197_v53 = vsel %vm379_vm0, %v5125_v21, 0.0 }
 0xaee   : > { %v5013_v19 = vpop.xlane.xlu0 %5012  ;;  %5198 = vadd.xlane.f32.xlu0 %v5197_v53 }
 0xaef   : > { %v5063_v4 = vmul.f32 0.03125, %v5013_v19  ;;  %v5126_v12 = vmul.f32 %v11278_v63, %v11278_v63 }
 0xaf1   : > { %v11284_v61 = vsub.f32 %v11097_v34, %v5063_v4  ;;  %v5200_v47 = vsel %vm379_vm0, %v5126_v12, 0.0 }
 0xaf2   : > { %v5016_v13 = vpop.xlane.xlu1 %5015  ;;  %5201 = vadd.xlane.f32.xlu1 %v5200_v47 }
 0xaf3   : > { %v5064_v38 = vmul.f32 0.03125, %v5016_v13  ;;  %v5127_v49 = vmul.f32 %v11284_v61, %v11284_v61 }
 0xaf5   : > { %v11290_v6 = vsub.f32 %v11102_v59, %v5064_v38  ;;  %v5203_v21 = vsel %vm379_vm0, %v5127_v49, 0.0 }
 0xaf6   : > { %v5019_v53 = vpop.xlane.xlu0 %5018  ;;  %5204 = vadd.xlane.f32.xlu0 %v5203_v21 }
 0xaf7   : > { %v5065_v19 = vmul.f32 0.03125, %v5019_v53  ;;  %v5128_v4 = vmul.f32 %v11290_v6, %v11290_v6 }
 0xaf9   : > { %v11296_v34 = vsub.f32 %v11107_v50, %v5065_v19  ;;  %v5206_v12 = vsel %vm379_vm0, %v5128_v4, 0.0 }
 0xafa   : > { %v5022_v47 = vpop.xlane.xlu1 %5021  ;;  %5207 = vadd.xlane.f32.xlu1 %v5206_v12 }
 0xafb   : > { %v5066_v13 = vmul.f32 0.03125, %v5022_v47  ;;  %v5129_v38 = vmul.f32 %v11296_v34, %v11296_v34 }
 0xafd   : > { %v11302_v59 = vsub.f32 %v11112_v57, %v5066_v13  ;;  %v5209_v49 = vsel %vm379_vm0, %v5129_v38, 0.0 }
 0xafe   : > { %v5025_v21 = vpop.xlane.xlu0 %5024  ;;  %5210 = vadd.xlane.f32.xlu0 %v5209_v49 }
 0xaff   : > { %v5067_v53 = vmul.f32 0.03125, %v5025_v21  ;;  %v5130_v19 = vmul.f32 %v11302_v59, %v11302_v59 }
 0xb01   : > { %v11308_v50 = vsub.f32 %v11117_v31, %v5067_v53  ;;  %v5212_v4 = vsel %vm379_vm0, %v5130_v19, 0.0 }
 0xb02   : > { %v5028_v12 = vpop.xlane.xlu1 %5027  ;;  %5213 = vadd.xlane.f32.xlu1 %v5212_v4 }
 0xb03   : > { %v5068_v47 = vmul.f32 0.03125, %v5028_v12  ;;  %v5131_v13 = vmul.f32 %v11308_v50, %v11308_v50 }
 0xb05   : > { %v11314_v57 = vsub.f32 %v11122_v44, %v5068_v47  ;;  %v5215_v38 = vsel %vm379_vm0, %v5131_v13, 0.0 }
 0xb06   : > { %v5031_v49 = vpop.xlane.xlu0 %5030  ;;  %5216 = vadd.xlane.f32.xlu0 %v5215_v38 }
 0xb07   : > { %v5069_v21 = vmul.f32 0.03125, %v5031_v49  ;;  %v5132_v53 = vmul.f32 %v11314_v57, %v11314_v57 }
 0xb09   : > { %v11320_v31 = vsub.f32 %v11127_v40, %v5069_v21  ;;  %v5218_v19 = vsel %vm379_vm0, %v5132_v53, 0.0 }
 0xb0a   : > { %v5034_v4 = vpop.xlane.xlu1 %5033  ;;  %5219 = vadd.xlane.f32.xlu1 %v5218_v19 }
 0xb0b   : > { %v5070_v12 = vmul.f32 0.03125, %v5034_v4  ;;  %v5133_v47 = vmul.f32 %v11320_v31, %v11320_v31 }
 0xb0d   : > { %v11326_v44 = vsub.f32 %v11132_v18, %v5070_v12  ;;  %v5221_v13 = vsel %vm379_vm0, %v5133_v47, 0.0 }
 0xb0e   : > { %5222 = vadd.xlane.f32.xlu0 %v5221_v13  ;;  %v5037_v38 = vpop.xlane.xlu0 %5036 }
 0xb0f   : > { %v5071_v49 = vmul.f32 0.03125, %v5037_v38  ;;  %v5134_v21 = vmul.f32 %v11326_v44, %v11326_v44 }
 0xb11   : > { %v11332_v40 = vsub.f32 %v11137_v26, %v5071_v49  ;;  %v5224_v53 = vsel %vm379_vm0, %v5134_v21, 0.0 }
 0xb12   : > { %5225 = vadd.xlane.f32.xlu1 %v5224_v53  ;;  %v5040_v19 = vpop.xlane.xlu1 %5039 }
 0xb13   : > { %v5072_v4 = vmul.f32 0.03125, %v5040_v19  ;;  %v5135_v12 = vmul.f32 %v11332_v40, %v11332_v40 }
 0xb15   : > { %v11338_v18 = vsub.f32 %v11142_v35, %v5072_v4  ;;  %v5227_v47 = vsel %vm379_vm0, %v5135_v12, 0.0  ;;  %v5363_v12 = vsub.s32 3, %v9078_v15 }
 0xb16   : > { %5228 = vadd.xlane.f32.xlu0 %v5227_v47 }
 0xb17   : > { %v5136_v13 = vmul.f32 %v11338_v18, %v11338_v18 }
 0xb19   : > { %v5230_v38 = vsel %vm379_vm0, %v5136_v13, 0.0 }
 0xb1a   : > { %5231 = vadd.xlane.f32.xlu1 %v5230_v38  ;;  %v11349_v38 = vld [vmem:[%s12628_s6] sm:$0xff] }
 0xb2b   : > { %v5139_v49 = vpop.xlane.xlu0 %5138 }
 0xb2c   : > { %v5233_v21 = vmul.f32 0.03125, %v5139_v49 }
 0xb2e   : > { %v5265_v53 = vadd.f32 1e-05, %v5233_v21 }
 0xb2f   : > { %v5142_v26 = vpop.xlane.xlu1 %5141 }
 0xb30   : > { %8407 = vrsqrt.f32 %v5265_v53  ;;  %v5234_v19 = vmul.f32 0.03125, %v5142_v26  ;;  %v11352_v26 = vrot.slane %v11349_v38, %v5363_v12 }
 0xb32   : > { %v5266_v7 = vadd.f32 1e-05, %v5234_v19 }
 0xb33   : > { %v5145_v55 = vpop.xlane.xlu0 %5144 }
 0xb34   : > { %8409 = vrsqrt.f32 %v5266_v7  ;;  %v5235_v4 = vmul.f32 0.03125, %v5145_v55  ;;  %v5399_v55 = vsub.s32 4, %v9078_v15 }
 0xb36   : > { %v5267_v35 = vadd.f32 1e-05, %v5235_v4 }
 0xb37   : > { %v5148_v47 = vpop.xlane.xlu1 %5147 }
 0xb38   : > { %8411 = vrsqrt.f32 %v5267_v35  ;;  %v5236_v46 = vmul.f32 0.03125, %v5148_v47 }
 0xb3a   : > { %v8408_v45 = vpop.eup %8407  ;;  %v5268_v9 = vadd.f32 1e-05, %v5236_v46 }
 0xb3b   : > { %v5329_v13 = vmul.f32 %v8408_v45, %v11147_v30  ;;  %v5151_v7 = vpop.xlane.xlu0 %5150  ;;  %v11358_v30 = vrot.slane %v11349_v38, %v5399_v55 }
 0xb3c   : > { %8413 = vrsqrt.f32 %v5268_v9  ;;  %v5237_v49 = vmul.f32 0.03125, %v5151_v7 }
 0xb3d   : > { %v5365_v45 = vmul.f32 %v11352_v26, %v5329_v13 }
 0xb3e   : > { %v8410_v21 = vpop.eup %8409  ;;  %v5269_v35 = vadd.f32 1e-05, %v5237_v49 }
 0xb3f   : > { %v5330_v53 = vmul.f32 %v8410_v21, %v11152_v39  ;;  %v5154_v46 = vpop.xlane.xlu1 %5153  ;;  %v5401_v7 = vadd.f32 %v11358_v30, %v5365_v45 }
 0xb40   : > { %8415 = vrsqrt.f32 %v5269_v35  ;;  %v5238_v19 = vmul.f32 0.03125, %v5154_v46 }
 0xb41   : > { %v5366_v4 = vmul.f32 %v11352_v26, %v5330_v53 }
 0xb42   : > { %v8412_v12 = vpop.eup %8411  ;;  %v5270_v47 = vadd.f32 1e-05, %v5238_v19 }
 0xb43   : > { %v5331_v36 = vmul.f32 %v8412_v12, %v11158_v25  ;;  %v5157_v9 = vpop.xlane.xlu0 %5156  ;;  %v5402_v49 = vadd.f32 %v11358_v30, %v5366_v4 }
 0xb44   : > { %8417 = vrsqrt.f32 %v5270_v47  ;;  %v5239_v39 = vmul.f32 0.03125, %v5157_v9 }
 0xb45   : > { %v5433_v21 = vpack.c.bf16 %v5402_v49, %v5401_v7  ;;  %v5367_v55 = vmul.f32 %v11352_v26, %v5331_v36 }
 0xb46   : > { %v8414_v13 = vpop.eup %8413  ;;  %v5271_v58 = vadd.f32 1e-05, %v5239_v39 }
 0xb47   : > { %v5332_v35 = vmul.f32 %v8414_v13, %v11164_v29  ;;  %7990 = vmatprep.mubr.msk.bf16.mxu1 %vm379_vm0, %v5433_v21  ;;  %v5160_v53 = vpop.xlane.xlu1 %5159  ;;  %v5403_v47 = vadd.f32 %v11358_v30, %v5367_v55 }
 0xb48   : > { %8419 = vrsqrt.f32 %v5271_v58  ;;  %v5240_v46 = vmul.f32 0.03125, %v5160_v53 }
 0xb49   : > { %v5368_v25 = vmul.f32 %v11352_v26, %v5332_v35 }
 0xb4a   : > { %v8416_v19 = vpop.eup %8415  ;;  %v5272_v45 = vadd.f32 1e-05, %v5240_v46 }
 0xb4b   : > { %v5333_v4 = vmul.f32 %v8416_v19, %v11170_v48  ;;  %v5163_v12 = vpop.xlane.xlu0 %5162  ;;  %v5404_v9 = vadd.f32 %v11358_v30, %v5368_v25 }
 0xb4c   : > { %8421 = vrsqrt.f32 %v5272_v45  ;;  %v5241_v36 = vmul.f32 0.03125, %v5163_v12 }
 0xb4d   : > { %v5434_v7 = vpack.c.bf16 %v5404_v9, %v5403_v47  ;;  %v5369_v21 = vmul.f32 %v11352_v26, %v5333_v4 }
 0xb4e   : > { %v8418_v29 = vpop.eup %8417  ;;  %v5273_v49 = vadd.f32 1e-05, %v5241_v36 }
 0xb4f   : > { %v5334_v39 = vmul.f32 %v8418_v29, %v11176_v54  ;;  %7991 = vmatmul.mubr.msk.bf16.vlgmr.msra.gmra.mrb[132].mxu1 %vm379_vm0, %v5434_v7  ;;  %v5166_v58 = vpop.xlane.xlu1 %5165  ;;  %v5405_v25 = vadd.f32 %v11358_v30, %v5369_v21 }
 0xb50   : > { %8423 = vrsqrt.f32 %v5273_v49  ;;  %v5242_v13 = vmul.f32 0.03125, %v5166_v58 }
 0xb51   : > { %v5370_v48 = vmul.f32 %v11352_v26, %v5334_v39 }
 0xb52   : > { %v8420_v35 = vpop.eup %8419  ;;  %v5274_v55 = vadd.f32 1e-05, %v5242_v13 }
 0xb53   : > { %v5335_v53 = vmul.f32 %v8420_v35, %v11182_v14  ;;  %v5169_v46 = vpop.xlane.xlu0 %5168  ;;  %v5406_v19 = vadd.f32 %v11358_v30, %v5370_v48 }
 0xb54   : > { %8425 = vrsqrt.f32 %v5274_v55  ;;  %v5243_v54 = vmul.f32 0.03125, %v5169_v46 }
 0xb55   : > { %v5435_v45 = vpack.c.bf16 %v5406_v19, %v5405_v25  ;;  %v5371_v36 = vmul.f32 %v11352_v26, %v5335_v53 }
 0xb56   : > { %v8422_v12 = vpop.eup %8421  ;;  %v5275_v47 = vadd.f32 1e-05, %v5243_v54 }
 0xb57   : > { %v5336_v4 = vmul.f32 %v8422_v12, %v11188_v20  ;;  %7994 = vmatprep.mubr.msk.bf16.mxu1 %vm379_vm0, %v5435_v45  ;;  %v5172_v9 = vpop.xlane.xlu1 %5171  ;;  %v5407_v21 = vadd.f32 %v11358_v30, %v5371_v36 }
 0xb58   : > { %8427 = vrsqrt.f32 %v5275_v47  ;;  %v5244_v7 = vmul.f32 0.03125, %v5172_v9 }
 0xb59   : > { %v5372_v14 = vmul.f32 %v11352_v26, %v5336_v4 }
 0xb5a   : > { %v8424_v29 = vpop.eup %8423  ;;  %v5276_v49 = vadd.f32 1e-05, %v5244_v7 }
 0xb5b   : > { %v5337_v39 = vmul.f32 %v8424_v29, %v11194_v0  ;;  %v5175_v58 = vpop.xlane.xlu0 %5174  ;;  %v5408_v13 = vadd.f32 %v11358_v30, %v5372_v14 }
 0xb5c   : > { %8429 = vrsqrt.f32 %v5276_v49  ;;  %v5245_v20 = vmul.f32 0.03125, %v5175_v58 }
 0xb5d   : > { %v5436_v48 = vpack.c.bf16 %v5408_v13, %v5407_v21  ;;  %v5373_v25 = vmul.f32 %v11352_v26, %v5337_v39 }
 0xb5e   : > { %v8426_v35 = vpop.eup %8425  ;;  %v5277_v55 = vadd.f32 1e-05, %v5245_v20 }
 0xb5f   : > { %v5338_v53 = vmul.f32 %v8426_v35, %v11200_v27  ;;  %7995 = vmatmul.mubr.msk.bf16.gmra.mrb[136].mxu1 %vm379_vm0, %v5436_v48  ;;  %v5178_v46 = vpop.xlane.xlu1 %5177  ;;  %v5409_v4 = vadd.f32 %v11358_v30, %v5373_v25 }
 0xb60   : > { %8431 = vrsqrt.f32 %v5277_v55  ;;  %v5246_v19 = vmul.f32 0.03125, %v5178_v46 }
 0xb61   : > { %v5374_v0 = vmul.f32 %v11352_v26, %v5338_v53 }
 0xb62   : > { %v8428_v54 = vpop.eup %8427  ;;  %v5278_v45 = vadd.f32 1e-05, %v5246_v19 }
 0xb63   : > { %v5339_v12 = vmul.f32 %v8428_v54, %v11206_v10  ;;  %v5181_v47 = vpop.xlane.xlu0 %5180  ;;  %v5410_v9 = vadd.f32 %v11358_v30, %v5374_v0 }
 0xb64   : > { %8433 = vrsqrt.f32 %v5278_v45  ;;  %v5247_v27 = vmul.f32 0.03125, %v5181_v47 }
 0xb65   : > { %v5437_v36 = vpack.c.bf16 %v5410_v9, %v5409_v4  ;;  %v5375_v39 = vmul.f32 %v11352_v26, %v5339_v12 }
 0xb66   : > { %v8430_v7 = vpop.eup %8429  ;;  %v5279_v14 = vadd.f32 1e-05, %v5247_v27 }
 0xb67   : > { %v5340_v29 = vmul.f32 %v8430_v7, %v11212_v5  ;;  %7998 = vmatprep.mubr.msk.bf16.mxu1 %vm379_vm0, %v5437_v36  ;;  %v5184_v49 = vpop.xlane.xlu1 %5183  ;;  %v5411_v35 = vadd.f32 %v11358_v30, %v5375_v39 }
 0xb68   : > { %8435 = vrsqrt.f32 %v5279_v14  ;;  %v5248_v58 = vmul.f32 0.03125, %v5184_v49 }
 0xb69   : > { %v5376_v10 = vmul.f32 %v11352_v26, %v5340_v29 }
 0xb6a   : > { %v8432_v21 = vpop.eup %8431  ;;  %v5280_v13 = vadd.f32 1e-05, %v5248_v58 }
 0xb6b   : > { %v5341_v20 = vmul.f32 %v8432_v21, %v11218_v37  ;;  %v5187_v48 = vpop.xlane.xlu0 %5186  ;;  %v5412_v55 = vadd.f32 %v11358_v30, %v5376_v10 }
 0xb6c   : > { %8437 = vrsqrt.f32 %v5280_v13  ;;  %v5249_v5 = vmul.f32 0.03125, %v5187_v48 }
 0xb6d   : > { %v5438_v53 = vpack.c.bf16 %v5412_v55, %v5411_v35  ;;  %v5377_v54 = vmul.f32 %v11352_v26, %v5341_v20 }
 0xb6e   : > { %v8434_v46 = vpop.eup %8433  ;;  %v5281_v25 = vadd.f32 1e-05, %v5249_v5 }
 0xb6f   : > { %v5342_v19 = vmul.f32 %v8434_v46, %v11224_v33  ;;  %7999 = vmatmul.mubr.msk.bf16.gmra.mrb[140].mxu1 %vm379_vm0, %v5438_v53  ;;  %v5190_v0 = vpop.xlane.xlu1 %5189  ;;  %v5413_v27 = vadd.f32 %v11358_v30, %v5377_v54 }
 0xb70   : > { %8439 = vrsqrt.f32 %v5281_v25  ;;  %v5250_v45 = vmul.f32 0.03125, %v5190_v0 }
 0xb71   : > { %v5378_v37 = vmul.f32 %v11352_v26, %v5342_v19 }
 0xb72   : > { %v8436_v12 = vpop.eup %8435  ;;  %v5282_v47 = vadd.f32 1e-05, %v5250_v45 }
 0xb73   : > { %v5343_v4 = vmul.f32 %v8436_v12, %v11230_v23  ;;  %v5193_v9 = vpop.xlane.xlu0 %5192  ;;  %v5414_v36 = vadd.f32 %v11358_v30, %v5378_v37 }
 0xb74   : > { %8441 = vrsqrt.f32 %v5282_v47  ;;  %v5251_v33 = vmul.f32 0.03125, %v5193_v9 }
 0xb75   : > { %v5439_v7 = vpack.c.bf16 %v5414_v36, %v5413_v27  ;;  %v5379_v58 = vmul.f32 %v11352_v26, %v5343_v4 }
 0xb76   : > { %v8438_v14 = vpop.eup %8437  ;;  %v5283_v29 = vadd.f32 1e-05, %v5251_v33 }
 0xb77   : > { %v5344_v49 = vmul.f32 %v8438_v14, %v11239_v60  ;;  %8002 = vmatprep.mubr.msk.bf16.mxu1 %vm379_vm0, %v5439_v7  ;;  %v5196_v39 = vpop.xlane.xlu1 %5195  ;;  %v5415_v35 = vadd.f32 %v11358_v30, %v5379_v58 }
 0xb78   : > { %8443 = vrsqrt.f32 %v5283_v29  ;;  %v5252_v10 = vmul.f32 0.03125, %v5196_v39 }
 0xb79   : > { %v5380_v23 = vmul.f32 %v11352_v26, %v5344_v49 }
 0xb7a   : > { %v8440_v21 = vpop.eup %8439  ;;  %v5284_v13 = vadd.f32 1e-05, %v5252_v10 }
 0xb7b   : > { %v5345_v20 = vmul.f32 %v8440_v21, %v11248_v43  ;;  %v5199_v48 = vpop.xlane.xlu0 %5198  ;;  %v5416_v55 = vadd.f32 %v11358_v30, %v5380_v23 }
 0xb7c   : > { %8445 = vrsqrt.f32 %v5284_v13  ;;  %v5253_v60 = vmul.f32 0.03125, %v5199_v48 }
 0xb7d   : > { %v5440_v5 = vpack.c.bf16 %v5416_v55, %v5415_v35  ;;  %v5381_v0 = vmul.f32 %v11352_v26, %v5345_v20 }
 0xb7e   : > { %v8442_v53 = vpop.eup %8441  ;;  %v5285_v46 = vadd.f32 1e-05, %v5253_v60 }
 0xb7f   : > { %v5346_v25 = vmul.f32 %v8442_v53, %v11254_v11  ;;  %8003 = vmatmul.mubr.msk.bf16.gmra.mrb[144].mxu1 %vm379_vm0, %v5440_v5  ;;  %v5202_v19 = vpop.xlane.xlu1 %5201  ;;  %v5417_v4 = vadd.f32 %v11358_v30, %v5381_v0 }
 0xb80   : > { %8447 = vrsqrt.f32 %v5285_v46  ;;  %v5254_v54 = vmul.f32 0.03125, %v5202_v19 }
 0xb81   : > { %v5382_v43 = vmul.f32 %v11352_v26, %v5346_v25 }
 0xb82   : > { %v8444_v45 = vpop.eup %8443  ;;  %v5286_v37 = vadd.f32 1e-05, %v5254_v54 }
 0xb83   : > { %v5347_v12 = vmul.f32 %v8444_v45, %v11260_v3  ;;  %v5205_v47 = vpop.xlane.xlu0 %5204  ;;  %v5418_v9 = vadd.f32 %v11358_v30, %v5382_v43 }
 0xb84   : > { %8449 = vrsqrt.f32 %v5286_v37  ;;  %v5255_v11 = vmul.f32 0.03125, %v5205_v47 }
 0xb85   : > { %v5441_v27 = vpack.c.bf16 %v5418_v9, %v5417_v4  ;;  %v5383_v29 = vmul.f32 %v11352_v26, %v5347_v12 }
 0xb86   : > { %v8446_v36 = vpop.eup %8445  ;;  %v5287_v33 = vadd.f32 1e-05, %v5255_v11 }
 0xb87   : > { %v5348_v7 = vmul.f32 %v8446_v36, %v11266_v2  ;;  %8006 = vmatprep.mubr.msk.bf16.mxu1 %vm379_vm0, %v5441_v27  ;;  %v5208_v14 = vpop.xlane.xlu1 %5207  ;;  %v5419_v21 = vadd.f32 %v11358_v30, %v5383_v29 }
 0xb88   : > { %8451 = vrsqrt.f32 %v5287_v33  ;;  %v5256_v49 = vmul.f32 0.03125, %v5208_v14 }
 0xb89   : > { %v5384_v3 = vmul.f32 %v11352_v26, %v5348_v7 }
 0xb8a   : > { %v8448_v39 = vpop.eup %8447  ;;  %v5288_v58 = vadd.f32 1e-05, %v5256_v49 }
 0xb8b   : > { %v5349_v10 = vmul.f32 %v8448_v39, %v11272_v16  ;;  %v5211_v23 = vpop.xlane.xlu0 %5210  ;;  %v5420_v13 = vadd.f32 %v11358_v30, %v5384_v3 }
 0xb8c   : > { %8453 = vrsqrt.f32 %v5288_v58  ;;  %v5257_v2 = vmul.f32 0.03125, %v5211_v23 }
 0xb8d   : > { %v5442_v20 = vpack.c.bf16 %v5420_v13, %v5419_v21  ;;  %v5385_v5 = vmul.f32 %v11352_v26, %v5349_v10 }
 0xb8e   : > { %v8450_v48 = vpop.eup %8449  ;;  %v5289_v35 = vadd.f32 1e-05, %v5257_v2 }
 0xb8f   : > { %v5350_v55 = vmul.f32 %v8450_v48, %v11278_v63  ;;  %8007 = vmatmul.mubr.msk.bf16.gmra.mrb[148].mxu1 %vm379_vm0, %v5442_v20  ;;  %v5214_v60 = vpop.xlane.xlu1 %5213  ;;  %v5421_v54 = vadd.f32 %v11358_v30, %v5385_v5 }
 0xb90   : > { %8455 = vrsqrt.f32 %v5289_v35  ;;  %v5258_v53 = vmul.f32 0.03125, %v5214_v60 }
 0xb91   : > { %v5386_v16 = vmul.f32 %v11352_v26, %v5350_v55 }
 0xb92   : > { %v8452_v46 = vpop.eup %8451  ;;  %v5290_v25 = vadd.f32 1e-05, %v5258_v53 }
 0xb93   : > { %v5351_v19 = vmul.f32 %v8452_v46, %v11284_v61  ;;  %v5217_v0 = vpop.xlane.xlu0 %5216  ;;  %v5422_v43 = vadd.f32 %v11358_v30, %v5386_v16 }
 0xb94   : > { %8457 = vrsqrt.f32 %v5290_v25  ;;  %v5259_v63 = vmul.f32 0.03125, %v5217_v0 }
 0xb95   : > { %v5443_v45 = vpack.c.bf16 %v5422_v43, %v5421_v54  ;;  %v5387_v9 = vmul.f32 %v11352_v26, %v5351_v19 }
 0xb96   : > { %v8454_v37 = vpop.eup %8453  ;;  %v5291_v12 = vadd.f32 1e-05, %v5259_v63 }
 0xb97   : > { %v5352_v47 = vmul.f32 %v8454_v37, %v11290_v6  ;;  %8010 = vmatprep.mubr.msk.bf16.mxu1 %vm379_vm0, %v5443_v45  ;;  %v5220_v4 = vpop.xlane.xlu1 %5219  ;;  %v5423_v14 = vadd.f32 %v11358_v30, %v5387_v9 }
 0xb98   : > { %8459 = vrsqrt.f32 %v5291_v12  ;;  %v5260_v11 = vmul.f32 0.03125, %v5220_v4 }
 0xb99   : > { %v5388_v61 = vmul.f32 %v11352_v26, %v5352_v47 }
 0xb9a   : > { %v8456_v27 = vpop.eup %8455  ;;  %v5292_v36 = vadd.f32 1e-05, %v5260_v11 }
 0xb9b   : > { %v5353_v33 = vmul.f32 %v8456_v27, %v11296_v34  ;;  %v5223_v7 = vpop.xlane.xlu0 %5222  ;;  %v5424_v29 = vadd.f32 %v11358_v30, %v5388_v61 }
 0xb9c   : > { %8461 = vrsqrt.f32 %v5292_v36  ;;  %v5261_v6 = vmul.f32 0.03125, %v5223_v7 }
 0xb9d   : > { %v5444_v49 = vpack.c.bf16 %v5424_v29, %v5423_v14  ;;  %v5389_v23 = vmul.f32 %v11352_v26, %v5353_v33 }
 0xb9e   : > { %v8458_v3 = vpop.eup %8457  ;;  %v5293_v39 = vadd.f32 1e-05, %v5261_v6 }
 0xb9f   : > { %v5354_v58 = vmul.f32 %v8458_v3, %v11302_v59  ;;  %8011 = vmatmul.mubr.msk.bf16.gmra.mrb[152].mxu1 %vm379_vm0, %v5444_v49  ;;  %v5226_v10 = vpop.xlane.xlu1 %5225  ;;  %v5425_v35 = vadd.f32 %v11358_v30, %v5389_v23  ;;  %v8211_v49 = vld [vmem:[%s12630_s8 + $0x20] sm:$0xff]   ;;  %v8212_v3 = vld [vmem:[%s12630_s8 + $0x28] sm:$0xff]  }
 0xba0   : > { %8463 = vrsqrt.f32 %v5293_v39  ;;  %v5262_v21 = vmul.f32 0.03125, %v5226_v10  ;;  %v8213_v39 = vld [vmem:[%s12630_s8 + $0x30] sm:$0xff]   ;;  %v5451_v10 = vsub.s32 6, %v9078_v15 }
 0xba1   : > { %v5390_v34 = vmul.f32 %v11352_v26, %v5354_v58  ;;  %v8214_v58 = vld [vmem:[%s12630_s8 + $0x38] sm:$0xff]  }
 0xba2   : > { %v8460_v13 = vpop.eup %8459  ;;  %v5294_v2 = vadd.f32 1e-05, %v5262_v21  ;;  %v11495_v23 = vrot.slane %v11349_v38, %v5451_v10 }
 0xba3   : > { %v5355_v20 = vmul.f32 %v8460_v13, %v11308_v50  ;;  %v5229_v48 = vpop.xlane.xlu0 %5228  ;;  %v5426_v55 = vadd.f32 %v11358_v30, %v5390_v34 }
 0xba4   : > { %8465 = vrsqrt.f32 %v5294_v2  ;;  %v5263_v59 = vmul.f32 0.03125, %v5229_v48 }
 0xba5   : > { %v5445_v60 = vpack.c.bf16 %v5426_v55, %v5425_v35  ;;  %v5391_v25 = vmul.f32 %v11352_v26, %v5355_v20 }
 0xba6   : > { %v8462_v5 = vpop.eup %8461  ;;  %v5295_v53 = vadd.f32 1e-05, %v5263_v59 }
 0xba7   : > { %v5356_v16 = vmul.f32 %v8462_v5, %v11314_v57  ;;  %8014 = vmatprep.mubr.msk.bf16.mxu1 %vm379_vm0, %v5445_v60  ;;  %v5232_v46 = vpop.xlane.xlu1 %5231  ;;  %v5427_v63 = vadd.f32 %v11358_v30, %v5391_v25 }
 0xba8   : > { %8467 = vrsqrt.f32 %v5295_v53  ;;  %v5264_v19 = vmul.f32 0.03125, %v5232_v46 }
 0xba9   : > { %v5392_v50 = vmul.f32 %v11352_v26, %v5356_v16 }
 0xbaa   : > { %v8464_v0 = vpop.eup %8463  ;;  %v5296_v54 = vadd.f32 1e-05, %v5264_v19 }
 0xbab   : > { %v5357_v43 = vmul.f32 %v8464_v0, %v11320_v31  ;;  %v5428_v45 = vadd.f32 %v11358_v30, %v5392_v50 }
 0xbac   : > { %8469 = vrsqrt.f32 %v5296_v54 }
 0xbad   : > { %v5446_v37 = vpack.c.bf16 %v5428_v45, %v5427_v63  ;;  %v5393_v47 = vmul.f32 %v11352_v26, %v5357_v43 }
 0xbae   : > { %v8466_v57 = vpop.eup %8465 }
 0xbaf   : > { %v5358_v12 = vmul.f32 %v8466_v57, %v11326_v44  ;;  %8015 = vmatmul.mubr.msk.bf16.gmra.mrb[156].mxu1 %vm379_vm0, %v5446_v37  ;;  %v5429_v31 = vadd.f32 %v11358_v30, %v5393_v47 }
 0xbb1   : > { %v5394_v4 = vmul.f32 %v11352_v26, %v5358_v12 }
 0xbb2   : > { %v8468_v9 = vpop.eup %8467 }
 0xbb3   : > { %v5359_v11 = vmul.f32 %v8468_v9, %v11332_v40  ;;  %v5430_v61 = vadd.f32 %v11358_v30, %v5394_v4  ;;  %v8207_v40 = vld [vmem:[%s12630_s8] sm:$0xff]  }
 0xbb4   : > { %8022 = vmatprep.subr.bf16.mxu1 %v8207_v40 }
 0xbb5   : > { %v5447_v27 = vpack.c.bf16 %v5430_v61, %v5429_v31  ;;  %v5395_v44 = vmul.f32 %v11352_v26, %v5359_v11  ;;  %8023 = vmatpush3.bf16.msra.mxu1 %v8207_v40 }
 0xbb6   : > { %v8470_v36 = vpop.eup %8469 }
 0xbb7   : > { %v5360_v33 = vmul.f32 %v8470_v36, %v11338_v18  ;;  %8018 = vmatprep.mubr.msk.bf16.mxu1 %vm379_vm0, %v5447_v27  ;;  %v5431_v14 = vadd.f32 %v11358_v30, %v5395_v44  ;;  %v8208_v18 = vld [vmem:[%s12630_s8 + $0x8] sm:$0xff]  }
 0xbb8   : > { %8024 = vmatprep.subr.bf16.mxu1 %v8208_v18 }
 0xbb9   : > { %v5396_v7 = vmul.f32 %v11352_v26, %v5360_v33  ;;  %8025 = vmatpush3.bf16.msra.mxu1 %v8208_v18  ;;  %v8209_v26 = vld [vmem:[%s12630_s8 + $0x10] sm:$0xff]  }
 0xbba   : > { %8026 = vmatprep.subr.bf16.mxu1 %v8209_v26 }
 0xbbb   : > { %v5432_v29 = vadd.f32 %v11358_v30, %v5396_v7  ;;  %v8210_v30 = vld [vmem:[%s12630_s8 + $0x18] sm:$0xff]  }
 0xbbd   : > { %v5448_v6 = vpack.c.bf16 %v5432_v29, %v5431_v14  ;;  %8027 = vmatpush3.bf16.msra.mxu1 %v8209_v26 }
 0xbbe   : > { %8028 = vmatprep.subr.bf16.mxu1 %v8210_v30 }
 0xbbf   : > { %8019 = vmatmul.mubr.msk.bf16.gmra.mrb[160].mxu1 %vm379_vm0, %v5448_v6 }
 0xbc1   : > { %8029 = vmatpush3.bf16.msra.mxu1 %v8210_v30 }
 0xbc2   : > { %8030 = vmatprep.subr.bf16.mxu1 %v8211_v49 }
 0xbc5   : > { %8031 = vmatpush3.bf16.msra.mxu1 %v8211_v49 }
 0xbc6   : > { %8032 = vmatprep.subr.bf16.mxu1 %v8212_v3 }
 0xbc9   : > { %8033 = vmatpush3.bf16.msra.mxu1 %v8212_v3 }
 0xbca   : > { %8034 = vmatprep.subr.bf16.mxu1 %v8213_v39 }
 0xbcd   : > { %8035 = vmatpush3.bf16.msra.mxu1 %v8213_v39 }
 0xbce   : > { %8036 = vmatprep.subr.bf16.mxu1 %v8214_v58 }
 0xbd1   : > { %8037 = vmatpush3.bf16.msra.mxu1 %v8214_v58 }
 0xc22   : > { %v7992_v21 = vpop.f32.mrb[132].mxu1 }
 0xc23   : > { %v5552_v34 = vadd.f32 %v7992_v21, %v11495_v23  ;;  %v5543_v13 = vpop.f32.mrb[133].mxu1 }
 0xc24   : > { %v5544_v2 = vadd.f32 %v5543_v13, %v11495_v23  ;;  %v7993_v20 = vpop.f32.mrb[134].mxu1  ;;  %v12653_v13 = vmov -1.0  }
 0xc25   : > { %v5704_v48 = vmul.f32 0.70710677, %v5552_v34  ;;  %v5555_v35 = vadd.f32 %v7993_v20, %v11495_v23  ;;  %v5546_v55 = vpop.f32.mrb[135].mxu1  ;;  %v11541_v6 = vmul.f32 0.5, %v5552_v34 }
 0xc26   : > { %v11500_v59 = vmul.f32 0.70710677, %v5544_v2  ;;  %v11505_v53 = vadd.f32 %v5546_v55, %v11495_v23  ;;  %v11552_v58 = vmul.f32 0.5, %v5544_v2 }
 0xc27   : > { %v5800_v60 = vand.u32 2147483647, %v5704_v48  ;;  %v11502_v5 = vmul.f32 0.70710677, %v5555_v35  ;;  %vm5736_vm3 = vcmp.ge.f32.partialorder %v5704_v48, 0.0  ;;  %v11554_v10 = vmul.f32 0.5, %v5555_v35 }
 0xc28   : > { %v11508_v38 = vand.u32 2147483647, %v11500_v59  ;;  %v11513_v50 = vmul.f32 0.70710677, %v11505_v53  ;;  %v11560_v20 = vsel %vm5736_vm3, 1.0, %v12653_v13  ;;  %vm5734_vm4 = vcmp.ge.f32.partialorder %v11500_v59, 0.0 }
 0xc29   : > { %v5832_v16 = vmul.f32 0.3275911, %v5800_v60  ;;  %v5801_v25 = vand.u32 2147483647, %v11502_v5  ;;  %v6248_v12 = vsub.f32 0.0, %v5800_v60  ;;  %vm5737_vm5 = vcmp.ge.f32.partialorder %v11502_v5, 0.0 }
 0xc2a   : > { %v5830_v46 = vmul.f32 0.3275911, %v11508_v38  ;;  %v11516_v43 = vand.u32 2147483647, %v11513_v50  ;;  %v11600_v5 = vsel %vm5734_vm4, 1.0, %v12653_v13  ;;  %vm5735_vm6 = vcmp.ge.f32.partialorder %v11513_v50, 0.0 }
 0xc2b   : > { %v5864_v19 = vadd.f32 1.0, %v5832_v16  ;;  %v5833_v54 = vmul.f32 0.3275911, %v5801_v25  ;;  %v6249_v31 = vsub.f32 0.0, %v5801_v25  ;;  %v6280_v7 = vmul.f32 %v6248_v12, %v5800_v60 }
 0xc2c   : > { %v5862_v0 = vadd.f32 1.0, %v5830_v46  ;;  %v5831_v45 = vmul.f32 0.3275911, %v11516_v43  ;;  %v6246_v46 = vsub.f32 0.0, %v11508_v38 }
 0xc2d   : > { %8471 = vrcp.f32 %v5864_v19  ;;  %v5865_v63 = vadd.f32 1.0, %v5833_v54  ;;  %v6281_v30 = vmul.f32 %v6249_v31, %v5801_v25  ;;  %v6314_v48 = vmul.f32 1.442695, %v6280_v7 }
 0xc2e   : > { %8473 = vrcp.f32 %v5862_v0  ;;  %v5863_v37 = vadd.f32 1.0, %v5831_v45 }
 0xc2f   : > { %8475 = vrcp.f32 %v5865_v63  ;;  %v6316_v0 = vmul.f32 1.442695, %v6281_v30  ;;  %v11582_v30 = vmul.f32 0.5, %v11505_v53 }
 0xc30   : > { %8477 = vrcp.f32 %v5863_v37 }
 0xc32   : > { %v7996_v57 = vpop.f32.mrb[136].mxu1 }
 0xc33   : > { %v11520_v47 = vadd.f32 %v7996_v57, %v11495_v23  ;;  %v5559_v4 = vpop.f32.mrb[137].mxu1  ;;  %v6247_v57 = vsub.f32 0.0, %v11516_v43 }
 0xc34   : > { %v11523_v9 = vadd.f32 %v5559_v4, %v11495_v23  ;;  %v7997_v11 = vpop.f32.mrb[138].mxu1 }
 0xc35   : > { %v11526_v61 = vmul.f32 0.70710677, %v11520_v47  ;;  %v11529_v27 = vadd.f32 %v7997_v11, %v11495_v23  ;;  %v5562_v36 = vpop.f32.mrb[139].mxu1 }
 0xc36   : > { %v11532_v33 = vmul.f32 0.70710677, %v11523_v9  ;;  %v11575_v4 = vadd.f32 %v5562_v36, %v11495_v23 }
 0xc37   : > { %v11534_v44 = vpop.eup %8471  ;;  %v11537_v14 = vand.u32 2147483647, %v11526_v61  ;;  %v11550_v3 = vmul.f32 0.70710677, %v11529_v27  ;;  %vm5740_vm7 = vcmp.ge.f32.partialorder %v11526_v61, 0.0 }
 0xc38   : > { %v11539_v29 = vpop.eup %8473  ;;  %v5960_v40 = vmul.f32 1.0614054, %v11534_v44  ;;  %v11545_v18 = vand.u32 2147483647, %v11532_v33  ;;  %vm5738_vm8 = vcmp.ge.f32.partialorder %v11532_v33, 0.0  ;;  %v11719_v61 = vmul.f32 0.5, %v11575_v4 }
 0xc39   : > { %v5958_v26 = vmul.f32 1.0614054, %v11539_v29  ;;  %v5836_v49 = vmul.f32 0.3275911, %v11537_v14  ;;  %v11557_v34 = vpop.eup %8475  ;;  %v11569_v54 = vand.u32 2147483647, %v11550_v3 }
 0xc3a   : > { %v5992_v39 = vadd.f32 -1.4531521, %v5960_v40  ;;  %v5834_v21 = vmul.f32 0.3275911, %v11545_v18  ;;  %v5961_v2 = vmul.f32 1.0614054, %v11557_v34  ;;  %v11565_v35 = vpop.eup %8477 }
 0xc3b   : > { %v5990_v55 = vadd.f32 -1.4531521, %v5958_v26  ;;  %v5868_v60 = vadd.f32 1.0, %v5836_v49  ;;  %v5959_v37 = vmul.f32 1.0614054, %v11565_v35  ;;  %v6278_v26 = vmul.f32 %v6246_v46, %v11508_v38 }
 0xc3c   : > { %v6024_v16 = vmul.f32 %v11534_v44, %v5992_v39  ;;  %v5866_v25 = vadd.f32 1.0, %v5834_v21  ;;  %v5993_v45 = vadd.f32 -1.4531521, %v5961_v2  ;;  %v5837_v12 = vmul.f32 0.3275911, %v11569_v54 }
 0xc3d   : > { %v6022_v19 = vmul.f32 %v11539_v29, %v5990_v55  ;;  %8479 = vrcp.f32 %v5868_v60  ;;  %v5991_v40 = vadd.f32 -1.4531521, %v5959_v37  ;;  %v6279_v55 = vmul.f32 %v6247_v57, %v11516_v43 }
 0xc3e   : > { %v6056_v63 = vadd.f32 1.4214138, %v6024_v16  ;;  %8481 = vrcp.f32 %v5866_v25  ;;  %v6025_v7 = vmul.f32 %v11557_v34, %v5993_v45  ;;  %v5869_v49 = vadd.f32 1.0, %v5837_v12 }
 0xc3f   : > { %8483 = vpow2.f32 %v6314_v48  ;;  %v6054_v31 = vadd.f32 1.4214138, %v6022_v19  ;;  %v6023_v36 = vmul.f32 %v11565_v35, %v5991_v40  ;;  %v11588_v60 = vmul.f32 0.70710677, %v11575_v4 }
 0xc40   : > { %v6088_v11 = vmul.f32 %v11534_v44, %v6056_v63  ;;  %v6057_v21 = vadd.f32 1.4214138, %v6025_v7  ;;  %8485 = vpow2.f32 %v6316_v0  ;;  %v6310_v43 = vmul.f32 1.442695, %v6278_v26 }
 0xc41   : > { %8487 = vrcp.f32 %v5869_v49  ;;  %v6086_v38 = vmul.f32 %v11539_v29, %v6054_v31  ;;  %v6055_v2 = vadd.f32 1.4214138, %v6023_v36  ;;  %v11603_v19 = vand.u32 2147483647, %v11588_v60 }
 0xc42   : > { %v6120_v39 = vadd.f32 -0.28449672, %v6088_v11  ;;  %v8000_v48 = vpop.f32.mrb[140].mxu1  ;;  %v6089_v46 = vmul.f32 %v11557_v34, %v6057_v21  ;;  %v5769_v45 = vsel %vm5737_vm5, 1.0, %v12653_v13  ;;  %v6312_v11 = vmul.f32 1.442695, %v6279_v55 }
 0xc43   : > { %v11590_v16 = vpop.f32.mrb[141].mxu1  ;;  %v6087_v57 = vmul.f32 %v11565_v35, %v6055_v2  ;;  %v6252_v59 = vsub.f32 0.0, %v11537_v14  ;;  %v5835_v31 = vmul.f32 0.3275911, %v11603_v19  ;;  %v6118_v26 = vadd.f32 -0.28449672, %v6086_v38 }
 0xc44   : > { %v6152_v53 = vmul.f32 %v11534_v44, %v6120_v39  ;;  %v11595_v25 = vpop.f32.mrb[142].mxu1  ;;  %v6121_v37 = vadd.f32 -0.28449672, %v6089_v46  ;;  %8489 = vpow2.f32 %v6310_v43  ;;  %v6250_v22 = vsub.f32 0.0, %v11545_v18 }
 0xc45   : > { %v11605_v0 = vpop.f32.mrb[143].mxu1  ;;  %v6119_v36 = vadd.f32 -0.28449672, %v6087_v57  ;;  %v5867_v46 = vadd.f32 1.0, %v5835_v31  ;;  %v6284_v51 = vmul.f32 %v6252_v59, %v11537_v14  ;;  %v6150_v43 = vmul.f32 %v11539_v29, %v6118_v26 }
 0xc46   : > { %v6184_v63 = vadd.f32 0.2548296, %v6152_v53  ;;  %v6153_v49 = vmul.f32 %v11557_v34, %v6121_v37  ;;  %v11639_v26 = vmul.f32 0.5, %v11520_v47  ;;  %vm5741_vm9 = vcmp.ge.f32.partialorder %v11550_v3, 0.0 }
 0xc47   : > { %v11609_v12 = vpop.eup %8479  ;;  %8491 = vrcp.f32 %v5867_v46  ;;  %v6151_v14 = vmul.f32 %v11565_v35, %v6119_v36  ;;  %v6182_v46 = vadd.f32 0.2548296, %v6150_v43  ;;  %v11733_v4 = vadd.f32 %v11605_v0, %v11495_v23 }
 0xc48   : > { %v11614_v7 = vpop.eup %8481  ;;  %v6216_v40 = vmul.f32 %v11534_v44, %v6184_v63  ;;  %v5964_v39 = vmul.f32 1.0614054, %v11609_v12  ;;  %v6185_v2 = vadd.f32 0.2548296, %v6153_v49  ;;  %v11623_v44 = vadd.f32 %v8000_v48, %v11495_v23 }
 0xc49   : > { %v8484_v21 = vpop.eup %8483  ;;  %v5962_v53 = vmul.f32 1.0614054, %v11614_v7  ;;  %8493 = vpow2.f32 %v6312_v11  ;;  %vm5739_vm10 = vcmp.ge.f32.partialorder %v11588_v60, 0.0  ;;  %v11871_v1 = vmul.f32 0.5, %v11733_v4 }
 0xc4a   : > { %v6376_v55 = vmul.f32 %v8484_v21, %v6216_v40  ;;  %v5996_v13 = vadd.f32 -1.4531521, %v5964_v39  ;;  %v8486_v38 = vpop.eup %8485  ;;  %v6217_v37 = vmul.f32 %v11557_v34, %v6185_v2  ;;  %v12705_v40 = vmov -1.0  }
 0xc4b   : > { %v5994_v56 = vadd.f32 -1.4531521, %v5962_v53  ;;  %v11628_v31 = vpop.eup %8487  ;;  %v11633_v49 = vsel %vm5735_vm6, 1.0, %v12705_v40  ;;  %v6282_v21 = vmul.f32 %v6250_v22, %v11545_v18  ;;  %v11644_v50 = vmul.f32 0.70710677, %v11623_v44 }
 0xc4c   : > { %v6408_v63 = vsub.f32 1.0, %v6376_v55  ;;  %v6028_v57 = vmul.f32 %v11609_v12, %v5996_v13  ;;  %v6377_v39 = vmul.f32 %v8486_v38, %v6217_v37  ;;  %v5965_v53 = vmul.f32 1.0614054, %v11628_v31 }
 0xc4d   : > { %v6026_v48 = vmul.f32 %v11614_v7, %v5994_v56  ;;  %v6322_v56 = vmul.f32 1.442695, %v6284_v51  ;;  %v6183_v55 = vadd.f32 0.2548296, %v6151_v14  ;;  %v6253_v51 = vsub.f32 0.0, %v11569_v54 }
 0xc4e   : > { %v6440_v59 = vmul.f32 %v6408_v63, %v11560_v20  ;;  %v6060_v34 = vadd.f32 1.4214138, %v6028_v57  ;;  %v6409_v36 = vsub.f32 1.0, %v6377_v39  ;;  %v11648_v20 = vmul.f32 0.5, %v11523_v9  ;;  %v8490_v37 = vpop.eup %8489 }
 0xc4f   : > { %v6058_v13 = vadd.f32 1.4214138, %v6026_v48  ;;  %v5997_v2 = vadd.f32 -1.4531521, %v5965_v53  ;;  %v11657_v14 = vand.u32 2147483647, %v11644_v50  ;;  %v6214_v48 = vmul.f32 %v11539_v29, %v6182_v46 }
 0xc50   : > { %v6092_v11 = vmul.f32 %v11609_v12, %v6060_v34  ;;  %v6472_v38 = vadd.f32 1.0, %v6440_v59  ;;  %v6441_v63 = vmul.f32 %v6409_v36, %v5769_v45  ;;  %8495 = vpow2.f32 %v6322_v56 }
 0xc51   : > { %v6090_v47 = vmul.f32 %v11614_v7, %v6058_v13  ;;  %v6029_v57 = vmul.f32 %v11628_v31, %v5997_v2  ;;  %v6318_v45 = vmul.f32 1.442695, %v6282_v21  ;;  %v11664_v34 = vpop.eup %8491  ;;  %v6215_v13 = vmul.f32 %v11565_v35, %v6183_v55 }
 0xc52   : > { %v6124_v22 = vadd.f32 -0.28449672, %v6092_v11  ;;  %v11652_v18 = vpop.f32.mrb[144].mxu1  ;;  %v6473_v59 = vadd.f32 1.0, %v6441_v63  ;;  %v5840_v11 = vmul.f32 0.3275911, %v11657_v14  ;;  %v11672_v2 = vmul.f32 %v6472_v38, %v11541_v6 }
 0xc53   : > { %v6122_v43 = vadd.f32 -0.28449672, %v6090_v47  ;;  %v11659_v9 = vpop.f32.mrb[145].mxu1  ;;  %v6061_v36 = vadd.f32 1.4214138, %v6029_v57  ;;  %v11680_v46 = vadd.f32 %v11590_v16, %v11495_v23  ;;  %v8494_v35 = vpop.eup %8493  ;;  %v6285_v63 = vmul.f32 %v6253_v51, %v11569_v54 }
 0xc54   : > { %v11662_v39 = vpop.f32.mrb[146].mxu1  ;;  %v6156_v53 = vmul.f32 %v11609_v12, %v6124_v22  ;;  %v11675_v29 = vmul.f32 %v6473_v59, %v11554_v10  ;;  %v5963_v21 = vmul.f32 1.0614054, %v11664_v34  ;;  %v5872_v22 = vadd.f32 1.0, %v5840_v11 }
 0xc55   : > { %v11669_v47 = vpop.f32.mrb[147].mxu1  ;;  %v6154_v56 = vmul.f32 %v11614_v7, %v6122_v43  ;;  %v6093_v55 = vmul.f32 %v11628_v31, %v6061_v36  ;;  %v6374_v57 = vmul.f32 %v8490_v37, %v6214_v48  ;;  %8497 = vpow2.f32 %v6318_v45 }
 0xc56   : > { %v5995_v10 = vadd.f32 -1.4531521, %v5963_v21  ;;  %v6375_v38 = vmul.f32 %v8494_v35, %v6215_v13  ;;  %v6188_v59 = vadd.f32 0.2548296, %v6156_v53  ;;  %8499 = vrcp.f32 %v5872_v22 }
 0xc57   : > { %v6125_v16 = vadd.f32 -0.28449672, %v6093_v55  ;;  %v6251_v43 = vsub.f32 0.0, %v11603_v19  ;;  %v11691_v36 = vmul.f32 0.70710677, %v11680_v46  ;;  %v11696_v51 = vadd.f32 %v11595_v25, %v11495_v23 }
 0xc58   : > { %v6027_v8 = vmul.f32 %v11664_v34, %v5995_v10  ;;  %v6186_v54 = vadd.f32 0.2548296, %v6154_v56  ;;  %v6324_v37 = vmul.f32 1.442695, %v6285_v63  ;;  %v6406_v48 = vsub.f32 1.0, %v6374_v57 }
 0xc59   : > { %v11699_v45 = vmul.f32 0.5, %v11529_v27  ;;  %v11702_v53 = vand.u32 2147483647, %v11691_v36  ;;  %v6407_v11 = vsub.f32 1.0, %v6375_v38  ;;  %v5772_v21 = vsel %vm5740_vm7, 1.0, %v12705_v40 }
 0xc5a   : > { %v6059_v13 = vadd.f32 1.4214138, %v6027_v8  ;;  %v6220_v3 = vmul.f32 %v11609_v12, %v6188_v59  ;;  %v5770_v25 = vsel %vm5738_vm8, 1.0, %v12705_v40  ;;  %v8496_v35 = vpop.eup %8495  ;;  %v11712_v56 = vsel %vm5741_vm9, 1.0, %v12705_v40 }
 0xc5b   : > { %v6157_v8 = vmul.f32 %v11628_v31, %v6125_v16  ;;  %v6283_v27 = vmul.f32 %v6251_v43, %v11603_v19  ;;  %v5838_v55 = vmul.f32 0.3275911, %v11702_v53  ;;  %v6218_v63 = vmul.f32 %v11614_v7, %v6186_v54 }
 0xc5c   : > { %8501 = vpow2.f32 %v6324_v37  ;;  %v11722_v12 = vmul.f32 0.70710677, %v11696_v51  ;;  %v6438_v33 = vmul.f32 %v6406_v48, %v11600_v5  ;;  %v6091_v22 = vmul.f32 %v11664_v34, %v6059_v13 }
 0xc5d   : > { %v6256_v57 = vsub.f32 0.0, %v11657_v14  ;;  %v5870_v10 = vadd.f32 1.0, %v5838_v55  ;;  %v6439_v19 = vmul.f32 %v6407_v11, %v11633_v49  ;;  %v6380_v38 = vmul.f32 %v8496_v35, %v6220_v3 }
 0xc5e   : > { %v11729_v59 = vand.u32 2147483647, %v11722_v12  ;;  %v6189_v16 = vadd.f32 0.2548296, %v6157_v8  ;;  %v6320_v5 = vmul.f32 1.442695, %v6283_v27 }
 0xc5f   : > { %v8498_v7 = vpop.eup %8497  ;;  %8503 = vrcp.f32 %v5870_v10  ;;  %v11741_v49 = vmul.f32 0.5, %v11623_v44  ;;  %vm5744_vm11 = vcmp.ge.f32.partialorder %v11644_v50, 0.0  ;;  %v6470_v13 = vadd.f32 1.0, %v6438_v33 }
 0xc60   : > { %v11738_v54 = vpop.eup %8499  ;;  %v6378_v37 = vmul.f32 %v8498_v7, %v6218_v63  ;;  %v5841_v48 = vmul.f32 0.3275911, %v11729_v59  ;;  %v6123_v11 = vadd.f32 -0.28449672, %v6091_v22  ;;  %v6288_v35 = vmul.f32 %v6256_v57, %v11657_v14 }
 0xc61   : > { %v5968_v3 = vmul.f32 1.0614054, %v11738_v54  ;;  %v6471_v27 = vadd.f32 1.0, %v6439_v19  ;;  %v6412_v55 = vsub.f32 1.0, %v6380_v38  ;;  %v11752_v44 = vmul.f32 0.70710677, %v11733_v4 }
 0xc62   : > { %v11736_v43 = vpop.f32.mrb[148].mxu1  ;;  %v5873_v63 = vadd.f32 1.0, %v5841_v48  ;;  %v6221_v7 = vmul.f32 %v11628_v31, %v6189_v16  ;;  %8505 = vpow2.f32 %v6320_v5  ;;  %v11759_v33 = vadd.f32 %v11652_v18, %v11495_v23 }
 0xc63   : > { %v11745_v0 = vpop.f32.mrb[149].mxu1  ;;  %v6000_v6 = vadd.f32 -1.4531521, %v5968_v3  ;;  %v6410_v22 = vsub.f32 1.0, %v6378_v37  ;;  %v11764_v14 = vsel %vm5739_vm10, 1.0, %v12705_v40  ;;  %v6155_v19 = vmul.f32 %v11664_v34, %v6123_v11 }
 0xc64   : > { %v11749_v8 = vpop.f32.mrb[150].mxu1  ;;  %8507 = vrcp.f32 %v5873_v63  ;;  %v11767_v57 = vand.u32 2147483647, %v11752_v44  ;;  %v11773_v31 = vsel %vm5744_vm11, 1.0, %v12705_v40  ;;  %v6330_v38 = vmul.f32 1.442695, %v6288_v35 }
 0xc65   : > { %v11754_v10 = vpop.f32.mrb[151].mxu1  ;;  %v6032_v18 = vmul.f32 %v11738_v54, %v6000_v6  ;;  %v11777_v5 = vmul.f32 %v6470_v13, %v11552_v58  ;;  %v11780_v60 = vmul.f32 %v6471_v27, %v11582_v30  ;;  %v6444_v37 = vmul.f32 %v6412_v55, %v5772_v21 }
 0xc66   : > { %v8502_v16 = vpop.eup %8501  ;;  %v5839_v48 = vmul.f32 0.3275911, %v11767_v57  ;;  %vm5742_vm12 = vcmp.ge.f32.partialorder %v11691_v36, 0.0  ;;  %v11785_v50 = vmul.f32 0.70710677, %v11759_v33  ;;  %v6442_v63 = vmul.f32 %v6410_v22, %v5770_v25 }
 0xc67   : > { %v6381_v3 = vmul.f32 %v8502_v16, %v6221_v7  ;;  %v6064_v11 = vadd.f32 1.4214138, %v6032_v18  ;;  %v6254_v6 = vsub.f32 0.0, %v11702_v53  ;;  %v11790_v58 = vadd.f32 %v11659_v9, %v11495_v23 }
 0xc68   : > { %v5871_v35 = vadd.f32 1.0, %v5839_v48  ;;  %v6187_v21 = vadd.f32 0.2548296, %v6155_v19  ;;  %8509 = vpow2.f32 %v6330_v38  ;;  %v11795_v13 = vmul.f32 0.5, %v11680_v46 }
 0xc69   : > { %v11792_v30 = vpop.eup %8503  ;;  %v11798_v27 = vand.u32 2147483647, %v11785_v50  ;;  %v6476_v55 = vadd.f32 1.0, %v6444_v37  ;;  %v6096_v25 = vmul.f32 %v11738_v54, %v6064_v11  ;;  %v6413_v22 = vsub.f32 1.0, %v6381_v3 }
 0xc6a   : > { %v5966_v7 = vmul.f32 1.0614054, %v11792_v30  ;;  %8511 = vrcp.f32 %v5871_v35  ;;  %v11805_v9 = vsel %vm5742_vm12, 1.0, %v12705_v40  ;;  %v11808_v19 = vmul.f32 0.5, %v11696_v51 }
 0xc6b   : > { %v5844_v46 = vmul.f32 0.3275911, %v11798_v27  ;;  %v6474_v18 = vadd.f32 1.0, %v6442_v63  ;;  %v6286_v16 = vmul.f32 %v6254_v6, %v11702_v53  ;;  %v11813_v37 = vmul.f32 0.70710677, %v11790_v58 }
 0xc6c   : > { %v5998_v38 = vadd.f32 -1.4531521, %v5966_v7  ;;  %v8506_v48 = vpop.eup %8505  ;;  %v6219_v3 = vmul.f32 %v11664_v34, %v6187_v21  ;;  %vm5745_vm13 = vcmp.ge.f32.partialorder %v11722_v12, 0.0  ;;  %v11819_v11 = vadd.f32 %v11662_v39, %v11495_v23 }
 0xc6d   : > { %v5876_v36 = vadd.f32 1.0, %v5844_v46  ;;  %v11824_v63 = vmul.f32 %v6476_v55, %v11639_v26  ;;  %v6128_v35 = vadd.f32 -0.28449672, %v6096_v25  ;;  %v11828_v6 = vand.u32 2147483647, %v11813_v37 }
 0xc6e   : > { %v11821_v51 = vpop.eup %8507  ;;  %v6030_v53 = vmul.f32 %v11792_v30, %v5998_v38  ;;  %v6445_v34 = vmul.f32 %v6413_v22, %v11712_v56  ;;  %v6257_v7 = vsub.f32 0.0, %v11729_v59  ;;  %v11834_v39 = vmul.f32 %v6474_v18, %v11648_v20 }
 0xc6f   : > { %v5969_v21 = vmul.f32 1.0614054, %v11821_v51  ;;  %8513 = vrcp.f32 %v5876_v36  ;;  %v6326_v32 = vmul.f32 1.442695, %v6286_v16  ;;  %v5842_v26 = vmul.f32 0.3275911, %v11828_v6 }
 0xc70   : > { %v6062_v46 = vadd.f32 1.4214138, %v6030_v53  ;;  %v6379_v55 = vmul.f32 %v8506_v48, %v6219_v3  ;;  %v6255_v38 = vsub.f32 0.0, %v11767_v57  ;;  %v11839_v24 = vmul.f32 0.70710677, %v11819_v11 }
 0xc71   : > { %v6001_v25 = vadd.f32 -1.4531521, %v5969_v21  ;;  %v6160_v22 = vmul.f32 %v11738_v54, %v6128_v35  ;;  %v11848_v20 = vsel %vm5745_vm13, 1.0, %v12705_v40  ;;  %v5874_v18 = vadd.f32 1.0, %v5842_v26 }
 0xc72   : > { %v11841_v56 = vpop.f32.mrb[152].mxu1  ;;  %v6094_v36 = vmul.f32 %v11792_v30, %v6062_v46  ;;  %v8510_v48 = vpop.eup %8509  ;;  %v6477_v3 = vadd.f32 1.0, %v6445_v34  ;;  %v6289_v21 = vmul.f32 %v6257_v7, %v11729_v59  ;;  %v11855_v28 = vand.u32 2147483647, %v11839_v24 }
 0xc73   : > { %v11850_v16 = vpop.f32.mrb[153].mxu1  ;;  %v6033_v53 = vmul.f32 %v11821_v51, %v6001_v25  ;;  %vm5743_vm14 = vcmp.ge.f32.partialorder %v11752_v44, 0.0  ;;  %8515 = vrcp.f32 %v5874_v18  ;;  %v11864_v12 = vadd.f32 %v11669_v47, %v11495_v23 }
 0xc74   : > { %v11857_v35 = vpop.f32.mrb[154].mxu1  ;;  %v11859_v46 = vpop.eup %8511  ;;  %v6126_v42 = vadd.f32 -0.28449672, %v6094_v36  ;;  %v6411_v26 = vsub.f32 1.0, %v6379_v55  ;;  %v6287_v7 = vmul.f32 %v6255_v38, %v11767_v57  ;;  %v6192_v52 = vadd.f32 0.2548296, %v6160_v22 }
 0xc75   : > { %v11866_v34 = vpop.f32.mrb[155].mxu1  ;;  %v6065_v25 = vadd.f32 1.4214138, %v6033_v53  ;;  %v5967_v59 = vmul.f32 1.0614054, %v11859_v46  ;;  %8517 = vpow2.f32 %v6326_v32  ;;  %v11876_v47 = vsel %vm5743_vm14, 1.0, %v12705_v40 }
 0xc76   : > { %v5845_v44 = vmul.f32 0.3275911, %v11855_v28  ;;  %v6158_v36 = vmul.f32 %v11792_v30, %v6126_v42  ;;  %v6332_v18 = vmul.f32 1.442695, %v6289_v21  ;;  %v11880_v41 = vmul.f32 0.70710677, %v11864_v12 }
 0xc77   : > { %v5999_v17 = vadd.f32 -1.4531521, %v5967_v59  ;;  %v6097_v55 = vmul.f32 %v11821_v51, %v6065_v25  ;;  %v6534_v32 = vpack.c.bf16 %v11780_v60, %v11777_v5  ;;  %v11887_v57 = vmul.f32 %v6477_v3, %v11699_v45 }
 0xc78   : > { %v5877_v53 = vadd.f32 1.0, %v5845_v44  ;;  %v6443_v42 = vmul.f32 %v6411_v26, %v11764_v14  ;;  %v6328_v22 = vmul.f32 1.442695, %v6287_v7  ;;  %v6224_v21 = vmul.f32 %v11738_v54, %v6192_v52 }
 0xc79   : > { %v11884_v4 = vpop.eup %8513  ;;  %v6031_v38 = vmul.f32 %v11859_v46, %v5999_v17  ;;  %vm5748_vm15 = vcmp.ge.f32.partialorder %v11785_v50, 0.0  ;;  %8038 = vmatprep.mubr.bf16.mxu1 %v6534_v32  ;;  %v6190_v59 = vadd.f32 0.2548296, %v6158_v36  ;;  %v11895_v60 = vmul.f32 0.5, %v11759_v33 }
 0xc7a   : > { %v5972_v25 = vmul.f32 1.0614054, %v11884_v4  ;;  %8519 = vrcp.f32 %v5877_v53  ;;  %v6260_v45 = vsub.f32 0.0, %v11798_v27  ;;  %v12706_v14 = vpack.c.bf16 %v11675_v29, %v11672_v2 }
 0xc7b   : > { %v6063_v5 = vadd.f32 1.4214138, %v6031_v38  ;;  %v6129_v17 = vadd.f32 -0.28449672, %v6097_v55  ;;  %8521 = vpow2.f32 %v6332_v18  ;;  %v11902_v54 = vand.u32 2147483647, %v11880_v41 }
 0xc7c   : > { %8039 = vmatmul.mubr.bf16.vlgmr.msra.gmra.mrb[164].mxu1 %v12706_v14  ;;  %v6004_v52 = vadd.f32 -1.4531521, %v5972_v25  ;;  %v6475_v3 = vadd.f32 1.0, %v6443_v42  ;;  %8523 = vpow2.f32 %v6328_v22  ;;  %v11908_v33 = vsel %vm5748_vm15, 1.0, %v12705_v40 }
 0xc7d   : > { %v6095_v26 = vmul.f32 %v11859_v46, %v6063_v5  ;;  %v11910_v7 = vpop.eup %8515  ;;  %v6384_v44 = vmul.f32 %v8510_v48, %v6224_v21  ;;  %v5843_v29 = vmul.f32 0.3275911, %v11902_v54  ;;  %v11916_v36 = vadd.f32 %v11736_v43, %v11495_v23 }
 0xc7e   : > { %v6036_v2 = vmul.f32 %v11884_v4, %v6004_v52  ;;  %v6222_v18 = vmul.f32 %v11792_v30, %v6190_v59  ;;  %v6292_v55 = vmul.f32 %v6260_v45, %v11798_v27  ;;  %v5970_v53 = vmul.f32 1.0614054, %v11910_v7 }
 0xc7f   : > { %v6258_v50 = vsub.f32 0.0, %v11828_v6  ;;  %v8518_v42 = vpop.eup %8517  ;;  %v6161_v48 = vmul.f32 %v11821_v51, %v6129_v17  ;;  %v6127_v38 = vadd.f32 -0.28449672, %v6095_v26  ;;  %v5875_v21 = vadd.f32 1.0, %v5843_v29 }
 0xc80   : > { %v6068_v22 = vadd.f32 1.4214138, %v6036_v2  ;;  %v11928_v43 = vmul.f32 0.5, %v11790_v58  ;;  %vm5746_vm1 = vcmp.ge.f32.partialorder %v11813_v37, 0.0  ;;  %v6002_v30 = vadd.f32 -1.4531521, %v5970_v53 }
 0xc81   : > { %v11932_v27 = vmul.f32 0.5, %v11819_v11  ;;  %v6416_v5 = vsub.f32 1.0, %v6384_v44  ;;  %8525 = vrcp.f32 %v5875_v21  ;;  %v11938_v14 = vmul.f32 0.70710677, %v11916_v36 }
 0xc82   : > { %v11922_v32 = vpop.f32.mrb[156].mxu1  ;;  %v6100_v45 = vmul.f32 %v11884_v4, %v6068_v22  ;;  %v6338_v52 = vmul.f32 1.442695, %v6292_v55  ;;  %v6034_v58 = vmul.f32 %v11910_v7, %v6002_v30  ;;  %v6290_v26 = vmul.f32 %v6258_v50, %v11828_v6 }
 0xc83   : > { %v11925_v25 = vpop.f32.mrb[157].mxu1  ;;  %v11946_v11 = vadd.f32 %v11745_v0, %v11495_v23  ;;  %v6382_v44 = vmul.f32 %v8518_v42, %v6222_v18  ;;  %v6193_v29 = vadd.f32 0.2548296, %v6161_v48  ;;  %v6159_v53 = vmul.f32 %v11859_v46, %v6127_v38 }
 0xc84   : > { %v11934_v59 = vpop.f32.mrb[158].mxu1  ;;  %v11948_v2 = vpop.eup %8519  ;;  %v11954_v22 = vsel %vm5746_vm1, 1.0, %v12705_v40  ;;  %v11957_v55 = vmul.f32 %v6475_v3, %v11719_v61  ;;  %v6132_v21 = vadd.f32 -0.28449672, %v6100_v45  ;;  %v6066_v6 = vadd.f32 1.4214138, %v6034_v58 }
 0xc85   : > { %12707 = vst [vmem:[#allocation35_spill] sm:$0xff] %v11934_v59  ;;  %v11940_v17 = vpop.f32.mrb[159].mxu1  ;;  %v5973_v50 = vmul.f32 1.0614054, %v11948_v2  ;;  %v8522_v0 = vpop.eup %8521  ;;  %v6448_v30 = vmul.f32 %v6416_v5, %v11773_v31  ;;  %vm5749_vm2 = vcmp.ge.f32.partialorder %v11839_v24, 0.0  ;;  %v6261_v18 = vsub.f32 0.0, %v11855_v28 }
 0xc86   : > { %12708 = vst [vmem:[#allocation36_spill] sm:$0xff] %v11940_v17  ;;  %v11964_v42 = vand.u32 2147483647, %v11938_v14  ;;  %v8524_v37 = vpop.eup %8523  ;;  %v6098_v48 = vmul.f32 %v11910_v7, %v6066_v6  ;;  %v6334_v38 = vmul.f32 1.442695, %v6290_v26  ;;  %v6414_v45 = vsub.f32 1.0, %v6382_v44 }
 0xc87   : > { %v6005_v61 = vadd.f32 -1.4531521, %v5973_v50  ;;  %v11968_v3 = vmul.f32 0.70710677, %v11946_v11  ;;  %v6225_v58 = vmul.f32 %v11821_v51, %v6193_v29  ;;  %v6191_v62 = vadd.f32 0.2548296, %v6159_v53 }
 0xc88   : > { %v5848_v31 = vmul.f32 0.3275911, %v11964_v42  ;;  %v6164_v24 = vmul.f32 %v11884_v4, %v6132_v21  ;;  %8527 = vpow2.f32 %v6338_v52  ;;  %v11974_v5 = vsel %vm5749_vm2, 1.0, %v12705_v40 }
 0xc89   : > { %v6037_v15 = vmul.f32 %v11948_v2, %v6005_v61  ;;  %v6480_v6 = vadd.f32 1.0, %v6448_v30  ;;  %v6293_v26 = vmul.f32 %v6261_v18, %v11855_v28  ;;  %v6259_v50 = vsub.f32 0.0, %v11902_v54 }
 0xc8a   : > { %v5880_v17 = vadd.f32 1.0, %v5848_v31  ;;  %v6130_v44 = vadd.f32 -0.28449672, %v6098_v48  ;;  %8529 = vpow2.f32 %v6334_v38  ;;  %v11980_v29 = vand.u32 2147483647, %v11968_v3 }
 0xc8b   : > { %v6069_v51 = vadd.f32 1.4214138, %v6037_v15  ;;  %v11982_v53 = vpop.eup %8525  ;;  %v6446_v52 = vmul.f32 %v6414_v45, %v11805_v9  ;;  %v6385_v21 = vmul.f32 %v8522_v0, %v6225_v58  ;;  %v6223_v59 = vmul.f32 %v11859_v46, %v6191_v62 }
 0xc8c   : > { %8531 = vrcp.f32 %v5880_v17  ;;  %v6196_v30 = vadd.f32 0.2548296, %v6164_v24  ;;  %v5971_v18 = vmul.f32 1.0614054, %v11982_v53  ;;  %v11990_v48 = vadd.f32 %v11749_v8, %v11495_v23 }
 0xc8d   : > { %v6101_v28 = vmul.f32 %v11948_v2, %v6069_v51  ;;  %v6340_v15 = vmul.f32 1.442695, %v6293_v26  ;;  %v11993_v38 = vmul.f32 0.5, %v11864_v12  ;;  %vm5747_vm3 = vcmp.ge.f32.partialorder %v11880_v41, 0.0 }
 0xc8e   : > { %v5846_v9 = vmul.f32 0.3275911, %v11980_v29  ;;  %v11998_v62 = vmul.f32 %v6480_v6, %v11741_v49  ;;  %v6162_v46 = vmul.f32 %v11910_v7, %v6130_v44  ;;  %v6003_v17 = vadd.f32 -1.4531521, %v5971_v18 }
 0xc8f   : > { %v6291_v0 = vmul.f32 %v6259_v50, %v11902_v54  ;;  %v6478_v8 = vadd.f32 1.0, %v6446_v52  ;;  %v6417_v45 = vsub.f32 1.0, %v6385_v21  ;;  %v6383_v58 = vmul.f32 %v8524_v37, %v6223_v59 }
 0xc90   : > { %v5878_v31 = vadd.f32 1.0, %v5846_v9  ;;  %v6228_v24 = vmul.f32 %v11884_v4, %v6196_v30  ;;  %v6133_v26 = vadd.f32 -0.28449672, %v6101_v28  ;;  %v6035_v51 = vmul.f32 %v11982_v53, %v6003_v17 }
 0xc91   : > { %v12009_v49 = vmul.f32 0.70710677, %v11990_v48  ;;  %v12016_v54 = vsel %vm5747_vm3, 1.0, %v12705_v40  ;;  %v12019_v59 = vmul.f32 0.5, %v11916_v36  ;;  %v12023_v4 = vadd.f32 %v11754_v10, %v11495_v23 }
 0xc92   : > { %v12002_v61 = vpop.f32.mrb[160].mxu1  ;;  %8533 = vrcp.f32 %v5878_v31  ;;  %v8528_v50 = vpop.eup %8527  ;;  %v6194_v44 = vadd.f32 0.2548296, %v6162_v46  ;;  %v6067_v52 = vadd.f32 1.4214138, %v6035_v51  ;;  %v12028_v30 = vmul.f32 %v6478_v8, %v11795_v13 }
 0xc93   : > { %v12004_v12 = vpop.f32.mrb[161].mxu1  ;;  %8535 = vpow2.f32 %v6340_v15  ;;  %v6336_v21 = vmul.f32 1.442695, %v6291_v0  ;;  %vm5752_vm4 = vcmp.ge.f32.partialorder %v11938_v14, 0.0  ;;  %v6264_v41 = vsub.f32 0.0, %v11964_v42 }
 0xc94   : > { %v12011_v6 = vpop.f32.mrb[162].mxu1  ;;  %v12033_v36 = vand.u32 2147483647, %v12009_v49  ;;  %v8530_v28 = vpop.eup %8529  ;;  %v6449_v10 = vmul.f32 %v6417_v45, %v11848_v20  ;;  %v6415_v18 = vsub.f32 1.0, %v6383_v58  ;;  %v6388_v9 = vmul.f32 %v8528_v50, %v6228_v24 }
 0xc95   : > { %v12025_v37 = vpop.f32.mrb[163].mxu1  ;;  %v6165_v46 = vmul.f32 %v11948_v2, %v6133_v26  ;;  %v6099_v17 = vmul.f32 %v11982_v53, %v6067_v52  ;;  %v12042_v14 = vmul.f32 0.70710677, %v12023_v4  ;;  %v6536_v0 = vpack.c.bf16 %v11957_v55, %v11834_v39 }
 0xc96   : > { %v12037_v15 = vpop.eup %8531  ;;  %v5849_v13 = vmul.f32 0.3275911, %v12033_v36  ;;  %v6226_v8 = vmul.f32 %v11910_v7, %v6194_v44  ;;  %8537 = vpow2.f32 %v6336_v21  ;;  %v12048_v20 = vsel %vm5752_vm4, 1.0, %v12705_v40 }
 0xc97   : > { %v5976_v45 = vmul.f32 1.0614054, %v12037_v15  ;;  %v6296_v58 = vmul.f32 %v6264_v41, %v11964_v42  ;;  %v12053_v31 = vmul.f32 0.5, %v11946_v11  ;;  %v12056_v26 = vand.u32 2147483647, %v12042_v14  ;;  %8042 = vmatprep.mubr.bf16.mxu1 %v6536_v0 }
 0xc98   : > { %v5881_v24 = vadd.f32 1.0, %v5849_v13  ;;  %v6481_v51 = vadd.f32 1.0, %v6449_v10  ;;  %v6420_v39 = vsub.f32 1.0, %v6388_v9  ;;  %v6197_v55 = vadd.f32 0.2548296, %v6165_v46 }
 0xc99   : > { %v6008_v7 = vadd.f32 -1.4531521, %v5976_v45  ;;  %v6447_v50 = vmul.f32 %v6415_v18, %v11876_v47  ;;  %v6131_v44 = vadd.f32 -0.28449672, %v6099_v17  ;;  %v5847_v52 = vmul.f32 0.3275911, %v12056_v26 }
 0xc9a   : > { %8539 = vrcp.f32 %v5881_v24  ;;  %v6386_v21 = vmul.f32 %v8530_v28, %v6226_v8  ;;  %vm5750_vm5 = vcmp.ge.f32.partialorder %v11968_v3, 0.0  ;;  %v6262_v11 = vsub.f32 0.0, %v11980_v29 }
 0xc9b   : > { %v6040_v42 = vmul.f32 %v12037_v15, %v6008_v7  ;;  %v6346_v13 = vmul.f32 1.442695, %v6296_v58  ;;  %v5879_v10 = vadd.f32 1.0, %v5847_v52  ;;  %v6537_v9 = vpack.c.bf16 %v11887_v57, %v11824_v63 }
 0xc9c   : > { %v12063_v41 = vpop.eup %8533  ;;  %v12069_v47 = vadd.f32 %v11841_v56, %v11495_v23  ;;  %v6452_v28 = vmul.f32 %v6420_v39, %v11908_v33  ;;  %v6229_v46 = vmul.f32 %v11948_v2, %v6197_v55  ;;  %v6479_v8 = vadd.f32 1.0, %v6447_v50 }
 0xc9d   : > { %v8536_v18 = vpop.eup %8535  ;;  %v6072_v17 = vadd.f32 1.4214138, %v6040_v42  ;;  %v5974_v0 = vmul.f32 1.0614054, %v12063_v41  ;;  %v6163_v45 = vmul.f32 %v11982_v53, %v6131_v44  ;;  %8541 = vrcp.f32 %v5879_v10  ;;  %8043 = vmatmul.mubr.bf16.gmra.mrb[168].mxu1 %v6537_v9 }
 0xc9e   : > { %v12076_v58 = vmul.f32 0.70710677, %v12069_v47  ;;  %v12079_v63 = vmul.f32 %v6481_v51, %v11808_v19  ;;  %v6418_v56 = vsub.f32 1.0, %v6386_v21  ;;  %v6294_v33 = vmul.f32 %v6262_v11, %v11980_v29 }
 0xc9f   : > { %v6006_v57 = vadd.f32 -1.4531521, %v5974_v0  ;;  %v6104_v2 = vmul.f32 %v12037_v15, %v6072_v17  ;;  %v12086_v24 = vsel %vm5750_vm5, 1.0, %v12705_v40  ;;  %v12093_v55 = vadd.f32 %v11850_v16, %v11495_v23 }
 0xca0   : > { %v12089_v39 = vand.u32 2147483647, %v12076_v58  ;;  %v8538_v19 = vpop.eup %8537  ;;  %v6484_v51 = vadd.f32 1.0, %v6452_v28  ;;  %v6389_v7 = vmul.f32 %v8536_v18, %v6229_v46  ;;  %v6265_v29 = vsub.f32 0.0, %v12033_v36 }
 0xca1   : > { %v6038_v50 = vmul.f32 %v12063_v41, %v6006_v57  ;;  %v12098_v44 = vmul.f32 %v6479_v8, %v11871_v1  ;;  %v6195_v3 = vadd.f32 0.2548296, %v6163_v45  ;;  %8543 = vpow2.f32 %v6346_v13 }
 0xca2   : > { %v5852_v52 = vmul.f32 0.3275911, %v12089_v39  ;;  %v6450_v21 = vmul.f32 %v6418_v56, %v11954_v22  ;;  %v6342_v11 = vmul.f32 1.442695, %v6294_v33  ;;  %v12103_v16 = vmul.f32 0.70710677, %v12093_v55 }
 0xca3   : > { %v6070_v42 = vadd.f32 1.4214138, %v6038_v50  ;;  %v6136_v9 = vadd.f32 -0.28449672, %v6104_v2  ;;  %v12108_v18 = vmul.f32 0.5, %v11990_v48  ;;  %vm5753_vm6 = vcmp.ge.f32.partialorder %v12009_v49, 0.0 }
 0xca4   : > { %v12105_v10 = vpop.eup %8539  ;;  %v5884_v1 = vadd.f32 1.0, %v5852_v52  ;;  %v12112_v13 = vmul.f32 %v6484_v51, %v11895_v60  ;;  %v6421_v28 = vsub.f32 1.0, %v6389_v7  ;;  %v6297_v46 = vmul.f32 %v6265_v29, %v12033_v36 }
 0xca5   : > { %v5977_v22 = vmul.f32 1.0614054, %v12105_v10  ;;  %v6227_v17 = vmul.f32 %v11982_v53, %v6195_v3  ;;  %v12118_v0 = vand.u32 2147483647, %v12103_v16  ;;  %v12122_v48 = vadd.f32 %v11857_v35, %v11495_v23 }
 0xca6   : > { %8545 = vrcp.f32 %v5884_v1  ;;  %v6482_v8 = vadd.f32 1.0, %v6450_v21  ;;  %v6102_v45 = vmul.f32 %v12063_v41, %v6070_v42  ;;  %v6168_v57 = vmul.f32 %v12037_v15, %v6136_v9 }
 0xca7   : > { %8547 = vpow2.f32 %v6342_v11  ;;  %v6009_v60 = vadd.f32 -1.4531521, %v5977_v22  ;;  %v12125_v56 = vpop.eup %8541  ;;  %v12131_v53 = vsel %vm5753_vm6, 1.0, %v12705_v40  ;;  %v12134_v36 = vmul.f32 0.5, %v12023_v4 }
 0xca8   : > { %v5850_v35 = vmul.f32 0.3275911, %v12118_v0  ;;  %v6453_v33 = vmul.f32 %v6421_v28, %v11974_v5  ;;  %v6348_v51 = vmul.f32 1.442695, %v6297_v46  ;;  %v5975_v7 = vmul.f32 1.0614054, %v12125_v56 }
 0xca9   : > { %v6041_v2 = vmul.f32 %v12105_v10, %v6009_v60  ;;  %v6387_v50 = vmul.f32 %v8538_v19, %v6227_v17  ;;  %vm5751_vm7 = vcmp.ge.f32.partialorder %v12042_v14, 0.0  ;;  %v12142_v49 = vmul.f32 0.70710677, %v12122_v48 }
 0xcaa   : > { %v5882_v29 = vadd.f32 1.0, %v5850_v35  ;;  %v12145_v3 = vmul.f32 %v6482_v8, %v11928_v43  ;;  %v6134_v4 = vadd.f32 -0.28449672, %v6102_v45  ;;  %v12149_v5 = vadd.f32 %v11866_v34, %v11495_v23 }
 0xcab   : > { %v6073_v52 = vadd.f32 1.4214138, %v6041_v2  ;;  %v8544_v21 = vpop.eup %8543  ;;  %v6200_v42 = vadd.f32 0.2548296, %v6168_v57  ;;  %v6007_v11 = vadd.f32 -1.4531521, %v5975_v7  ;;  %v6538_v45 = vpack.c.bf16 %v12098_v44, %v12028_v30 }
 0xcac   : > { %v6263_v19 = vsub.f32 0.0, %v12056_v26  ;;  %8549 = vrcp.f32 %v5882_v29  ;;  %v6485_v14 = vadd.f32 1.0, %v6453_v33  ;;  %v12154_v1 = vsel %vm5751_vm7, 1.0, %v12705_v40 }
 0xcad   : > { %v6105_v9 = vmul.f32 %v12105_v10, %v6073_v52  ;;  %8551 = vpow2.f32 %v6348_v51  ;;  %v6419_v43 = vsub.f32 1.0, %v6387_v50  ;;  %v6039_v28 = vmul.f32 %v12125_v56, %v6007_v11  ;;  %8046 = vmatprep.mubr.bf16.mxu1 %v6538_v45 }
 0xcae   : > { %v6268_v22 = vsub.f32 0.0, %v12089_v39  ;;  %v12159_v34 = vand.u32 2147483647, %v12142_v49  ;;  %v6166_v46 = vmul.f32 %v12063_v41, %v6134_v4  ;;  %v12163_v8 = vmul.f32 0.70710677, %v12149_v5 }
 0xcaf   : > { %v6137_v17 = vadd.f32 -0.28449672, %v6105_v9  ;;  %v6232_v57 = vmul.f32 %v12037_v15, %v6200_v42  ;;  %v6071_v35 = vadd.f32 1.4214138, %v6039_v28  ;;  %v6295_v33 = vmul.f32 %v6263_v19, %v12056_v26 }
 0xcb0   : > { %v12167_v60 = vpop.eup %8545  ;;  %v5853_v2 = vmul.f32 0.3275911, %v12159_v34  ;;  %v12173_v7 = vmul.f32 %v6485_v14, %v11932_v27  ;;  %v12176_v50 = vmul.f32 0.5, %v12069_v47  ;;  %vm5756_vm8 = vcmp.ge.f32.partialorder %v12076_v58, 0.0 }
 0xcb1   : > { %v8548_v51 = vpop.eup %8547  ;;  %v5980_v30 = vmul.f32 1.0614054, %v12167_v60  ;;  %v6451_v44 = vmul.f32 %v6419_v43, %v12016_v54  ;;  %v6169_v15 = vmul.f32 %v12105_v10, %v6137_v17  ;;  %v6300_v26 = vmul.f32 %v6268_v22, %v12089_v39 }
 0xcb2   : > { %v5885_v29 = vadd.f32 1.0, %v5853_v2  ;;  %v6198_v4 = vadd.f32 0.2548296, %v6166_v46  ;;  %v6103_v52 = vmul.f32 %v12125_v56, %v6071_v35  ;;  %v12185_v42 = vand.u32 2147483647, %v12163_v8 }
 0xcb3   : > { %v6012_v27 = vadd.f32 -1.4531521, %v5980_v30  ;;  %v6392_v47 = vmul.f32 %v8544_v21, %v6232_v57  ;;  %v6266_v11 = vsub.f32 0.0, %v12118_v0  ;;  %v6539_v19 = vpack.c.bf16 %v12079_v63, %v11998_v62 }
 0xcb4   : > { %8553 = vrcp.f32 %v5885_v29  ;;  %v6344_v54 = vmul.f32 1.442695, %v6295_v33  ;;  %v12193_v39 = vsel %vm5756_vm8, 1.0, %v12705_v40  ;;  %v5851_v9 = vmul.f32 0.3275911, %v12185_v42 }
 0xcb5   : > { %v6044_v14 = vmul.f32 %v12167_v60, %v6012_v27  ;;  %v6483_v28 = vadd.f32 1.0, %v6451_v44  ;;  %v6201_v21 = vadd.f32 0.2548296, %v6169_v15  ;;  %v12200_v22 = vmul.f32 0.5, %v12093_v55  ;;  %8047 = vmatmul.mubr.bf16.gmra.mrb[172].mxu1 %v6539_v19 }
 0xcb6   : > { %v12197_v43 = vpop.eup %8549  ;;  %v12204_v62 = vadd.f32 %v11922_v32, %v11495_v23  ;;  %v6230_v58 = vmul.f32 %v12063_v41, %v6198_v4  ;;  %v6135_v46 = vadd.f32 -0.28449672, %v6103_v52  ;;  %v6354_v17 = vmul.f32 1.442695, %v6300_v26 }
 0xcb7   : > { %v8552_v63 = vpop.eup %8551  ;;  %v5978_v45 = vmul.f32 1.0614054, %v12197_v43  ;;  %v6424_v57 = vsub.f32 1.0, %v6392_v47  ;;  %vm5754_vm9 = vcmp.ge.f32.partialorder %v12103_v16, 0.0  ;;  %v6298_v35 = vmul.f32 %v6266_v11, %v12118_v0 }
 0xcb8   : > { %v5883_v33 = vadd.f32 1.0, %v5851_v9  ;;  %8555 = vpow2.f32 %v6344_v54  ;;  %v6076_v55 = vadd.f32 1.4214138, %v6044_v14  ;;  %v12211_v30 = vmul.f32 0.70710677, %v12204_v62 }
 0xcb9   : > { %v6010_v2 = vadd.f32 -1.4531521, %v5978_v45  ;;  %v12214_v32 = vmul.f32 %v6483_v28, %v11993_v38  ;;  %v6233_v41 = vmul.f32 %v12105_v10, %v6201_v21  ;;  %v12219_v44 = vadd.f32 %v11925_v25, %v11495_v23 }
 0xcba   : > { %8557 = vrcp.f32 %v5883_v33  ;;  %v6390_v15 = vmul.f32 %v8548_v51, %v6230_v58  ;;  %v6167_v0 = vmul.f32 %v12125_v56, %v6135_v46  ;;  %v6456_v29 = vmul.f32 %v6424_v57, %v12048_v20 }
 0xcbb   : > { %8559 = vpow2.f32 %v6354_v17  ;;  %v6042_v26 = vmul.f32 %v12197_v43, %v6010_v2  ;;  %v12227_v38 = vsel %vm5754_vm9, 1.0, %v12705_v40  ;;  %v6350_v4 = vmul.f32 1.442695, %v6298_v35  ;;  %v12709_v2 = vld [vmem:[#allocation35_spill] sm:$0xff] }
 0xcbc   : > { %v12230_v10 = vand.u32 2147483647, %v12211_v30  ;;  %v6108_v25 = vmul.f32 %v12167_v60, %v6076_v55  ;;  %v12234_v51 = vmul.f32 0.5, %v12122_v48  ;;  %v6269_v27 = vsub.f32 0.0, %v12159_v34 }
 0xcbd   : > { %v6074_v52 = vadd.f32 1.4214138, %v6042_v26  ;;  %v6393_v20 = vmul.f32 %v8552_v63, %v6233_v41  ;;  %v12240_v11 = vmul.f32 0.5, %v12149_v5  ;;  %v12244_v19 = vmul.f32 0.70710677, %v12219_v44 }
 0xcbe   : > { %v12237_v47 = vpop.eup %8553  ;;  %v5856_v16 = vmul.f32 0.3275911, %v12230_v10  ;;  %v6422_v54 = vsub.f32 1.0, %v6390_v15  ;;  %v6199_v14 = vadd.f32 0.2548296, %v6167_v0  ;;  %vm5757_vm10 = vcmp.ge.f32.partialorder %v12142_v49, 0.0 }
 0xcbf   : > { %v5981_v48 = vmul.f32 1.0614054, %v12237_v47  ;;  %v6488_v9 = vadd.f32 1.0, %v6456_v29  ;;  %8561 = vpow2.f32 %v6350_v4  ;;  %v6267_v28 = vsub.f32 0.0, %v12185_v42 }
 0xcc0   : > { %v5888_v21 = vadd.f32 1.0, %v5856_v16  ;;  %v6140_v63 = vadd.f32 -0.28449672, %v6108_v25  ;;  %v6106_v5 = vmul.f32 %v12197_v43, %v6074_v52  ;;  %v6301_v46 = vmul.f32 %v6269_v27, %v12159_v34 }
 0xcc1   : > { %v6013_v58 = vadd.f32 -1.4531521, %v5981_v48  ;;  %v6425_v17 = vsub.f32 1.0, %v6393_v20  ;;  %v12252_v45 = vsel %vm5757_vm10, 1.0, %v12705_v40  ;;  %v12255_v49 = vand.u32 2147483647, %v12244_v19 }
 0xcc2   : > { %8563 = vrcp.f32 %v5888_v21  ;;  %v8556_v57 = vpop.eup %8555  ;;  %v6454_v35 = vmul.f32 %v6422_v54, %v12086_v24  ;;  %v6231_v33 = vmul.f32 %v12125_v56, %v6199_v14  ;;  %v12262_v41 = vadd.f32 %v12709_v2, %v11495_v23  ;;  %v12710_v14 = vld [vmem:[#allocation36_spill] sm:$0xff] }
 0xcc3   : > { %v6045_v55 = vmul.f32 %v12237_v47, %v6013_v58  ;;  %v12267_v15 = vmul.f32 %v6488_v9, %v12019_v59  ;;  %vm5755_vm11 = vcmp.ge.f32.partialorder %v12163_v8, 0.0  ;;  %v6299_v0 = vmul.f32 %v6267_v28, %v12185_v42 }
 0xcc4   : > { %v12264_v34 = vpop.eup %8557  ;;  %v5854_v26 = vmul.f32 0.3275911, %v12255_v49  ;;  %v6172_v56 = vmul.f32 %v12167_v60, %v6140_v63  ;;  %v6138_v29 = vadd.f32 -0.28449672, %v6106_v5  ;;  %v6356_v25 = vmul.f32 1.442695, %v6301_v46 }
 0xcc5   : > { %v8560_v24 = vpop.eup %8559  ;;  %v6077_v4 = vadd.f32 1.4214138, %v6045_v55  ;;  %v6457_v52 = vmul.f32 %v6425_v17, %v12131_v53  ;;  %v5979_v27 = vmul.f32 1.0614054, %v12264_v34  ;;  %v12276_v59 = vmul.f32 0.70710677, %v12262_v41 }
 0xcc6   : > { %v5886_v20 = vadd.f32 1.0, %v5854_v26  ;;  %v6486_v16 = vadd.f32 1.0, %v6454_v35  ;;  %v6391_v54 = vmul.f32 %v8556_v57, %v6231_v33  ;;  %v12281_v48 = vadd.f32 %v12710_v14, %v11495_v23 }
 0xcc7   : > { %v6109_v42 = vmul.f32 %v12237_v47, %v6077_v4  ;;  %v12286_v9 = vsel %vm5755_vm11, 1.0, %v12705_v40  ;;  %v6011_v53 = vadd.f32 -1.4531521, %v5979_v27  ;;  %v6352_v28 = vmul.f32 1.442695, %v6299_v0 }
 0xcc8   : > { %8565 = vrcp.f32 %v5886_v20  ;;  %v6204_v21 = vadd.f32 0.2548296, %v6172_v56  ;;  %vm5760_vm12 = vcmp.ge.f32.partialorder %v12211_v30, 0.0  ;;  %v6489_v58 = vadd.f32 1.0, %v6457_v52 }
 0xcc9   : > { %v6141_v63 = vadd.f32 -0.28449672, %v6109_v42  ;;  %8567 = vpow2.f32 %v6356_v25  ;;  %v8562_v5 = vpop.eup %8561  ;;  %v6170_v46 = vmul.f32 %v12197_v43, %v6138_v29  ;;  %v6043_v17 = vmul.f32 %v12264_v34, %v6011_v53 }
 0xcca   : > { %v5825_v57 = vand.u32 2147483647, %v12276_v59  ;;  %v12293_v8 = vmul.f32 %v6486_v16, %v12053_v31  ;;  %v6423_v35 = vsub.f32 1.0, %v6391_v54  ;;  %v6272_v33 = vsub.f32 0.0, %v12230_v10 }
 0xccb   : > { %v12297_v55 = vmul.f32 0.70710677, %v12281_v48  ;;  %v6173_v0 = vmul.f32 %v12237_v47, %v6141_v63  ;;  %v6075_v26 = vadd.f32 1.4214138, %v6043_v17  ;;  %v6540_v29 = vpack.c.bf16 %v12214_v32, %v12145_v3 }
 0xccc   : > { %v12299_v2 = vpop.eup %8563  ;;  %v5857_v56 = vmul.f32 0.3275911, %v5825_v57  ;;  %v6236_v4 = vmul.f32 %v12167_v60, %v6204_v21  ;;  %8569 = vpow2.f32 %v6352_v28  ;;  %v12308_v31 = vsel %vm5760_vm12, 1.0, %v12705_v40 }
 0xccd   : > { %v5984_v25 = vmul.f32 1.0614054, %v12299_v2  ;;  %v12312_v52 = vmul.f32 %v6489_v58, %v12108_v18  ;;  %v6202_v27 = vadd.f32 0.2548296, %v6170_v46  ;;  %v6107_v20 = vmul.f32 %v12264_v34, %v6075_v26  ;;  %8050 = vmatprep.mubr.bf16.mxu1 %v6540_v29 }
 0xcce   : > { %v5889_v16 = vadd.f32 1.0, %v5857_v56  ;;  %v6455_v3 = vmul.f32 %v6423_v35, %v12154_v1  ;;  %v6304_v60 = vmul.f32 %v6272_v33, %v12230_v10  ;;  %v12318_v54 = vand.u32 2147483647, %v12297_v55 }
 0xccf   : > { %v6016_v32 = vadd.f32 -1.4531521, %v5984_v25  ;;  %v6205_v30 = vadd.f32 0.2548296, %v6173_v0  ;;  %v6139_v42 = vadd.f32 -0.28449672, %v6107_v20  ;;  %v6541_v18 = vpack.c.bf16 %v12173_v7, %v12112_v13 }
 0xcd0   : > { %8571 = vrcp.f32 %v5889_v16  ;;  %v6396_v14 = vmul.f32 %v8560_v24, %v6236_v4  ;;  %vm5758_vm13 = vcmp.ge.f32.partialorder %v12244_v19, 0.0  ;;  %v5855_v28 = vmul.f32 0.3275911, %v12318_v54 }
 0xcd1   : > { %v6048_v53 = vmul.f32 %v12299_v2, %v6016_v32  ;;  %v6234_v10 = vmul.f32 %v12197_v43, %v6202_v27  ;;  %v6171_v21 = vmul.f32 %v12264_v34, %v6139_v42  ;;  %v6270_v63 = vsub.f32 0.0, %v12255_v49  ;;  %8051 = vmatmul.mubr.bf16.gmra.mrb[176].mxu1 %v6541_v18 }
 0xcd2   : > { %v12325_v1 = vpop.eup %8565  ;;  %v12332_v58 = vadd.f32 %v12002_v61, %v11495_v23  ;;  %v6273_v46 = vsub.f32 0.0, %v5825_v57  ;;  %v5887_v17 = vadd.f32 1.0, %v5855_v28  ;;  %v6237_v35 = vmul.f32 %v12237_v47, %v6205_v30 }
 0xcd3   : > { %v8568_v13 = vpop.eup %8567  ;;  %v6080_v7 = vadd.f32 1.4214138, %v6048_v53  ;;  %v5982_v24 = vmul.f32 1.0614054, %v12325_v1  ;;  %v6203_v33 = vadd.f32 0.2548296, %v6171_v21  ;;  %v6394_v61 = vmul.f32 %v8562_v5, %v6234_v10 }
 0xcd4   : > { %v6362_v0 = vmul.f32 1.442695, %v6304_v60  ;;  %v12337_v43 = vmul.f32 0.70710677, %v12332_v58  ;;  %v6428_v26 = vsub.f32 1.0, %v6396_v14  ;;  %8573 = vrcp.f32 %v5887_v17 }
 0xcd5   : > { %v6112_v56 = vmul.f32 %v12299_v2, %v6080_v7  ;;  %v6014_v29 = vadd.f32 -1.4531521, %v5982_v24  ;;  %v12343_v4 = vsel %vm5758_vm13, 1.0, %v12705_v40  ;;  %v6302_v25 = vmul.f32 %v6270_v63, %v12255_v49 }
 0xcd6   : > { %v12347_v47 = vand.u32 2147483647, %v12337_v43  ;;  %v8570_v27 = vpop.eup %8569  ;;  %v6487_v20 = vadd.f32 1.0, %v6455_v3  ;;  %v6305_v60 = vmul.f32 %v6273_v46, %v5825_v57  ;;  %v6397_v30 = vmul.f32 %v8568_v13, %v6237_v35 }
 0xcd7   : > { %v6144_v16 = vadd.f32 -0.28449672, %v6112_v56  ;;  %v6046_v32 = vmul.f32 %v12325_v1, %v6014_v29  ;;  %v6235_v42 = vmul.f32 %v12264_v34, %v6203_v33  ;;  %8575 = vpow2.f32 %v6362_v0 }
 0xcd8   : > { %v5860_v5 = vmul.f32 0.3275911, %v12347_v47  ;;  %v6460_v19 = vmul.f32 %v6428_v26, %v12193_v39  ;;  %v12356_v14 = vadd.f32 %v12004_v12, %v11495_v23  ;;  %v6426_v53 = vsub.f32 1.0, %v6394_v61 }
 0xcd9   : > { %v6176_v18 = vmul.f32 %v12299_v2, %v6144_v16  ;;  %v6078_v49 = vadd.f32 1.4214138, %v6046_v32  ;;  %v6358_v28 = vmul.f32 1.442695, %v6302_v25  ;;  %vm5761_vm14 = vcmp.ge.f32.partialorder %v12276_v59, 0.0 }
 0xcda   : > { %v12358_v3 = vpop.eup %8571  ;;  %v5892_v57 = vadd.f32 1.0, %v5860_v5  ;;  %v6364_v21 = vmul.f32 1.442695, %v6305_v60  ;;  %v6271_v39 = vsub.f32 0.0, %v12318_v54  ;;  %v6429_v63 = vsub.f32 1.0, %v6397_v30 }
 0xcdb   : > { %v6110_v34 = vmul.f32 %v12325_v1, %v6078_v49  ;;  %v5985_v10 = vmul.f32 1.0614054, %v12358_v3  ;;  %v6395_v13 = vmul.f32 %v8570_v27, %v6235_v42  ;;  %v12365_v12 = vmul.f32 0.70710677, %v12356_v14 }
 0xcdc   : > { %8577 = vrcp.f32 %v5892_v57  ;;  %v12368_v7 = vmul.f32 %v6487_v20, %v12134_v36  ;;  %v6208_v24 = vadd.f32 0.2548296, %v6176_v18  ;;  %v6492_v35 = vadd.f32 1.0, %v6460_v19 }
 0xcdd   : > { %v6142_v46 = vadd.f32 -0.28449672, %v6110_v34  ;;  %v6017_v17 = vadd.f32 -1.4531521, %v5985_v10  ;;  %8579 = vpow2.f32 %v6358_v28  ;;  %v12371_v33 = vand.u32 2147483647, %v12365_v12 }
 0xcde   : > { %v12375_v0 = vadd.f32 %v12011_v6, %v11495_v23  ;;  %v12377_v26 = vpop.eup %8573  ;;  %v6458_v56 = vmul.f32 %v6426_v53, %v12227_v38  ;;  %v6303_v61 = vmul.f32 %v6271_v39, %v12318_v54  ;;  %v6461_v25 = vmul.f32 %v6429_v63, %v12252_v45 }
 0xcdf   : > { %v6174_v29 = vmul.f32 %v12325_v1, %v6142_v46  ;;  %v6049_v36 = vmul.f32 %v12358_v3, %v6017_v17  ;;  %v6427_v27 = vsub.f32 1.0, %v6395_v13  ;;  %v5983_v20 = vmul.f32 1.0614054, %v12377_v26 }
 0xce0   : > { %v5858_v16 = vmul.f32 0.3275911, %v12371_v33  ;;  %v6240_v6 = vmul.f32 %v12299_v2, %v6208_v24  ;;  %8581 = vpow2.f32 %v6364_v21  ;;  %v12388_v5 = vmul.f32 0.70710677, %v12375_v0 }
 0xce1   : > { %v6206_v32 = vadd.f32 0.2548296, %v6174_v29  ;;  %v6081_v60 = vadd.f32 1.4214138, %v6049_v36  ;;  %v8576_v30 = vpop.eup %8575  ;;  %v6015_v38 = vadd.f32 -1.4531521, %v5983_v20  ;;  %v12392_v54 = vadd.f32 %v12025_v37, %v11495_v23 }
 0xce2   : > { %v5890_v42 = vadd.f32 1.0, %v5858_v16  ;;  %v6490_v45 = vadd.f32 1.0, %v6458_v56  ;;  %v12397_v19 = vsel %vm5761_vm14, 1.0, %v12705_v40  ;;  %v6360_v18 = vmul.f32 1.442695, %v6303_v61 }
 0xce3   : > { %v6113_v2 = vmul.f32 %v12358_v3, %v6081_v60  ;;  %v6493_v49 = vadd.f32 1.0, %v6461_v25  ;;  %v6459_v53 = vmul.f32 %v6427_v27, %v12286_v9  ;;  %v6047_v28 = vmul.f32 %v12377_v26, %v6015_v38 }
 0xce4   : > { %8583 = vrcp.f32 %v5890_v42  ;;  %v12403_v57 = vmul.f32 %v6492_v35, %v12176_v50  ;;  %v6400_v23 = vmul.f32 %v8576_v30, %v6240_v6  ;;  %v6276_v34 = vsub.f32 0.0, %v12347_v47 }
 0xce5   : > { %v6145_v37 = vadd.f32 -0.28449672, %v6113_v2  ;;  %v6238_v59 = vmul.f32 %v12325_v1, %v6206_v32  ;;  %v6079_v21 = vadd.f32 1.4214138, %v6047_v28  ;;  %v12410_v39 = vand.u32 2147483647, %v12388_v5 }
 0xce6   : > { %v12406_v10 = vpop.eup %8577  ;;  %v12413_v9 = vmul.f32 0.70710677, %v12392_v54  ;;  %v6522_v63 = vmul.f32 %v6490_v45, %v12200_v22  ;;  %8585 = vpow2.f32 %v6360_v18  ;;  %v12419_v46 = vmul.f32 %v6493_v49, %v12234_v51 }
 0xce7   : > { %v6177_v50 = vmul.f32 %v12358_v3, %v6145_v37  ;;  %v5988_v13 = vmul.f32 1.0614054, %v12406_v10  ;;  %v8580_v24 = vpop.eup %8579  ;;  %v6491_v17 = vadd.f32 1.0, %v6459_v53  ;;  %v6111_v1 = vmul.f32 %v12377_v26, %v6079_v21 }
 0xce8   : > { %v5861_v35 = vmul.f32 0.3275911, %v12410_v39  ;;  %v6432_v56 = vsub.f32 1.0, %v6400_v23  ;;  %vm5759_vm15 = vcmp.ge.f32.partialorder %v12297_v55, 0.0  ;;  %v6308_v22 = vmul.f32 %v6276_v34, %v12347_v47 }
 0xce9   : > { %v6209_v29 = vadd.f32 0.2548296, %v6177_v50  ;;  %v6020_v36 = vadd.f32 -1.4531521, %v5988_v13  ;;  %v6398_v61 = vmul.f32 %v8580_v24, %v6238_v59  ;;  %v6143_v25 = vadd.f32 -0.28449672, %v6111_v1 }
 0xcea   : > { %v5893_v27 = vadd.f32 1.0, %v5861_v35  ;;  %v12426_v20 = vand.u32 2147483647, %v12413_v9  ;;  %v8582_v51 = vpop.eup %8581  ;;  %v6274_v32 = vsub.f32 0.0, %v12371_v33  ;;  %v6542_v60 = vpack.c.bf16 %v12368_v7, %v12293_v8 }
 0xceb   : > { %v6241_v16 = vmul.f32 %v12358_v3, %v6209_v29  ;;  %v6052_v6 = vmul.f32 %v12406_v10, %v6020_v36  ;;  %v6523_v30 = vmul.f32 %v6491_v17, %v12240_v11  ;;  %v6175_v47 = vmul.f32 %v12377_v26, %v6143_v25 }
 0xcec   : > { %8587 = vrcp.f32 %v5893_v27  ;;  %v5859_v38 = vmul.f32 0.3275911, %v12426_v20  ;;  %v6464_v42 = vmul.f32 %v6432_v56, %v12308_v31  ;;  %v6370_v18 = vmul.f32 1.442695, %v6308_v22  ;;  %8054 = vmatprep.mubr.bf16.mxu1 %v6542_v60 }
 0xced   : > { %v6401_v45 = vmul.f32 %v8582_v51, %v6241_v16  ;;  %v6084_v2 = vadd.f32 1.4214138, %v6052_v6  ;;  %v6430_v49 = vsub.f32 1.0, %v6398_v61  ;;  %v6207_v53 = vadd.f32 0.2548296, %v6175_v47 }
 0xcee   : > { %v12437_v3 = vpop.eup %8583  ;;  %v5891_v28 = vadd.f32 1.0, %v5859_v38  ;;  %v6543_v8 = vpack.c.bf16 %v12312_v52, %v12267_v15  ;;  %v6306_v37 = vmul.f32 %v6274_v32, %v12371_v33  ;;  %v6544_v34 = vpack.c.bf16 %v6523_v30, %v6522_v63 }
 0xcef   : > { %v6433_v11 = vsub.f32 1.0, %v6401_v45  ;;  %v6116_v7 = vmul.f32 %v12406_v10, %v6084_v2  ;;  %v5986_v23 = vmul.f32 1.0614054, %v12437_v3  ;;  %v6239_v31 = vmul.f32 %v12377_v26, %v6207_v53 }
 0xcf0   : > { %8589 = vrcp.f32 %v5891_v28  ;;  %8055 = vmatmul.mubr.bf16.gmra.mrb[180].mxu1 %v6543_v8  ;;  %v6545_v59 = vpack.c.bf16 %v12419_v46, %v12403_v57  ;;  %v8586_v21 = vpop.eup %8585  ;;  %v6496_v50 = vadd.f32 1.0, %v6464_v42  ;;  %v6462_v24 = vmul.f32 %v6430_v49, %v12343_v4 }
 0xcf1   : > { %v6465_v13 = vmul.f32 %v6433_v11, %v12397_v19  ;;  %v6148_v15 = vadd.f32 -0.28449672, %v6116_v7  ;;  %v6018_v52 = vadd.f32 -1.4531521, %v5986_v23  ;;  %v6399_v17 = vmul.f32 %v8586_v21, %v6239_v31  ;;  %8058 = vmatprep.mubr.bf16.mxu1 %v6544_v34 }
 0xcf2   : > { %v6277_v1 = vsub.f32 0.0, %v12410_v39  ;;  %v5696_v33 = vmul.f32 0.5, %v12204_v62  ;;  %v5697_v26 = vmul.f32 0.5, %v12262_v41  ;;  %v5791_v57 = vsel %vm5759_vm15, 1.0, %v12705_v40 }
 0xcf3   : > { %v6497_v63 = vadd.f32 1.0, %v6465_v13  ;;  %v6050_v35 = vmul.f32 %v12437_v3, %v6018_v52  ;;  %v6431_v19 = vsub.f32 1.0, %v6399_v17  ;;  %8591 = vpow2.f32 %v6370_v18 }
 0xcf4   : > { %v6366_v46 = vmul.f32 1.442695, %v6306_v37  ;;  %v6528_v56 = vmul.f32 %v6496_v50, %v5696_v33  ;;  %v6180_v29 = vmul.f32 %v12406_v10, %v6148_v15  ;;  %v6494_v61 = vadd.f32 1.0, %v6462_v24 }
 0xcf5   : > { %v6529_v4 = vmul.f32 %v6497_v63, %v5697_v26  ;;  %v6082_v36 = vadd.f32 1.4214138, %v6050_v35  ;;  %v6463_v62 = vmul.f32 %v6431_v19, %v5791_v57  ;;  %v6309_v41 = vmul.f32 %v6277_v1, %v12410_v39 }
 0xcf6   : > { %v8588_v22 = vpop.eup %8587  ;;  %v6275_v25 = vsub.f32 0.0, %v12426_v20  ;;  %v5694_v16 = vmul.f32 0.5, %v12219_v44  ;;  %v5695_v6 = vmul.f32 0.5, %v12281_v48  ;;  %v6212_v60 = vadd.f32 0.2548296, %v6180_v29 }
 0xcf7   : > { %v6114_v27 = vmul.f32 %v12437_v3, %v6082_v36  ;;  %v5989_v51 = vmul.f32 1.0614054, %v8588_v22  ;;  %v6547_v55 = vpack.c.bf16 %v6529_v4, %v6528_v56  ;;  %v6495_v32 = vadd.f32 1.0, %v6463_v62 }
 0xcf8   : > { %8059 = vmatmul.mubr.bf16.gmra.mrb[184].mxu1 %v6545_v59  ;;  %8593 = vpow2.f32 %v6366_v46  ;;  %v6526_v42 = vmul.f32 %v6494_v61, %v5694_v16  ;;  %v6372_v39 = vmul.f32 1.442695, %v6309_v41  ;;  %v6307_v2 = vmul.f32 %v6275_v25, %v12426_v20 }
 0xcf9   : > { %v6146_v30 = vadd.f32 -0.28449672, %v6114_v27  ;;  %v6021_v47 = vadd.f32 -1.4531521, %v5989_v51  ;;  %v6527_v45 = vmul.f32 %v6495_v32, %v5695_v6  ;;  %v6244_v44 = vmul.f32 %v12406_v10, %v6212_v60 }
 0xcfa   : > { %v8590_v38 = vpop.eup %8589  ;;  %8595 = vpow2.f32 %v6372_v39  ;;  %v6368_v23 = vmul.f32 1.442695, %v6307_v2  ;;  %vm5764_vm1 = vcmp.ge.f32.partialorder %v12337_v43, 0.0  ;;  %vm5762_vm2 = vcmp.ge.f32.partialorder %v12365_v12, 0.0 }
 0xcfb   : > { %v6178_v18 = vmul.f32 %v12437_v3, %v6146_v30  ;;  %v6053_v49 = vmul.f32 %v8588_v22, %v6021_v47  ;;  %v5987_v53 = vmul.f32 1.0614054, %v8590_v38  ;;  %v6546_v28 = vpack.c.bf16 %v6527_v45, %v6526_v42 }
 0xcfc   : > { %8597 = vpow2.f32 %v6368_v23  ;;  %v5796_v63 = vsel %vm5764_vm1, 1.0, %v12705_v40  ;;  %vm5765_vm3 = vcmp.ge.f32.partialorder %v12388_v5, 0.0  ;;  %v5794_v4 = vsel %vm5762_vm2, 1.0, %v12705_v40 }
 0xcfd   : > { %v6210_v48 = vadd.f32 0.2548296, %v6178_v18  ;;  %v6085_v8 = vadd.f32 1.4214138, %v6053_v49  ;;  %v6019_v11 = vadd.f32 -1.4531521, %v5987_v53  ;;  %v8592_v7 = vpop.eup %8591  ;;  %8062 = vmatprep.mubr.bf16.mxu1 %v6546_v28 }
 0xcfe   : > { %v6404_v34 = vmul.f32 %v8592_v7, %v6244_v44  ;;  %v5797_v29 = vsel %vm5765_vm3, 1.0, %v12705_v40  ;;  %vm5763_vm4 = vcmp.ge.f32.partialorder %v12413_v9, 0.0  ;;  %v5700_v12 = vmul.f32 0.5, %v12332_v58  ;;  %v12712_v49 = vld [vmem:[#allocation5_spill] sm:$0xff]  ;;  %v12714_v7 = vld [vmem:[#allocation6_spill] sm:$0xff] }
 0xcff   : > { %v6117_v37 = vmul.f32 %v8588_v22, %v6085_v8  ;;  %v6051_v31 = vmul.f32 %v8590_v38, %v6019_v11  ;;  %v6242_v20 = vmul.f32 %v12437_v3, %v6210_v48  ;;  %v5701_v5 = vmul.f32 0.5, %v12375_v0  ;;  %v12711_v0 = vld [vmem:[#allocation2_spill] sm:$0xff]  ;;  %v12713_v48 = vld [vmem:[#allocation3_spill] sm:$0xff] }
 0xd00   : > { %8063 = vmatmul.mubr.bf16.gmra.mrb[188].mxu1 %v6547_v55  ;;  %v6436_v10 = vsub.f32 1.0, %v6404_v34  ;;  %v5795_v27 = vsel %vm5763_vm4, 1.0, %v12705_v40  ;;  %v5698_v32 = vmul.f32 0.5, %v12356_v14  ;;  %v5699_v9 = vmul.f32 0.5, %v12392_v54  ;;  %v8639_v40 = vld [vmem:[%s12628_s6] sm:$0xff] }
 0xd01   : > { %v6149_v59 = vadd.f32 -0.28449672, %v6117_v37  ;;  %v6083_v21 = vadd.f32 1.4214138, %v6051_v31  ;;  %v6568_v42 = vsub.s32 5, %v12711_v0  ;;  %v12715_v37 = vld [vmem:[#allocation4_spill] sm:$0xff] }
 0xd02   : > { %v8594_v50 = vpop.eup %8593  ;;  %v6468_v3 = vmul.f32 %v6436_v10, %v5796_v63  ;;  %v12719_v63 = vld [vmem:[#allocation8_spill] sm:$0xff]  ;;  %v12726_v0 = vld [vmem:[#allocation18_spill] sm:$0xff] }
 0xd03   : > { %v6181_v13 = vmul.f32 %v8588_v22, %v6149_v59  ;;  %v6115_v15 = vmul.f32 %v8590_v38, %v6083_v21  ;;  %v6402_v52 = vmul.f32 %v8594_v50, %v6242_v20  ;;  %v12482_v45 = vrot.slane %v8639_v40, %v6568_v42  ;;  %v12727_v40 = vld [vmem:[#allocation16_spill] sm:$0xff] }
 0xd04   : > { %v8596_v26 = vpop.eup %8595  ;;  %v6500_v36 = vadd.f32 1.0, %v6468_v3 }
 0xd05   : > { %v6213_v24 = vadd.f32 0.2548296, %v6181_v13  ;;  %v6147_v17 = vadd.f32 -0.28449672, %v6115_v15  ;;  %v6434_v35 = vsub.f32 1.0, %v6402_v52  ;;  %v12716_v13 = vld [vmem:[#allocation9_spill] sm:$0xff] }
 0xd06   : > { %v8598_v43 = vpop.eup %8597  ;;  %v6532_v51 = vmul.f32 %v6500_v36, %v5700_v12  ;;  %v12722_v12 = vld [vmem:[#allocation14_spill] sm:$0xff] }
 0xd07   : > { %v6245_v1 = vmul.f32 %v8588_v22, %v6213_v24  ;;  %v6179_v33 = vmul.f32 %v8590_v38, %v6147_v17  ;;  %v6466_v22 = vmul.f32 %v6434_v35, %v5794_v4  ;;  %v12717_v24 = vld [vmem:[#allocation7_spill] sm:$0xff] }
 0xd09   : > { %v6405_v57 = vmul.f32 %v8596_v26, %v6245_v1  ;;  %v6211_v19 = vadd.f32 0.2548296, %v6179_v33  ;;  %v6498_v55 = vadd.f32 1.0, %v6466_v22  ;;  %v12718_v33 = vld [vmem:[#allocation10_spill] sm:$0xff]  ;;  %v12721_v22 = vld [vmem:[#allocation11_spill] sm:$0xff] }
 0xd0b   : > { %v6437_v46 = vsub.f32 1.0, %v6405_v57  ;;  %v6243_v56 = vmul.f32 %v8590_v38, %v6211_v19  ;;  %v6530_v47 = vmul.f32 %v6498_v55, %v5698_v32  ;;  %v12724_v32 = vld [vmem:[#allocation17_spill] sm:$0xff] }
 0xd0d   : > { %v6469_v61 = vmul.f32 %v6437_v46, %v5797_v29  ;;  %v6403_v62 = vmul.f32 %v8598_v43, %v6243_v56  ;;  %v12720_v43 = vld [vmem:[#allocation13_spill] sm:$0xff] }
 0xd0f   : > { %v6501_v41 = vadd.f32 1.0, %v6469_v61  ;;  %v6435_v25 = vsub.f32 1.0, %v6403_v62 }
 0xd11   : > { %v6533_v16 = vmul.f32 %v6501_v41, %v5701_v5  ;;  %v6467_v6 = vmul.f32 %v6435_v25, %v5795_v27  ;;  %v12723_v41 = vld [vmem:[#allocation12_spill] sm:$0xff] }
 0xd13   : > { %v6499_v60 = vadd.f32 1.0, %v6467_v6  ;;  %v6549_v30 = vpack.c.bf16 %v6533_v16, %v6532_v51 }
 0xd15   : > { %v6531_v38 = vmul.f32 %v6499_v60, %v5699_v9 }
 0xd17   : > { %v6548_v58 = vpack.c.bf16 %v6531_v38, %v6530_v47  ;;  %v12725_v47 = vld [vmem:[#allocation15_spill] sm:$0xff] }
 0xd19   : > { %8066 = vmatprep.mubr.bf16.mxu1 %v6548_v58 }
 0xd1a   : > { %8067 = vmatmul.mubr.bf16.gmra.mrb[192].mxu1 %v6549_v30 }
 0xd4f   : > { %v8040_v39 = vpop.f32.mrb[164].mxu1 }
 0xd50   : > { %v6661_v14 = vadd.f32 %v8040_v39, %v12482_v45  ;;  %v6652_v2 = vpop.f32.mrb[165].mxu1 }
 0xd51   : > { %v6653_v54 = vadd.f32 %v6652_v2, %v12482_v45  ;;  %v8041_v18 = vpop.f32.mrb[166].mxu1 }
 0xd52   : > { %v6781_v53 = vadd.f32 %v6661_v14, %v12712_v49  ;;  %v6664_v28 = vadd.f32 %v8041_v18, %v12482_v45  ;;  %v6655_v44 = vpop.f32.mrb[167].mxu1 }
 0xd53   : > { %v6779_v8 = vadd.f32 %v6653_v54, %v12713_v48  ;;  %v6656_v11 = vadd.f32 %v6655_v44, %v12482_v45 }
 0xd54   : > { %6813 = vst.msk [vmem:[%s12490_s25 + $0x10] sm:$0xff] %vm379_vm0, %v6781_v53  ;;  %v6782_v23 = vadd.f32 %v6664_v28, %v12714_v7  ;;  %v12728_v53 = vld [vmem:[#allocation21_spill] sm:$0xff] }
 0xd55   : > { %6811 = vst.msk [vmem:[%s12490_s25] sm:$0xff] %vm379_vm0, %v6779_v8  ;;  %v6780_v31 = vadd.f32 %v6656_v11, %v12715_v37  ;;  %v12729_v8 = vld [vmem:[#allocation19_spill] sm:$0xff] }
 0xd56   : > { %6814 = vst.msk [vmem:[%s12490_s25 + $0x18] sm:$0xff] %vm379_vm0, %v6782_v23  ;;  %v12730_v23 = vld [vmem:[#allocation22_spill] sm:$0xff] }
 0xd57   : > { %6812 = vst.msk [vmem:[%s12490_s25 + $0x8] sm:$0xff] %vm379_vm0, %v6780_v31  ;;  %v12731_v31 = vld [vmem:[#allocation20_spill] sm:$0xff] }
 0xd70   : > { %v8044_v34 = vpop.f32.mrb[168].mxu1 }
 0xd71   : > { %v6677_v20 = vadd.f32 %v8044_v34, %v12482_v45  ;;  %v6668_v59 = vpop.f32.mrb[169].mxu1 }
 0xd72   : > { %v6669_v21 = vadd.f32 %v6668_v59, %v12482_v45  ;;  %v8045_v50 = vpop.f32.mrb[170].mxu1 }
 0xd73   : > { %v6785_v15 = vadd.f32 %v6677_v20, %v12716_v13  ;;  %v6680_v10 = vadd.f32 %v8045_v50, %v12482_v45  ;;  %v6671_v52 = vpop.f32.mrb[171].mxu1 }
 0xd74   : > { %v6783_v17 = vadd.f32 %v6669_v21, %v12717_v24  ;;  %v6672_v1 = vadd.f32 %v6671_v52, %v12482_v45 }
 0xd75   : > { %6817 = vst.msk [vmem:[%s12490_s25 + $0x30] sm:$0xff] %vm379_vm0, %v6785_v15  ;;  %v6786_v26 = vadd.f32 %v6680_v10, %v12718_v33  ;;  %v12732_v15 = vld [vmem:[#allocation25_spill] sm:$0xff] }
 0xd76   : > { %6815 = vst.msk [vmem:[%s12490_s25 + $0x20] sm:$0xff] %vm379_vm0, %v6783_v17  ;;  %v6784_v3 = vadd.f32 %v6672_v1, %v12719_v63  ;;  %v12733_v17 = vld [vmem:[#allocation23_spill] sm:$0xff] }
 0xd77   : > { %6818 = vst.msk [vmem:[%s12490_s25 + $0x38] sm:$0xff] %vm379_vm0, %v6786_v26  ;;  %v12734_v26 = vld [vmem:[#allocation26_spill] sm:$0xff] }
 0xd78   : > { %6816 = vst.msk [vmem:[%s12490_s25 + $0x28] sm:$0xff] %vm379_vm0, %v6784_v3  ;;  %v12735_v3 = vld [vmem:[#allocation24_spill] sm:$0xff] }
 0xd88   : > { %v8048_v35 = vpop.f32.mrb[172].mxu1 }
 0xd89   : > { %v6693_v57 = vadd.f32 %v8048_v35, %v12482_v45  ;;  %v6684_v19 = vpop.f32.mrb[173].mxu1 }
 0xd8a   : > { %v6685_v46 = vadd.f32 %v6684_v19, %v12482_v45  ;;  %v8049_v56 = vpop.f32.mrb[174].mxu1 }
 0xd8b   : > { %v6789_v4 = vadd.f32 %v6693_v57, %v12720_v43  ;;  %v6696_v29 = vadd.f32 %v8049_v56, %v12482_v45  ;;  %v6687_v36 = vpop.f32.mrb[175].mxu1 }
 0xd8c   : > { %v6787_v61 = vadd.f32 %v6685_v46, %v12721_v22  ;;  %v6688_v62 = vadd.f32 %v6687_v36, %v12482_v45 }
 0xd8d   : > { %6821 = vst.msk [vmem:[%s12490_s25 + $0x50] sm:$0xff] %vm379_vm0, %v6789_v4  ;;  %v6790_v5 = vadd.f32 %v6696_v29, %v12722_v12  ;;  %v12736_v4 = vld [vmem:[#allocation29_spill] sm:$0xff] }
 0xd8e   : > { %6819 = vst.msk [vmem:[%s12490_s25 + $0x40] sm:$0xff] %vm379_vm0, %v6787_v61  ;;  %v6788_v25 = vadd.f32 %v6688_v62, %v12723_v41  ;;  %v12737_v61 = vld [vmem:[#allocation27_spill] sm:$0xff] }
 0xd8f   : > { %6822 = vst.msk [vmem:[%s12490_s25 + $0x58] sm:$0xff] %vm379_vm0, %v6790_v5  ;;  %v12738_v5 = vld [vmem:[#allocation30_spill] sm:$0xff] }
 0xd90   : > { %6820 = vst.msk [vmem:[%s12490_s25 + $0x48] sm:$0xff] %vm379_vm0, %v6788_v25  ;;  %v12739_v25 = vld [vmem:[#allocation28_spill] sm:$0xff] }
 0xda4   : > { %v8052_v27 = vpop.f32.mrb[176].mxu1 }
 0xda5   : > { %v6709_v51 = vadd.f32 %v8052_v27, %v12482_v45  ;;  %v6700_v55 = vpop.f32.mrb[177].mxu1 }
 0xda6   : > { %v6701_v16 = vadd.f32 %v6700_v55, %v12482_v45  ;;  %v8053_v6 = vpop.f32.mrb[178].mxu1 }
 0xda7   : > { %v6793_v9 = vadd.f32 %v6709_v51, %v12724_v32  ;;  %v6712_v60 = vadd.f32 %v8053_v6, %v12482_v45  ;;  %v6703_v30 = vpop.f32.mrb[179].mxu1 }
 0xda8   : > { %v6791_v38 = vadd.f32 %v6701_v16, %v12725_v47  ;;  %v6704_v58 = vadd.f32 %v6703_v30, %v12482_v45 }
 0xda9   : > { %6825 = vst.msk [vmem:[%s12490_s25 + $0x70] sm:$0xff] %vm379_vm0, %v6793_v9  ;;  %v6794_v42 = vadd.f32 %v6712_v60, %v12726_v0  ;;  %v12740_v9 = vld [vmem:[#allocation33_spill] sm:$0xff] }
 0xdaa   : > { %6823 = vst.msk [vmem:[%s12490_s25 + $0x60] sm:$0xff] %vm379_vm0, %v6791_v38  ;;  %v6792_v39 = vadd.f32 %v6704_v58, %v12727_v40  ;;  %v12741_v38 = vld [vmem:[#allocation31_spill] sm:$0xff] }
 0xdab   : > { %6826 = vst.msk [vmem:[%s12490_s25 + $0x78] sm:$0xff] %vm379_vm0, %v6794_v42  ;;  %v12742_v42 = vld [vmem:[#allocation34_spill] sm:$0xff] }
 0xdac   : > { %6824 = vst.msk [vmem:[%s12490_s25 + $0x68] sm:$0xff] %vm379_vm0, %v6792_v39  ;;  %v12743_v39 = vld [vmem:[#allocation32_spill] sm:$0xff] }
 0xdc3   : > { %v8056_v14 = vpop.f32.mrb[180].mxu1 }
 0xdc4   : > { %v6725_v2 = vadd.f32 %v8056_v14, %v12482_v45  ;;  %v6716_v54 = vpop.f32.mrb[181].mxu1 }
 0xdc5   : > { %v6717_v18 = vadd.f32 %v6716_v54, %v12482_v45  ;;  %v8057_v49 = vpop.f32.mrb[182].mxu1 }
 0xdc6   : > { %v6797_v28 = vadd.f32 %v6725_v2, %v12728_v53  ;;  %v6728_v44 = vadd.f32 %v8057_v49, %v12482_v45  ;;  %v6719_v48 = vpop.f32.mrb[183].mxu1 }
 0xdc7   : > { %v6795_v11 = vadd.f32 %v6717_v18, %v12729_v8  ;;  %v6720_v7 = vadd.f32 %v6719_v48, %v12482_v45 }
 0xdc8   : > { %6829 = vst.msk [vmem:[%s12490_s25 + $0x90] sm:$0xff] %vm379_vm0, %v6797_v28  ;;  %v6798_v37 = vadd.f32 %v6728_v44, %v12730_v23 }
 0xdc9   : > { %6827 = vst.msk [vmem:[%s12490_s25 + $0x80] sm:$0xff] %vm379_vm0, %v6795_v11  ;;  %v6796_v34 = vadd.f32 %v6720_v7, %v12731_v31 }
 0xdca   : > { %6830 = vst.msk [vmem:[%s12490_s25 + $0x98] sm:$0xff] %vm379_vm0, %v6798_v37 }
 0xdcb   : > { %6828 = vst.msk [vmem:[%s12490_s25 + $0x88] sm:$0xff] %vm379_vm0, %v6796_v34  ;;  %v8060_v20 = vpop.f32.mrb[184].mxu1 }
 0xdcc   : > { %v6741_v59 = vadd.f32 %v8060_v20, %v12482_v45  ;;  %v6732_v21 = vpop.f32.mrb[185].mxu1 }
 0xdcd   : > { %v6733_v50 = vadd.f32 %v6732_v21, %v12482_v45  ;;  %v8061_v13 = vpop.f32.mrb[186].mxu1 }
 0xdce   : > { %v6801_v10 = vadd.f32 %v6741_v59, %v12732_v15  ;;  %v6744_v52 = vadd.f32 %v8061_v13, %v12482_v45  ;;  %v6735_v24 = vpop.f32.mrb[187].mxu1 }
 0xdcf   : > { %v6799_v1 = vadd.f32 %v6733_v50, %v12733_v17  ;;  %v6736_v33 = vadd.f32 %v6735_v24, %v12482_v45 }
 0xdd0   : > { %6833 = vst.msk [vmem:[%s12490_s25 + $0xb0] sm:$0xff] %vm379_vm0, %v6801_v10  ;;  %v6802_v63 = vadd.f32 %v6744_v52, %v12734_v26 }
 0xdd1   : > { %6831 = vst.msk [vmem:[%s12490_s25 + $0xa0] sm:$0xff] %vm379_vm0, %v6799_v1  ;;  %v6800_v35 = vadd.f32 %v6736_v33, %v12735_v3 }
 0xdd2   : > { %6834 = vst.msk [vmem:[%s12490_s25 + $0xb8] sm:$0xff] %vm379_vm0, %v6802_v63 }
 0xdd3   : > { %6832 = vst.msk [vmem:[%s12490_s25 + $0xa8] sm:$0xff] %vm379_vm0, %v6800_v35  ;;  %v8064_v57 = vpop.f32.mrb[188].mxu1 }
 0xdd4   : > { %v6757_v19 = vadd.f32 %v8064_v57, %v12482_v45  ;;  %v6748_v46 = vpop.f32.mrb[189].mxu1 }
 0xdd5   : > { %v6749_v56 = vadd.f32 %v6748_v46, %v12482_v45  ;;  %v8065_v43 = vpop.f32.mrb[190].mxu1 }
 0xdd6   : > { %v6805_v29 = vadd.f32 %v6757_v19, %v12736_v4  ;;  %v6760_v36 = vadd.f32 %v8065_v43, %v12482_v45  ;;  %v6751_v22 = vpop.f32.mrb[191].mxu1 }
 0xdd7   : > { %v6803_v62 = vadd.f32 %v6749_v56, %v12737_v61  ;;  %v6752_v12 = vadd.f32 %v6751_v22, %v12482_v45 }
 0xdd8   : > { %6837 = vst.msk [vmem:[%s12490_s25 + $0xd0] sm:$0xff] %vm379_vm0, %v6805_v29  ;;  %v6806_v41 = vadd.f32 %v6760_v36, %v12738_v5 }
 0xdd9   : > { %6835 = vst.msk [vmem:[%s12490_s25 + $0xc0] sm:$0xff] %vm379_vm0, %v6803_v62  ;;  %v6804_v27 = vadd.f32 %v6752_v12, %v12739_v25 }
 0xdda   : > { %6838 = vst.msk [vmem:[%s12490_s25 + $0xd8] sm:$0xff] %vm379_vm0, %v6806_v41 }
 0xddb   : > { %6836 = vst.msk [vmem:[%s12490_s25 + $0xc8] sm:$0xff] %vm379_vm0, %v6804_v27 }
 0xded   : > { %v8068_v51 = vpop.f32.mrb[192].mxu1 }
 0xdee   : > { %v6773_v55 = vadd.f32 %v8068_v51, %v12482_v45  ;;  %v6764_v16 = vpop.f32.mrb[193].mxu1 }
 0xdef   : > { %v6765_v6 = vadd.f32 %v6764_v16, %v12482_v45  ;;  %v8069_v32 = vpop.f32.mrb[194].mxu1 }
 0xdf0   : > { %v6809_v60 = vadd.f32 %v6773_v55, %v12740_v9  ;;  %v6776_v30 = vadd.f32 %v8069_v32, %v12482_v45  ;;  %v6767_v47 = vpop.f32.mrb[195].mxu1 }
 0xdf1   : > { %v6807_v58 = vadd.f32 %v6765_v6, %v12741_v38  ;;  %v6768_v0 = vadd.f32 %v6767_v47, %v12482_v45 }
 0xdf2   : > { %6841 = vst.msk [vmem:[%s12490_s25 + $0xf0] sm:$0xff] %vm379_vm0, %v6809_v60  ;;  %v6810_v40 = vadd.f32 %v6776_v30, %v12742_v42 }
 0xdf3   : > { %6839 = vst.msk [vmem:[%s12490_s25 + $0xe0] sm:$0xff] %vm379_vm0, %v6807_v58  ;;  %v6808_v14 = vadd.f32 %v6768_v0, %v12743_v39 }
 0xdf4   : > { %6842 = vst.msk [vmem:[%s12490_s25 + $0xf8] sm:$0xff] %vm379_vm0, %v6810_v40 }
 0xdf5   : > { %6840 = vst.msk [vmem:[%s12490_s25 + $0xe8] sm:$0xff] %vm379_vm0, %v6808_v14 }
 0xdf6 PF: > { %s19_s30 = sadd.s32 1, %s8646_s30  }
 0xdf7   : > { %p16_p4 = scmp.ge.s32.totalorder %s19_s30, 4  }
 0xdf9   :  { %18 = sbr.rel (!%p16_p4) target bundleno = 1 (0x1), region = 86 }

</bundles_post_ra>
